<compile_context>
chip_gen: v5e
topology: v5e:2x2
jax: 0.10.0
libtpu: 0.0.40
codegen_flags: <defaults>
</compile_context>

<pallas_src>
import functools

import jax
import jax.numpy as jnp
from jax.experimental import pallas as pl
from jax.experimental.pallas import tpu as pltpu

EPS = 1e-5
IN_F = 28 * 28
HID = 800
OUT_F = 10
OUT_PAD = 128   # lane-dense fc3 output width


def _bn_relu(h, gamma, beta):
    """Training-mode BatchNorm1d + ReLU over the batch axis, f32 math."""
    mu = jnp.mean(h, axis=0, keepdims=True)
    c = h - mu                                        # centered, reused
    var = jnp.mean(c * c, axis=0, keepdims=True)      # biased variance
    scale = jax.lax.rsqrt(var + EPS) * gamma          # (1, F) row, EUP rsqrt
    return jnp.maximum(c * scale + beta, 0.0)


def student_kernel(x_ref,
                   w1_ref, g1_ref, be1_ref,
                   w2_ref, g2_ref, be2_ref,
                   w3_ref, b3_ref,
                   out_ref):
    x = x_ref[...]                                                      # (mb, 784) bf16

    # fc1 (bias dropped: cancels in BN) -> bn1 -> relu
    h = jnp.dot(x, w1_ref[...], preferred_element_type=jnp.float32)    # (mb, 800) f32
    h = _bn_relu(h, g1_ref[...], be1_ref[...]).astype(jnp.bfloat16)

    # fc2 (bias dropped) -> bn2 -> relu
    h = jnp.dot(h, w2_ref[...], preferred_element_type=jnp.float32)    # (mb, 800) f32
    h = _bn_relu(h, g2_ref[...], be2_ref[...]).astype(jnp.bfloat16)

    # fc3 (lane-padded to 128 output columns -> unmasked vst)
    out_ref[...] = (
        jnp.dot(h, w3_ref[...], preferred_element_type=jnp.float32) + b3_ref[...]
    )                                                                   # (mb, 128) f32


@functools.partial(jax.jit, static_argnames=("micro_batch",))
def student_forward(x_nchw, kparams, micro_batch=None):
    """Forward pass.

    micro_batch=None  -> exact module semantics: BN statistics over the whole
                         batch, grid=(1,).
    micro_batch=M     -> batch is a stack of independent M-sample forwards; one
                         grid step per micro-batch, weights stay VMEM-resident
                         across steps (amortized weight DMA).
    """
    n = x_nchw.shape[0]
    mb = n if micro_batch is None else micro_batch
    assert n % mb == 0, "batch must be a multiple of micro_batch"
    num_mb = n // mb

    x2d = x_nchw.reshape(n, IN_F).astype(jnp.bfloat16)   # same layout as torch .view(-1, 784)
    (w1, g1, be1, w2, g2, be2, w3p, b3p) = kparams

    row_map = lambda b: (b, 0)      # activation tile varies with the grid step
    const_map = lambda b: (0, 0)    # weights / BN params: same block every step -> resident

    out = pl.pallas_call(
        student_kernel,
        out_shape=jax.ShapeDtypeStruct((n, OUT_PAD), jnp.float32),
        grid=(num_mb,),
        in_specs=[
            pl.BlockSpec((mb, IN_F), row_map),        # x
            pl.BlockSpec((IN_F, HID), const_map),     # w1 (bf16, resident)
            pl.BlockSpec((1, HID), const_map),        # gamma1
            pl.BlockSpec((1, HID), const_map),        # beta1
            pl.BlockSpec((HID, HID), const_map),      # w2 (bf16, resident)
            pl.BlockSpec((1, HID), const_map),        # gamma2
            pl.BlockSpec((1, HID), const_map),        # beta2
            pl.BlockSpec((HID, OUT_PAD), const_map),  # w3 padded (bf16, resident)
            pl.BlockSpec((1, OUT_PAD), const_map),    # b3 padded (f32)
        ],
        out_specs=pl.BlockSpec((mb, OUT_PAD), row_map),
        compiler_params=pltpu.CompilerParams(
            dimension_semantics=("parallel",),
            vmem_limit_bytes=12 * 1024 * 1024,
        ),
    )(x2d, w1, g1, be1, w2, g2, be2, w3p, b3p)
    return out[:, :OUT_F]


def init_params(key):
    """PyTorch-faithful f32 module parameters.
    nn.Linear default init: U(-1/sqrt(fan_in), 1/sqrt(fan_in)) for W and b.
    Weights stored as (in, out) so the kernel computes x @ W (== x @ W.T in torch)."""
    def linear(k, fin, fout):
        kw, kb = jax.random.split(k)
        bound = 1.0 / jnp.sqrt(fin)
        w = jax.random.uniform(kw, (fin, fout), jnp.float32, -bound, bound)
        b = jax.random.uniform(kb, (1, fout), jnp.float32, -bound, bound)
        return w, b

    k1, k2, k3 = jax.random.split(key, 3)
    w1, b1 = linear(k1, IN_F, HID)
    w2, b2 = linear(k2, HID, HID)
    w3, b3 = linear(k3, HID, OUT_F)
    g1 = jnp.ones((1, HID), jnp.float32)
    be1 = jnp.zeros((1, HID), jnp.float32)
    g2 = jnp.ones((1, HID), jnp.float32)
    be2 = jnp.zeros((1, HID), jnp.float32)
    return (w1, b1, g1, be1, w2, b2, g2, be2, w3, b3)


def prepare_kernel_params(params):
    """One-time conversion to the kernel's storage format:
    bf16 weights, fc1/fc2 biases dropped (training-mode BN cancels them),
    fc3 padded to 128 lanes."""
    (w1, b1, g1, be1, w2, b2, g2, be2, w3, b3) = params
    del b1, b2
    w3p = jnp.zeros((HID, OUT_PAD), jnp.float32).at[:, :OUT_F].set(w3).astype(jnp.bfloat16)
    b3p = jnp.zeros((1, OUT_PAD), jnp.float32).at[:, :OUT_F].set(b3)
    return (w1.astype(jnp.bfloat16), g1, be1,
            w2.astype(jnp.bfloat16), g2, be2,
            w3p, b3p)


def reference_forward_f32(x_nchw, params):
    """Module-faithful f32 reference (includes the pre-BN biases)."""
    (w1, b1, g1, be1, w2, b2, g2, be2, w3, b3) = params
    x = x_nchw.reshape(x_nchw.shape[0], -1).astype(jnp.float32)

    def bn_relu(h, g, be):
        mu = jnp.mean(h, axis=0, keepdims=True)
        var = jnp.mean((h - mu) ** 2, axis=0, keepdims=True)
        return jnp.maximum((h - mu) / jnp.sqrt(var + EPS) * g + be, 0.0)

    h = bn_relu(x @ w1 + b1, g1, be1)
    h = bn_relu(h @ w2 + b2, g2, be2)
    return h @ w3 + b3


def reference_forward_bf16(x_nchw, kparams):
    """Plain-XLA mirror of the exact kernel math (same bf16 casts, no pre-BN bias)."""
    (w1, g1, be1, w2, g2, be2, w3p, b3p) = kparams
    x = x_nchw.reshape(x_nchw.shape[0], -1).astype(jnp.bfloat16)
    h = jnp.dot(x, w1, preferred_element_type=jnp.float32)
    h = _bn_relu(h, g1, be1).astype(jnp.bfloat16)
    h = jnp.dot(h, w2, preferred_element_type=jnp.float32)
    h = _bn_relu(h, g2, be2).astype(jnp.bfloat16)
    return (jnp.dot(h, w3p, preferred_element_type=jnp.float32) + b3p)[:, :OUT_F]


if __name__ == "__main__":
    key = jax.random.PRNGKey(0)
    kx, kx2, kp = jax.random.split(key, 3)

    # Same shape convention as the PyTorch example: (16, 1, 28, 28) NCHW
    x = jax.random.normal(kx, (16, 1, 28, 28), jnp.float32)
    params = init_params(kp)
    kparams = prepare_kernel_params(params)

    # --- spec-matching single forward (grid=(1,), BN over the full 16-sample batch) ---
    out = jax.block_until_ready(student_forward(x, kparams))
    assert out.shape == (16, OUT_F)

    # 1) Exact-math mirror (same bf16 quantization) -> tight tolerance.
    mirror = reference_forward_bf16(x, kparams)
    assert jnp.allclose(out, mirror, atol=5e-3, rtol=5e-3), "mismatch vs bf16 mirror"

    # 2) Module-faithful f32 reference (with pre-BN biases) -> bf16-loosened tolerance.
    ref = reference_forward_f32(x, params)
    assert jnp.allclose(out, ref, atol=3e-2, rtol=3e-2), "mismatch vs f32 reference"

    # --- amortized path: 3 independent 16-sample forwards in one pallas_call ---
    xb = jax.random.normal(kx2, (48, 1, 28, 28), jnp.float32)
    outb = jax.block_until_ready(student_forward(xb, kparams, micro_batch=16))
    assert outb.shape == (48, OUT_F)
    refb = jnp.concatenate(
        [reference_forward_bf16(xb[i * 16:(i + 1) * 16], kparams) for i in range(3)], axis=0)
    assert jnp.allclose(outb, refb, atol=5e-3, rtol=5e-3), "mismatch on multi-micro-batch grid"

    print("KERNEL_OK")
</pallas_src>

<mosaic_0001>
module attributes {stable_mosaic.version = 11 : i64} {
  func.func @student_kernel(%arg0: i32, %arg1: memref<16x784xbf16, #tpu.memory_space<vmem>>, %arg2: memref<784x800xbf16, #tpu.memory_space<vmem>>, %arg3: memref<1x800xf32, #tpu.memory_space<vmem>>, %arg4: memref<1x800xf32, #tpu.memory_space<vmem>>, %arg5: memref<800x800xbf16, #tpu.memory_space<vmem>>, %arg6: memref<1x800xf32, #tpu.memory_space<vmem>>, %arg7: memref<1x800xf32, #tpu.memory_space<vmem>>, %arg8: memref<800x128xbf16, #tpu.memory_space<vmem>>, %arg9: memref<1x128xf32, #tpu.memory_space<vmem>>, %arg10: memref<16x128xf32, #tpu.memory_space<vmem>>) attributes {dimension_semantics = [#tpu.dimension_semantics<parallel>], iteration_bounds = array<i64: 1>, scalar_prefetch = 0 : i64, scratch_operands = 0 : i64, tpu.core_type = #tpu.core_type<tc>, window_params = [{transform_indices = @transform_0, window_bounds = array<i64: 16, 784>}, {pipeline_mode = #tpu.pipeline_mode<synchronous>, transform_indices = @transform_1, window_bounds = array<i64: 784, 800>}, {pipeline_mode = #tpu.pipeline_mode<synchronous>, transform_indices = @transform_2, window_bounds = array<i64: 1, 800>}, {pipeline_mode = #tpu.pipeline_mode<synchronous>, transform_indices = @transform_3, window_bounds = array<i64: 1, 800>}, {pipeline_mode = #tpu.pipeline_mode<synchronous>, transform_indices = @transform_4, window_bounds = array<i64: 800, 800>}, {pipeline_mode = #tpu.pipeline_mode<synchronous>, transform_indices = @transform_5, window_bounds = array<i64: 1, 800>}, {pipeline_mode = #tpu.pipeline_mode<synchronous>, transform_indices = @transform_6, window_bounds = array<i64: 1, 800>}, {pipeline_mode = #tpu.pipeline_mode<synchronous>, transform_indices = @transform_7, window_bounds = array<i64: 800, 128>}, {pipeline_mode = #tpu.pipeline_mode<synchronous>, transform_indices = @transform_8, window_bounds = array<i64: 1, 128>}, {transform_indices = @transform_9, window_bounds = array<i64: 16, 128>}]} {
    %c0 = arith.constant 0 : index
    %c0_0 = arith.constant 0 : index
    %0 = vector.load %arg1[%c0, %c0_0] : memref<16x784xbf16, #tpu.memory_space<vmem>>, vector<16x784xbf16>
    %c0_1 = arith.constant 0 : index
    %c0_2 = arith.constant 0 : index
    %1 = vector.load %arg2[%c0_1, %c0_2] : memref<784x800xbf16, #tpu.memory_space<vmem>>, vector<784x800xbf16>
    %cst = arith.constant dense<0.000000e+00> : vector<16x800xf32>
    %2 = tpu.matmul %0, %1, %cst {dimension_numbers = #tpu.dot_dimension_numbers<[1], [0], [0], [1], [0, 0, 1, 1], [], []>} : vector<16x784xbf16>, vector<784x800xbf16>, vector<16x800xf32> -> vector<16x800xf32>
    %c0_3 = arith.constant 0 : index
    %c0_4 = arith.constant 0 : index
    %3 = vector.load %arg3[%c0_3, %c0_4] : memref<1x800xf32, #tpu.memory_space<vmem>>, vector<1x800xf32>
    %c0_5 = arith.constant 0 : index
    %c0_6 = arith.constant 0 : index
    %4 = vector.load %arg4[%c0_5, %c0_6] : memref<1x800xf32, #tpu.memory_space<vmem>>, vector<1x800xf32>
    %cst_7 = arith.constant dense<0.000000e+00> : vector<800xf32>
    %5 = vector.multi_reduction <add>, %2, %cst_7 [0] : vector<16x800xf32> to vector<800xf32>
    %6 = vector.shape_cast %5 : vector<800xf32> to vector<1x800xf32>
    %cst_8 = arith.constant 1.600000e+01 : f32
    %7 = vector.broadcast %cst_8 : f32 to vector<1x800xf32>
    %8 = arith.divf %6, %7 : vector<1x800xf32>
    %9 = vector.broadcast %8 : vector<1x800xf32> to vector<16x800xf32>
    %10 = arith.subf %2, %9 : vector<16x800xf32>
    %11 = arith.mulf %10, %10 : vector<16x800xf32>
    %cst_9 = arith.constant dense<0.000000e+00> : vector<800xf32>
    %12 = vector.multi_reduction <add>, %11, %cst_9 [0] : vector<16x800xf32> to vector<800xf32>
    %13 = vector.shape_cast %12 : vector<800xf32> to vector<1x800xf32>
    %cst_10 = arith.constant 1.600000e+01 : f32
    %14 = vector.broadcast %cst_10 : f32 to vector<1x800xf32>
    %15 = arith.divf %13, %14 : vector<1x800xf32>
    %cst_11 = arith.constant 9.99999974E-6 : f32
    %16 = vector.broadcast %cst_11 : f32 to vector<1x800xf32>
    %17 = arith.addf %15, %16 : vector<1x800xf32>
    %18 = math.rsqrt %17 : vector<1x800xf32>
    %19 = arith.mulf %18, %3 : vector<1x800xf32>
    %20 = vector.broadcast %19 : vector<1x800xf32> to vector<16x800xf32>
    %21 = arith.mulf %10, %20 : vector<16x800xf32>
    %22 = vector.broadcast %4 : vector<1x800xf32> to vector<16x800xf32>
    %23 = arith.addf %21, %22 : vector<16x800xf32>
    %cst_12 = arith.constant 0.000000e+00 : f32
    %24 = vector.broadcast %cst_12 : f32 to vector<16x800xf32>
    %25 = arith.maximumf %23, %24 : vector<16x800xf32>
    %26 = arith.truncf %25 : vector<16x800xf32> to vector<16x800xbf16>
    %c0_13 = arith.constant 0 : index
    %c0_14 = arith.constant 0 : index
    %27 = vector.load %arg5[%c0_13, %c0_14] : memref<800x800xbf16, #tpu.memory_space<vmem>>, vector<800x800xbf16>
    %cst_15 = arith.constant dense<0.000000e+00> : vector<16x800xf32>
    %28 = tpu.matmul %26, %27, %cst_15 {dimension_numbers = #tpu.dot_dimension_numbers<[1], [0], [0], [1], [0, 0, 1, 1], [], []>} : vector<16x800xbf16>, vector<800x800xbf16>, vector<16x800xf32> -> vector<16x800xf32>
    %c0_16 = arith.constant 0 : index
    %c0_17 = arith.constant 0 : index
    %29 = vector.load %arg6[%c0_16, %c0_17] : memref<1x800xf32, #tpu.memory_space<vmem>>, vector<1x800xf32>
    %c0_18 = arith.constant 0 : index
    %c0_19 = arith.constant 0 : index
    %30 = vector.load %arg7[%c0_18, %c0_19] : memref<1x800xf32, #tpu.memory_space<vmem>>, vector<1x800xf32>
    %cst_20 = arith.constant dense<0.000000e+00> : vector<800xf32>
    %31 = vector.multi_reduction <add>, %28, %cst_20 [0] : vector<16x800xf32> to vector<800xf32>
    %32 = vector.shape_cast %31 : vector<800xf32> to vector<1x800xf32>
    %cst_21 = arith.constant 1.600000e+01 : f32
    %33 = vector.broadcast %cst_21 : f32 to vector<1x800xf32>
    %34 = arith.divf %32, %33 : vector<1x800xf32>
    %35 = vector.broadcast %34 : vector<1x800xf32> to vector<16x800xf32>
    %36 = arith.subf %28, %35 : vector<16x800xf32>
    %37 = arith.mulf %36, %36 : vector<16x800xf32>
    %cst_22 = arith.constant dense<0.000000e+00> : vector<800xf32>
    %38 = vector.multi_reduction <add>, %37, %cst_22 [0] : vector<16x800xf32> to vector<800xf32>
    %39 = vector.shape_cast %38 : vector<800xf32> to vector<1x800xf32>
    %cst_23 = arith.constant 1.600000e+01 : f32
    %40 = vector.broadcast %cst_23 : f32 to vector<1x800xf32>
    %41 = arith.divf %39, %40 : vector<1x800xf32>
    %cst_24 = arith.constant 9.99999974E-6 : f32
    %42 = vector.broadcast %cst_24 : f32 to vector<1x800xf32>
    %43 = arith.addf %41, %42 : vector<1x800xf32>
    %44 = math.rsqrt %43 : vector<1x800xf32>
    %45 = arith.mulf %44, %29 : vector<1x800xf32>
    %46 = vector.broadcast %45 : vector<1x800xf32> to vector<16x800xf32>
    %47 = arith.mulf %36, %46 : vector<16x800xf32>
    %48 = vector.broadcast %30 : vector<1x800xf32> to vector<16x800xf32>
    %49 = arith.addf %47, %48 : vector<16x800xf32>
    %cst_25 = arith.constant 0.000000e+00 : f32
    %50 = vector.broadcast %cst_25 : f32 to vector<16x800xf32>
    %51 = arith.maximumf %49, %50 : vector<16x800xf32>
    %52 = arith.truncf %51 : vector<16x800xf32> to vector<16x800xbf16>
    %c0_26 = arith.constant 0 : index
    %c0_27 = arith.constant 0 : index
    %53 = vector.load %arg8[%c0_26, %c0_27] : memref<800x128xbf16, #tpu.memory_space<vmem>>, vector<800x128xbf16>
    %cst_28 = arith.constant dense<0.000000e+00> : vector<16x128xf32>
    %54 = tpu.matmul %52, %53, %cst_28 {dimension_numbers = #tpu.dot_dimension_numbers<[1], [0], [0], [1], [0, 0, 1, 1], [], []>} : vector<16x800xbf16>, vector<800x128xbf16>, vector<16x128xf32> -> vector<16x128xf32>
    %c0_29 = arith.constant 0 : index
    %c0_30 = arith.constant 0 : index
    %55 = vector.load %arg9[%c0_29, %c0_30] : memref<1x128xf32, #tpu.memory_space<vmem>>, vector<1x128xf32>
    %56 = vector.broadcast %55 : vector<1x128xf32> to vector<16x128xf32>
    %57 = arith.addf %54, %56 : vector<16x128xf32>
    %c0_31 = arith.constant 0 : index
    %c0_32 = arith.constant 0 : index
    %58 = vector.load %arg10[%c0_31, %c0_32] : memref<16x128xf32, #tpu.memory_space<vmem>>, vector<16x128xf32>
    tpu.vector_store %arg10[%c0_31, %c0_32], %57 {strides = array<i32>} : memref<16x128xf32, #tpu.memory_space<vmem>>, vector<16x128xf32>,
    return
  }
  func.func @transform_0(%arg0: i32) -> (i32, i32) {
    %c0_i32 = arith.constant 0 : i32
    %c0_i32_0 = arith.constant 0 : i32
    return %arg0, %c0_i32 : i32, i32
  }
  func.func @transform_1(%arg0: i32) -> (i32, i32) {
    %c0_i32 = arith.constant 0 : i32
    %c0_i32_0 = arith.constant 0 : i32
    %c0_i32_1 = arith.constant 0 : i32
    return %c0_i32, %c0_i32_0 : i32, i32
  }
  func.func @transform_2(%arg0: i32) -> (i32, i32) {
    %c0_i32 = arith.constant 0 : i32
    %c0_i32_0 = arith.constant 0 : i32
    %c0_i32_1 = arith.constant 0 : i32
    return %c0_i32, %c0_i32_0 : i32, i32
  }
  func.func @transform_3(%arg0: i32) -> (i32, i32) {
    %c0_i32 = arith.constant 0 : i32
    %c0_i32_0 = arith.constant 0 : i32
    %c0_i32_1 = arith.constant 0 : i32
    return %c0_i32, %c0_i32_0 : i32, i32
  }
  func.func @transform_4(%arg0: i32) -> (i32, i32) {
    %c0_i32 = arith.constant 0 : i32
    %c0_i32_0 = arith.constant 0 : i32
    %c0_i32_1 = arith.constant 0 : i32
    return %c0_i32, %c0_i32_0 : i32, i32
  }
  func.func @transform_5(%arg0: i32) -> (i32, i32) {
    %c0_i32 = arith.constant 0 : i32
    %c0_i32_0 = arith.constant 0 : i32
    %c0_i32_1 = arith.constant 0 : i32
    return %c0_i32, %c0_i32_0 : i32, i32
  }
  func.func @transform_6(%arg0: i32) -> (i32, i32) {
    %c0_i32 = arith.constant 0 : i32
    %c0_i32_0 = arith.constant 0 : i32
    %c0_i32_1 = arith.constant 0 : i32
    return %c0_i32, %c0_i32_0 : i32, i32
  }
  func.func @transform_7(%arg0: i32) -> (i32, i32) {
    %c0_i32 = arith.constant 0 : i32
    %c0_i32_0 = arith.constant 0 : i32
    %c0_i32_1 = arith.constant 0 : i32
    return %c0_i32, %c0_i32_0 : i32, i32
  }
  func.func @transform_8(%arg0: i32) -> (i32, i32) {
    %c0_i32 = arith.constant 0 : i32
    %c0_i32_0 = arith.constant 0 : i32
    %c0_i32_1 = arith.constant 0 : i32
    return %c0_i32, %c0_i32_0 : i32, i32
  }
  func.func @transform_9(%arg0: i32) -> (i32, i32) {
    %c0_i32 = arith.constant 0 : i32
    %c0_i32_0 = arith.constant 0 : i32
    return %arg0, %c0_i32 : i32, i32
  }
}

</mosaic_0001>

<bundles_post_ra>
// kernel: student_forward.1
= control target key start
LH: loop header
LB: loop body
LE: loop exit
PB: predicated region body
PF: predicated region fallthrough
CT: control target
= control target key end

     0   :  { %14 = vsyncpa [#allocation3], 0  ;;  %s11883_s0 = inlined_call_operand.vmem [shape: bf16[16,784], index: 0, kind: input, shape index: {}]   ;;  %s11884_s1 = inlined_call_operand.hbm [shape: bf16[784,800], index: 1, kind: input, shape index: {}]   ;;  %s11885_s2 = inlined_call_operand.hbm [shape: f32[1,800], index: 2, kind: input, shape index: {}]   ;;  %s11886_s3 = inlined_call_operand.hbm [shape: f32[1,800], index: 3, kind: input, shape index: {}]   ;;  %s11887_s4 = inlined_call_operand.hbm [shape: bf16[800,800], index: 4, kind: input, shape index: {}]   ;;  %s11888_s5 = inlined_call_operand.hbm [shape: f32[1,800], index: 5, kind: input, shape index: {}]   ;;  %s11889_s6 = inlined_call_operand.hbm [shape: f32[1,800], index: 6, kind: input, shape index: {}]   ;;  %s11890_s7 = inlined_call_operand.hbm [shape: bf16[800,128], index: 7, kind: input, shape index: {}]   ;;  %s11891_s8 = inlined_call_operand.hbm [shape: f32[1,128], index: 8, kind: input, shape index: {}]   ;;  %s11892_s9 = inlined_call_operand.hbm [shape: f32[16,128], index: 9, kind: output, shape index: {}]  }
   0x1   :  { %15 = vsyncpa [#allocation6], 0 }
   0x2   :  { %16 = vsyncpa [#allocation9], 0 }
   0x3   :  { %17 = vsyncpa [#allocation12], 0 }
   0x4   :  { %18 = vsyncpa [#allocation15], 0  ;;  %s40_s11 = sshll.u32 %s11885_s2, 4  ;;  %s41_s11 = int_to_ptr.hbm [resolvable:$true] %s40_s11 }
   0x5   :  { %19 = vsyncpa [#allocation4], 0  ;;  %s11139_s12 = smov [#allocation5]   ;;  %s61_s16 = sshll.u32 %s11887_s4, 4  ;;  %s62_s16 = int_to_ptr.hbm [resolvable:$true] %s61_s16 }
   0x6   :  { %s42_s13 = sshll.u32 %s11139_s12, 4  ;;  %s11140_s17 = smov [#allocation8]   ;;  %s43_s13 = int_to_ptr.vmem [resolvable:$true] %s42_s13 }
   0x7   :  { %45 = dma.hbm_to_vmem [thread:$0]  %s41_s11, 112, %s43_s13, [#allocation6]  }
   0x8   :  { %s63_s18 = sshll.u32 %s11140_s17, 4  ;;  %s86_s21 = sshll.u32 %s11889_s6, 4  ;;  %s64_s18 = int_to_ptr.vmem [resolvable:$true] %s63_s18  ;;  %s87_s21 = int_to_ptr.hbm [resolvable:$true] %s86_s21 }
   0x9   :  { %s11141_s2 = smov 448   ;;  %s11142_s22 = smov 28  }
   0xa   :  { %69 = dma.hbm_to_vmem [thread:$0]  %s62_s16, 44800, %s64_s18, [#allocation9], %s11141_s2, %s11141_s2, %s11142_s22  }
   0xb   :  { %s26_s25 = sshll.u32 %s11884_s1, 4  ;;  %s11143_s26 = smov [#allocation11]   ;;  %s27_s25 = int_to_ptr.hbm [resolvable:$true] %s26_s25 }
   0xc   :  { %s88_s27 = sshll.u32 %s11143_s26, 4  ;;  %s11144_s4 = smov [#allocation2]   ;;  %s89_s27 = int_to_ptr.vmem [resolvable:$true] %s88_s27 }
   0xd   :  { %91 = dma.hbm_to_vmem [thread:$0]  %s87_s21, 112, %s89_s27, [#allocation12]  }
   0xe   :  { %s28_s28 = sshll.u32 %s11144_s4, 4  ;;  %s51_s6 = sshll.u32 %s11886_s3, 4  ;;  %s29_s28 = int_to_ptr.vmem [resolvable:$true] %s28_s28  ;;  %s52_s6 = int_to_ptr.hbm [resolvable:$true] %s51_s6 }
   0xf   :  { %34 = dma.hbm_to_vmem [thread:$0]  %s27_s25, 43904, %s29_s28, [#allocation3], %s11141_s2, %s11141_s2, %s11142_s22  }
  0x10   :  { %s75_s12 = sshll.u32 %s11888_s5, 4  ;;  %s11145_s13 = smov [#allocation7]   ;;  %s76_s12 = int_to_ptr.hbm [resolvable:$true] %s75_s12 }
  0x11   :  { %s53_s1 = sshll.u32 %s11145_s13, 4  ;;  %s11146_s14 = smov [#allocation10]   ;;  %s54_s1 = int_to_ptr.vmem [resolvable:$true] %s53_s1 }
  0x12   :  { %56 = dma.hbm_to_vmem [thread:$0]  %s52_s6, 112, %s54_s1, [#allocation6]  }
  0x13   :  { %s77_s15 = sshll.u32 %s11146_s14, 4  ;;  %s96_s18 = sshll.u32 %s11890_s7, 4  ;;  %s78_s15 = int_to_ptr.vmem [resolvable:$true] %s77_s15  ;;  %s97_s18 = int_to_ptr.hbm [resolvable:$true] %s96_s18 }
  0x14   :  { %80 = dma.hbm_to_vmem [thread:$0]  %s76_s12, 112, %s78_s15, [#allocation9]  }
  0x15   :  { %s11147_s3 = smov [#allocation13]   ;;  %s110_s5 = sshll.u32 %s11891_s8, 4  ;;  %s111_s5 = int_to_ptr.hbm [resolvable:$true] %s110_s5 }
  0x16   :  { %s98_s19 = sshll.u32 %s11147_s3, 4  ;;  %s11148_s2 = smov 64   ;;  %s99_s19 = int_to_ptr.vmem [resolvable:$true] %s98_s19 }
  0x17   :  { %s11149_s22 = smov 4   ;;  %s11150_s23 = smov [#allocation14]  }
  0x18   :  { %104 = dma.hbm_to_vmem [thread:$0]  %s97_s18, 6400, %s99_s19, [#allocation12], %s11148_s2, %s11148_s2, %s11149_s22  }
  0x19   :  { %s112_s24 = sshll.u32 %s11150_s23, 4  ;;  %s113_s24 = int_to_ptr.vmem [resolvable:$true] %s112_s24 }
  0x1a   :  { %115 = dma.hbm_to_vmem [thread:$0]  %s111_s5, 16, %s113_s24, [#allocation15]  }
  0x1b   :  { %11127 = dma.done.wait [#allocation3], 43904  }
  0x1c   :  { %11128 = vsyncadd [#allocation3], 4294923392 }
  0x1d   :  { %11129 = dma.done.wait [#allocation6], 224  }
  0x1e   :  { %11130 = vsyncadd [#allocation6], 4294967072 }
  0x1f   :  { %11131 = dma.done.wait [#allocation9], 44912  }
  0x20   :  { %11132 = vsyncadd [#allocation9], 4294922384 }
  0x21   :  { %11133 = dma.done.wait [#allocation12], 6512  }
  0x22   :  { %11134 = vsyncadd [#allocation12], 4294960784 }
  0x23   :  { %11135 = dma.done.wait [#allocation15], 16  }
  0x24   :  { %11136 = vsyncadd [#allocation15], 4294967280  ;;  %v7323_v0 = vld [vmem:[#allocation2 + $0x188] sm:$0xf]  ;;  %v10171_v1 = vld [vmem:[#allocation2 + $0x1a0] sm:$0xf0] }
  0x25   :  { %v7547_v2 = vld [vmem:[#allocation2 + $0x348] sm:$0xf]  ;;  %v7324_v3 = vor.u32 %v10171_v1, %v7323_v0  ;;  %v10227_v4 = vld [vmem:[#allocation2 + $0x360] sm:$0xf0]  ;;  %v7295_v11 = vld [vmem:[#allocation2 + $0x150] sm:$0xf] }
  0x26   :  { %v7771_v5 = vld [vmem:[#allocation2 + $0x508] sm:$0xf]  ;;  %v10283_v6 = vld [vmem:[#allocation2 + $0x520] sm:$0xf0]  ;;  %v7548_v7 = vor.u32 %v10227_v4, %v7547_v2  ;;  %v10164_v13 = vld [vmem:[#allocation2 + $0x168] sm:$0xf0] }
  0x27   :  { %v7772_v8 = vor.u32 %v10283_v6, %v7771_v5  ;;  %v7995_v9 = vld [vmem:[#allocation2 + $0x6c8] sm:$0xf]  ;;  %v10339_v10 = vld [vmem:[#allocation2 + $0x6e0] sm:$0xf0]  ;;  %2352 = vmatpush.bf16.msra.mxu0 %v7324_v3  ;;  %v7519_v14 = vld [vmem:[#allocation2 + $0x310] sm:$0xf]  ;;  %v7296_v16 = vor.u32 %v10164_v13, %v7295_v11 }
  0x28   :  { %v7996_v12 = vor.u32 %v10339_v10, %v7995_v9  ;;  %v10220_v15 = vld [vmem:[#allocation2 + $0x328] sm:$0xf0]  ;;  %2366 = vmatpush.bf16.msra.mxu1 %v7548_v7  ;;  %v7743_v18 = vld [vmem:[#allocation2 + $0x4d0] sm:$0xf]  ;;  %v7267_v23 = vld [vmem:[#allocation2 + $0x118] sm:$0xf] }
  0x29   :  { %2380 = vmatpush.bf16.msra.mxu2 %v7772_v8  ;;  %v7520_v17 = vor.u32 %v10220_v15, %v7519_v14  ;;  %v10276_v19 = vld [vmem:[#allocation2 + $0x4e8] sm:$0xf0]  ;;  %v7967_v20 = vld [vmem:[#allocation2 + $0x690] sm:$0xf]  ;;  %v10157_v24 = vld [vmem:[#allocation2 + $0x130] sm:$0xf0] }
  0x2a   :  { %2394 = vmatpush.bf16.msra.mxu3 %v7996_v12  ;;  %v7744_v21 = vor.u32 %v10276_v19, %v7743_v18  ;;  %v10332_v22 = vld [vmem:[#allocation2 + $0x6a8] sm:$0xf0]  ;;  %v7491_v26 = vld [vmem:[#allocation2 + $0x2d8] sm:$0xf]  ;;  %v10213_v27 = vld [vmem:[#allocation2 + $0x2f0] sm:$0xf0]  ;;  %v7268_v29 = vor.u32 %v10157_v24, %v7267_v23 }
  0x2b   :  { %v7968_v25 = vor.u32 %v10332_v22, %v7967_v20  ;;  %v7715_v28 = vld [vmem:[#allocation2 + $0x498] sm:$0xf]  ;;  %2353 = vmatpush.bf16.msra.mxu0 %v7296_v16  ;;  %v10269_v30 = vld [vmem:[#allocation2 + $0x4b0] sm:$0xf0]  ;;  %v7492_v33 = vor.u32 %v10213_v27, %v7491_v26  ;;  %v7239_v35 = vld [vmem:[#allocation2 + $0xe0] sm:$0xf] }
  0x2c   :  { %v7939_v31 = vld [vmem:[#allocation2 + $0x658] sm:$0xf]  ;;  %v10325_v32 = vld [vmem:[#allocation2 + $0x670] sm:$0xf0]  ;;  %2367 = vmatpush.bf16.msra.mxu1 %v7520_v17  ;;  %v7716_v34 = vor.u32 %v10269_v30, %v7715_v28  ;;  %v10150_v36 = vld [vmem:[#allocation2 + $0xf8] sm:$0xf0] }
  0x2d   :  { %2381 = vmatpush.bf16.msra.mxu2 %v7744_v21  ;;  %v7463_v37 = vld [vmem:[#allocation2 + $0x2a0] sm:$0xf]  ;;  %v7940_v38 = vor.u32 %v10325_v32, %v7939_v31  ;;  %v10206_v39 = vld [vmem:[#allocation2 + $0x2b8] sm:$0xf0]  ;;  %v7240_v44 = vor.u32 %v10150_v36, %v7239_v35  ;;  %v7211_v47 = vld [vmem:[#allocation2 + $0xa8] sm:$0xf] }
  0x2e   :  { %2395 = vmatpush.bf16.msra.mxu3 %v7968_v25  ;;  %v7687_v40 = vld [vmem:[#allocation2 + $0x460] sm:$0xf]  ;;  %v10262_v41 = vld [vmem:[#allocation2 + $0x478] sm:$0xf0]  ;;  %v7464_v45 = vor.u32 %v10206_v39, %v7463_v37  ;;  %v10143_v48 = vld [vmem:[#allocation2 + $0xc0] sm:$0xf0] }
  0x2f   :  { %v7911_v42 = vld [vmem:[#allocation2 + $0x620] sm:$0xf]  ;;  %v10318_v43 = vld [vmem:[#allocation2 + $0x638] sm:$0xf0]  ;;  %2354 = vmatpush.bf16.msra.mxu0 %v7268_v29  ;;  %v7688_v46 = vor.u32 %v10262_v41, %v7687_v40  ;;  %v7435_v49 = vld [vmem:[#allocation2 + $0x268] sm:$0xf]  ;;  %v7212_v56 = vor.u32 %v10143_v48, %v7211_v47 }
  0x30   :  { %2368 = vmatpush.bf16.msra.mxu1 %v7492_v33  ;;  %v7912_v50 = vor.u32 %v10318_v43, %v7911_v42  ;;  %v10199_v51 = vld [vmem:[#allocation2 + $0x280] sm:$0xf0]  ;;  %v7659_v52 = vld [vmem:[#allocation2 + $0x428] sm:$0xf]  ;;  %v7183_v59 = vld [vmem:[#allocation2 + $0x70] sm:$0xf] }
  0x31   :  { %2382 = vmatpush.bf16.msra.mxu2 %v7716_v34  ;;  %v10255_v53 = vld [vmem:[#allocation2 + $0x440] sm:$0xf0]  ;;  %v7883_v54 = vld [vmem:[#allocation2 + $0x5e8] sm:$0xf]  ;;  %v7436_v57 = vor.u32 %v10199_v51, %v7435_v49  ;;  %v10136_v60 = vld [vmem:[#allocation2 + $0x88] sm:$0xf0] }
  0x32   :  { %2396 = vmatpush.bf16.msra.mxu3 %v7940_v38  ;;  %v10311_v55 = vld [vmem:[#allocation2 + $0x600] sm:$0xf0]  ;;  %v7660_v58 = vor.u32 %v10255_v53, %v7659_v52  ;;  %v7407_v61 = vld [vmem:[#allocation2 + $0x230] sm:$0xf]  ;;  %v10192_v63 = vld [vmem:[#allocation2 + $0x248] sm:$0xf0]  ;;  %v7184_v4 = vor.u32 %v10136_v60, %v7183_v59 }
  0x33   :  { %2355 = vmatpush.bf16.msra.mxu0 %v7240_v44  ;;  %v7884_v62 = vor.u32 %v10311_v55, %v7883_v54  ;;  %v7631_v0 = vld [vmem:[#allocation2 + $0x3f0] sm:$0xf]  ;;  %v10248_v1 = vld [vmem:[#allocation2 + $0x408] sm:$0xf0]  ;;  %v7408_v5 = vor.u32 %v10192_v63, %v7407_v61  ;;  %v7155_v7 = vld [vmem:[#allocation2 + $0x38] sm:$0xf] }
  0x34   :  { %2369 = vmatpush.bf16.msra.mxu1 %v7464_v45  ;;  %v7855_v2 = vld [vmem:[#allocation2 + $0x5b0] sm:$0xf]  ;;  %v10304_v3 = vld [vmem:[#allocation2 + $0x5c8] sm:$0xf0]  ;;  %v7632_v6 = vor.u32 %v10248_v1, %v7631_v0  ;;  %v10129_v8 = vld [vmem:[#allocation2 + $0x50] sm:$0xf0] }
  0x35   :  { %2383 = vmatpush.bf16.msra.mxu2 %v7688_v46  ;;  %v7379_v9 = vld [vmem:[#allocation2 + $0x1f8] sm:$0xf]  ;;  %v7856_v10 = vor.u32 %v10304_v3, %v7855_v2  ;;  %v10185_v11 = vld [vmem:[#allocation2 + $0x210] sm:$0xf0]  ;;  %v7156_v16 = vor.u32 %v10129_v8, %v7155_v7  ;;  %v7127_v17 = vld [vmem:[#allocation2] sm:$0xf] }
  0x36   :  { %2397 = vmatpush.bf16.msra.mxu3 %v7912_v50  ;;  %v7603_v12 = vld [vmem:[#allocation2 + $0x3b8] sm:$0xf]  ;;  %v10241_v13 = vld [vmem:[#allocation2 + $0x3d0] sm:$0xf0]  ;;  %v10122_v18 = vld [vmem:[#allocation2 + $0x18] sm:$0xf0]  ;;  %v7380_v19 = vor.u32 %v10185_v11, %v7379_v9 }
  0x37   :  { %2356 = vmatpush.bf16.msra.mxu0 %v7212_v56  ;;  %v7827_v14 = vld [vmem:[#allocation2 + $0x578] sm:$0xf]  ;;  %v10297_v15 = vld [vmem:[#allocation2 + $0x590] sm:$0xf0]  ;;  %v7604_v20 = vor.u32 %v10241_v13, %v7603_v12  ;;  %v7351_v21 = vld [vmem:[#allocation2 + $0x1c0] sm:$0xf]  ;;  %v7128_v31 = vor.u32 %v10122_v18, %v7127_v17 }
  0x38   :  { %2370 = vmatpush.bf16.msra.mxu1 %v7436_v57  ;;  %v10178_v22 = vld [vmem:[#allocation2 + $0x1d8] sm:$0xf0]  ;;  %v7575_v23 = vld [vmem:[#allocation2 + $0x380] sm:$0xf]  ;;  %v7828_v24 = vor.u32 %v10297_v15, %v7827_v14  ;;  %v8219_v28 = vld [vmem:[#allocation2 + $0x888] sm:$0xf] }
  0x39   :  { %2384 = vmatpush.bf16.msra.mxu2 %v7660_v58  ;;  %v10234_v25 = vld [vmem:[#allocation2 + $0x398] sm:$0xf0]  ;;  %v7799_v26 = vld [vmem:[#allocation2 + $0x540] sm:$0xf]  ;;  %v10395_v29 = vld [vmem:[#allocation2 + $0x8a0] sm:$0xf0]  ;;  %v7352_v35 = vor.u32 %v10178_v22, %v7351_v21 }
  0x3a   :  { %2398 = vmatpush.bf16.msra.mxu3 %v7884_v62  ;;  %v10290_v27 = vld [vmem:[#allocation2 + $0x558] sm:$0xf0]  ;;  %v8443_v30 = vld [vmem:[#allocation2 + $0xa48] sm:$0xf]  ;;  %v10451_v32 = vld [vmem:[#allocation2 + $0xa60] sm:$0xf0]  ;;  %v7576_v36 = vor.u32 %v10234_v25, %v7575_v23  ;;  %v8220_v41 = vor.u32 %v10395_v29, %v8219_v28 }
  0x3b   :  { %2357 = vmatpush.bf16.msra.mxu0 %v7184_v4  ;;  %v10168_v33 = vld [vmem:[#allocation2 + $0x18c] sm:$0xf]  ;;  %v7325_v34 = vld [vmem:[#allocation2 + $0x1a4] sm:$0xf0]  ;;  %v8471_v37 = vld [vmem:[#allocation2 + $0xa80] sm:$0xf]  ;;  %v7800_v40 = vor.u32 %v10290_v27, %v7799_v26  ;;  %v8444_v45 = vor.u32 %v10451_v32, %v8443_v30 }
  0x3c   :  { %2371 = vmatpush.bf16.msra.mxu1 %v7408_v5  ;;  %v10458_v38 = vld [vmem:[#allocation2 + $0xa98] sm:$0xf0]  ;;  %v7107_v39 = vld [vmem:[%s11883_s0 + $0x8] sm:$0xf]  ;;  %v10116_v42 = vld [vmem:[%s11883_s0 + $0x20] sm:$0xf0]  ;;  %v7328_v46 = vor.u32 %v10168_v33, %v7325_v34 }
  0x3d   :  { %2385 = vmatpush.bf16.msra.mxu2 %v7632_v6  ;;  %v10224_v43 = vld [vmem:[#allocation2 + $0x34c] sm:$0xf]  ;;  %v7549_v44 = vld [vmem:[#allocation2 + $0x364] sm:$0xf0]  ;;  %v8191_v47 = vld [vmem:[#allocation2 + $0x850] sm:$0xf]  ;;  %v8472_v50 = vor.u32 %v10458_v38, %v8471_v37  ;;  %v11235_v54 = vor.u32 %v10116_v42, %v7107_v39 }
  0x3e   :  { %2399 = vmatpush.bf16.msra.mxu3 %v7856_v10  ;;  %v10388_v48 = vld [vmem:[#allocation2 + $0x868] sm:$0xf0]  ;;  %v8415_v49 = vld [vmem:[#allocation2 + $0xa10] sm:$0xf]  ;;  %v10161_v52 = vld [vmem:[#allocation2 + $0x154] sm:$0xf]  ;;  %v7552_v56 = vor.u32 %v10224_v43, %v7549_v44 }
  0x3f   :  { %2358 = vmatpush.bf16.msra.mxu0 %v7156_v16  ;;  %v10444_v51 = vld [vmem:[#allocation2 + $0xa28] sm:$0xf0]  ;;  %v7297_v53 = vld [vmem:[#allocation2 + $0x16c] sm:$0xf0]  ;;  %v7099_v55 = vld [vmem:[%s11883_s0] sm:$0xf]  ;;  %v8192_v57 = vor.u32 %v10388_v48, %v8191_v47 }
  0x40   :  { %2372 = vmatpush.bf16.msra.mxu1 %v7380_v19  ;;  %v10217_v58 = vld [vmem:[#allocation2 + $0x314] sm:$0xf]  ;;  %v7521_v59 = vld [vmem:[#allocation2 + $0x32c] sm:$0xf0]  ;;  %v10115_v60 = vld [vmem:[%s11883_s0 + $0x18] sm:$0xf0]  ;;  %v8416_v61 = vor.u32 %v10444_v51, %v8415_v49  ;;  %v7300_v62 = vor.u32 %v10161_v52, %v7297_v53 }
  0x41   :  { %2386 = vmatpush.bf16.msra.mxu2 %v7604_v20  ;;  %v8163_v63 = vld [vmem:[#allocation2 + $0x818] sm:$0xf]  ;;  %v10381_v0 = vld [vmem:[#allocation2 + $0x830] sm:$0xf0]  ;;  %v11243_v2 = vor.u32 %v10115_v60, %v7099_v55  ;;  %v10154_v4 = vld [vmem:[#allocation2 + $0x11c] sm:$0xf]  ;;  %v7524_v9 = vor.u32 %v10217_v58, %v7521_v59 }
  0x42   :  { %2400 = vmatpush.bf16.msra.mxu3 %v7828_v24  ;;  %v8387_v1 = vld [vmem:[#allocation2 + $0x9d8] sm:$0xf]  ;;  %v10437_v3 = vld [vmem:[#allocation2 + $0x9f0] sm:$0xf0]  ;;  %v10112_v6 = vld [vmem:[%s11883_s0 + $0x4] sm:$0xf]  ;;  %v8164_v10 = vor.u32 %v10381_v0, %v8163_v63 }
  0x43   :  { %2359 = vmatpush.bf16.msra.mxu0 %v7128_v31  ;;  %v7269_v5 = vld [vmem:[#allocation2 + $0x134] sm:$0xf0]  ;;  %v7101_v7 = vld [vmem:[%s11883_s0 + $0x1c] sm:$0xf0]  ;;  %v10113_v8 = vld [vmem:[%s11883_s0 + $0xc] sm:$0xf]  ;;  %v8388_v15 = vor.u32 %v10437_v3, %v8387_v1 }
  0x44   :  { %2373 = vmatpush.bf16.msra.mxu1 %v7352_v35  ;;  %v10210_v11 = vld [vmem:[#allocation2 + $0x2dc] sm:$0xf]  ;;  %v7493_v12 = vld [vmem:[#allocation2 + $0x2f4] sm:$0xf0]  ;;  %v11256_v13 = vor.u32 %v10112_v6, %v7101_v7  ;;  %v7109_v14 = vld [vmem:[%s11883_s0 + $0x24] sm:$0xf0]  ;;  %v7272_v16 = vor.u32 %v10154_v4, %v7269_v5 }
  0x45   :  { %2387 = vmatpush.bf16.msra.mxu2 %v7576_v36  ;;  %v8135_v17 = vld [vmem:[#allocation2 + $0x7e0] sm:$0xf]  ;;  %v10374_v18 = vld [vmem:[#allocation2 + $0x7f8] sm:$0xf0]  ;;  %v11261_v20 = vor.u32 %v10113_v8, %v7109_v14  ;;  %v10147_v22 = vld [vmem:[#allocation2 + $0xe4] sm:$0xf]  ;;  %v7496_v24 = vor.u32 %v10210_v11, %v7493_v12 }
  0x46   :  { %2401 = vmatpush.bf16.msra.mxu3 %v7800_v40  ;;  %2360 = vmatmul.bf16.vlgmr.msra.gmra.mxu0 %v11243_v2  ;;  %v8359_v19 = vld [vmem:[#allocation2 + $0x9a0] sm:$0xf]  ;;  %v10430_v21 = vld [vmem:[#allocation2 + $0x9b8] sm:$0xf0]  ;;  %v8136_v25 = vor.u32 %v10374_v18, %v8135_v17  ;;  %v10203_v26 = vld [vmem:[#allocation2 + $0x2a4] sm:$0xf] }
  0x47   :  { %2408 = vmatpush.bf16.msrb.mxu0 %v8220_v41  ;;  %v7241_v23 = vld [vmem:[#allocation2 + $0xfc] sm:$0xf0]  ;;  %2374 = vmatmul.bf16.vlgmr.msra.gmra.mxu1 %v11256_v13  ;;  %v8360_v28 = vor.u32 %v10430_v21, %v8359_v19  ;;  %v8107_v30 = vld [vmem:[#allocation2 + $0x7a8] sm:$0xf]  ;;  %v10367_v31 = vld [vmem:[#allocation2 + $0x7c0] sm:$0xf0] }
  0x48   :  { %2422 = vmatpush.bf16.msrb.mxu1 %v8444_v45  ;;  %2388 = vmatmul.bf16.vlgmr.msra.gmra.mxu2 %v11235_v54  ;;  %v7465_v27 = vld [vmem:[#allocation2 + $0x2bc] sm:$0xf0]  ;;  %v7244_v29 = vor.u32 %v10147_v22, %v7241_v23  ;;  %v8331_v32 = vld [vmem:[#allocation2 + $0x968] sm:$0xf]  ;;  %v10423_v33 = vld [vmem:[#allocation2 + $0x980] sm:$0xf0]  ;;  %v8108_v38 = vor.u32 %v10367_v31, %v8107_v30 }
  0x49   :  { %2443 = vmatpush.bf16.msrb.mxu2 %v8472_v50  ;;  %2402 = vmatmul.bf16.vlgmr.msra.gmra.mxu3 %v11261_v20  ;;  %v10140_v34 = vld [vmem:[#allocation2 + $0xac] sm:$0xf]  ;;  %v7213_v35 = vld [vmem:[#allocation2 + $0xc4] sm:$0xf0]  ;;  %v7468_v37 = vor.u32 %v10203_v26, %v7465_v27  ;;  %v7123_v40 = vld [vmem:[%s11883_s0 + $0x18] sm:$0xf]  ;;  %v8332_v42 = vor.u32 %v10423_v33, %v8331_v32 }
  0x4a   :  { %2450 = vmatpush.bf16.msrb.mxu3 %v7328_v46  ;;  %v10196_v36 = vld [vmem:[#allocation2 + $0x26c] sm:$0xf]  ;;  %v7437_v39 = vld [vmem:[#allocation2 + $0x284] sm:$0xf0]  ;;  %v10118_v41 = vld [vmem:[%s11883_s0 + $0x30] sm:$0xf0]  ;;  %v7216_v43 = vor.u32 %v10140_v34, %v7213_v35 }
  0x4b   :  { %2409 = vmatpush.bf16.msrb.mxu0 %v8192_v57  ;;  %v8079_v44 = vld [vmem:[#allocation2 + $0x770] sm:$0xf]  ;;  %v10360_v45 = vld [vmem:[#allocation2 + $0x788] sm:$0xf0]  ;;  %v10133_v48 = vld [vmem:[#allocation2 + $0x74] sm:$0xf]  ;;  %v11271_v50 = vor.u32 %v10118_v41, %v7123_v40  ;;  %v7440_v51 = vor.u32 %v10196_v36, %v7437_v39 }
  0x4c   :  { %2423 = vmatpush.bf16.msrb.mxu1 %v8416_v61  ;;  %v8303_v46 = vld [vmem:[#allocation2 + $0x930] sm:$0xf]  ;;  %v10416_v47 = vld [vmem:[#allocation2 + $0x948] sm:$0xf0]  ;;  %v8080_v52 = vor.u32 %v10360_v45, %v8079_v44  ;;  %v10189_v53 = vld [vmem:[#allocation2 + $0x234] sm:$0xf] }
  0x4d   :  { %2464 = vmatpush.bf16.msra.mxu2 %v7552_v56  ;;  %v7185_v49 = vld [vmem:[#allocation2 + $0x8c] sm:$0xf0]  ;;  %vm2348_vm0 = vcmask 130048   ;;  %v8304_v56 = vor.u32 %v10416_v47, %v8303_v46  ;;  %v8051_v58 = vld [vmem:[#allocation2 + $0x738] sm:$0xf]  ;;  %s7080_s25 = sshll.u32 %s11892_s9, 4  ;;  %s7081_s25 = int_to_ptr.hbm [resolvable:$true] %s7080_s25 }
  0x4e   :  { %2451 = vmatpush.bf16.msrb.mxu3 %v7300_v62  ;;  %v7409_v55 = vld [vmem:[#allocation2 + $0x24c] sm:$0xf0]  ;;  %v7188_v57 = vor.u32 %v10133_v48, %v7185_v49  ;;  %v10353_v59 = vld [vmem:[#allocation2 + $0x750] sm:$0xf0]  ;;  %v8275_v60 = vld [vmem:[#allocation2 + $0x8f8] sm:$0xf] }
  0x4f   :  { %2410 = vmatpush.bf16.msrb.mxu0 %v8164_v10  ;;  %v10409_v61 = vld [vmem:[#allocation2 + $0x910] sm:$0xf0]  ;;  %v10126_v62 = vld [vmem:[#allocation2 + $0x3c] sm:$0xf]  ;;  %v7157_v63 = vld [vmem:[#allocation2 + $0x54] sm:$0xf0]  ;;  %v7412_v3 = vor.u32 %v10189_v53, %v7409_v55  ;;  %v8052_v4 = vor.u32 %v10353_v59, %v8051_v58 }
  0x50   :  { %2424 = vmatpush.bf16.msrb.mxu1 %v8388_v15  ;;  %v10182_v0 = vld [vmem:[#allocation2 + $0x1fc] sm:$0xf]  ;;  %v7381_v1 = vld [vmem:[#allocation2 + $0x214] sm:$0xf0]  ;;  %v8023_v5 = vld [vmem:[#allocation2 + $0x700] sm:$0xf]  ;;  %v8276_v8 = vor.u32 %v10409_v61, %v8275_v60 }
  0x51   :  { %2465 = vmatpush.bf16.msra.mxu2 %v7524_v9  ;;  %v10346_v6 = vld [vmem:[#allocation2 + $0x718] sm:$0xf0]  ;;  %v8247_v7 = vld [vmem:[#allocation2 + $0x8c0] sm:$0xf]  ;;  %v7160_v9 = vor.u32 %v10126_v62, %v7157_v63  ;;  %v10119_v11 = vld [vmem:[#allocation2 + $0x4] sm:$0xf]  ;;  %v7384_v21 = vor.u32 %v10182_v0, %v7381_v1 }
  0x52   :  { %2452 = vmatpush.bf16.msrb.mxu3 %v7272_v16  ;;  %v10402_v10 = vld [vmem:[#allocation2 + $0x8d8] sm:$0xf0]  ;;  %v7129_v12 = vld [vmem:[#allocation2 + $0x1c] sm:$0xf0]  ;;  %v10280_v14 = vld [vmem:[#allocation2 + $0x50c] sm:$0xf]  ;;  %v8024_v22 = vor.u32 %v10346_v6, %v8023_v5 }
  0x53   :  { %2411 = vmatpush.bf16.msrb.mxu0 %v8136_v25  ;;  %v7773_v15 = vld [vmem:[#allocation2 + $0x524] sm:$0xf0]  ;;  %v10336_v16 = vld [vmem:[#allocation2 + $0x6cc] sm:$0xf]  ;;  %v7115_v23 = vld [vmem:[%s11883_s0 + $0x10] sm:$0xf]  ;;  %v8248_v26 = vor.u32 %v10402_v10, %v8247_v7  ;;  %v7132_v27 = vor.u32 %v10119_v11, %v7129_v12 }
  0x54   :  { %2425 = vmatpush.bf16.msrb.mxu1 %v8360_v28  ;;  %v7997_v17 = vld [vmem:[#allocation2 + $0x6e4] sm:$0xf0]  ;;  %v10392_v18 = vld [vmem:[#allocation2 + $0x88c] sm:$0xf]  ;;  %v10175_v25 = vld [vmem:[#allocation2 + $0x1c4] sm:$0xf]  ;;  %v7776_v31 = vor.u32 %v10280_v14, %v7773_v15 }
  0x55   :  { %2466 = vmatpush.bf16.msra.mxu2 %v7496_v24  ;;  %v8221_v19 = vld [vmem:[#allocation2 + $0x8a4] sm:$0xf0]  ;;  %v10117_v24 = vld [vmem:[%s11883_s0 + $0x28] sm:$0xf0]  ;;  %v7353_v28 = vld [vmem:[#allocation2 + $0x1dc] sm:$0xf0]  ;;  %v8000_v32 = vor.u32 %v10336_v16, %v7997_v17 }
  0x56   :  { %2453 = vmatpush.bf16.msrb.mxu3 %v7244_v29  ;;  %v10114_v29 = vld [vmem:[%s11883_s0 + $0x14] sm:$0xf]  ;;  %v7117_v30 = vld [vmem:[%s11883_s0 + $0x2c] sm:$0xf0]  ;;  %v10448_v33 = vld [vmem:[#allocation2 + $0xa4c] sm:$0xf]  ;;  %v8224_v36 = vor.u32 %v10392_v18, %v8221_v19  ;;  %v7356_v41 = vor.u32 %v10175_v25, %v7353_v28 }
  0x57   :  { %2412 = vmatpush.bf16.msrb.mxu0 %v8108_v38  ;;  %v8445_v34 = vld [vmem:[#allocation2 + $0xa64] sm:$0xf0]  ;;  %v10273_v35 = vld [vmem:[#allocation2 + $0x4d4] sm:$0xf]  ;;  %v7745_v38 = vld [vmem:[#allocation2 + $0x4ec] sm:$0xf0] }
  0x58   :  { %2426 = vmatpush.bf16.msrb.mxu1 %v8332_v42  ;;  %8497 = vmatmul.msk.bf16.vlgmr.msrb.gmra.mxu2 %vm2348_vm0, %v11271_v50  ;;  %v10329_v39 = vld [vmem:[#allocation2 + $0x694] sm:$0xf]  ;;  %v7969_v40 = vld [vmem:[#allocation2 + $0x6ac] sm:$0xf0]  ;;  %v11289_v42 = vor.u32 %v10114_v29, %v7117_v30  ;;  %v8448_v45 = vor.u32 %v10448_v33, %v8445_v34  ;;  %v7748_v46 = vor.u32 %v10273_v35, %v7745_v38  ;;  %v7717_v53 = vld [vmem:[#allocation2 + $0x4b4] sm:$0xf0] }
  0x59   :  { %2467 = vmatpush.bf16.msra.mxu2 %v7468_v37  ;;  %v11287_v37 = vor.u32 %v10117_v24, %v7115_v23  ;;  %v8193_v44 = vld [vmem:[#allocation2 + $0x86c] sm:$0xf0]  ;;  %v7972_v47 = vor.u32 %v10329_v39, %v7969_v40  ;;  %v10441_v48 = vld [vmem:[#allocation2 + $0xa14] sm:$0xf]  ;;  %v10322_v55 = vld [vmem:[#allocation2 + $0x65c] sm:$0xf] }
  0x5a   :  { %2454 = vmatpush.bf16.msrb.mxu3 %v7216_v43  ;;  %v10385_v43 = vld [vmem:[#allocation2 + $0x854] sm:$0xf]  ;;  %v8417_v49 = vld [vmem:[#allocation2 + $0xa2c] sm:$0xf0]  ;;  %v8165_v58 = vld [vmem:[#allocation2 + $0x834] sm:$0xf0] }
  0x5b   :  { %2413 = vmatpush.bf16.msrb.mxu0 %v8080_v52  ;;  %v8196_v52 = vor.u32 %v10385_v43, %v8193_v44  ;;  %v8420_v59 = vor.u32 %v10441_v48, %v8417_v49  ;;  %v10434_v62 = vld [vmem:[#allocation2 + $0x9dc] sm:$0xf]  ;;  %v8389_v63 = vld [vmem:[#allocation2 + $0x9f4] sm:$0xf0]  ;;  %v10259_v0 = vld [vmem:[#allocation2 + $0x464] sm:$0xf] }
  0x5c   :  { %2427 = vmatpush.bf16.msrb.mxu1 %v8304_v56  ;;  %v7941_v56 = vld [vmem:[#allocation2 + $0x674] sm:$0xf0]  ;;  %v7913_v5 = vld [vmem:[#allocation2 + $0x63c] sm:$0xf0]  ;;  %v10371_v6 = vld [vmem:[#allocation2 + $0x7e4] sm:$0xf] }
  0x5d   :  { %2468 = vmatpush.bf16.msra.mxu2 %v7440_v51  ;;  %v10266_v51 = vld [vmem:[#allocation2 + $0x49c] sm:$0xf]  ;;  %v7944_v61 = vor.u32 %v10322_v55, %v7941_v56  ;;  %v8137_v7 = vld [vmem:[#allocation2 + $0x7fc] sm:$0xf0]  ;;  %v10427_v11 = vld [vmem:[#allocation2 + $0x9a4] sm:$0xf] }
  0x5e   :  { %2455 = vmatpush.bf16.msrb.mxu3 %v7188_v57  ;;  %v10378_v57 = vld [vmem:[#allocation2 + $0x81c] sm:$0xf]  ;;  %v7720_v60 = vor.u32 %v10266_v51, %v7717_v53  ;;  %v8361_v12 = vld [vmem:[#allocation2 + $0x9bc] sm:$0xf0]  ;;  %v10252_v14 = vld [vmem:[#allocation2 + $0x42c] sm:$0xf]  ;;  %v8140_v15 = vor.u32 %v10371_v6, %v8137_v7 }
  0x5f   :  { %2414 = vmatpush.bf16.msrb.mxu0 %v8052_v4  ;;  %v8168_v1 = vor.u32 %v10378_v57, %v8165_v58  ;;  %v10315_v4 = vld [vmem:[#allocation2 + $0x624] sm:$0xf]  ;;  %v7661_v16 = vld [vmem:[#allocation2 + $0x444] sm:$0xf0]  ;;  %v10308_v17 = vld [vmem:[#allocation2 + $0x5ec] sm:$0xf] }
  0x60   :  { %2428 = vmatpush.bf16.msrb.mxu1 %v8276_v8  ;;  %v8392_v8 = vor.u32 %v10434_v62, %v8389_v63  ;;  %v7916_v10 = vor.u32 %v10315_v4, %v7913_v5  ;;  %v7885_v18 = vld [vmem:[#allocation2 + $0x604] sm:$0xf0]  ;;  %v10364_v19 = vld [vmem:[#allocation2 + $0x7ac] sm:$0xf]  ;;  %v7664_v23 = vor.u32 %v10252_v14, %v7661_v16  ;;  %v7633_v29 = vld [vmem:[#allocation2 + $0x40c] sm:$0xf0] }
  0x61   :  { %2469 = vmatpush.bf16.msra.mxu2 %v7412_v3  ;;  %v7689_v3 = vld [vmem:[#allocation2 + $0x47c] sm:$0xf0]  ;;  %v7888_v24 = vor.u32 %v10308_v17, %v7885_v18  ;;  %v10420_v25 = vld [vmem:[#allocation2 + $0x96c] sm:$0xf]  ;;  %v10301_v30 = vld [vmem:[#allocation2 + $0x5b4] sm:$0xf] }
  0x62   :  { %2456 = vmatpush.bf16.msrb.mxu3 %v7160_v9  ;;  %v7692_v9 = vor.u32 %v10259_v0, %v7689_v3  ;;  %v8081_v33 = vld [vmem:[#allocation2 + $0x78c] sm:$0xf0]  ;;  %v10413_v38 = vld [vmem:[#allocation2 + $0x934] sm:$0xf]  ;;  %v10238_v40 = vld [vmem:[#allocation2 + $0x3bc] sm:$0xf] }
  0x63   :  { %2415 = vmatpush.bf16.msrb.mxu0 %v8024_v22  ;;  %v8364_v22 = vor.u32 %v10427_v11, %v8361_v12  ;;  %v8305_v39 = vld [vmem:[#allocation2 + $0x94c] sm:$0xf0]  ;;  %v7605_v43 = vld [vmem:[#allocation2 + $0x3d4] sm:$0xf0]  ;;  %v10294_v44 = vld [vmem:[#allocation2 + $0x57c] sm:$0xf] }
  0x64   :  { %2429 = vmatpush.bf16.msrb.mxu1 %v8248_v26  ;;  %v8333_v26 = vld [vmem:[#allocation2 + $0x984] sm:$0xf0]  ;;  %v8308_v48 = vor.u32 %v10413_v38, %v8305_v39  ;;  %v10406_v49 = vld [vmem:[#allocation2 + $0x8fc] sm:$0xf]  ;;  %v8277_v51 = vld [vmem:[#allocation2 + $0x914] sm:$0xf0] }
  0x65   :  { %2470 = vmatpush.bf16.msra.mxu2 %v7384_v21  ;;  %v8109_v21 = vld [vmem:[#allocation2 + $0x7c4] sm:$0xf0]  ;;  %v8336_v34 = vor.u32 %v10420_v25, %v8333_v26  ;;  %v10231_v55 = vld [vmem:[#allocation2 + $0x384] sm:$0xf]  ;;  %v7577_v56 = vld [vmem:[#allocation2 + $0x39c] sm:$0xf0] }
  0x66   :  { %2457 = vmatpush.bf16.msrb.mxu3 %v7132_v27  ;;  %2416 = vmatmul.bf16.vlgmr.msrb.gmra.mxu0 %v11287_v37  ;;  %v10245_v27 = vld [vmem:[#allocation2 + $0x3f4] sm:$0xf]  ;;  %v8112_v28 = vor.u32 %v10364_v19, %v8109_v21  ;;  %v10287_v57 = vld [vmem:[#allocation2 + $0x544] sm:$0xf]  ;;  %v7331_v62 = vld [vmem:[#allocation2 + $0x190] sm:$0xf]  ;;  %v7580_v6 = vor.u32 %v10231_v55, %v7577_v56 }
  0x67   :  { %2478 = vmatpush.bf16.msra.mxu0 %v7776_v31  ;;  %2430 = vmatmul.bf16.vlgmr.msrb.gmra.mxu1 %v11289_v42  ;;  %v7857_v31 = vld [vmem:[#allocation2 + $0x5cc] sm:$0xf0]  ;;  %v7636_v35 = vor.u32 %v10245_v27, %v7633_v29  ;;  %v10172_v63 = vld [vmem:[#allocation2 + $0x1a8] sm:$0xf0]  ;;  %v10455_v4 = vld [vmem:[#allocation2 + $0xa84] sm:$0xf] }
  0x68   :  { %2492 = vmatpush.bf16.msra.mxu1 %v8000_v32  ;;  %v10357_v32 = vld [vmem:[#allocation2 + $0x774] sm:$0xf]  ;;  %v7555_v0 = vld [vmem:[#allocation2 + $0x350] sm:$0xf]  ;;  %v10228_v3 = vld [vmem:[#allocation2 + $0x368] sm:$0xf0]  ;;  %v7332_v11 = vor.u32 %v10172_v63, %v7331_v62 }
  0x69   :  { %2471 = vmatpush.bf16.msra.mxu2 %v7356_v41  ;;  %2458 = vmatmul.bf16.vlgmr.msrb.gmra.mxu3 %v11243_v2  ;;  %v8084_v41 = vor.u32 %v10357_v32, %v8081_v33  ;;  %v8473_v5 = vld [vmem:[#allocation2 + $0xa9c] sm:$0xf0]  ;;  %v7779_v12 = vld [vmem:[#allocation2 + $0x510] sm:$0xf]  ;;  %v10284_v14 = vld [vmem:[#allocation2 + $0x528] sm:$0xf0] }
  0x6a   :  { %2506 = vmatpush.bf16.msra.mxu3 %v8224_v36  ;;  %v7860_v36 = vor.u32 %v10301_v30, %v7857_v31  ;;  %v8476_v16 = vor.u32 %v10455_v4, %v8473_v5  ;;  %v8003_v17 = vld [vmem:[#allocation2 + $0x6d0] sm:$0xf]  ;;  %v10340_v18 = vld [vmem:[#allocation2 + $0x6e8] sm:$0xf0]  ;;  %v7303_v19 = vld [vmem:[#allocation2 + $0x158] sm:$0xf]  ;;  %v7780_v25 = vor.u32 %v10284_v14, %v7779_v12 }
  0x6b   :  { %2479 = vmatpush.bf16.msra.mxu0 %v7748_v46  ;;  %v10350_v46 = vld [vmem:[#allocation2 + $0x73c] sm:$0xf]  ;;  %v8004_v26 = vor.u32 %v10340_v18, %v8003_v17  ;;  %v7751_v27 = vld [vmem:[#allocation2 + $0x4d8] sm:$0xf]  ;;  %v10333_v32 = vld [vmem:[#allocation2 + $0x6b0] sm:$0xf0] }
  0x6c   :  { %2493 = vmatpush.bf16.msra.mxu1 %v7972_v47  ;;  %2472 = vmatmul.bf16.vlgmr.msra.gmra.mxu2 %v11256_v13  ;;  %v8053_v47 = vld [vmem:[#allocation2 + $0x754] sm:$0xf0]  ;;  %v7275_v33 = vld [vmem:[#allocation2 + $0x120] sm:$0xf]  ;;  %v7695_v55 = vld [vmem:[#allocation2 + $0x468] sm:$0xf] }
  0x6d   :  { %2520 = vmatpush.bf16.msrb.mxu2 %v8448_v45  ;;  %v7829_v45 = vld [vmem:[#allocation2 + $0x594] sm:$0xf0]  ;;  %v8056_v58 = vor.u32 %v10350_v46, %v8053_v47  ;;  %v10326_v46 = vld [vmem:[#allocation2 + $0x678] sm:$0xf0]  ;;  %v7247_v47 = vld [vmem:[#allocation2 + $0xe8] sm:$0xf] }
  0x6e   :  { %2507 = vmatpush.bf16.msra.mxu3 %v8196_v52  ;;  %v7608_v52 = vor.u32 %v10238_v40, %v7605_v43  ;;  %v7832_v53 = vor.u32 %v10294_v44, %v7829_v45  ;;  %v7975_v31 = vld [vmem:[#allocation2 + $0x698] sm:$0xf]  ;;  %v7723_v40 = vld [vmem:[#allocation2 + $0x4a0] sm:$0xf]  ;;  %v10263_v56 = vld [vmem:[#allocation2 + $0x480] sm:$0xf0] }
  0x6f   :  { %2480 = vmatpush.bf16.msra.mxu0 %v7720_v60  ;;  %v10343_v60 = vld [vmem:[#allocation2 + $0x704] sm:$0xf]  ;;  %v7976_v39 = vor.u32 %v10333_v32, %v7975_v31  ;;  %v7947_v45 = vld [vmem:[#allocation2 + $0x660] sm:$0xf]  ;;  %v10144_v62 = vld [vmem:[#allocation2 + $0xc8] sm:$0xf0] }
  0x70   :  { %2494 = vmatpush.bf16.msra.mxu1 %v7944_v61  ;;  %v8025_v61 = vld [vmem:[#allocation2 + $0x71c] sm:$0xf0]  ;;  %v7443_v63 = vld [vmem:[#allocation2 + $0x270] sm:$0xf]  ;;  %v10256_v5 = vld [vmem:[#allocation2 + $0x448] sm:$0xf0] }
  0x71   :  { %2521 = vmatpush.bf16.msrb.mxu2 %v8420_v59  ;;  %v7801_v59 = vld [vmem:[#allocation2 + $0x55c] sm:$0xf0]  ;;  %v7667_v4 = vld [vmem:[#allocation2 + $0x430] sm:$0xf]  ;;  %v7415_v12 = vld [vmem:[#allocation2 + $0x238] sm:$0xf] }
  0x72   :  { %2508 = vmatpush.bf16.msra.mxu3 %v8168_v1  ;;  %v8280_v1 = vor.u32 %v10406_v49, %v8277_v51  ;;  %v7804_v7 = vor.u32 %v10287_v57, %v7801_v59  ;;  %v7471_v49 = vld [vmem:[#allocation2 + $0x2a8] sm:$0xf]  ;;  %v10207_v51 = vld [vmem:[#allocation2 + $0x2c0] sm:$0xf0]  ;;  %v10193_v14 = vld [vmem:[#allocation2 + $0x250] sm:$0xf0] }
  0x73   :  { %2481 = vmatpush.bf16.msra.mxu0 %v7692_v9  ;;  %v8249_v9 = vld [vmem:[#allocation2 + $0x8dc] sm:$0xf0]  ;;  %v7919_v57 = vld [vmem:[#allocation2 + $0x628] sm:$0xf]  ;;  %v7472_v59 = vor.u32 %v10207_v51, %v7471_v49  ;;  %v7639_v17 = vld [vmem:[#allocation2 + $0x3f8] sm:$0xf] }
  0x74   :  { %2495 = vmatpush.bf16.msra.mxu1 %v7916_v10  ;;  %v8028_v10 = vor.u32 %v10343_v60, %v8025_v61  ;;  %v10319_v60 = vld [vmem:[#allocation2 + $0x640] sm:$0xf0]  ;;  %v7219_v61 = vld [vmem:[#allocation2 + $0xb0] sm:$0xf]  ;;  %v10249_v18 = vld [vmem:[#allocation2 + $0x410] sm:$0xf0] }
  0x75   :  { %2522 = vmatpush.bf16.msrb.mxu2 %v8392_v8  ;;  %v10399_v8 = vld [vmem:[#allocation2 + $0x8c4] sm:$0xf]  ;;  %v10242_v31 = vld [vmem:[#allocation2 + $0x3d8] sm:$0xf0]  ;;  %v7835_v32 = vld [vmem:[#allocation2 + $0x580] sm:$0xf] }
  0x76   :  { %2509 = vmatpush.bf16.msra.mxu3 %v8140_v15  ;;  %v7556_v15 = vor.u32 %v10228_v3, %v7555_v0  ;;  %v8252_v21 = vor.u32 %v10399_v8, %v8249_v9  ;;  %v10200_v0 = vld [vmem:[#allocation2 + $0x288] sm:$0xf0]  ;;  %v7920_v3 = vor.u32 %v10319_v60, %v7919_v57  ;;  %v7891_v8 = vld [vmem:[#allocation2 + $0x5f0] sm:$0xf]  ;;  %v10235_v49 = vld [vmem:[#allocation2 + $0x3a0] sm:$0xf0] }
  0x77   :  { %2482 = vmatpush.bf16.msra.mxu0 %v7664_v23  ;;  %v7527_v23 = vld [vmem:[#allocation2 + $0x318] sm:$0xf]  ;;  %v10312_v9 = vld [vmem:[#allocation2 + $0x608] sm:$0xf0]  ;;  %v7807_v51 = vld [vmem:[#allocation2 + $0x548] sm:$0xf] }
  0x78   :  { %2496 = vmatpush.bf16.msra.mxu1 %v7888_v24  ;;  %v10221_v24 = vld [vmem:[#allocation2 + $0x330] sm:$0xf0]  ;;  %v10459_v57 = vld [vmem:[#allocation2 + $0xaa0] sm:$0xf0]  ;;  %s11152_s0 = smov [#allocation16]   ;;  %s11153_s26 = smov 128  }
  0x79   :  { %2523 = vmatpush.bf16.msrb.mxu2 %v8364_v22  ;;  %v10165_v22 = vld [vmem:[#allocation2 + $0x170] sm:$0xf0]  ;;  %v7528_v30 = vor.u32 %v10221_v24, %v7527_v23  ;;  %v7163_v24 = vld [vmem:[#allocation2 + $0x40] sm:$0xf]  ;;  %s7078_s24 = sshll.u32 %s11152_s0, 4  ;;  %s11154_s27 = smov 8   ;;  %s7079_s24 = int_to_ptr.vmem [resolvable:$true] %s7078_s24 }
  0x7a   :  { %2510 = vmatpush.bf16.msra.mxu3 %v8112_v28  ;;  %v10277_v28 = vld [vmem:[#allocation2 + $0x4f0] sm:$0xf0]  ;;  %v7304_v29 = vor.u32 %v10165_v22, %v7303_v19  ;;  %v7863_v22 = vld [vmem:[#allocation2 + $0x5b8] sm:$0xf] }
  0x7b   :  { %2483 = vmatpush.bf16.msra.mxu0 %v7636_v35  ;;  %v7499_v35 = vld [vmem:[#allocation2 + $0x2e0] sm:$0xf]  ;;  %v7752_v38 = vor.u32 %v10277_v28, %v7751_v27  ;;  %v10305_v23 = vld [vmem:[#allocation2 + $0x5d0] sm:$0xf0]  ;;  %v10186_v27 = vld [vmem:[#allocation2 + $0x218] sm:$0xf0]  ;;  %v7640_v28 = vor.u32 %v10249_v18, %v7639_v17 }
  0x7c   :  { %2497 = vmatpush.bf16.msra.mxu1 %v7860_v36  ;;  %v10214_v36 = vld [vmem:[#allocation2 + $0x2f8] sm:$0xf0]  ;;  %v10169_v60 = vld [vmem:[#allocation2 + $0x194] sm:$0xf] }
  0x7d   :  { %2524 = vmatpush.bf16.msrb.mxu2 %v8336_v34  ;;  %v10158_v34 = vld [vmem:[#allocation2 + $0x138] sm:$0xf0]  ;;  %v7500_v44 = vor.u32 %v10214_v36, %v7499_v35  ;;  %v7135_v36 = vld [vmem:[#allocation2 + $0x8] sm:$0xf] }
  0x7e   :  { %2511 = vmatpush.bf16.msra.mxu3 %v8084_v41  ;;  %v10270_v41 = vld [vmem:[#allocation2 + $0x4b8] sm:$0xf0]  ;;  %v7276_v43 = vor.u32 %v10158_v34, %v7275_v33 }
  0x7f   :  { %2484 = vmatpush.bf16.msra.mxu0 %v7608_v52  ;;  %v7724_v52 = vor.u32 %v10270_v41, %v7723_v40  ;;  %v10298_v35 = vld [vmem:[#allocation2 + $0x598] sm:$0xf0]  ;;  %v10179_v40 = vld [vmem:[#allocation2 + $0x1e0] sm:$0xf0]  ;;  %v8227_v41 = vld [vmem:[#allocation2 + $0x890] sm:$0xf] }
  0x80   :  { %2498 = vmatpush.bf16.msra.mxu1 %v7832_v53  ;;  %v7948_v53 = vor.u32 %v10326_v46, %v7947_v45  ;;  %v8451_v45 = vld [vmem:[#allocation2 + $0xa50] sm:$0xf]  ;;  %v10452_v46 = vld [vmem:[#allocation2 + $0xa68] sm:$0xf0]  ;;  %v10438_v17 = vld [vmem:[#allocation2 + $0x9f8] sm:$0xf0] }
  0x81   :  { %2525 = vmatpush.bf16.msrb.mxu2 %v8308_v48  ;;  %v10151_v48 = vld [vmem:[#allocation2 + $0x100] sm:$0xf0] }
  0x82   :  { %2512 = vmatpush.bf16.msra.mxu3 %v8056_v58  ;;  %v7248_v58 = vor.u32 %v10151_v48, %v7247_v47  ;;  %v7836_v47 = vor.u32 %v10298_v35, %v7835_v32  ;;  %v7583_v48 = vld [vmem:[#allocation2 + $0x388] sm:$0xf] }
  0x83   :  { %2485 = vmatpush.bf16.msra.mxu0 %v7580_v6  ;;  %v7220_v6 = vor.u32 %v10144_v62, %v7219_v61  ;;  %v7333_v61 = vld [vmem:[#allocation2 + $0x1ac] sm:$0xf0]  ;;  %v8199_v62 = vld [vmem:[#allocation2 + $0x858] sm:$0xf] }
  0x84   :  { %2499 = vmatpush.bf16.msra.mxu1 %v7804_v7  ;;  %v7444_v7 = vor.u32 %v10200_v0, %v7443_v63  ;;  %v7584_v63 = vor.u32 %v10235_v49, %v7583_v48  ;;  %v10389_v0 = vld [vmem:[#allocation2 + $0x870] sm:$0xf0]  ;;  %v7473_v48 = vld [vmem:[#allocation2 + $0x2c4] sm:$0xf0] }
  0x85   :  { %2526 = vmatpush.bf16.msrb.mxu2 %v8280_v1  ;;  %v7696_v1 = vor.u32 %v10263_v56, %v7695_v55  ;;  %v10291_v55 = vld [vmem:[#allocation2 + $0x560] sm:$0xf0]  ;;  %v8479_v56 = vld [vmem:[#allocation2 + $0xa88] sm:$0xf] }
  0x86   :  { %2513 = vmatpush.bf16.msra.mxu3 %v8028_v10  ;;  %2486 = vmatmul.bf16.vlgmr.msra.gmra.mxu0 %v11235_v54  ;;  %v7191_v10 = vld [vmem:[#allocation2 + $0x78] sm:$0xf] }
  0x87   :  { %2541 = vmatpush.bf16.msrb.mxu0 %v8476_v16  ;;  %2500 = vmatmul.bf16.vlgmr.msra.gmra.mxu1 %v11261_v20  ;;  %v7892_v16 = vor.u32 %v10312_v9, %v7891_v8  ;;  %v7557_v8 = vld [vmem:[#allocation2 + $0x36c] sm:$0xf0]  ;;  %v8200_v9 = vor.u32 %v10389_v0, %v8199_v62 }
  0x88   :  { %2548 = vmatpush.bf16.msrb.mxu1 %v7332_v11  ;;  %v10137_v11 = vld [vmem:[#allocation2 + $0x90] sm:$0xf0]  ;;  %v7445_v62 = vld [vmem:[#allocation2 + $0x28c] sm:$0xf0] }
  0x89   :  { %2527 = vmatpush.bf16.msrb.mxu2 %v8252_v21  ;;  %2514 = vmatmul.bf16.vlgmr.msra.gmra.mxu3 %v11287_v37  ;;  %v7192_v19 = vor.u32 %v10137_v11, %v7191_v10  ;;  %v7416_v21 = vor.u32 %v10193_v14, %v7415_v12  ;;  %v10162_v11 = vld [vmem:[#allocation2 + $0x15c] sm:$0xf]  ;;  %v7305_v12 = vld [vmem:[#allocation2 + $0x174] sm:$0xf0]  ;;  %v8171_v14 = vld [vmem:[#allocation2 + $0x820] sm:$0xf] }
  0x8a   :  { %2562 = vmatpush.bf16.msrb.mxu3 %v7556_v15  ;;  %v7668_v15 = vor.u32 %v10256_v5, %v7667_v4  ;;  %v7808_v4 = vor.u32 %v10291_v55, %v7807_v51  ;;  %v8480_v5 = vor.u32 %v10459_v57, %v8479_v56  ;;  %v8087_v55 = vld [vmem:[#allocation2 + $0x778] sm:$0xf]  ;;  %v10361_v56 = vld [vmem:[#allocation2 + $0x790] sm:$0xf0] }
  0x8b   :  { %2576 = vmatpush.bf16.msra.mxu0 %v7780_v25  ;;  %v10130_v25 = vld [vmem:[#allocation2 + $0x58] sm:$0xf0]  ;;  %v8311_v57 = vld [vmem:[#allocation2 + $0x938] sm:$0xf] }
  0x8c   :  { %2549 = vmatpush.bf16.msrb.mxu1 %v7304_v29  ;;  %2528 = vmatmul.bf16.vlgmr.msrb.gmra.mxu2 %v11289_v42  ;;  %v7864_v29 = vor.u32 %v10305_v23, %v7863_v22  ;;  %v7164_v33 = vor.u32 %v10130_v25, %v7163_v24  ;;  %v7529_v22 = vld [vmem:[#allocation2 + $0x334] sm:$0xf0]  ;;  %v10155_v25 = vld [vmem:[#allocation2 + $0x124] sm:$0xf] }
  0x8d   :  { %2590 = vmatpush.bf16.msra.mxu2 %v8004_v26  ;;  %v7387_v26 = vld [vmem:[#allocation2 + $0x200] sm:$0xf] }
  0x8e   :  { %2563 = vmatpush.bf16.msrb.mxu3 %v7528_v30  ;;  %v7611_v30 = vld [vmem:[#allocation2 + $0x3c0] sm:$0xf]  ;;  %v7388_v34 = vor.u32 %v10186_v27, %v7387_v26  ;;  %v8143_v27 = vld [vmem:[#allocation2 + $0x7e8] sm:$0xf] }
  0x8f   :  { %2577 = vmatpush.bf16.msra.mxu0 %v7752_v38  ;;  %v10123_v38 = vld [vmem:[#allocation2 + $0x20] sm:$0xf0]  ;;  %v7277_v26 = vld [vmem:[#allocation2 + $0x13c] sm:$0xf0] }
  0x90   :  { %2550 = vmatpush.bf16.msrb.mxu1 %v7276_v43  ;;  %v7612_v43 = vor.u32 %v10242_v31, %v7611_v30  ;;  %v10431_v30 = vld [vmem:[#allocation2 + $0x9c0] sm:$0xf0]  ;;  %v7280_v32 = vor.u32 %v10155_v25, %v7277_v26  ;;  %v10337_v25 = vld [vmem:[#allocation2 + $0x6d4] sm:$0xf]  ;;  %v8005_v26 = vld [vmem:[#allocation2 + $0x6ec] sm:$0xf0] }
  0x91   :  { %2591 = vmatpush.bf16.msra.mxu2 %v7976_v39  ;;  %v7359_v39 = vld [vmem:[#allocation2 + $0x1c8] sm:$0xf] }
  0x92   :  { %2564 = vmatpush.bf16.msrb.mxu3 %v7500_v44  ;;  %v10396_v44 = vld [vmem:[#allocation2 + $0x8a8] sm:$0xf0] }
  0x93   :  { %2578 = vmatpush.bf16.msra.mxu0 %v7724_v52  ;;  %v7136_v52 = vor.u32 %v10123_v38, %v7135_v36  ;;  %v10148_v38 = vld [vmem:[#allocation2 + $0xec] sm:$0xf] }
  0x94   :  { %2551 = vmatpush.bf16.msrb.mxu1 %v7248_v58  ;;  %v8228_v58 = vor.u32 %v10396_v44, %v8227_v41  ;;  %v10368_v41 = vld [vmem:[#allocation2 + $0x7c8] sm:$0xf0] }
  0x95   :  { %2592 = vmatpush.bf16.msra.mxu2 %v7948_v53  ;;  %v7360_v53 = vor.u32 %v10179_v40, %v7359_v39  ;;  %v7249_v39 = vld [vmem:[#allocation2 + $0x104] sm:$0xf0]  ;;  %v8115_v40 = vld [vmem:[#allocation2 + $0x7b0] sm:$0xf]  ;;  %v10424_v44 = vld [vmem:[#allocation2 + $0x988] sm:$0xf0] }
  0x96   :  { %2565 = vmatpush.bf16.msrb.mxu3 %v7472_v59  ;;  %8498 = vmatmul.msk.bf16.vlgmr.msrb.gmra.mxu0 %vm2348_vm0, %v11271_v50  ;;  %v8452_v59 = vor.u32 %v10452_v46, %v8451_v45  ;;  %v7252_v46 = vor.u32 %v10148_v38, %v7249_v39  ;;  %v8116_v49 = vor.u32 %v10368_v41, %v8115_v40  ;;  %v8229_v38 = vld [vmem:[#allocation2 + $0x8ac] sm:$0xf0]  ;;  %v10274_v40 = vld [vmem:[#allocation2 + $0x4dc] sm:$0xf]  ;;  %v7753_v41 = vld [vmem:[#allocation2 + $0x4f4] sm:$0xf0] }
  0x97   :  { %2579 = vmatpush.bf16.msra.mxu0 %v7696_v1  ;;  %v8423_v1 = vld [vmem:[#allocation2 + $0xa18] sm:$0xf] }
  0x98   :  { %2552 = vmatpush.bf16.msrb.mxu1 %v7220_v6  ;;  %v7336_v6 = vor.u32 %v10169_v60, %v7333_v61  ;;  %v10197_v61 = vld [vmem:[#allocation2 + $0x274] sm:$0xf] }
  0x99   :  { %2593 = vmatpush.bf16.msra.mxu2 %v7920_v3  ;;  %v10445_v3 = vld [vmem:[#allocation2 + $0xa30] sm:$0xf0] }
  0x9a   :  { %2566 = vmatpush.bf16.msrb.mxu3 %v7444_v7  ;;  %v10225_v7 = vld [vmem:[#allocation2 + $0x354] sm:$0xf]  ;;  %v8424_v10 = vor.u32 %v10445_v3, %v8423_v1  ;;  %v10134_v1 = vld [vmem:[#allocation2 + $0x7c] sm:$0xf]  ;;  %v7193_v3 = vld [vmem:[#allocation2 + $0x94] sm:$0xf0] }
  0x9b   :  { %2580 = vmatpush.bf16.msra.mxu0 %v7668_v15  ;;  %v10382_v15 = vld [vmem:[#allocation2 + $0x838] sm:$0xf0]  ;;  %v7560_v18 = vor.u32 %v10225_v7, %v7557_v8  ;;  %v7448_v8 = vor.u32 %v10197_v61, %v7445_v62  ;;  %v10323_v61 = vld [vmem:[#allocation2 + $0x664] sm:$0xf]  ;;  %v7949_v62 = vld [vmem:[#allocation2 + $0x67c] sm:$0xf0] }
  0x9c   :  { %2553 = vmatpush.bf16.msrb.mxu1 %v7192_v19  ;;  %v7308_v19 = vor.u32 %v10162_v11, %v7305_v12  ;;  %v8172_v23 = vor.u32 %v10382_v15, %v8171_v14  ;;  %v10410_v7 = vld [vmem:[#allocation2 + $0x918] sm:$0xf0]  ;;  %v7417_v11 = vld [vmem:[#allocation2 + $0x254] sm:$0xf0]  ;;  %v10127_v12 = vld [vmem:[#allocation2 + $0x44] sm:$0xf] }
  0x9d   :  { %2594 = vmatpush.bf16.msra.mxu2 %v7892_v16  ;;  %v8395_v16 = vld [vmem:[#allocation2 + $0x9e0] sm:$0xf] }
  0x9e   :  { %2567 = vmatpush.bf16.msrb.mxu3 %v7416_v21  ;;  %v10218_v21 = vld [vmem:[#allocation2 + $0x31c] sm:$0xf]  ;;  %v8396_v24 = vor.u32 %v10438_v17, %v8395_v16  ;;  %v7165_v16 = vld [vmem:[#allocation2 + $0x5c] sm:$0xf0]  ;;  %v8031_v17 = vld [vmem:[#allocation2 + $0x708] sm:$0xf] }
  0x9f   :  { %2581 = vmatpush.bf16.msra.mxu0 %v7640_v28  ;;  %v10375_v28 = vld [vmem:[#allocation2 + $0x800] sm:$0xf0]  ;;  %v7532_v31 = vor.u32 %v10218_v21, %v7529_v22  ;;  %v10281_v22 = vld [vmem:[#allocation2 + $0x514] sm:$0xf] }
  0xa0   :  { %2554 = vmatpush.bf16.msrb.mxu1 %v7164_v33  ;;  %v10211_v33 = vld [vmem:[#allocation2 + $0x2e4] sm:$0xf]  ;;  %v8144_v35 = vor.u32 %v10375_v28, %v8143_v27  ;;  %v7168_v27 = vor.u32 %v10127_v12, %v7165_v16 }
  0xa1   :  { %2595 = vmatpush.bf16.msra.mxu2 %v7864_v29  ;;  %v8367_v29 = vld [vmem:[#allocation2 + $0x9a8] sm:$0xf]  ;;  %v10403_v21 = vld [vmem:[#allocation2 + $0x8e0] sm:$0xf0] }
  0xa2   :  { %2568 = vmatpush.bf16.msrb.mxu3 %v7388_v34  ;;  %v7501_v34 = vld [vmem:[#allocation2 + $0x2fc] sm:$0xf0]  ;;  %v8368_v36 = vor.u32 %v10431_v30, %v8367_v29  ;;  %v10183_v28 = vld [vmem:[#allocation2 + $0x204] sm:$0xf] }
  0xa3   :  { %2582 = vmatpush.bf16.msra.mxu0 %v7612_v43  ;;  %v8339_v43 = vld [vmem:[#allocation2 + $0x970] sm:$0xf]  ;;  %v7504_v45 = vor.u32 %v10211_v33, %v7501_v34  ;;  %v7389_v29 = vld [vmem:[#allocation2 + $0x21c] sm:$0xf0]  ;;  %v8008_v34 = vor.u32 %v10337_v25, %v8005_v26  ;;  %v10435_v12 = vld [vmem:[#allocation2 + $0x9e4] sm:$0xf] }
  0xa4   :  { %2555 = vmatpush.bf16.msrb.mxu1 %v7136_v52  ;;  %v8340_v51 = vor.u32 %v10424_v44, %v8339_v43  ;;  %v10141_v52 = vld [vmem:[#allocation2 + $0xb4] sm:$0xf]  ;;  %v7392_v39 = vor.u32 %v10183_v28, %v7389_v29  ;;  %v10330_v43 = vld [vmem:[#allocation2 + $0x69c] sm:$0xf]  ;;  %v7977_v44 = vld [vmem:[#allocation2 + $0x6b4] sm:$0xf0] }
  0xa5   :  { %2596 = vmatpush.bf16.msra.mxu2 %v7836_v47  ;;  %v10204_v47 = vld [vmem:[#allocation2 + $0x2ac] sm:$0xf]  ;;  %v7893_v25 = vld [vmem:[#allocation2 + $0x60c] sm:$0xf0] }
  0xa6   :  { %2569 = vmatpush.bf16.msrb.mxu3 %v7360_v53  ;;  %v7221_v53 = vld [vmem:[#allocation2 + $0xcc] sm:$0xf0]  ;;  %v10428_v26 = vld [vmem:[#allocation2 + $0x9ac] sm:$0xf] }
  0xa7   :  { %2583 = vmatpush.bf16.msra.mxu0 %v7584_v63  ;;  %2556 = vmatmul.bf16.vlgmr.msrb.gmra.mxu1 %v11243_v2  ;;  %v7224_v60 = vor.u32 %v10141_v52, %v7221_v53  ;;  %v8088_v63 = vor.u32 %v10361_v56, %v8087_v55  ;;  %v7756_v52 = vor.u32 %v10274_v40, %v7753_v41  ;;  %v10386_v53 = vld [vmem:[#allocation2 + $0x85c] sm:$0xf]  ;;  %v8341_v40 = vld [vmem:[#allocation2 + $0x98c] sm:$0xf0] }
  0xa8   :  { %2604 = vmatpush.bf16.msra.mxu1 %v8228_v58  ;;  %v10417_v58 = vld [vmem:[#allocation2 + $0x950] sm:$0xf0]  ;;  %v7980_v55 = vor.u32 %v10330_v43, %v7977_v44  ;;  %v10358_v44 = vld [vmem:[#allocation2 + $0x77c] sm:$0xf] }
  0xa9   :  { %2597 = vmatpush.bf16.msra.mxu2 %v7808_v4  ;;  %2570 = vmatmul.bf16.vlgmr.msrb.gmra.mxu3 %v11256_v13  ;;  %v8312_v0 = vor.u32 %v10417_v58, %v8311_v57  ;;  %v8059_v4 = vld [vmem:[#allocation2 + $0x740] sm:$0xf]  ;;  %v8201_v57 = vld [vmem:[#allocation2 + $0x874] sm:$0xf0]  ;;  %v10267_v58 = vld [vmem:[#allocation2 + $0x4a4] sm:$0xf] }
  0xaa   :  { %2618 = vmatpush.bf16.msra.mxu3 %v8452_v59  ;;  %2584 = vmatmul.bf16.vlgmr.msra.gmra.mxu0 %v11235_v54  ;;  %v7476_v59 = vor.u32 %v10204_v47, %v7473_v48  ;;  %v10449_v48 = vld [vmem:[#allocation2 + $0xa54] sm:$0xf] }
  0xab   :  { %2639 = vmatpush.bf16.msrb.mxu0 %v8480_v5  ;;  %v10354_v5 = vld [vmem:[#allocation2 + $0x758] sm:$0xf0] }
  0xac   :  { %2605 = vmatpush.bf16.msra.mxu1 %v8200_v9  ;;  %2598 = vmatmul.bf16.vlgmr.msra.gmra.mxu2 %v11261_v20  ;;  %v7196_v9 = vor.u32 %v10134_v1, %v7193_v3  ;;  %v8060_v14 = vor.u32 %v10354_v5, %v8059_v4  ;;  %v8204_v1 = vor.u32 %v10386_v53, %v8201_v57  ;;  %v10379_v4 = vld [vmem:[#allocation2 + $0x824] sm:$0xf]  ;;  %v7837_v53 = vld [vmem:[#allocation2 + $0x59c] sm:$0xf0]  ;;  %v10414_v57 = vld [vmem:[#allocation2 + $0x93c] sm:$0xf] }
  0xad   :  { %2646 = vmatpush.bf16.msrb.mxu2 %v7336_v6  ;;  %v8283_v6 = vld [vmem:[#allocation2 + $0x900] sm:$0xf]  ;;  %v7952_v5 = vor.u32 %v10323_v61, %v7949_v62  ;;  %v10351_v61 = vld [vmem:[#allocation2 + $0x744] sm:$0xf] }
  0xae   :  { %2619 = vmatpush.bf16.msra.mxu3 %v8424_v10  ;;  %v10190_v10 = vld [vmem:[#allocation2 + $0x23c] sm:$0xf]  ;;  %v8284_v15 = vor.u32 %v10410_v7, %v8283_v6  ;;  %v8173_v6 = vld [vmem:[#allocation2 + $0x83c] sm:$0xf0]  ;;  %v10260_v7 = vld [vmem:[#allocation2 + $0x46c] sm:$0xf] }
  0xaf   :  { %2660 = vmatpush.bf16.msra.mxu0 %v7560_v18  ;;  %v10347_v18 = vld [vmem:[#allocation2 + $0x720] sm:$0xf0]  ;;  %v8061_v62 = vld [vmem:[#allocation2 + $0x75c] sm:$0xf0] }
  0xb0   :  { %2606 = vmatpush.bf16.msra.mxu1 %v8172_v23  ;;  %v7420_v23 = vor.u32 %v10190_v10, %v7417_v11  ;;  %v8032_v30 = vor.u32 %v10347_v18, %v8031_v17  ;;  %v10316_v10 = vld [vmem:[#allocation2 + $0x62c] sm:$0xf]  ;;  %v7921_v11 = vld [vmem:[#allocation2 + $0x644] sm:$0xf0] }
  0xb1   :  { %2647 = vmatpush.bf16.msrb.mxu2 %v7308_v19  ;;  %v8255_v19 = vld [vmem:[#allocation2 + $0x8c8] sm:$0xf]  ;;  %v10372_v17 = vld [vmem:[#allocation2 + $0x7ec] sm:$0xf]  ;;  %v7924_v18 = vor.u32 %v10316_v10, %v7921_v11  ;;  %v10407_v10 = vld [vmem:[#allocation2 + $0x904] sm:$0xf] }
  0xb2   :  { %2620 = vmatpush.bf16.msra.mxu3 %v8396_v24  ;;  %v7781_v24 = vld [vmem:[#allocation2 + $0x52c] sm:$0xf0]  ;;  %v8285_v11 = vld [vmem:[#allocation2 + $0x91c] sm:$0xf0] }
  0xb3   :  { %2661 = vmatpush.bf16.msra.mxu0 %v7532_v31  ;;  %v8256_v31 = vor.u32 %v10403_v21, %v8255_v19  ;;  %v7784_v33 = vor.u32 %v10281_v22, %v7781_v24  ;;  %v8145_v19 = vld [vmem:[#allocation2 + $0x804] sm:$0xf0]  ;;  %v10253_v21 = vld [vmem:[#allocation2 + $0x434] sm:$0xf]  ;;  %v7669_v22 = vld [vmem:[#allocation2 + $0x44c] sm:$0xf0] }
  0xb4   :  { %2607 = vmatpush.bf16.msra.mxu1 %v8144_v35  ;;  %v7137_v35 = vld [vmem:[#allocation2 + $0x24] sm:$0xf0]  ;;  %v10309_v24 = vld [vmem:[#allocation2 + $0x5f4] sm:$0xf]  ;;  %v8148_v28 = vor.u32 %v10372_v17, %v8145_v19  ;;  %v7672_v29 = vor.u32 %v10253_v21, %v7669_v22  ;;  %v7563_v19 = vld [vmem:[#allocation2 + $0x358] sm:$0xf] }
  0xb5   :  { %2648 = vmatpush.bf16.msrb.mxu2 %v7280_v32  ;;  %v10120_v32 = vld [vmem:[#allocation2 + $0xc] sm:$0xf]  ;;  %v8033_v17 = vld [vmem:[#allocation2 + $0x724] sm:$0xf0]  ;;  %v10229_v21 = vld [vmem:[#allocation2 + $0x370] sm:$0xf0] }
  0xb6   :  { %2621 = vmatpush.bf16.msra.mxu3 %v8368_v36  ;;  %v10393_v36 = vld [vmem:[#allocation2 + $0x894] sm:$0xf]  ;;  %v7140_v47 = vor.u32 %v10120_v32, %v7137_v35  ;;  %v8117_v32 = vld [vmem:[#allocation2 + $0x7cc] sm:$0xf0] }
  0xb7   :  { %2662 = vmatpush.bf16.msra.mxu0 %v7504_v45  ;;  %v10176_v45 = vld [vmem:[#allocation2 + $0x1cc] sm:$0xf] }
  0xb8   :  { %2608 = vmatpush.bf16.msra.mxu1 %v8116_v49  ;;  %v8453_v49 = vld [vmem:[#allocation2 + $0xa6c] sm:$0xf0] }
  0xb9   :  { %2649 = vmatpush.bf16.msrb.mxu2 %v7252_v46  ;;  %v7361_v46 = vld [vmem:[#allocation2 + $0x1e4] sm:$0xf0] }
  0xba   :  { %2622 = vmatpush.bf16.msra.mxu3 %v8340_v51  ;;  %8499 = vmatmul.msk.bf16.vlgmr.msrb.gmra.mxu0 %vm2348_vm0, %v11271_v50  ;;  %v8232_v51 = vor.u32 %v10393_v36, %v8229_v38  ;;  %v7364_v56 = vor.u32 %v10176_v45, %v7361_v46  ;;  %v10302_v36 = vld [vmem:[#allocation2 + $0x5bc] sm:$0xf]  ;;  %v7865_v38 = vld [vmem:[#allocation2 + $0x5d4] sm:$0xf0] }
  0xbb   :  { %2663 = vmatpush.bf16.msra.mxu0 %v7476_v59  ;;  %v7725_v59 = vld [vmem:[#allocation2 + $0x4bc] sm:$0xf0]  ;;  %v7868_v45 = vor.u32 %v10302_v36, %v7865_v38  ;;  %v8089_v46 = vld [vmem:[#allocation2 + $0x794] sm:$0xf0] }
  0xbc   :  { %2609 = vmatpush.bf16.msra.mxu1 %v8088_v63  ;;  %v10442_v63 = vld [vmem:[#allocation2 + $0xa1c] sm:$0xf]  ;;  %v7728_v3 = vor.u32 %v10267_v58, %v7725_v59  ;;  %v8313_v58 = vld [vmem:[#allocation2 + $0x954] sm:$0xf0]  ;;  %v8092_v59 = vor.u32 %v10358_v44, %v8089_v46  ;;  %v7759_v44 = vld [vmem:[#allocation2 + $0x4e0] sm:$0xf] }
  0xbd   :  { %2650 = vmatpush.bf16.msrb.mxu2 %v7224_v60  ;;  %v8456_v60 = vor.u32 %v10449_v48, %v8453_v49  ;;  %v7613_v48 = vld [vmem:[#allocation2 + $0x3dc] sm:$0xf0] }
  0xbe   :  { %2623 = vmatpush.bf16.msra.mxu3 %v8312_v0  ;;  %v8425_v0 = vld [vmem:[#allocation2 + $0xa34] sm:$0xf0] }
  0xbf   :  { %2664 = vmatpush.bf16.msra.mxu0 %v7448_v8  ;;  %v7697_v8 = vld [vmem:[#allocation2 + $0x484] sm:$0xf0] }
  0xc0   :  { %2610 = vmatpush.bf16.msra.mxu1 %v8060_v14  ;;  %v8397_v14 = vld [vmem:[#allocation2 + $0x9fc] sm:$0xf0]  ;;  %v7700_v16 = vor.u32 %v10260_v7, %v7697_v8  ;;  %v10456_v7 = vld [vmem:[#allocation2 + $0xa8c] sm:$0xf]  ;;  %v8481_v8 = vld [vmem:[#allocation2 + $0xaa4] sm:$0xf0] }
  0xc1   :  { %2651 = vmatpush.bf16.msrb.mxu2 %v7196_v9  ;;  %v8428_v9 = vor.u32 %v10442_v63, %v8425_v0  ;;  %v10232_v63 = vld [vmem:[#allocation2 + $0x38c] sm:$0xf] }
  0xc2   :  { %2624 = vmatpush.bf16.msra.mxu3 %v8284_v15  ;;  %v8176_v15 = vor.u32 %v10379_v4, %v8173_v6  ;;  %v7809_v4 = vld [vmem:[#allocation2 + $0x564] sm:$0xf0]  ;;  %v7339_v6 = vld [vmem:[#allocation2 + $0x198] sm:$0xf] }
  0xc3   :  { %2665 = vmatpush.bf16.msra.mxu0 %v7420_v23  ;;  %v8400_v23 = vor.u32 %v10435_v12, %v8397_v14  ;;  %v8064_v12 = vor.u32 %v10351_v61, %v8061_v62  ;;  %v10271_v62 = vld [vmem:[#allocation2 + $0x4c0] sm:$0xf0] }
  0xc4   :  { %2611 = vmatpush.bf16.msra.mxu1 %v8032_v30  ;;  %v10365_v30 = vld [vmem:[#allocation2 + $0x7b4] sm:$0xf] }
  0xc5   :  { %2652 = vmatpush.bf16.msrb.mxu2 %v7168_v27  ;;  %v8369_v27 = vld [vmem:[#allocation2 + $0x9c4] sm:$0xf0]  ;;  %v8120_v41 = vor.u32 %v10365_v30, %v8117_v32  ;;  %v8011_v32 = vld [vmem:[#allocation2 + $0x6d8] sm:$0xf] }
  0xc6   :  { %2625 = vmatpush.bf16.msra.mxu3 %v8256_v31  ;;  %v7896_v31 = vor.u32 %v10309_v24, %v7893_v25  ;;  %v8372_v35 = vor.u32 %v10428_v26, %v8369_v27  ;;  %v7787_v24 = vld [vmem:[#allocation2 + $0x518] sm:$0xf]  ;;  %v10285_v25 = vld [vmem:[#allocation2 + $0x530] sm:$0xf0]  ;;  %v7311_v26 = vld [vmem:[#allocation2 + $0x160] sm:$0xf] }
  0xc7   :  { %2666 = vmatpush.bf16.msra.mxu0 %v7392_v39  ;;  %2612 = vmatmul.bf16.vlgmr.msra.gmra.mxu1 %v11287_v37  ;;  %v10421_v39 = vld [vmem:[#allocation2 + $0x974] sm:$0xf]  ;;  %v10166_v27 = vld [vmem:[#allocation2 + $0x178] sm:$0xf0]  ;;  %v7788_v36 = vor.u32 %v10285_v25, %v7787_v24 }
  0xc8   :  { %2674 = vmatpush.bf16.msrb.mxu1 %v7784_v33  ;;  %v10246_v33 = vld [vmem:[#allocation2 + $0x3fc] sm:$0xf]  ;;  %v8344_v49 = vor.u32 %v10421_v39, %v8341_v40  ;;  %v7535_v39 = vld [vmem:[#allocation2 + $0x320] sm:$0xf]  ;;  %v7312_v40 = vor.u32 %v10166_v27, %v7311_v26  ;;  %v7451_v27 = vld [vmem:[#allocation2 + $0x278] sm:$0xf] }
  0xc9   :  { %2626 = vmatmul.bf16.vlgmr.msra.gmra.mxu3 %v11289_v42  ;;  %2653 = vmatpush.bf16.msrb.mxu2 %v7140_v47  ;;  %v10239_v47 = vld [vmem:[#allocation2 + $0x3c4] sm:$0xf] }
  0xca   :  { %2688 = vmatpush.bf16.msrb.mxu3 %v8008_v34  ;;  %v7641_v34 = vld [vmem:[#allocation2 + $0x414] sm:$0xf0] }
  0xcb   :  { %2667 = vmatpush.bf16.msra.mxu0 %v7364_v56  ;;  %v7644_v43 = vor.u32 %v10246_v33, %v7641_v34  ;;  %v11315_v56 = vpop.f32.mrf.mxu1  ;;  %v10341_v33 = vld [vmem:[#allocation2 + $0x6f0] sm:$0xf0] }
  0xcc   :  { %2675 = vmatpush.bf16.msrb.mxu1 %v7756_v52  ;;  %2654 = vmatmul.bf16.vlgmr.msrb.gmra.mxu2 %v11243_v2  ;;  %v10295_v52 = vld [vmem:[#allocation2 + $0x584] sm:$0xf] }
  0xcd   :  { %2702 = vmatpush.bf16.msra.mxu2 %v8232_v51  ;;  %v11311_v51 = vpop.f32.mrf.mxu0  ;;  %v7840_v0 = vor.u32 %v10295_v52, %v7837_v53  ;;  %v2403_v52 = vpop.f32.mrf.mxu3  ;;  %v7983_v53 = vld [vmem:[#allocation2 + $0x6a0] sm:$0xf] }
  0xce   :  { %2689 = vmatpush.bf16.msrb.mxu3 %v7980_v55  ;;  %2668 = vmatmul.bf16.vlgmr.msra.gmra.mxu0 %v11256_v13  ;;  %v11313_v55 = vpop.f32.mrf.mxu2  ;;  %v2376_v46 = vadd.f32 %v11315_v56, %v11311_v51  ;;  %v10215_v51 = vld [vmem:[#allocation2 + $0x300] sm:$0xf0]  ;;  %v7731_v56 = vld [vmem:[#allocation2 + $0x4a8] sm:$0xf] }
  0xcf   :  { %2716 = vmatpush.bf16.msrb.mxu0 %v8456_v60  ;;  %v7616_v60 = vor.u32 %v10239_v47, %v7613_v48  ;;  %v8012_v47 = vor.u32 %v10341_v33, %v8011_v32  ;;  %v7283_v48 = vld [vmem:[#allocation2 + $0x128] sm:$0xf]  ;;  %v10257_v32 = vld [vmem:[#allocation2 + $0x450] sm:$0xf0] }
  0xd0   :  { %2676 = vmatpush.bf16.msrb.mxu1 %v7728_v3  ;;  %v10288_v3 = vld [vmem:[#allocation2 + $0x54c] sm:$0xf] }
  0xd1   :  { %2703 = vmatpush.bf16.msra.mxu2 %v8204_v1  ;;  %v7585_v1 = vld [vmem:[#allocation2 + $0x3a4] sm:$0xf0] }
  0xd2   :  { %2690 = vmatpush.bf16.msrb.mxu3 %v7952_v5  ;;  %v8316_v5 = vor.u32 %v10414_v57, %v8313_v58  ;;  %v7588_v14 = vor.u32 %v10232_v63, %v7585_v1  ;;  %v10334_v57 = vld [vmem:[#allocation2 + $0x6b8] sm:$0xf0]  ;;  %v2390_v63 = vadd.f32 %v11313_v55, %v2376_v46  ;;  %v7255_v1 = vld [vmem:[#allocation2 + $0xf0] sm:$0xf] }
  0xd3   :  { %2717 = vmatpush.bf16.msrb.mxu0 %v8428_v9  ;;  %v10173_v9 = vld [vmem:[#allocation2 + $0x1b0] sm:$0xf0]  ;;  %v2377_v38 = vpop.f32.mrf.mxu1 }
  0xd4   :  { %2677 = vmatpush.bf16.msrb.mxu1 %v7700_v16  ;;  %v7812_v16 = vor.u32 %v10288_v3, %v7809_v4  ;;  %v7340_v22 = vor.u32 %v10173_v9, %v7339_v6  ;;  %v10152_v3 = vld [vmem:[#allocation2 + $0x108] sm:$0xf0]  ;;  %v7955_v4 = vld [vmem:[#allocation2 + $0x668] sm:$0xf]  ;;  %v7479_v9 = vld [vmem:[#allocation2 + $0x2b0] sm:$0xf] }
  0xd5   :  { %2704 = vmatpush.bf16.msra.mxu2 %v8176_v15  ;;  %v10344_v15 = vld [vmem:[#allocation2 + $0x70c] sm:$0xf] }
  0xd6   :  { %2691 = vmatpush.bf16.msrb.mxu3 %v7924_v18  ;;  %v8484_v18 = vor.u32 %v10456_v7, %v8481_v8  ;;  %v8036_v30 = vor.u32 %v10344_v15, %v8033_v17  ;;  %v11317_v34 = vpop.f32.mrf.mxu2  ;;  %v7732_v8 = vor.u32 %v10271_v62, %v7731_v56  ;;  %v10264_v15 = vld [vmem:[#allocation2 + $0x488] sm:$0xf0]  ;;  %v7871_v56 = vld [vmem:[#allocation2 + $0x5c0] sm:$0xf]  ;;  %v10306_v62 = vld [vmem:[#allocation2 + $0x5d8] sm:$0xf0] }
  0xd7   :  { %2718 = vmatpush.bf16.msrb.mxu0 %v8400_v23  ;;  %v8288_v23 = vor.u32 %v10407_v10, %v8285_v11  ;;  %v7256_v11 = vor.u32 %v10152_v3, %v7255_v1 }
  0xd8   :  { %2678 = vmatpush.bf16.msrb.mxu1 %v7672_v29  ;;  %v8257_v29 = vld [vmem:[#allocation2 + $0x8e4] sm:$0xf0] }
  0xd9   :  { %2705 = vmatpush.bf16.msra.mxu2 %v8148_v28  ;;  %v10400_v28 = vld [vmem:[#allocation2 + $0x8cc] sm:$0xf] }
  0xda   :  { %2692 = vmatpush.bf16.msrb.mxu3 %v7896_v31  ;;  %v2363_v31 = vpop.f32.mrf.mxu0 }
  0xdb   :  { %2719 = vmatpush.bf16.msrb.mxu0 %v8372_v35  ;;  %v7564_v35 = vor.u32 %v10229_v21, %v7563_v19  ;;  %v2378_v6 = vadd.f32 %v2377_v38, %v2363_v31  ;;  %v7227_v19 = vld [vmem:[#allocation2 + $0xb8] sm:$0xf]  ;;  %v10145_v21 = vld [vmem:[#allocation2 + $0xd0] sm:$0xf0]  ;;  %v10138_v38 = vld [vmem:[#allocation2 + $0x98] sm:$0xf0] }
  0xdc   :  { %2679 = vmatpush.bf16.msrb.mxu1 %v7644_v43  ;;  %v10222_v43 = vld [vmem:[#allocation2 + $0x338] sm:$0xf0]  ;;  %v7675_v31 = vld [vmem:[#allocation2 + $0x438] sm:$0xf] }
  0xdd   :  { %2706 = vmatpush.bf16.msra.mxu2 %v8120_v41  ;;  %v8260_v41 = vor.u32 %v10400_v28, %v8257_v29  ;;  %v7536_v58 = vor.u32 %v10222_v43, %v7535_v39  ;;  %v2392_v24 = vadd.f32 %v11317_v34, %v2378_v6  ;;  %v2405_v28 = vpop.f32.mrf.mxu3  ;;  %v7228_v29 = vor.u32 %v10145_v21, %v7227_v19  ;;  %v10313_v34 = vld [vmem:[#allocation2 + $0x610] sm:$0xf0]  ;;  %v7619_v6 = vld [vmem:[#allocation2 + $0x3c8] sm:$0xf]  ;;  %v7367_v21 = vld [vmem:[#allocation2 + $0x1d0] sm:$0xf] }
  0xde   :  { %2693 = vmatpush.bf16.msrb.mxu3 %v7868_v45  ;;  %v10278_v45 = vld [vmem:[#allocation2 + $0x4f8] sm:$0xf0]  ;;  %v11326_v55 = vpop.f32.mrf.mxu2  ;;  %v11151_v39 = vmov 16.0  }
  0xdf   :  { %2720 = vmatpush.bf16.msrb.mxu0 %v8344_v49  ;;  %v10159_v49 = vld [vmem:[#allocation2 + $0x140] sm:$0xf0]  ;;  %10879 = vrcp.f32 %v11151_v39  ;;  %v10460_v39 = vld [vmem:[#allocation2 + $0xaa8] sm:$0xf0] }
  0xe0   :  { %2680 = vmatpush.bf16.msrb.mxu1 %v7616_v60  ;;  %v7507_v60 = vld [vmem:[#allocation2 + $0x2e8] sm:$0xf]  ;;  %v7284_v61 = vor.u32 %v10159_v49, %v7283_v48  ;;  %v10194_v48 = vld [vmem:[#allocation2 + $0x258] sm:$0xf0]  ;;  %v7647_v49 = vld [vmem:[#allocation2 + $0x400] sm:$0xf] }
  0xe1   :  { %2707 = vmatpush.bf16.msra.mxu2 %v8092_v59  ;;  %v7760_v59 = vor.u32 %v10278_v45, %v7759_v44  ;;  %v7508_v7 = vor.u32 %v10215_v51, %v7507_v60  ;;  %v7676_v44 = vor.u32 %v10257_v32, %v7675_v31  ;;  %v7423_v45 = vld [vmem:[#allocation2 + $0x240] sm:$0xf]  ;;  %v7171_v60 = vld [vmem:[#allocation2 + $0x48] sm:$0xf]  ;;  %v10390_v31 = vld [vmem:[#allocation2 + $0x878] sm:$0xf0] }
  0xe2   :  { %2694 = vmatpush.bf16.msrb.mxu3 %v7840_v0  ;;  %v7984_v0 = vor.u32 %v10334_v57, %v7983_v53  ;;  %v7424_v3 = vor.u32 %v10194_v48, %v7423_v45 }
  0xe3   :  { %2721 = vmatpush.bf16.msrb.mxu0 %v8316_v5  ;;  %v10327_v5 = vld [vmem:[#allocation2 + $0x680] sm:$0xf0]  ;;  %v2417_v10 = vpop.f32.mrf.mxu0 }
  0xe4   :  { %2681 = vmatpush.bf16.msrb.mxu1 %v7588_v14  ;;  %v7703_v14 = vld [vmem:[#allocation2 + $0x470] sm:$0xf]  ;;  %v2431_v17 = vpop.f32.mrf.mxu1 }
  0xe5   :  { %2708 = vmatpush.bf16.msra.mxu2 %v8064_v12  ;;  %v10208_v12 = vld [vmem:[#allocation2 + $0x2c8] sm:$0xf0]  ;;  %v7704_v26 = vor.u32 %v10264_v15, %v7703_v14  ;;  %v7872_v15 = vor.u32 %v10306_v62, %v7871_v56 }
  0xe6   :  { %2695 = vmatpush.bf16.msrb.mxu3 %v7812_v16  ;;  %v2404_v16 = vadd.f32 %v2403_v52, %v2390_v63  ;;  %v7480_v25 = vor.u32 %v10208_v12, %v7479_v9  ;;  %v10250_v52 = vld [vmem:[#allocation2 + $0x418] sm:$0xf0]  ;;  %v2447_v51 = vpop.f32.mrf.mxu2  ;;  %v7395_v63 = vld [vmem:[#allocation2 + $0x208] sm:$0xf]  ;;  %v7143_v9 = vld [vmem:[#allocation2 + $0x10] sm:$0xf] }
  0xe7   :  { %2722 = vmatpush.bf16.msrb.mxu0 %v8288_v23  ;;  %2682 = vmatmul.bf16.vlgmr.msrb.gmra.mxu1 %v11235_v54  ;;  %v10320_v23 = vld [vmem:[#allocation2 + $0x648] sm:$0xf0] }
  0xe8   :  { %2737 = vmatpush.bf16.msra.mxu1 %v8484_v18  ;;  %v7956_v18 = vor.u32 %v10327_v5, %v7955_v4  ;;  %v2418_v33 = vadd.f32 %v2417_v10, %v2404_v16  ;;  %v7648_v4 = vor.u32 %v10250_v52, %v7647_v49  ;;  %v10187_v5 = vld [vmem:[#allocation2 + $0x220] sm:$0xf0]  ;;  %v10124_v10 = vld [vmem:[#allocation2 + $0x28] sm:$0xf0]  ;;  %v10397_v16 = vld [vmem:[#allocation2 + $0x8b0] sm:$0xf0] }
  0xe9   :  { %2696 = vmatmul.bf16.vlgmr.msrb.gmra.mxu3 %v11261_v20  ;;  %2709 = vmatpush.bf16.msra.mxu2 %v8036_v30  ;;  %v10201_v30 = vld [vmem:[#allocation2 + $0x290] sm:$0xf0] }
  0xea   :  { %2744 = vmatpush.bf16.msra.mxu3 %v7340_v22  ;;  %v7927_v22 = vld [vmem:[#allocation2 + $0x630] sm:$0xf]  ;;  %v7452_v43 = vor.u32 %v10201_v30, %v7451_v27  ;;  %v2432_v53 = vadd.f32 %v2431_v17, %v2418_v33  ;;  %v7843_v17 = vld [vmem:[#allocation2 + $0x588] sm:$0xf]  ;;  %v8459_v27 = vld [vmem:[#allocation2 + $0xa58] sm:$0xf] }
  0xeb   :  { %2723 = vmatpush.bf16.msrb.mxu0 %v8260_v41  ;;  %v2406_v41 = vadd.f32 %v2405_v28, %v2392_v24  ;;  %v2419_v46 = vpop.f32.mrf.mxu0  ;;  %v7396_v24 = vor.u32 %v10187_v5, %v7395_v63  ;;  %v7144_v28 = vor.u32 %v10124_v10, %v7143_v9  ;;  %v8207_v30 = vld [vmem:[#allocation2 + $0x860] sm:$0xf]  ;;  %v8179_v63 = vld [vmem:[#allocation2 + $0x828] sm:$0xf]  ;;  %v10163_v5 = vld [vmem:[#allocation2 + $0x164] sm:$0xf] }
  0xec   :  { %2758 = vmatpush.bf16.msrb.mxu1 %v7564_v35  ;;  %2710 = vmatmul.bf16.vlgmr.msra.gmra.mxu2 %v11287_v37  ;;  %v7928_v35 = vor.u32 %v10320_v23, %v7927_v22  ;;  %v11334_v12 = vadd.f32 %v11326_v55, %v2432_v53  ;;  %v10180_v22 = vld [vmem:[#allocation2 + $0x1e8] sm:$0xf0]  ;;  %v7591_v55 = vld [vmem:[#allocation2 + $0x390] sm:$0xf]  ;;  %v10226_v53 = vld [vmem:[#allocation2 + $0x35c] sm:$0xf] }
  0xed   :  { %2772 = vmatpush.bf16.msrb.mxu2 %v7788_v36  ;;  %v7199_v36 = vld [vmem:[#allocation2 + $0x80] sm:$0xf]  ;;  %v2420_v57 = vadd.f32 %v2419_v46, %v2406_v41  ;;  %v10292_v41 = vld [vmem:[#allocation2 + $0x568] sm:$0xf0]  ;;  %v10170_v46 = vld [vmem:[#allocation2 + $0x19c] sm:$0xf] }
  0xee   :  { %2745 = vmatpush.bf16.msra.mxu3 %v7312_v40  ;;  %2724 = vmatmul.bf16.vlgmr.msrb.gmra.mxu0 %v11289_v42  ;;  %v7899_v40 = vld [vmem:[#allocation2 + $0x5f8] sm:$0xf]  ;;  %v7537_v9 = vld [vmem:[#allocation2 + $0x33c] sm:$0xf0] }
  0xef   :  { %2786 = vmatpush.bf16.msra.mxu0 %v8012_v47  ;;  %v7200_v47 = vor.u32 %v10138_v38, %v7199_v36  ;;  %v8487_v38 = vld [vmem:[#allocation2 + $0xa90] sm:$0xf]  ;;  %v11343_v49 = vpop.f32.mrf.mxu2 }
  0xf0   :  { %2759 = vmatpush.bf16.msrb.mxu1 %v7536_v58  ;;  %v2433_v58 = vpop.f32.mrf.mxu1  ;;  %v8488_v52 = vor.u32 %v10460_v39, %v8487_v38  ;;  %v8123_v39 = vld [vmem:[#allocation2 + $0x7b8] sm:$0xf] }
  0xf1   :  { %2773 = vmatpush.bf16.msrb.mxu2 %v7760_v59  ;;  %v7900_v59 = vor.u32 %v10313_v34, %v7899_v40  ;;  %v2434_v1 = vadd.f32 %v2433_v58, %v2420_v57  ;;  %v7815_v34 = vld [vmem:[#allocation2 + $0x550] sm:$0xf]  ;;  %v7565_v57 = vld [vmem:[#allocation2 + $0x374] sm:$0xf0] }
  0xf2   :  { %2746 = vmatpush.bf16.msra.mxu3 %v7284_v61  ;;  %v10131_v61 = vld [vmem:[#allocation2 + $0x60] sm:$0xf0] }
  0xf3   :  { %2787 = vmatpush.bf16.msra.mxu0 %v7984_v0  ;;  %v11331_v0 = vpop.eup %10879  ;;  %v11336_v14 = vadd.f32 %v2447_v51, %v2434_v1  ;;  %v10446_v51 = vld [vmem:[#allocation2 + $0xa38] sm:$0xf0]  ;;  %v10383_v1 = vld [vmem:[#allocation2 + $0x840] sm:$0xf0] }
  0xf4   :  { %2760 = vmatpush.bf16.msrb.mxu1 %v7508_v7  ;;  %v10243_v7 = vld [vmem:[#allocation2 + $0x3e0] sm:$0xf0]  ;;  %v3093_v19 = vmul.f32 16.0, %v11331_v0  ;;  %vm3097_vm1 = vweird.f32 %v11331_v0 }
  0xf5   :  { %2774 = vmatpush.bf16.msrb.mxu2 %v7732_v8  ;;  %v7172_v8 = vor.u32 %v10131_v61, %v7171_v60  ;;  %v3040_v23 = vadd.f32 %v11336_v14, %v11334_v12  ;;  %v7816_v60 = vor.u32 %v10292_v41, %v7815_v34  ;;  %v8431_v61 = vld [vmem:[#allocation2 + $0xa20] sm:$0xf]  ;;  %v10149_v41 = vld [vmem:[#allocation2 + $0xf4] sm:$0xf] }
  0xf6   :  { %2747 = vmatpush.bf16.msra.mxu3 %v7256_v11  ;;  %v8235_v11 = vld [vmem:[#allocation2 + $0x898] sm:$0xf]  ;;  %v3094_v40 = vsub.f32 1.0, %v3093_v19  ;;  %v8151_v19 = vld [vmem:[#allocation2 + $0x7f0] sm:$0xf] }
  0xf7   :  { %2788 = vmatpush.bf16.msra.mxu0 %v7956_v18  ;;  %8500 = vmatmul.msk.bf16.vlgmr.msra.gmra.mxu1 %vm2348_vm0, %v11271_v50  ;;  %v10299_v18 = vld [vmem:[#allocation2 + $0x5a0] sm:$0xf0]  ;;  %v3041_v32 = vrot.slane %v3040_v23, 4  ;;  %v8236_v33 = vor.u32 %v10397_v16, %v8235_v11  ;;  %v8180_v11 = vor.u32 %v10383_v1, %v8179_v63  ;;  %v7453_v63 = vld [vmem:[#allocation2 + $0x294] sm:$0xf0] }
  0xf8   :  { %2761 = vmatpush.bf16.msrb.mxu1 %v7480_v25  ;;  %v7620_v25 = vor.u32 %v10243_v7, %v7619_v6  ;;  %v7844_v36 = vor.u32 %v10299_v18, %v7843_v17  ;;  %v3095_v56 = vmul.f32 %v11331_v0, %v3094_v40  ;;  %v7313_v6 = vld [vmem:[#allocation2 + $0x17c] sm:$0xf0]  ;;  %v8432_v7 = vor.u32 %v10446_v51, %v8431_v61  ;;  %v10439_v16 = vld [vmem:[#allocation2 + $0xa00] sm:$0xf0]  ;;  %v10369_v40 = vld [vmem:[#allocation2 + $0x7d0] sm:$0xf0] }
  0xf9   :  { %2775 = vmatpush.bf16.msrb.mxu2 %v7704_v26  ;;  %v10236_v26 = vld [vmem:[#allocation2 + $0x3a8] sm:$0xf0]  ;;  %v7316_v18 = vor.u32 %v10163_v5, %v7313_v6  ;;  %v10142_v61 = vld [vmem:[#allocation2 + $0xbc] sm:$0xf]  ;;  %v7229_v51 = vld [vmem:[#allocation2 + $0xd4] sm:$0xf0] }
  0xfa   :  { %2748 = vmatpush.bf16.msra.mxu3 %v7228_v29  ;;  %v10453_v29 = vld [vmem:[#allocation2 + $0xa70] sm:$0xf0]  ;;  %v7592_v45 = vor.u32 %v10236_v26, %v7591_v55  ;;  %v3096_v17 = vadd.f32 %v11331_v0, %v3095_v56  ;;  %v10212_v26 = vld [vmem:[#allocation2 + $0x2ec] sm:$0xf]  ;;  %v8319_v1 = vld [vmem:[#allocation2 + $0x940] sm:$0xf] }
  0xfb   :  { %2789 = vmatpush.bf16.msra.mxu0 %v7928_v35  ;;  %v11341_v35 = vpop.f32.mrf.mxu3  ;;  %v8460_v48 = vor.u32 %v10453_v29, %v8459_v27  ;;  %v7509_v27 = vld [vmem:[#allocation2 + $0x304] sm:$0xf0] }
  0xfc   :  { %2762 = vmatpush.bf16.msrb.mxu1 %v7452_v43  ;;  %v3042_v43 = vadd.f32 %v3041_v32, %v3040_v23  ;;  %v11357_v32 = vsel %vm3097_vm1, %v11331_v0, %v3096_v17  ;;  %v7512_v34 = vor.u32 %v10212_v26, %v7509_v27  ;;  %v8347_v0 = vld [vmem:[#allocation2 + $0x978] sm:$0xf]  ;;  %v2474_v5 = vadd.f32 %v11343_v49, %v11341_v35  ;;  %v7201_v17 = vld [vmem:[#allocation2 + $0x9c] sm:$0xf0]  ;;  %v10191_v35 = vld [vmem:[#allocation2 + $0x244] sm:$0xf] }
  0xfd   :  { %2776 = vmatpush.bf16.msrb.mxu2 %v7676_v44  ;;  %v7368_v44 = vor.u32 %v10180_v22, %v7367_v21  ;;  %v10376_v21 = vld [vmem:[#allocation2 + $0x808] sm:$0xf0]  ;;  %v7425_v49 = vld [vmem:[#allocation2 + $0x25c] sm:$0xf0]  ;;  %v10411_v26 = vld [vmem:[#allocation2 + $0x920] sm:$0xf0] }
  0xfe   :  { %2749 = vmatpush.bf16.msra.mxu3 %v7200_v47  ;;  %v7341_v47 = vld [vmem:[#allocation2 + $0x1b4] sm:$0xf0]  ;;  %v3043_v58 = vrot.slane %v3042_v43, 2  ;;  %v8152_v29 = vor.u32 %v10376_v21, %v8151_v19  ;;  %vm3082_vm1 = vcmask 261120  }
  0xff   :  { %2790 = vmatpush.bf16.msra.mxu0 %v7900_v59  ;;  %v8208_v59 = vor.u32 %v10390_v31, %v8207_v30  ;;  %v7344_v62 = vor.u32 %v10170_v46, %v7341_v47  ;;  %v8375_v30 = vld [vmem:[#allocation2 + $0x9b0] sm:$0xf]  ;;  %v10432_v31 = vld [vmem:[#allocation2 + $0x9c8] sm:$0xf0] }
 0x100   :  { %2763 = vmatpush.bf16.msrb.mxu1 %v7424_v3  ;;  %v3044_v3 = vadd.f32 %v3043_v58, %v3042_v43  ;;  %v7257_v43 = vld [vmem:[#allocation2 + $0x10c] sm:$0xf0]  ;;  %v8095_v58 = vld [vmem:[#allocation2 + $0x780] sm:$0xf] }
 0x101   :  { %2777 = vmatpush.bf16.msrb.mxu2 %v7648_v4  ;;  %v7568_v4 = vor.u32 %v10226_v53, %v7565_v57  ;;  %v7481_v46 = vld [vmem:[#allocation2 + $0x2cc] sm:$0xf0]  ;;  %v7260_v57 = vor.u32 %v10149_v41, %v7257_v43  ;;  %v7397_v41 = vld [vmem:[#allocation2 + $0x224] sm:$0xf0] }
 0x102   :  { %2750 = vmatpush.bf16.msra.mxu3 %v7172_v8  ;;  %v10219_v8 = vld [vmem:[#allocation2 + $0x324] sm:$0xf]  ;;  %v3045_v10 = vrot.slane %v3044_v3, 1 }
 0x103   :  { %2791 = vmatpush.bf16.msra.mxu0 %v7872_v15  ;;  %v8403_v15 = vld [vmem:[#allocation2 + $0x9e8] sm:$0xf]  ;;  %v11349_v22 = vpop.f32.mrf.mxu3  ;;  %v7540_v23 = vor.u32 %v10219_v8, %v7537_v9  ;;  %v10418_v8 = vld [vmem:[#allocation2 + $0x958] sm:$0xf0] }
 0x104   :  { %2764 = vmatpush.bf16.msrb.mxu1 %v7396_v24  ;;  %v10156_v24 = vld [vmem:[#allocation2 + $0x12c] sm:$0xf]  ;;  %v8404_v55 = vor.u32 %v10439_v16, %v8403_v15  ;;  %v2501_v53 = vpop.f32.mrf.mxu1  ;;  %v8067_v9 = vld [vmem:[#allocation2 + $0x748] sm:$0xf]  ;;  %v7232_v15 = vor.u32 %v10142_v61, %v7229_v51  ;;  %v7761_v61 = vld [vmem:[#allocation2 + $0x4fc] sm:$0xf0] }
 0x105   :  { %2778 = vmatpush.bf16.msrb.mxu2 %v7620_v25  ;;  %v7285_v25 = vld [vmem:[#allocation2 + $0x144] sm:$0xf0] }
 0x106   :  { %2751 = vmatpush.bf16.msra.mxu3 %v7144_v28  ;;  %v3046_v28 = vadd.f32 %v3045_v10, %v3044_v3  ;;  %v7288_v38 = vor.u32 %v10156_v24, %v7285_v25  ;;  %v10355_v10 = vld [vmem:[#allocation2 + $0x760] sm:$0xf0] }
 0x107   :  { %2792 = vmatpush.bf16.msra.mxu0 %v7844_v36  ;;  %v2475_v36 = vpop.f32.mrf.mxu2  ;;  %v8068_v19 = vor.u32 %v10355_v10, %v8067_v9 }
 0x108   :  { %2765 = vmatpush.bf16.msrb.mxu1 %v7368_v44  ;;  %v8376_v44 = vor.u32 %v10432_v31, %v8375_v30  ;;  %v3099_v47 = vmul.f32 %v11357_v32, %v3046_v28  ;;  %v2476_v25 = vadd.f32 %v2475_v36, %v11349_v22  ;;  %v8039_v28 = vld [vmem:[#allocation2 + $0x710] sm:$0xf]  ;;  %v10282_v30 = vld [vmem:[#allocation2 + $0x51c] sm:$0xf]  ;;  %v10184_v36 = vld [vmem:[#allocation2 + $0x20c] sm:$0xf] }
 0x109   :  { %2779 = vmatpush.bf16.msrb.mxu2 %v7592_v45  ;;  %2752 = vmatmul.bf16.vlgmr.msra.gmra.mxu3 %v11243_v2  ;;  %v10205_v45 = vld [vmem:[#allocation2 + $0x2b4] sm:$0xf] }
 0x10a   :  { %2800 = vmatpush.bf16.msrb.mxu3 %v8236_v33  ;;  %v2487_v33 = vpop.f32.mrf.mxu0  ;;  %v11361_v3 = vsub.f32 %v11334_v12, %v3099_v47  ;;  %v10135_v12 = vld [vmem:[#allocation2 + $0x84] sm:$0xf] }
 0x10b   :  { %2793 = vmatpush.bf16.msra.mxu0 %v7816_v60  ;;  %2766 = vmatmul.bf16.vlgmr.msrb.gmra.mxu1 %v11256_v13  ;;  %v7484_v60 = vor.u32 %v10205_v45, %v7481_v46  ;;  %v2488_v24 = vadd.f32 %v2487_v33, %v2474_v5  ;;  %v7204_v27 = vor.u32 %v10135_v12, %v7201_v17  ;;  %v8263_v46 = vld [vmem:[#allocation2 + $0x8d0] sm:$0xf]  ;;  %v8461_v12 = vld [vmem:[#allocation2 + $0xa74] sm:$0xf0] }
 0x10c   :  { %2814 = vmatpush.bf16.msra.mxu1 %v8460_v48  ;;  %2780 = vmatmul.bf16.vlgmr.msrb.gmra.mxu2 %v11235_v54  ;;  %v8124_v48 = vor.u32 %v10369_v40, %v8123_v39  ;;  %v11368_v6 = vpop.f32.mrf.mxu3  ;;  %v3120_v21 = vmul.f32 %v11361_v3, %v11361_v3  ;;  %v7789_v39 = vld [vmem:[#allocation2 + $0x534] sm:$0xf0]  ;;  %v10128_v40 = vld [vmem:[#allocation2 + $0x4c] sm:$0xf]  ;;  %v2503_v33 = vpop.f32.mrf.mxu1  ;;  %v7369_v5 = vld [vmem:[#allocation2 + $0x1ec] sm:$0xf0] }
 0x10d   :  { %2835 = vmatpush.bf16.msra.mxu2 %v8488_v52  ;;  %v10425_v52 = vld [vmem:[#allocation2 + $0x990] sm:$0xf0] }
 0x10e   :  { %2801 = vmatpush.bf16.msrb.mxu3 %v8208_v59  ;;  %2794 = vmatmul.bf16.vlgmr.msra.gmra.mxu0 %v11261_v20  ;;  %v10362_v59 = vld [vmem:[#allocation2 + $0x798] sm:$0xf0]  ;;  %v8348_v56 = vor.u32 %v10425_v52, %v8347_v0 }
 0x10f   :  { %2842 = vmatpush.bf16.msrb.mxu0 %v7344_v62  ;;  %v10198_v62 = vld [vmem:[#allocation2 + $0x27c] sm:$0xf] }
 0x110   :  { %2815 = vmatpush.bf16.msra.mxu1 %v8432_v7  ;;  %v8096_v7 = vor.u32 %v10362_v59, %v8095_v58  ;;  %v7456_v16 = vor.u32 %v10198_v62, %v7453_v63  ;;  %v8013_v59 = vld [vmem:[#allocation2 + $0x6f4] sm:$0xf0]  ;;  %v10121_v62 = vld [vmem:[#allocation2 + $0x14] sm:$0xf]  ;;  %v7145_v63 = vld [vmem:[#allocation2 + $0x2c] sm:$0xf0] }
 0x111   :  { %2856 = vmatpush.bf16.msrb.mxu2 %v7568_v4  ;;  %v11364_v4 = vsub.f32 %v11336_v14, %v3099_v47  ;;  %v11370_v14 = vpop.f32.mrf.mxu2  ;;  %v10404_v47 = vld [vmem:[#allocation2 + $0x8e8] sm:$0xf0] }
 0x112   :  { %2802 = vmatpush.bf16.msrb.mxu3 %v8180_v11  ;;  %v2489_v11 = vpop.f32.mrf.mxu0 }
 0x113   :  { %2843 = vmatpush.bf16.msrb.mxu0 %v7316_v18  ;;  %v8320_v18 = vor.u32 %v10418_v8, %v8319_v1  ;;  %v2490_v31 = vadd.f32 %v2489_v11, %v2476_v25  ;;  %v10177_v1 = vld [vmem:[#allocation2 + $0x1d4] sm:$0xf]  ;;  %v8237_v8 = vld [vmem:[#allocation2 + $0x8b4] sm:$0xf0]  ;;  %v7733_v25 = vld [vmem:[#allocation2 + $0x4c4] sm:$0xf0] }
 0x114   :  { %2816 = vmatpush.bf16.msra.mxu1 %v8404_v55  ;;  %v8291_v55 = vld [vmem:[#allocation2 + $0x908] sm:$0xf]  ;;  %v2517_v0 = vpop.f32.mrf.mxu3 }
 0x115   :  { %2857 = vmatpush.bf16.msrb.mxu2 %v7540_v23  ;;  %v3127_v23 = vmul.f32 %v11364_v4, %v11364_v4  ;;  %v8292_v22 = vor.u32 %v10411_v26, %v8291_v55  ;;  %v2504_v51 = vadd.f32 %v2503_v33, %v2490_v31  ;;  %v10387_v55 = vld [vmem:[#allocation2 + $0x864] sm:$0xf]  ;;  %v8209_v26 = vld [vmem:[#allocation2 + $0x87c] sm:$0xf0]  ;;  %v7957_v33 = vld [vmem:[#allocation2 + $0x684] sm:$0xf0] }
 0x116   :  { %2803 = vmatpush.bf16.msrb.mxu3 %v8152_v29  ;;  %v10348_v29 = vld [vmem:[#allocation2 + $0x728] sm:$0xf0]  ;;  %v10443_v31 = vld [vmem:[#allocation2 + $0xa24] sm:$0xf] }
 0x117   :  { %2844 = vmatpush.bf16.msrb.mxu0 %v7288_v38  ;;  %v7428_v38 = vor.u32 %v10191_v35, %v7425_v49  ;;  %v3134_v43 = vadd.f32 %v3127_v23, %v3120_v21  ;;  %v8040_v45 = vor.u32 %v10348_v29, %v8039_v28  ;;  %v2518_v11 = vadd.f32 %v2517_v0, %v2504_v51  ;;  %v10331_v35 = vld [vmem:[#allocation2 + $0x6a4] sm:$0xf]  ;;  %v7985_v49 = vld [vmem:[#allocation2 + $0x6bc] sm:$0xf0] }
 0x118   :  { %2817 = vmatpush.bf16.msra.mxu1 %v8376_v44  ;;  %v2502_v44 = vadd.f32 %v2501_v53, %v2488_v24  ;;  %v8264_v53 = vor.u32 %v10404_v47, %v8263_v46  ;;  %v7372_v21 = vor.u32 %v10177_v1, %v7369_v5  ;;  %v10268_v24 = vld [vmem:[#allocation2 + $0x4ac] sm:$0xf]  ;;  %v8181_v46 = vld [vmem:[#allocation2 + $0x844] sm:$0xf0]  ;;  %v10373_v1 = vld [vmem:[#allocation2 + $0x7f4] sm:$0xf] }
 0x119   :  { %2858 = vmatpush.bf16.msrb.mxu2 %v7512_v34  ;;  %v7173_v34 = vld [vmem:[#allocation2 + $0x64] sm:$0xf0]  ;;  %v3135_v9 = vrot.slane %v3134_v43, 4  ;;  %v2531_v17 = vpop.f32.mrf.mxu2 }
 0x11a   :  { %2804 = vmatpush.bf16.msrb.mxu3 %v8124_v48  ;;  %v10338_v48 = vld [vmem:[#allocation2 + $0x6dc] sm:$0xf]  ;;  %v2543_v52 = vpop.f32.mrf.mxu0  ;;  %v7176_v58 = vor.u32 %v10128_v40, %v7173_v34  ;;  %v2516_v10 = vadd.f32 %v11368_v6, %v2502_v44  ;;  %v2532_v29 = vadd.f32 %v2531_v17, %v2518_v11  ;;  %v7736_v40 = vor.u32 %v10268_v24, %v7733_v25  ;;  %v10324_v34 = vld [vmem:[#allocation2 + $0x66c] sm:$0xf] }
 0x11b   :  { %2845 = vmatpush.bf16.msrb.mxu0 %v7260_v57  ;;  %v7792_v57 = vor.u32 %v10282_v30, %v7789_v39  ;;  %v7988_v30 = vor.u32 %v10331_v35, %v7985_v49  ;;  %v7960_v0 = vor.u32 %v10324_v34, %v7957_v33  ;;  %v10366_v49 = vld [vmem:[#allocation2 + $0x7bc] sm:$0xf]  ;;  %v8097_v34 = vld [vmem:[#allocation2 + $0x79c] sm:$0xf0] }
 0x11c   :  { %2818 = vmatpush.bf16.msra.mxu1 %v8348_v56  ;;  %8501 = vmatmul.msk.bf16.vlgmr.msra.gmra.mxu2 %vm2348_vm0, %v11271_v50  ;;  %v7400_v56 = vor.u32 %v10184_v36, %v7397_v41  ;;  %v2530_v28 = vadd.f32 %v11370_v14, %v2516_v10  ;;  %v8212_v41 = vor.u32 %v10387_v55, %v8209_v26  ;;  %v7705_v14 = vld [vmem:[#allocation2 + $0x48c] sm:$0xf0]  ;;  %v8349_v55 = vld [vmem:[#allocation2 + $0x994] sm:$0xf0] }
 0x11d   :  { %2859 = vmatpush.bf16.msrb.mxu2 %v7484_v60  ;;  %v10275_v60 = vld [vmem:[#allocation2 + $0x4e4] sm:$0xf]  ;;  %v8377_v10 = vld [vmem:[#allocation2 + $0x9cc] sm:$0xf0] }
 0x11e   :  { %2805 = vmatpush.bf16.msrb.mxu3 %v8096_v7  ;;  %v10394_v7 = vld [vmem:[#allocation2 + $0x89c] sm:$0xf] }
 0x11f   :  { %2846 = vmatpush.bf16.msrb.mxu0 %v7232_v15  ;;  %v8016_v15 = vor.u32 %v10338_v48, %v8013_v59  ;;  %v8240_v23 = vor.u32 %v10394_v7, %v8237_v8  ;;  %v10317_v59 = vld [vmem:[#allocation2 + $0x634] sm:$0xf] }
 0x120   :  { %2819 = vmatpush.bf16.msra.mxu1 %v8320_v18  ;;  %v7764_v18 = vor.u32 %v10275_v60, %v7761_v61  ;;  %v7929_v60 = vld [vmem:[#allocation2 + $0x64c] sm:$0xf0] }
 0x121   :  { %2860 = vmatpush.bf16.msrb.mxu2 %v7456_v16  ;;  %v10450_v16 = vld [vmem:[#allocation2 + $0xa5c] sm:$0xf]  ;;  %v7932_v8 = vor.u32 %v10317_v59, %v7929_v60  ;;  %v7593_v59 = vld [vmem:[#allocation2 + $0x3ac] sm:$0xf0]  ;;  %v10352_v60 = vld [vmem:[#allocation2 + $0x74c] sm:$0xf] }
 0x122   :  { %2806 = vmatpush.bf16.msrb.mxu3 %v8068_v19  ;;  %v7148_v19 = vor.u32 %v10121_v62, %v7145_v63  ;;  %v8464_v6 = vor.u32 %v10450_v16, %v8461_v12  ;;  %v2545_v39 = vpop.f32.mrf.mxu0  ;;  %v7677_v62 = vld [vmem:[#allocation2 + $0x454] sm:$0xf0] }
 0x123   :  { %2847 = vmatpush.bf16.msrb.mxu0 %v7204_v27  ;;  %v3136_v27 = vadd.f32 %v3135_v9, %v3134_v43  ;;  %v11384_v36 = vadd.f32 %v2545_v39, %v2532_v29  ;;  %v10261_v43 = vld [vmem:[#allocation2 + $0x474] sm:$0xf]  ;;  %v7901_v16 = vld [vmem:[#allocation2 + $0x614] sm:$0xf0] }
 0x124   :  { %2820 = vmatpush.bf16.msra.mxu1 %v8292_v22  ;;  %v11382_v22 = vadd.f32 %v2543_v52, %v2530_v28  ;;  %v10436_v52 = vld [vmem:[#allocation2 + $0x9ec] sm:$0xf]  ;;  %v10429_v9 = vld [vmem:[#allocation2 + $0x9b4] sm:$0xf]  ;;  %v7873_v28 = vld [vmem:[#allocation2 + $0x5dc] sm:$0xf0] }
 0x125   :  { %2861 = vmatpush.bf16.msrb.mxu2 %v7428_v38  ;;  %v8433_v38 = vld [vmem:[#allocation2 + $0xa3c] sm:$0xf0]  ;;  %v3137_v47 = vrot.slane %v3136_v27, 2  ;;  %v8380_v35 = vor.u32 %v10429_v9, %v8377_v10  ;;  %v10289_v9 = vld [vmem:[#allocation2 + $0x554] sm:$0xf] }
 0x126   :  { %2807 = vmatpush.bf16.msrb.mxu3 %v8040_v45  ;;  %v8436_v44 = vor.u32 %v10443_v31, %v8433_v38  ;;  %v10380_v45 = vld [vmem:[#allocation2 + $0x82c] sm:$0xf]  ;;  %v3047_v48 = vadd.f32 %v11384_v36, %v11382_v22  ;;  %v7621_v38 = vld [vmem:[#allocation2 + $0x3e4] sm:$0xf0]  ;;  %v7817_v10 = vld [vmem:[#allocation2 + $0x56c] sm:$0xf0] }
 0x127   :  { %2848 = vmatpush.bf16.msrb.mxu0 %v7176_v58  ;;  %v7708_v58 = vor.u32 %v10261_v43, %v7705_v14  ;;  %v8184_v51 = vor.u32 %v10380_v45, %v8181_v46  ;;  %v3138_v5 = vadd.f32 %v3137_v47, %v3136_v27  ;;  %v10303_v27 = vld [vmem:[#allocation2 + $0x5c4] sm:$0xf]  ;;  %v10240_v31 = vld [vmem:[#allocation2 + $0x3cc] sm:$0xf]  ;;  %v11391_v43 = vpop.f32.mrf.mxu1  ;;  %v8321_v46 = vld [vmem:[#allocation2 + $0x95c] sm:$0xf0] }
 0x128   :  { %2821 = vmatpush.bf16.msra.mxu1 %v8264_v53  ;;  %v3048_v61 = vrot.slane %v3047_v48, 4  ;;  %v8153_v53 = vld [vmem:[#allocation2 + $0x80c] sm:$0xf0]  ;;  %v7876_v14 = vor.u32 %v10303_v27, %v7873_v28  ;;  %v10415_v45 = vld [vmem:[#allocation2 + $0x944] sm:$0xf]  ;;  %v7624_v47 = vor.u32 %v10240_v31, %v7621_v38  ;;  %v7820_v27 = vor.u32 %v10289_v9, %v7817_v10 }
 0x129   :  { %2862 = vmatpush.bf16.msrb.mxu2 %v7400_v56  ;;  %2808 = vmatmul.bf16.vlgmr.msrb.gmra.mxu3 %v11287_v37  ;;  %v10254_v56 = vld [vmem:[#allocation2 + $0x43c] sm:$0xf]  ;;  %v8156_v17 = vor.u32 %v10373_v1, %v8153_v53 }
 0x12a   :  { %2870 = vmatpush.bf16.msra.mxu3 %v7792_v57  ;;  %v8405_v57 = vld [vmem:[#allocation2 + $0xa04] sm:$0xf0]  ;;  %v3049_v7 = vadd.f32 %v3048_v61, %v3047_v48  ;;  %v7680_v11 = vor.u32 %v10254_v56, %v7677_v62  ;;  %v10296_v48 = vld [vmem:[#allocation2 + $0x58c] sm:$0xf]  ;;  %v10457_v62 = vld [vmem:[#allocation2 + $0xa94] sm:$0xf] }
 0x12b   :  { %2849 = vmatpush.bf16.msrb.mxu0 %v7148_v19  ;;  %2822 = vmatmul.bf16.vlgmr.msra.gmra.mxu1 %v11289_v42  ;;  %v8408_v63 = vor.u32 %v10436_v52, %v8405_v57  ;;  %v7649_v19 = vld [vmem:[#allocation2 + $0x41c] sm:$0xf0]  ;;  %v10233_v52 = vld [vmem:[#allocation2 + $0x394] sm:$0xf]  ;;  %v8069_v61 = vld [vmem:[#allocation2 + $0x764] sm:$0xf0] }
 0x12c   :  { %2884 = vmatpush.bf16.msrb.mxu1 %v8016_v15  ;;  %v10310_v15 = vld [vmem:[#allocation2 + $0x5fc] sm:$0xf]  ;;  %v3050_v12 = vrot.slane %v3049_v7, 2  ;;  %v10408_v56 = vld [vmem:[#allocation2 + $0x90c] sm:$0xf] }
 0x12d   :  { %2863 = vmatpush.bf16.msrb.mxu2 %v7372_v21  ;;  %v8125_v21 = vld [vmem:[#allocation2 + $0x7d4] sm:$0xf0]  ;;  %v7904_v25 = vor.u32 %v10310_v15, %v7901_v16  ;;  %v7347_v15 = vld [vmem:[#allocation2 + $0x1a0] sm:$0xf]  ;;  %v10174_v16 = vld [vmem:[#allocation2 + $0x1b8] sm:$0xf0] }
 0x12e   :  { %2871 = vmatpush.bf16.msra.mxu3 %v7764_v18  ;;  %2850 = vmatmul.bf16.vlgmr.msrb.gmra.mxu0 %v11243_v2  ;;  %v10247_v18 = vld [vmem:[#allocation2 + $0x404] sm:$0xf]  ;;  %v3051_v24 = vadd.f32 %v3050_v12, %v3049_v7  ;;  %v7571_v12 = vld [vmem:[#allocation2 + $0x360] sm:$0xf]  ;;  %v10286_v28 = vld [vmem:[#allocation2 + $0x538] sm:$0xf0] }
 0x12f   :  { %2898 = vmatpush.bf16.msra.mxu0 %v8240_v23  ;;  %v3139_v23 = vrot.slane %v3138_v5, 1  ;;  %v7652_v26 = vor.u32 %v10247_v18, %v7649_v19  ;;  %v8072_v18 = vor.u32 %v10352_v60, %v8069_v61  ;;  %v10230_v19 = vld [vmem:[#allocation2 + $0x378] sm:$0xf0] }
 0x130   :  { %2885 = vmatpush.bf16.msrb.mxu1 %v7988_v30  ;;  %2864 = vmatmul.bf16.vlgmr.msrb.gmra.mxu2 %v11256_v13  ;;  %v3052_v29 = vrot.slane %v3051_v24, 1  ;;  %v8128_v30 = vor.u32 %v10366_v49, %v8125_v21  ;;  %v8041_v49 = vld [vmem:[#allocation2 + $0x72c] sm:$0xf0]  ;;  %v7572_v31 = vor.u32 %v10230_v19, %v7571_v12  ;;  %v10342_v38 = vld [vmem:[#allocation2 + $0x6f8] sm:$0xf0]  ;;  %v11418_v12 = vpop.f32.mrf.mxu2 }
 0x131   :  { %2912 = vmatpush.bf16.msra.mxu2 %v8464_v6  ;;  %v10422_v6 = vld [vmem:[#allocation2 + $0x97c] sm:$0xf]  ;;  %v3140_v33 = vadd.f32 %v3139_v23, %v3138_v5  ;;  %v10401_v23 = vld [vmem:[#allocation2 + $0x8d4] sm:$0xf] }
 0x132   :  { %2872 = vmatpush.bf16.msra.mxu3 %v7736_v40  ;;  %v8352_v39 = vor.u32 %v10422_v6, %v8349_v55  ;;  %v10359_v40 = vld [vmem:[#allocation2 + $0x784] sm:$0xf]  ;;  %v10153_v19 = vld [vmem:[#allocation2 + $0x110] sm:$0xf0] }
 0x133   :  { %2899 = vmatpush.bf16.msra.mxu0 %v8212_v41  ;;  %v3053_v41 = vadd.f32 %v3052_v29, %v3051_v24  ;;  %v3185_v1 = vmul.f32 %v3140_v33, %v11357_v32  ;;  %v8265_v24 = vld [vmem:[#allocation2 + $0x8ec] sm:$0xf0]  ;;  %v8019_v29 = vld [vmem:[#allocation2 + $0x6e0] sm:$0xf]  ;;  %v11411_v33 = vpop.f32.mrf.mxu1 }
 0x134   :  { %2886 = vmatpush.bf16.msrb.mxu1 %v7960_v0  ;;  %v7845_v0 = vld [vmem:[#allocation2 + $0x5a4] sm:$0xf0] }
 0x135   :  { %2913 = vmatpush.bf16.msra.mxu2 %v8436_v44  ;;  %v11393_v44 = vpop.f32.mrf.mxu0  ;;  %v3100_v57 = vmul.f32 %v11357_v32, %v3053_v41  ;;  %v7848_v7 = vor.u32 %v10296_v48, %v7845_v0  ;;  %v11407_v6 = vadd.f32 1e-05, %v3185_v1  ;;  %v7515_v1 = vld [vmem:[#allocation2 + $0x2f0] sm:$0xf] }
 0x136   :  { %2873 = vmatpush.bf16.msra.mxu3 %v7708_v58  ;;  %v8100_v58 = vor.u32 %v10359_v40, %v8097_v34  ;;  %v10167_v40 = vld [vmem:[#allocation2 + $0x180] sm:$0xf0] }
 0x137   :  { %2900 = vmatpush.bf16.msra.mxu0 %v8184_v51  ;;  %v8324_v51 = vor.u32 %v10415_v45, %v8321_v46  ;;  %v11398_v53 = vsub.f32 %v11382_v22, %v3100_v57  ;;  %v11401_v5 = vsub.f32 %v11384_v36, %v3100_v57  ;;  %v7543_v45 = vld [vmem:[#allocation2 + $0x328] sm:$0xf]  ;;  %v10223_v46 = vld [vmem:[#allocation2 + $0x340] sm:$0xf0]  ;;  %10881 = vrsqrt.f32 %v11407_v6 }
 0x138   :  { %2887 = vmatpush.bf16.msrb.mxu1 %v7932_v8  ;;  %v8293_v8 = vld [vmem:[#allocation2 + $0x924] sm:$0xf0]  ;;  %v7544_v61 = vor.u32 %v10223_v46, %v7543_v45  ;;  %v7235_v45 = vld [vmem:[#allocation2 + $0xc0] sm:$0xf]  ;;  %vm3205_vm3 = vweird.f32 %v11407_v6 }
 0x139   :  { %2914 = vmatpush.bf16.msra.mxu2 %v8408_v63  ;;  %v8489_v63 = vld [vmem:[#allocation2 + $0xaac] sm:$0xf0]  ;;  %v3128_v22 = vmul.f32 %v11401_v5, %v11401_v5  ;;  %v8296_v21 = vor.u32 %v10408_v56, %v8293_v8  ;;  %v7767_v57 = vld [vmem:[#allocation2 + $0x4e8] sm:$0xf] }
 0x13a   :  { %2874 = vmatpush.bf16.msra.mxu3 %v7680_v11  ;;  %v7596_v11 = vor.u32 %v10233_v52, %v7593_v59  ;;  %v8492_v36 = vor.u32 %v10457_v62, %v8489_v63  ;;  %v8020_v52 = vor.u32 %v10342_v38, %v8019_v29  ;;  %v7991_v59 = vld [vmem:[#allocation2 + $0x6a8] sm:$0xf]  ;;  %v7291_v56 = vld [vmem:[#allocation2 + $0x130] sm:$0xf]  ;;  %v10160_v62 = vld [vmem:[#allocation2 + $0x148] sm:$0xf0] }
 0x13b   :  { %2901 = vmatpush.bf16.msra.mxu0 %v8156_v17  ;;  %v3121_v17 = vmul.f32 %v11398_v53, %v11398_v53 }
 0x13c   :  { %2888 = vmatpush.bf16.msrb.mxu1 %v7904_v25  ;;  %v7795_v25 = vld [vmem:[#allocation2 + $0x520] sm:$0xf] }
 0x13d   :  { %2915 = vmatpush.bf16.msra.mxu2 %v8380_v35  ;;  %v10345_v35 = vld [vmem:[#allocation2 + $0x714] sm:$0xf]  ;;  %v3141_v55 = vadd.f32 %v3128_v22, %v3121_v17  ;;  %v11413_v41 = vpop.f32.mrf.mxu0  ;;  %v7796_v48 = vor.u32 %v10286_v28, %v7795_v25  ;;  %v7292_v17 = vor.u32 %v10160_v62, %v7291_v56  ;;  %v7907_v62 = vld [vmem:[#allocation2 + $0x600] sm:$0xf] }
 0x13e   :  { %2875 = vmatpush.bf16.msra.mxu3 %v7652_v26  ;;  %v11409_v26 = vpop.f32.mrf.mxu3 }
 0x13f   :  { %2902 = vmatpush.bf16.msra.mxu0 %v8128_v30  ;;  %v7348_v30 = vor.u32 %v10174_v16, %v7347_v15  ;;  %v3142_v34 = vrot.slane %v3141_v55, 4  ;;  %v10272_v15 = vld [vmem:[#allocation2 + $0x4c8] sm:$0xf0]  ;;  %v7963_v16 = vld [vmem:[#allocation2 + $0x670] sm:$0xf]  ;;  %v2572_v38 = vadd.f32 %v11409_v26, %v11391_v43 }
 0x140   :  { %2889 = vmatpush.bf16.msrb.mxu1 %v7876_v14  ;;  %v8044_v14 = vor.u32 %v10345_v35, %v8041_v49 }
 0x141   :  { %2916 = vmatpush.bf16.msra.mxu2 %v8352_v39  ;;  %v7319_v39 = vld [vmem:[#allocation2 + $0x168] sm:$0xf]  ;;  %v3143_v0 = vadd.f32 %v3142_v34, %v3141_v55  ;;  %v11424_v55 = vpop.eup %10881  ;;  %v7935_v34 = vld [vmem:[#allocation2 + $0x638] sm:$0xf] }
 0x142   :  { %2876 = vmatpush.bf16.msra.mxu3 %v7624_v47  ;;  %v8268_v47 = vor.u32 %v10401_v23, %v8265_v24  ;;  %v7320_v60 = vor.u32 %v10167_v40, %v7319_v39  ;;  %v10209_v23 = vld [vmem:[#allocation2 + $0x2d0] sm:$0xf0]  ;;  %vm3206_vm2 = vweird.f32 %v11424_v55 }
 0x143   :  { %2903 = vmatpush.bf16.msra.mxu0 %v8100_v58  ;;  %v10279_v58 = vld [vmem:[#allocation2 + $0x500] sm:$0xf0]  ;;  %v3144_v63 = vrot.slane %v3143_v0, 2  ;;  %vm11473_vm4 = vmor %vm3205_vm3, %vm3206_vm2 }
 0x144   :  { %2890 = vmatpush.bf16.msrb.mxu1 %v7848_v7  ;;  %v10216_v7 = vld [vmem:[#allocation2 + $0x308] sm:$0xf0]  ;;  %v7768_v8 = vor.u32 %v10279_v58, %v7767_v57  ;;  %v11426_v28 = vpop.f32.mrf.mxu1 }
 0x145   :  { %2917 = vmatpush.bf16.msra.mxu2 %v8324_v51  ;;  %v10335_v51 = vld [vmem:[#allocation2 + $0x6c0] sm:$0xf0]  ;;  %v3145_v9 = vadd.f32 %v3144_v63, %v3143_v0  ;;  %v7516_v22 = vor.u32 %v10216_v7, %v7515_v1  ;;  %v11422_v24 = vpop.f32.mrf.mxu0  ;;  %v10202_v0 = vld [vmem:[#allocation2 + $0x298] sm:$0xf0]  ;;  %v7207_v1 = vld [vmem:[#allocation2 + $0x88] sm:$0xf] }
 0x146   :  { %2877 = vmatpush.bf16.msra.mxu3 %v7596_v11  ;;  %v7992_v10 = vor.u32 %v10335_v51, %v7991_v59  ;;  %v7739_v11 = vld [vmem:[#allocation2 + $0x4b0] sm:$0xf]  ;;  %v2573_v49 = vpop.f32.mrf.mxu3  ;;  %v7683_v59 = vld [vmem:[#allocation2 + $0x440] sm:$0xf]  ;;  %v10314_v63 = vld [vmem:[#allocation2 + $0x618] sm:$0xf0] }
 0x147   :  { %2904 = vmatpush.bf16.msra.mxu0 %v8072_v18  ;;  %v10328_v18 = vld [vmem:[#allocation2 + $0x688] sm:$0xf0]  ;;  %v3146_v35 = vrot.slane %v3145_v9, 1  ;;  %v7740_v25 = vor.u32 %v10272_v15, %v7739_v11  ;;  %v2574_v57 = vadd.f32 %v2573_v49, %v11411_v33  ;;  %v10139_v7 = vld [vmem:[#allocation2 + $0xa0] sm:$0xf0] }
 0x148   :  { %2891 = vmatpush.bf16.msrb.mxu1 %v7820_v27  ;;  %v7964_v29 = vor.u32 %v10328_v18, %v7963_v16  ;;  %v7908_v16 = vor.u32 %v10314_v63, %v7907_v62  ;;  %v7879_v18 = vld [vmem:[#allocation2 + $0x5c8] sm:$0xf]  ;;  %v10398_v62 = vld [vmem:[#allocation2 + $0x8b8] sm:$0xf0]  ;;  %v8467_v63 = vld [vmem:[#allocation2 + $0xa60] sm:$0xf] }
 0x149   :  { %2918 = vmatpush.bf16.msra.mxu2 %v8296_v21  ;;  %2878 = vmatmul.bf16.vlgmr.msra.gmra.mxu3 %v11235_v54  ;;  %v7487_v21 = vld [vmem:[#allocation2 + $0x2b8] sm:$0xf]  ;;  %v3147_v27 = vadd.f32 %v3146_v35, %v3145_v9  ;;  %v10195_v9 = vld [vmem:[#allocation2 + $0x260] sm:$0xf0]  ;;  %v2588_v11 = vadd.f32 %v11413_v41, %v2574_v57  ;;  %v7208_v35 = vor.u32 %v10139_v7, %v7207_v1  ;;  %v7179_v41 = vld [vmem:[#allocation2 + $0x50] sm:$0xf] }
 0x14a   :  { %2933 = vmatpush.bf16.msrb.mxu3 %v8492_v36  ;;  %v7263_v36 = vld [vmem:[#allocation2 + $0xf8] sm:$0xf]  ;;  %v7488_v40 = vor.u32 %v10209_v23, %v7487_v21  ;;  %v10307_v21 = vld [vmem:[#allocation2 + $0x5e0] sm:$0xf0]  ;;  %v10132_v23 = vld [vmem:[#allocation2 + $0x68] sm:$0xf0] }
 0x14b   :  { %2905 = vmatpush.bf16.msra.mxu0 %v8044_v14  ;;  %2892 = vmatmul.bf16.vlgmr.msrb.gmra.mxu1 %v11261_v20  ;;  %v7264_v39 = vor.u32 %v10153_v19, %v7263_v36  ;;  %v10321_v14 = vld [vmem:[#allocation2 + $0x650] sm:$0xf0]  ;;  %v3186_v46 = vmul.f32 %v3147_v27, %v11357_v32  ;;  %v7403_v27 = vld [vmem:[#allocation2 + $0x210] sm:$0xf]  ;;  %v7151_v57 = vld [vmem:[#allocation2 + $0x18] sm:$0xf] }
 0x14c   :  { %2940 = vmatpush.bf16.msra.mxu1 %v7348_v30  ;;  %v7711_v30 = vld [vmem:[#allocation2 + $0x478] sm:$0xf]  ;;  %v7936_v26 = vor.u32 %v10321_v14, %v7935_v34  ;;  %v7180_v34 = vor.u32 %v10132_v23, %v7179_v41  ;;  %v7627_v14 = vld [vmem:[#allocation2 + $0x3d0] sm:$0xf]  ;;  %v10454_v1 = vld [vmem:[#allocation2 + $0xa78] sm:$0xf0] }
 0x14d   :  { %2919 = vmatpush.bf16.msra.mxu2 %v8268_v47  ;;  %v10146_v47 = vld [vmem:[#allocation2 + $0xd8] sm:$0xf0]  ;;  %v11434_v43 = vadd.f32 1e-05, %v3186_v46  ;;  %v2643_v36 = vpop.f32.mrf.mxu0  ;;  %v7851_v46 = vld [vmem:[#allocation2 + $0x590] sm:$0xf] }
 0x14e   :  { %2954 = vmatpush.bf16.msra.mxu3 %v7572_v31  ;;  %2906 = vmatmul.bf16.vlgmr.msra.gmra.mxu0 %v11287_v37  ;;  %v10265_v31 = vld [vmem:[#allocation2 + $0x490] sm:$0xf0]  ;;  %v7236_v51 = vor.u32 %v10146_v47, %v7235_v45  ;;  %v2627_v33 = vpop.f32.mrf.mxu3  ;;  %v10244_v45 = vld [vmem:[#allocation2 + $0x3e8] sm:$0xf0]  ;;  %v8495_v41 = vld [vmem:[#allocation2 + $0xa98] sm:$0xf] }
 0x14f   :  { %2968 = vmatpush.bf16.msrb.mxu0 %v7796_v48  ;;  %v7459_v48 = vld [vmem:[#allocation2 + $0x280] sm:$0xf]  ;;  %v7712_v58 = vor.u32 %v10265_v31, %v7711_v30  ;;  %10883 = vrsqrt.f32 %v11434_v43  ;;  %v10461_v23 = vld [vmem:[#allocation2 + $0xab0] sm:$0xf0]  ;;  %vm3215_vm6 = vweird.f32 %v11434_v43 }
 0x150   :  { %2941 = vmatpush.bf16.msra.mxu1 %v7320_v60  ;;  %2920 = vmatmul.bf16.vlgmr.msra.gmra.mxu2 %v11289_v42  ;;  %v10258_v60 = vld [vmem:[#allocation2 + $0x458] sm:$0xf0]  ;;  %v7460_v56 = vor.u32 %v10202_v0, %v7459_v48 }
 0x151   :  { %2982 = vmatpush.bf16.msrb.mxu2 %v8020_v52  ;;  %v3200_v52 = vmul.f32 %v11424_v55, %v11407_v6  ;;  %v7684_v15 = vor.u32 %v10258_v60, %v7683_v59  ;;  %v7375_v59 = vld [vmem:[#allocation2 + $0x1d8] sm:$0xf]  ;;  %v10181_v60 = vld [vmem:[#allocation2 + $0x1f0] sm:$0xf0] }
 0x152   :  { %2955 = vmatpush.bf16.msra.mxu3 %v7544_v61  ;;  %v2586_v61 = vadd.f32 %v11393_v44, %v2572_v38  ;;  %v2601_v44 = vpop.f32.mrf.mxu2 }
 0x153   :  { %2969 = vmatpush.bf16.msrb.mxu0 %v7768_v8  ;;  %v7431_v8 = vld [vmem:[#allocation2 + $0x248] sm:$0xf]  ;;  %v2602_v31 = vadd.f32 %v2601_v44, %v2588_v11  ;;  %v7376_v44 = vor.u32 %v10181_v60, %v7375_v59  ;;  %v8411_v59 = vld [vmem:[#allocation2 + $0x9f0] sm:$0xf]  ;;  %v10440_v60 = vld [vmem:[#allocation2 + $0xa08] sm:$0xf0] }
 0x154   :  { %2942 = vmatpush.bf16.msra.mxu1 %v7292_v17  ;;  %v7655_v17 = vld [vmem:[#allocation2 + $0x408] sm:$0xf]  ;;  %v2600_v19 = vadd.f32 %v11418_v12, %v2586_v61  ;;  %v7432_v49 = vor.u32 %v10195_v9, %v7431_v8  ;;  %v7880_v12 = vor.u32 %v10307_v21, %v7879_v18  ;;  %v8243_v61 = vld [vmem:[#allocation2 + $0x8a0] sm:$0xf]  ;;  %v7599_v8 = vld [vmem:[#allocation2 + $0x398] sm:$0xf] }
 0x155   :  { %2983 = vmatpush.bf16.msrb.mxu2 %v7992_v10  ;;  %v3201_v10 = vmul.f32 %v11424_v55, %v3200_v52  ;;  %v10300_v52 = vld [vmem:[#allocation2 + $0x5a8] sm:$0xf0]  ;;  %v10237_v9 = vld [vmem:[#allocation2 + $0x3b0] sm:$0xf0]  ;;  %v8215_v21 = vld [vmem:[#allocation2 + $0x868] sm:$0xf] }
 0x156   :  { %2956 = vmatpush.bf16.msra.mxu3 %v7516_v22  ;;  %v10251_v22 = vld [vmem:[#allocation2 + $0x420] sm:$0xf0]  ;;  %v2614_v38 = vadd.f32 %v11426_v28, %v2600_v19  ;;  %v8244_v19 = vor.u32 %v10398_v62, %v8243_v61 }
 0x157   :  { %2970 = vmatpush.bf16.msrb.mxu0 %v7740_v25  ;;  %v2615_v25 = vpop.f32.mrf.mxu1  ;;  %v11443_v30 = vmul.f32 0.5, %v3201_v10  ;;  %v7823_v10 = vld [vmem:[#allocation2 + $0x558] sm:$0xf] }
 0x158   :  { %2943 = vmatpush.bf16.msra.mxu1 %v7264_v39  ;;  %v7656_v39 = vor.u32 %v10251_v22, %v7655_v17  ;;  %v2628_v47 = vadd.f32 %v2627_v33, %v2614_v38  ;;  %v2616_v48 = vadd.f32 %v2615_v25, %v2602_v31  ;;  %v7852_v33 = vor.u32 %v10300_v52, %v7851_v46  ;;  %v8702_v17 = vld [vmem:[#allocation8 + $0x188] sm:$0xf]  ;;  %v10514_v22 = vld [vmem:[#allocation8 + $0x1a0] sm:$0xf0]  ;;  %v10447_v31 = vld [vmem:[#allocation2 + $0xa40] sm:$0xf0] }
 0x159   :  { %2984 = vmatpush.bf16.msrb.mxu2 %v7964_v29  ;;  %8502 = vmatmul.msk.bf16.vlgmr.msrb.gmra.mxu3 %vm2348_vm0, %v11271_v50  ;;  %v10188_v29 = vld [vmem:[#allocation2 + $0x228] sm:$0xf0]  ;;  %v7600_v25 = vor.u32 %v10237_v9, %v7599_v8  ;;  %v8412_v9 = vor.u32 %v10440_v60, %v8411_v59  ;;  %v8590_v59 = vld [vmem:[#allocation8 + $0xa8] sm:$0xf] }
 0x15a   :  { %2957 = vmatpush.bf16.msra.mxu3 %v7488_v40  ;;  %v11446_v40 = vpop.eup %10883  ;;  %v7404_v0 = vor.u32 %v10188_v29, %v7403_v27  ;;  %v11451_v11 = vadd.f32 %v11422_v24, %v2628_v47  ;;  %v10391_v27 = vld [vmem:[#allocation2 + $0x880] sm:$0xf0]  ;;  %v8439_v29 = vld [vmem:[#allocation2 + $0xa28] sm:$0xf]  ;;  %v10570_v46 = vld [vmem:[#allocation8 + $0x360] sm:$0xf0] }
 0x15b   :  { %2971 = vmatpush.bf16.msrb.mxu0 %v7712_v58  ;;  %v10125_v58 = vld [vmem:[#allocation2 + $0x30] sm:$0xf0]  ;;  %v3210_v28 = vmul.f32 %v11446_v40, %v11434_v43  ;;  %v8674_v47 = vld [vmem:[#allocation8 + $0x150] sm:$0xf]  ;;  %v8440_v52 = vor.u32 %v10447_v31, %v8439_v29  ;;  %vm3216_vm5 = vweird.f32 %v11446_v40  ;;  %v8618_v31 = vld [vmem:[#allocation8 + $0xe0] sm:$0xf] }
 0x15c   :  { %2944 = vmatpush.bf16.msra.mxu1 %v7236_v51  ;;  %v7152_v7 = vor.u32 %v10125_v58, %v7151_v57  ;;  %v10507_v57 = vld [vmem:[#allocation8 + $0x168] sm:$0xf0]  ;;  %v8187_v58 = vld [vmem:[#allocation2 + $0x830] sm:$0xf]  ;;  %vm11495_vm7 = vmor %vm3215_vm6, %vm3216_vm5 }
 0x15d   :  { %2985 = vmatpush.bf16.msrb.mxu2 %v7936_v26  ;;  %v2629_v26 = vpop.f32.mrf.mxu3  ;;  %v3211_v18 = vmul.f32 %v11446_v40, %v3210_v28  ;;  %v10486_v60 = vld [vmem:[#allocation8 + $0xc0] sm:$0xf0] }
 0x15e   :  { %2958 = vmatpush.bf16.msra.mxu3 %v7460_v56  ;;  %v2630_v51 = vadd.f32 %v2629_v26, %v2616_v48  ;;  %v7628_v56 = vor.u32 %v10244_v45, %v7627_v14  ;;  %v8703_v14 = vor.u32 %v10514_v22, %v8702_v17  ;;  %v8496_v45 = vor.u32 %v10461_v23, %v8495_v41  ;;  %v10384_v26 = vld [vmem:[#allocation2 + $0x848] sm:$0xf0]  ;;  %v8383_v17 = vld [vmem:[#allocation2 + $0x9b8] sm:$0xf]  ;;  %v10433_v22 = vld [vmem:[#allocation2 + $0x9d0] sm:$0xf0] }
 0x15f   :  { %2972 = vmatpush.bf16.msrb.mxu0 %v7684_v15  ;;  %v3212_v48 = vmul.f32 0.5, %v3211_v18  ;;  %v8188_v8 = vor.u32 %v10384_v26, %v8187_v58  ;;  %v8384_v29 = vor.u32 %v10433_v22, %v8383_v17  ;;  %v10549_v58 = vld [vmem:[#allocation8 + $0x2b8] sm:$0xf0]  ;;  %v10542_v17 = vld [vmem:[#allocation8 + $0x280] sm:$0xf0] }
 0x160   :  { %2945 = vmatpush.bf16.msra.mxu1 %v7208_v35  ;;  %v11453_v15 = vadd.f32 %v2643_v36, %v2630_v51  ;;  %v8468_v35 = vor.u32 %v10454_v1, %v8467_v63  ;;  %v11460_v36 = vpop.f32.mrf.mxu2  ;;  %v8898_v51 = vld [vmem:[#allocation8 + $0x310] sm:$0xf]  ;;  %v8675_v63 = vor.u32 %v10507_v57, %v8674_v47  ;;  %v10563_v1 = vld [vmem:[#allocation8 + $0x328] sm:$0xf0]  ;;  %v8842_v57 = vld [vmem:[#allocation8 + $0x2a0] sm:$0xf] }
 0x161   :  { %2986 = vmatpush.bf16.msrb.mxu2 %v7908_v16  ;;  %v10293_v16 = vld [vmem:[#allocation2 + $0x570] sm:$0xf0]  ;;  %v8562_v22 = vld [vmem:[#allocation8 + $0x70] sm:$0xf] }
 0x162   :  { %2959 = vmatpush.bf16.msra.mxu3 %v7432_v49  ;;  %v11456_v49 = vpop.f32.mrf.mxu0  ;;  %v3054_v24 = vadd.f32 %v11453_v15, %v11451_v11  ;;  %v7824_v38 = vor.u32 %v10293_v16, %v7823_v10  ;;  %v10500_v10 = vld [vmem:[#allocation8 + $0x130] sm:$0xf0]  ;;  %v10377_v16 = vld [vmem:[#allocation2 + $0x810] sm:$0xf0] }
 0x163   :  { %2973 = vmatpush.bf16.msrb.mxu0 %v7656_v39  ;;  %v8926_v39 = vld [vmem:[#allocation8 + $0x348] sm:$0xf]  ;;  %v10479_v18 = vld [vmem:[#allocation8 + $0x88] sm:$0xf0] }
 0x164   :  { %2946 = vmatpush.bf16.msra.mxu1 %v7180_v34  ;;  %v3055_v34 = vrot.slane %v3054_v24, 4  ;;  %v8927_v61 = vor.u32 %v10570_v46, %v8926_v39  ;;  %v11484_v6 = vpop.f32.mrf.mxu1 }
 0x165   :  { %2987 = vmatpush.bf16.msrb.mxu2 %v7880_v12  ;;  %v3203_v12 = vsub.f32 1.5, %v11443_v30  ;;  %v11463_v30 = vld [vmem:[#allocation5] sm:$0x7f] }
 0x166   :  { %2960 = vmatpush.bf16.msra.mxu3 %v7404_v0  ;;  %v8216_v0 = vor.u32 %v10391_v27, %v8215_v21  ;;  %v3056_v28 = vadd.f32 %v3055_v34, %v3054_v24  ;;  %v8870_v24 = vld [vmem:[#allocation8 + $0x2d8] sm:$0xf] }
 0x167   :  { %2974 = vmatpush.bf16.msrb.mxu0 %v7628_v56  ;;  %v3204_v56 = vmul.f32 %v11424_v55, %v3203_v12  ;;  %v10370_v12 = vld [vmem:[#allocation2 + $0x7d8] sm:$0xf0]  ;;  %v8355_v34 = vld [vmem:[#allocation2 + $0x980] sm:$0xf] }
 0x168   :  { %2947 = vmatpush.bf16.msra.mxu1 %v7152_v7  ;;  %v3057_v62 = vrot.slane %v3056_v28, 2  ;;  %v3213_v7 = vsub.f32 1.5, %v3212_v48  ;;  %v11486_v41 = vpop.f32.mrf.mxu2  ;;  %v3271_v48 = vperm.slane %v11463_v30, 1 }
 0x169   :  { %2988 = vmatpush.bf16.msrb.mxu2 %v7852_v33  ;;  %v8646_v33 = vld [vmem:[#allocation8 + $0x118] sm:$0xf] }
 0x16a   :  { %2961 = vmatpush.bf16.msra.mxu3 %v7376_v44  ;;  %v8159_v44 = vld [vmem:[#allocation2 + $0x7f8] sm:$0xf]  ;;  %v11478_v21 = vpop.f32.mrf.mxu0  ;;  %v8647_v23 = vor.u32 %v10500_v10, %v8646_v33  ;;  %v3214_v27 = vmul.f32 %v11446_v40, %v3213_v7 }
 0x16b   :  { %2975 = vmatpush.bf16.msrb.mxu0 %v7600_v25  ;;  %2948 = vmatmul.bf16.vlgmr.msra.gmra.mxu1 %v11243_v2  ;;  %v10556_v25 = vld [vmem:[#allocation8 + $0x2f0] sm:$0xf0]  ;;  %v8160_v2 = vor.u32 %v10377_v16, %v8159_v44  ;;  %v8814_v16 = vld [vmem:[#allocation8 + $0x268] sm:$0xf] }
 0x16c   :  { %2996 = vmatpush.bf16.msrb.mxu1 %v8244_v19  ;;  %v3270_v19 = vperm.slane %v11463_v30, 0  ;;  %v8871_v46 = vor.u32 %v10556_v25, %v8870_v24  ;;  %v3218_v43 = vsel %vm11495_vm7, %v11446_v40, %v3214_v27  ;;  %v2670_v40 = vadd.f32 %v11456_v49, %v11460_v36  ;;  %v2697_v7 = vpop.f32.mrf.mxu3  ;;  %v2685_v44 = vpop.f32.mrf.mxu1  ;;  %v10356_v24 = vld [vmem:[#allocation2 + $0x768] sm:$0xf0]  ;;  %v8299_v25 = vld [vmem:[#allocation2 + $0x910] sm:$0xf] }
 0x16d   :  { %2989 = vmatpush.bf16.msrb.mxu2 %v7824_v38  ;;  %2962 = vmatmul.bf16.vlgmr.msra.gmra.mxu3 %v11256_v13  ;;  %v3058_v13 = vadd.f32 %v3057_v62, %v3056_v28  ;;  %v10493_v38 = vld [vmem:[#allocation8 + $0xf8] sm:$0xf0]  ;;  %v3285_v10 = vmul.f32 %v3271_v48, %v3218_v43  ;;  %v10412_v27 = vld [vmem:[#allocation2 + $0x928] sm:$0xf0]  ;;  %v8047_v48 = vld [vmem:[#allocation2 + $0x718] sm:$0xf] }
 0x16e   :  { %3010 = vmatpush.bf16.msrb.mxu3 %v8468_v35  ;;  %2976 = vmatmul.bf16.vlgmr.msrb.gmra.mxu0 %v11235_v54  ;;  %v8899_v35 = vor.u32 %v10563_v1, %v8898_v51  ;;  %v3208_v54 = vsel %vm11473_vm4, %v11424_v55, %v3204_v56  ;;  %v8131_v55 = vld [vmem:[#allocation2 + $0x7c0] sm:$0xf]  ;;  %v10363_v62 = vld [vmem:[#allocation2 + $0x7a0] sm:$0xf0]  ;;  %v8300_v47 = vor.u32 %v10412_v27, %v8299_v25  ;;  %v10405_v43 = vld [vmem:[#allocation2 + $0x8f0] sm:$0xf0] }
 0x16f   :  { %3031 = vmatpush.bf16.msra.mxu0 %v8496_v45  ;;  %v11490_v45 = vmul.f32 %v3270_v19, %v3208_v54  ;;  %v8132_v28 = vor.u32 %v10370_v12, %v8131_v55  ;;  %v10419_v1 = vld [vmem:[#allocation2 + $0x960] sm:$0xf0]  ;;  %v8075_v19 = vld [vmem:[#allocation2 + $0x750] sm:$0xf]  ;;  %v2672_v54 = vadd.f32 %v11478_v21, %v11486_v41  ;;  %v10535_v55 = vld [vmem:[#allocation8 + $0x248] sm:$0xf0] }
 0x170   :  { %2997 = vmatpush.bf16.msrb.mxu1 %v8216_v0  ;;  %2990 = vmatmul.bf16.vlgmr.msrb.gmra.mxu2 %v11261_v20  ;;  %v3059_v20 = vrot.slane %v3058_v13, 1  ;;  %v10472_v21 = vld [vmem:[#allocation8 + $0x50] sm:$0xf0] }
 0x171   :  { %5565 = vmatpush.bf16.msra.mxu2 %v8703_v14  ;;  %v10426_v14 = vld [vmem:[#allocation2 + $0x998] sm:$0xf0]  ;;  %v3291_v33 = vperm.slane %v11490_v45, 0 }
 0x172   :  { %3011 = vmatpush.bf16.msrb.mxu3 %v8440_v52  ;;  %v3060_v39 = vadd.f32 %v3059_v20, %v3058_v13  ;;  %v8619_v52 = vor.u32 %v10493_v38, %v8618_v31  ;;  %v8356_v26 = vor.u32 %v10426_v14, %v8355_v34  ;;  %v8591_v13 = vor.u32 %v10486_v60, %v8590_v59  ;;  %v2711_v20 = vpop.f32.mrf.mxu2  ;;  %v8786_v38 = vld [vmem:[#allocation8 + $0x230] sm:$0xf]  ;;  %v8534_v14 = vld [vmem:[#allocation8 + $0x38] sm:$0xf] }
 0x173   :  { %5579 = vmatpush.bf16.msrb.mxu0 %v8927_v61  ;;  %v8103_v61 = vld [vmem:[#allocation2 + $0x788] sm:$0xf]  ;;  %v8815_v31 = vor.u32 %v10542_v17, %v8814_v16  ;;  %v8563_v34 = vor.u32 %v10479_v18, %v8562_v22  ;;  %v3298_v41 = vmul.f32 %v3291_v33, %v11361_v3  ;;  %v8787_v59 = vor.u32 %v10535_v55, %v8786_v38  ;;  %v10521_v38 = vld [vmem:[#allocation8 + $0x1d8] sm:$0xf0] }
 0x174   :  { %2998 = vmatpush.bf16.msrb.mxu1 %v8188_v8  ;;  %v3101_v0 = vmul.f32 %v11357_v32, %v3060_v39  ;;  %v8843_v8 = vor.u32 %v10549_v58, %v8842_v57  ;;  %v8104_v49 = vor.u32 %v10363_v62, %v8103_v61  ;;  %v3292_v39 = vperm.slane %v3285_v10, 0  ;;  %v8271_v58 = vld [vmem:[#allocation2 + $0x8d8] sm:$0xf]  ;;  %v2699_v3 = vpop.f32.mrf.mxu3  ;;  %v10626_v61 = vld [vmem:[#allocation8 + $0x520] sm:$0xf0] }
 0x175   :  { %5566 = vmatpush.bf16.msra.mxu2 %v8675_v63  ;;  %v8327_v63 = vld [vmem:[#allocation2 + $0x948] sm:$0xf]  ;;  %v2686_v57 = vadd.f32 %v2685_v44, %v2672_v54  ;;  %v8535_v60 = vor.u32 %v10472_v21, %v8534_v14  ;;  %v9374_v62 = vld [vmem:[#allocation8 + $0x6c8] sm:$0xf]  ;;  %v10528_v10 = vld [vmem:[#allocation8 + $0x210] sm:$0xf0] }
 0x176   :  { %3012 = vmatpush.bf16.msrb.mxu3 %v8412_v9  ;;  %v11505_v51 = vsub.f32 %v11451_v11, %v3101_v0  ;;  %v11508_v56 = vsub.f32 %v11453_v15, %v3101_v0  ;;  %v11513_v9 = vld [vmem:[#allocation7] sm:$0x7f]  ;;  %v8328_v36 = vor.u32 %v10419_v1, %v8327_v63  ;;  %v3305_v0 = vmul.f32 %v3291_v33, %v11364_v4  ;;  %v10682_v63 = vld [vmem:[#allocation8 + $0x6e0] sm:$0xf0]  ;;  %v8506_v17 = vld [vmem:[#allocation8] sm:$0xf] }
 0x177   :  { %5580 = vmatpush.bf16.msrb.mxu0 %v8899_v35  ;;  %v3314_v45 = vperm.slane %v11513_v9, 1  ;;  %v3299_v1 = vmul.f32 %v3292_v39, %v11398_v53  ;;  %v3306_v4 = vmul.f32 %v3292_v39, %v11401_v5  ;;  %v9122_v53 = vld [vmem:[#allocation8 + $0x4d0] sm:$0xf]  ;;  %v9375_v22 = vor.u32 %v10682_v63, %v9374_v62  ;;  %v10661_v63 = vld [vmem:[#allocation8 + $0x638] sm:$0xf0] }
 0x178   :  { %2999 = vmatpush.bf16.msrb.mxu1 %v8160_v2  ;;  %v3122_v11 = vmul.f32 %v11505_v51, %v11505_v51  ;;  %v3129_v15 = vmul.f32 %v11508_v56, %v11508_v56  ;;  %v3313_v2 = vperm.slane %v11513_v9, 0  ;;  %v9346_v54 = vld [vmem:[#allocation8 + $0x690] sm:$0xf] }
 0x179   :  { %5567 = vmatpush.bf16.msra.mxu2 %v8647_v23  ;;  %v11521_v23 = vpop.f32.mrf.mxu0  ;;  %v3328_v25 = vadd.f32 %v3314_v45, %v3299_v1  ;;  %v3335_v27 = vadd.f32 %v3314_v45, %v3306_v4 }
 0x17a   :  { %3013 = vmatpush.bf16.msrb.mxu3 %v8384_v29  ;;  %v3148_v35 = vadd.f32 %v3129_v15, %v3122_v11  ;;  %v2684_v29 = vadd.f32 %v11484_v6, %v2670_v40  ;;  %v10349_v6 = vld [vmem:[#allocation2 + $0x730] sm:$0xf0]  ;;  %v2700_v40 = vadd.f32 %v2699_v3, %v2686_v57  ;;  %v3327_v11 = vadd.f32 %v3313_v2, %v3298_v41  ;;  %v2713_v16 = vpop.f32.mrf.mxu2  ;;  %v9318_v57 = vld [vmem:[#allocation8 + $0x658] sm:$0xf] }
 0x17b   :  { %5581 = vmatpush.bf16.msrb.mxu0 %v8871_v46  ;;  %v8076_v46 = vor.u32 %v10356_v24, %v8075_v19  ;;  %v8272_v15 = vor.u32 %v10405_v43, %v8271_v58  ;;  %v3334_v44 = vadd.f32 %v3313_v2, %v3305_v0  ;;  %v10675_v24 = vld [vmem:[#allocation8 + $0x6a8] sm:$0xf0]  ;;  %v8730_v2 = vld [vmem:[#allocation8 + $0x1c0] sm:$0xf]  ;;  %v10668_v58 = vld [vmem:[#allocation8 + $0x670] sm:$0xf0] }
 0x17c   :  { %3000 = vmatpush.bf16.msrb.mxu1 %v8132_v28  ;;  %v3149_v12 = vrot.slane %v3148_v35, 4  ;;  %v9150_v28 = vld [vmem:[#allocation8 + $0x508] sm:$0xf]  ;;  %v2714_v18 = vadd.f32 %v2713_v16, %v2700_v40  ;;  %v3341_v55 = vmax.f32 %v3327_v11, 0.0  ;;  %v9347_v14 = vor.u32 %v10675_v24, %v9346_v54  ;;  %v10654_v11 = vld [vmem:[#allocation8 + $0x600] sm:$0xf0] }
 0x17d   :  { %5568 = vmatpush.bf16.msra.mxu2 %v8619_v52  ;;  %v8731_v45 = vor.u32 %v10521_v38, %v8730_v2  ;;  %v9038_v40 = vld [vmem:[#allocation8 + $0x428] sm:$0xf]  ;;  %v8982_v24 = vld [vmem:[#allocation8 + $0x3b8] sm:$0xf] }
 0x17e   :  { %3014 = vmatpush.bf16.msrb.mxu3 %v8356_v26  ;;  %v3150_v52 = vadd.f32 %v3149_v12, %v3148_v35  ;;  %8503 = vmatmul.msk.bf16.vlgmr.msra.gmra.mxu0 %vm2348_vm0, %v11271_v50  ;;  %v2698_v26 = vadd.f32 %v2697_v7, %v2684_v29  ;;  %v8758_v50 = vld [vmem:[#allocation8 + $0x1f8] sm:$0xf]  ;;  %v8048_v7 = vor.u32 %v10349_v6, %v8047_v48  ;;  %v10619_v35 = vld [vmem:[#allocation8 + $0x4e8] sm:$0xf0]  ;;  %v3348_v12 = vmax.f32 %v3334_v44, 0.0 }
 0x17f   :  { %5582 = vmatpush.bf16.msrb.mxu0 %v8843_v8  ;;  %v2739_v8 = vpop.f32.mrf.mxu1  ;;  %v8759_v19 = vor.u32 %v10528_v10, %v8758_v50  ;;  %v3342_v48 = vmax.f32 %v3328_v25, 0.0  ;;  %v3349_v6 = vmax.f32 %v3335_v27, 0.0  ;;  %v9262_v10 = vld [vmem:[#allocation8 + $0x5e8] sm:$0xf]  ;;  %v10584_v25 = vld [vmem:[#allocation8 + $0x3d0] sm:$0xf0] }
 0x180   :  { %3001 = vmatpush.bf16.msrb.mxu1 %v8104_v49  ;;  %v3151_v33 = vrot.slane %v3150_v52, 2  ;;  %v10465_v49 = vld [vmem:[#allocation8 + $0x18] sm:$0xf0]  ;;  %v2712_v5 = vadd.f32 %v2711_v20, %v2698_v26  ;;  %v9123_v20 = vor.u32 %v10619_v35, %v9122_v53  ;;  %v9234_v53 = vld [vmem:[#allocation8 + $0x5b0] sm:$0xf] }
 0x181   :  { %5569 = vmatpush.bf16.msra.mxu2 %v8591_v13  ;;  %v8507_v39 = vor.u32 %v10465_v49, %v8506_v17  ;;  %v11540_v62 = vpack.c.bf16 %v3349_v6, %v3342_v48  ;;  %v9010_v17 = vld [vmem:[#allocation8 + $0x3f0] sm:$0xf]  ;;  %v10591_v49 = vld [vmem:[#allocation8 + $0x408] sm:$0xf0]  ;;  %v10633_v48 = vld [vmem:[#allocation8 + $0x558] sm:$0xf0] }
 0x182   :  { %3015 = vmatpush.bf16.msrb.mxu3 %v8328_v36  ;;  %v3152_v13 = vadd.f32 %v3151_v33, %v3150_v52  ;;  %v9151_v36 = vor.u32 %v10626_v61, %v9150_v28  ;;  %v2726_v21 = vadd.f32 %v11521_v23, %v2712_v5  ;;  %v11536_v23 = vpack.c.bf16 %v3348_v12, %v3341_v55  ;;  %v10605_v61 = vld [vmem:[#allocation8 + $0x478] sm:$0xf0] }
 0x183   :  { %5583 = vmatpush.bf16.msrb.mxu0 %v8815_v31  ;;  %v2727_v31 = vpop.f32.mrf.mxu0  ;;  %v3272_v55 = vperm.slane %v11463_v30, 2 }
 0x184   :  { %3002 = vmatpush.bf16.msrb.mxu1 %v8076_v46  ;;  %v3153_v29 = vrot.slane %v3152_v13, 1  ;;  %v2728_v41 = vadd.f32 %v2727_v31, %v2714_v18  ;;  %v9094_v46 = vld [vmem:[#allocation8 + $0x498] sm:$0xf]  ;;  %v2740_v43 = vadd.f32 %v2739_v8, %v2726_v21  ;;  %v10598_v8 = vld [vmem:[#allocation8 + $0x440] sm:$0xf0] }
 0x185   :  { %5570 = vmatpush.bf16.msra.mxu2 %v8563_v34  ;;  %v9039_v44 = vor.u32 %v10598_v8, %v9038_v40  ;;  %v10640_v31 = vld [vmem:[#allocation8 + $0x590] sm:$0xf0]  ;;  %v8954_v21 = vld [vmem:[#allocation8 + $0x380] sm:$0xf] }
 0x186   :  { %3016 = vmatpush.bf16.msrb.mxu3 %v8300_v47  ;;  %v3154_v34 = vadd.f32 %v3153_v29, %v3152_v13  ;;  %v10612_v47 = vld [vmem:[#allocation8 + $0x4b0] sm:$0xf0]  ;;  %v9206_v29 = vld [vmem:[#allocation8 + $0x578] sm:$0xf] }
 0x187   :  { %5584 = vmatpush.bf16.msrb.mxu0 %v8787_v59  ;;  %v2741_v52 = vpop.f32.mrf.mxu1  ;;  %v9095_v3 = vor.u32 %v10612_v47, %v9094_v46  ;;  %v9178_v47 = vld [vmem:[#allocation8 + $0x540] sm:$0xf] }
 0x188   :  { %3003 = vmatpush.bf16.msrb.mxu1 %v8048_v7  ;;  %v3187_v0 = vmul.f32 %v3154_v34, %v11357_v32  ;;  %v2742_v28 = vadd.f32 %v2741_v52, %v2728_v41  ;;  %v10577_v41 = vld [vmem:[#allocation8 + $0x398] sm:$0xf0] }
 0x189   :  { %5571 = vmatpush.bf16.msra.mxu2 %v8535_v60  ;;  %v9066_v60 = vld [vmem:[#allocation8 + $0x460] sm:$0xf] }
 0x18a   :  { %3017 = vmatpush.bf16.msrb.mxu3 %v8272_v15  ;;  %v11538_v26 = vadd.f32 1e-05, %v3187_v0  ;;  %v3061_v59 = vadd.f32 %v2742_v28, %v2740_v43  ;;  %v9067_v4 = vor.u32 %v10605_v61, %v9066_v60  ;;  %v3315_v61 = vperm.slane %v11513_v9, 2 }
 0x18b   :  { %5585 = vmatpush.bf16.msrb.mxu0 %v8759_v19  ;;  %3004 = vmatmul.bf16.vlgmr.msrb.gmra.mxu1 %v11287_v37  ;;  %v9319_v37 = vor.u32 %v10668_v58, %v9318_v57  ;;  %v9011_v19 = vor.u32 %v10591_v49, %v9010_v17  ;;  %v10511_v58 = vld [vmem:[#allocation8 + $0x18c] sm:$0xf] }
 0x18c   :  { %5593 = vmatpush.bf16.msra.mxu1 %v9151_v36  ;;  %10885 = vrsqrt.f32 %v11538_v26  ;;  %v3062_v1 = vrot.slane %v3061_v59, 4  ;;  %v9263_v36 = vor.u32 %v10654_v11, %v9262_v10  ;;  %vm3225_vm9 = vweird.f32 %v11538_v26  ;;  %v2753_v57 = vpop.f32.mrf.mxu3 }
 0x18d   :  { %3018 = vmatmul.bf16.vlgmr.msrb.gmra.mxu3 %v11289_v42  ;;  %5572 = vmatpush.bf16.msra.mxu2 %v8507_v39  ;;  %v9290_v42 = vld [vmem:[#allocation8 + $0x620] sm:$0xf]  ;;  %v8983_v39 = vor.u32 %v10584_v25, %v8982_v24  ;;  %v10483_v25 = vld [vmem:[#allocation8 + $0xac] sm:$0xf] }
 0x18e   :  { %5607 = vmatpush.bf16.msra.mxu3 %v9375_v22  ;;  %v3063_v33 = vadd.f32 %v3062_v1, %v3061_v59  ;;  %v9291_v50 = vor.u32 %v10661_v63, %v9290_v42  ;;  %v10647_v22 = vld [vmem:[#allocation8 + $0x5c8] sm:$0xf0]  ;;  %v9179_v59 = vor.u32 %v10633_v48, %v9178_v47  ;;  %v10504_v63 = vld [vmem:[#allocation8 + $0x154] sm:$0xf]  ;;  %v8676_v1 = vld [vmem:[#allocation8 + $0x16c] sm:$0xf0] }
 0x18f   :  { %5586 = vmatpush.bf16.msrb.mxu0 %v8731_v45  ;;  %v9235_v27 = vor.u32 %v10647_v22, %v9234_v53  ;;  %v9207_v45 = vor.u32 %v10640_v31, %v9206_v29  ;;  %v2781_v46 = vpop.f32.mrf.mxu2  ;;  %v8679_v10 = vor.u32 %v10504_v63, %v8676_v1  ;;  %v10490_v22 = vld [vmem:[#allocation8 + $0xe4] sm:$0xf] }
 0x190   :  { %5594 = vmatpush.bf16.msra.mxu1 %v9123_v20  ;;  %5573 = vmatmul.bf16.vlgmr.msra.gmra.mxu2 %v11536_v23  ;;  %v3064_v7 = vrot.slane %v3063_v33, 2 }
 0x192   :  { %5608 = vmatpush.bf16.msra.mxu3 %v9347_v14  ;;  %5587 = vmatmul.bf16.vlgmr.msrb.gmra.mxu0 %v11540_v62  ;;  %v10886_v15 = vpop.eup %10885  ;;  %v3065_v16 = vadd.f32 %v3064_v7, %v3063_v33  ;;  %v2767_v14 = vpop.f32.mrf.mxu1 }
 0x193   :  { %v3220_v13 = vmul.f32 %v10886_v15, %v11538_v26  ;;  %vm3226_vm8 = vweird.f32 %v10886_v15  ;;  %v8955_v26 = vor.u32 %v10577_v41, %v8954_v21  ;;  %v8564_v21 = vld [vmem:[#allocation8 + $0x8c] sm:$0xf0] }
 0x194   :  { %5595 = vmatpush.bf16.msra.mxu1 %v9095_v3  ;;  %v3066_v18 = vrot.slane %v3065_v16, 1  ;;  %vm3227_vm10 = vmor %vm3225_vm9, %vm3226_vm8 }
 0x195   :  { %v3221_v5 = vmul.f32 %v10886_v15, %v3220_v13 }
 0x196   :  { %5609 = vmatpush.bf16.msra.mxu3 %v9319_v37  ;;  %v3067_v54 = vadd.f32 %v3066_v18, %v3065_v16  ;;  %v2768_v18 = vadd.f32 %v2767_v14, %v2753_v57  ;;  %v10476_v14 = vld [vmem:[#allocation8 + $0x74] sm:$0xf]  ;;  %v9598_v57 = vld [vmem:[#allocation8 + $0x888] sm:$0xf] }
 0x197   :  { %v3222_v35 = vmul.f32 0.5, %v3221_v5  ;;  %v2783_v17 = vpop.f32.mrf.mxu2  ;;  %v8620_v5 = vld [vmem:[#allocation8 + $0xfc] sm:$0xf0]  ;;  %v8567_v47 = vor.u32 %v10476_v14, %v8564_v21 }
 0x198   :  { %5596 = vmatpush.bf16.msra.mxu1 %v9067_v4  ;;  %v3102_v38 = vmul.f32 %v11357_v32, %v3067_v54  ;;  %v8623_v54 = vor.u32 %v10490_v22, %v8620_v5  ;;  %v2782_v29 = vadd.f32 %v2781_v46, %v2768_v18  ;;  %v10738_v46 = vld [vmem:[#allocation8 + $0x8a0] sm:$0xf0]  ;;  %v9514_v18 = vld [vmem:[#allocation8 + $0x7e0] sm:$0xf] }
 0x199   :  { %v3223_v2 = vsub.f32 1.5, %v3222_v35  ;;  %v2795_v35 = vpop.f32.mrf.mxu0 }
 0x19a   :  { %5610 = vmatpush.bf16.msra.mxu3 %v9291_v50  ;;  %v11549_v34 = vsub.f32 %v2740_v43, %v3102_v38  ;;  %v11551_v20 = vsub.f32 %v2742_v28, %v3102_v38  ;;  %v8704_v43 = vld [vmem:[#allocation8 + $0x1a4] sm:$0xf0]  ;;  %v2769_v7 = vpop.f32.mrf.mxu1  ;;  %v2796_v41 = vadd.f32 %v2795_v35, %v2782_v29 }
 0x19b   :  { %v3224_v12 = vmul.f32 %v10886_v15, %v3223_v2  ;;  %v8707_v37 = vor.u32 %v10511_v58, %v8704_v43  ;;  %v9599_v43 = vor.u32 %v10738_v46, %v9598_v57 }
 0x19c   :  { %5597 = vmatpush.bf16.msra.mxu1 %v9039_v44  ;;  %v3123_v0 = vmul.f32 %v11549_v34, %v11549_v34  ;;  %v3130_v52 = vmul.f32 %v11551_v20, %v11551_v20  ;;  %v8648_v44 = vld [vmem:[#allocation8 + $0x134] sm:$0xf0] }
 0x19d   :  { %v3228_v6 = vsel %vm3227_vm10, %v10886_v15, %v3224_v12  ;;  %v10497_v15 = vld [vmem:[#allocation8 + $0x11c] sm:$0xf]  ;;  %5621 = vmatpush.bf16.msrb.mxu2 %v9599_v43 }
 0x19e   :  { %5611 = vmatpush.bf16.msra.mxu3 %v9263_v36  ;;  %v3286_v28 = vmul.f32 %v3272_v55, %v3228_v6  ;;  %v3155_v3 = vadd.f32 %v3130_v52, %v3123_v0  ;;  %v2755_v36 = vpop.f32.mrf.mxu3  ;;  %v10469_v6 = vld [vmem:[#allocation8 + $0x3c] sm:$0xf]  ;;  %v8536_v0 = vld [vmem:[#allocation8 + $0x54] sm:$0xf0] }
 0x19f   :  { %v2770_v38 = vadd.f32 %v2769_v7, %v2755_v36  ;;  %v2837_v55 = vpop.f32.mrf.mxu2 }
 0x1a0   :  { %5598 = vmatpush.bf16.msra.mxu1 %v9011_v19  ;;  %v3293_v60 = vperm.slane %v3286_v28, 0  ;;  %v3156_v42 = vrot.slane %v3155_v3, 4 }
 0x1a1   :  { %v2797_v48 = vpop.f32.mrf.mxu0 }
 0x1a2   :  { %5612 = vmatpush.bf16.msra.mxu3 %v9235_v27  ;;  %v3300_v4 = vmul.f32 %v3293_v60, %v11505_v51  ;;  %v3307_v33 = vmul.f32 %v3293_v60, %v11508_v56  ;;  %v3157_v40 = vadd.f32 %v3156_v42, %v3155_v3  ;;  %v8651_v51 = vor.u32 %v10497_v15, %v8648_v44  ;;  %v8592_v27 = vld [vmem:[#allocation8 + $0xc4] sm:$0xf0] }
 0x1a3   :  { %v8539_v3 = vor.u32 %v10469_v6, %v8536_v0  ;;  %v9458_v6 = vld [vmem:[#allocation8 + $0x770] sm:$0xf]  ;;  %v10703_v0 = vld [vmem:[#allocation8 + $0x788] sm:$0xf0] }
 0x1a4   :  { %5599 = vmatpush.bf16.msra.mxu1 %v8983_v39  ;;  %v3329_v8 = vadd.f32 %v3315_v61, %v3300_v4  ;;  %v3336_v50 = vadd.f32 %v3315_v61, %v3307_v33  ;;  %v3158_v11 = vrot.slane %v3157_v40, 2  ;;  %v8595_v39 = vor.u32 %v10483_v25, %v8592_v27  ;;  %v10462_v61 = vld [vmem:[#allocation8 + $0x4] sm:$0xf]  ;;  %v9570_v33 = vld [vmem:[#allocation8 + $0x850] sm:$0xf] }
 0x1a5   :  { %v9459_v57 = vor.u32 %v10703_v0, %v9458_v6  ;;  %v10609_v6 = vld [vmem:[#allocation8 + $0x49c] sm:$0xf]  ;;  %v9096_v0 = vld [vmem:[#allocation8 + $0x4b4] sm:$0xf0] }
 0x1a6   :  { %5613 = vmatpush.bf16.msra.mxu3 %v9207_v45  ;;  %v3343_v13 = vmax.f32 %v3329_v8, 0.0  ;;  %v3350_v16 = vmax.f32 %v3336_v50, 0.0  ;;  %v3159_v49 = vadd.f32 %v3158_v11, %v3157_v40  ;;  %v2784_v45 = vadd.f32 %v2783_v17, %v2770_v38  ;;  %v10731_v40 = vld [vmem:[#allocation8 + $0x868] sm:$0xf0] }
 0x1a7   :  { %v2839_v4 = vpop.f32.mrf.mxu2  ;;  %v9571_v8 = vor.u32 %v10731_v40, %v9570_v33  ;;  %v3273_v17 = vperm.slane %v11463_v30, 3  ;;  %v3316_v30 = vperm.slane %v11513_v9, 3  ;;  %v9544_v33 = vld [vmem:[#allocation8 + $0x834] sm:$0xf0]  ;;  %v9822_v40 = vld [vmem:[#allocation8 + $0xa48] sm:$0xf] }
 0x1a8   :  { %5600 = vmatpush.bf16.msra.mxu1 %v8955_v26  ;;  %v11560_v53 = vpack.c.bf16 %v3350_v16, %v3343_v13  ;;  %v3160_v56 = vrot.slane %v3159_v49, 1  ;;  %v2823_v2 = vpop.f32.mrf.mxu1  ;;  %v2798_v26 = vadd.f32 %v2797_v48, %v2784_v45  ;;  %v9542_v13 = vld [vmem:[#allocation8 + $0x818] sm:$0xf]  ;;  %v10724_v16 = vld [vmem:[#allocation8 + $0x830] sm:$0xf0] }
 0x1a9   :  { %5622 = vmatpush.bf16.msrb.mxu2 %v9571_v8  ;;  %v9600_v45 = vld [vmem:[#allocation8 + $0x8a4] sm:$0xf0]  ;;  %v10794_v8 = vld [vmem:[#allocation8 + $0xa60] sm:$0xf0] }
 0x1aa   :  { %5614 = vmatpush.bf16.msra.mxu3 %v9179_v59  ;;  %v3161_v19 = vadd.f32 %v3160_v56, %v3159_v49  ;;  %v9543_v49 = vor.u32 %v10724_v16, %v9542_v13  ;;  %v9152_v16 = vld [vmem:[#allocation8 + $0x524] sm:$0xf0] }
 0x1ab   :  { %5601 = vmatmul.bf16.vlgmr.msra.gmra.mxu1 %v11560_v53  ;;  %v11565_v56 = vpop.f32.mrf.mxu0 }
 0x1ac   :  { %v3188_v24 = vmul.f32 %v3161_v19, %v11357_v32  ;;  %v2809_v12 = vpop.f32.mrf.mxu3  ;;  %v10717_v19 = vld [vmem:[#allocation8 + $0x7f8] sm:$0xf0] }
 0x1ad   :  { %v2810_v52 = vadd.f32 %v2809_v12, %v2796_v41  ;;  %5623 = vmatpush.bf16.msrb.mxu2 %v9543_v49  ;;  %v10735_v41 = vld [vmem:[#allocation8 + $0x88c] sm:$0xf] }
 0x1ae   :  { %5663 = vmatpush.bf16.msrb.mxu3 %v8707_v37  ;;  %v3195_v31 = vadd.f32 1e-05, %v3188_v24  ;;  %v8508_v37 = vld [vmem:[#allocation8 + $0x1c] sm:$0xf0] }
 0x1af   :  { %v2824_v63 = vadd.f32 %v2823_v2, %v2810_v52  ;;  %v8511_v11 = vor.u32 %v10462_v61, %v8508_v37  ;;  %v10710_v2 = vld [vmem:[#allocation8 + $0x7c0] sm:$0xf0] }
 0x1b0   :  { %10887 = vrsqrt.f32 %v3195_v31  ;;  %v2825_v60 = vpop.f32.mrf.mxu1  ;;  %vm3235_vm12 = vweird.f32 %v3195_v31 }
 0x1b1   :  { %v2838_v15 = vadd.f32 %v2837_v55, %v2824_v63 }
 0x1b2   :  { %5664 = vmatpush.bf16.msrb.mxu3 %v8679_v10 }
 0x1b3   :  { %v2865_v25 = vpop.f32.mrf.mxu2  ;;  %v2853_v48 = vpop.f32.mrf.mxu0 }
 0x1b4   :  { %v2811_v59 = vpop.f32.mrf.mxu3 }
 0x1b5   :  { %v2812_v1 = vadd.f32 %v2811_v59, %v2798_v26  ;;  %v9430_v59 = vld [vmem:[#allocation8 + $0x738] sm:$0xf] }
 0x1b6   :  { %5665 = vmatpush.bf16.msrb.mxu3 %v8651_v51  ;;  %v10888_v58 = vpop.eup %10887 }
 0x1b7   :  { %v3230_v28 = vmul.f32 %v10888_v58, %v3195_v31  ;;  %v2826_v10 = vadd.f32 %v2825_v60, %v2812_v1  ;;  %vm3236_vm11 = vweird.f32 %v10888_v58  ;;  %v9486_v31 = vld [vmem:[#allocation8 + $0x7a8] sm:$0xf]  ;;  %v10696_v60 = vld [vmem:[#allocation8 + $0x750] sm:$0xf0] }
 0x1b8   :  { %vm3237_vm13 = vmor %vm3235_vm12, %vm3236_vm11  ;;  %v9431_v61 = vor.u32 %v10696_v60, %v9430_v59 }
 0x1b9   :  { %v3231_v42 = vmul.f32 %v10888_v58, %v3230_v28  ;;  %v2840_v44 = vadd.f32 %v2839_v4, %v2826_v10  ;;  %v10721_v4 = vld [vmem:[#allocation8 + $0x81c] sm:$0xf] }
 0x1ba   :  { %5666 = vmatpush.bf16.msrb.mxu3 %v8623_v54  ;;  %v9515_v54 = vor.u32 %v10717_v19, %v9514_v18  ;;  %v9516_v19 = vld [vmem:[#allocation8 + $0x7fc] sm:$0xf0] }
 0x1bb   :  { %v3232_v50 = vmul.f32 0.5, %v3231_v42  ;;  %v3068_v51 = vadd.f32 %v2840_v44, %v2838_v15  ;;  %v2867_v26 = vpop.f32.mrf.mxu2 }
 0x1bc   :  { %5624 = vmatpush.bf16.msrb.mxu2 %v9515_v54  ;;  %v2868_v18 = vadd.f32 %v2867_v26, %v2853_v48  ;;  %v10787_v54 = vld [vmem:[#allocation8 + $0xa28] sm:$0xf0]  ;;  %v10773_v26 = vld [vmem:[#allocation8 + $0x9b8] sm:$0xf0] }
 0x1bd   :  { %v3233_v7 = vsub.f32 1.5, %v3232_v50  ;;  %v3069_v5 = vrot.slane %v3068_v51, 4 }
 0x1be   :  { %5667 = vmatpush.bf16.msrb.mxu3 %v8595_v39  ;;  %v9487_v39 = vor.u32 %v10710_v2, %v9486_v31  ;;  %v9124_v31 = vld [vmem:[#allocation8 + $0x4ec] sm:$0xf0] }
 0x1bf   :  { %v3234_v36 = vmul.f32 %v10888_v58, %v3233_v7  ;;  %v3070_v24 = vadd.f32 %v3069_v5, %v3068_v51  ;;  %v9402_v7 = vld [vmem:[#allocation8 + $0x700] sm:$0xf]  ;;  %v10714_v51 = vld [vmem:[#allocation8 + $0x7e4] sm:$0xf]  ;;  %v2866_v5 = vadd.f32 %v2865_v25, %v11565_v56  ;;  %v9488_v25 = vld [vmem:[#allocation8 + $0x7c4] sm:$0xf0] }
 0x1c0   :  { %5625 = vmatpush.bf16.msrb.mxu2 %v9487_v39  ;;  %v10707_v39 = vld [vmem:[#allocation8 + $0x7ac] sm:$0xf] }
 0x1c1   :  { %v3238_v22 = vsel %vm3237_vm13, %v10888_v58, %v3234_v36  ;;  %v3071_v29 = vrot.slane %v3070_v24, 2  ;;  %v9603_v58 = vor.u32 %v10735_v41, %v9600_v45  ;;  %v9547_v36 = vor.u32 %v10721_v4, %v9544_v33  ;;  %v10780_v41 = vld [vmem:[#allocation8 + $0x9f0] sm:$0xf0]  ;;  %v9068_v4 = vld [vmem:[#allocation8 + $0x47c] sm:$0xf0] }
 0x1c2   :  { %5668 = vmatpush.bf16.msrb.mxu3 %v8567_v47  ;;  %v3287_v35 = vmul.f32 %v3273_v17, %v3238_v22 }
 0x1c3   :  { %v3072_v12 = vadd.f32 %v3071_v29, %v3070_v24  ;;  %v10616_v29 = vld [vmem:[#allocation8 + $0x4d4] sm:$0xf] }
 0x1c4   :  { %v3294_v27 = vperm.slane %v3287_v35, 0  ;;  %5626 = vmatpush.bf16.msrb.mxu2 %v9459_v57  ;;  %v9794_v35 = vld [vmem:[#allocation8 + $0xa10] sm:$0xf]  ;;  %v10700_v57 = vld [vmem:[#allocation8 + $0x774] sm:$0xf] }
 0x1c5   :  { %v3073_v47 = vrot.slane %v3072_v12, 1 }
 0x1c6   :  { %5669 = vmatpush.bf16.msrb.mxu3 %v8539_v3  ;;  %v3301_v38 = vmul.f32 %v3294_v27, %v11549_v34  ;;  %v3308_v55 = vmul.f32 %v3294_v27, %v11551_v20  ;;  %v10728_v34 = vld [vmem:[#allocation8 + $0x854] sm:$0xf]  ;;  %v9572_v20 = vld [vmem:[#allocation8 + $0x86c] sm:$0xf0] }
 0x1c7   :  { %v3074_v46 = vadd.f32 %v3073_v47, %v3072_v12  ;;  %v9575_v1 = vor.u32 %v10728_v34, %v9572_v20  ;;  %v9127_v12 = vor.u32 %v10616_v29, %v9124_v31  ;;  %v9460_v20 = vld [vmem:[#allocation8 + $0x78c] sm:$0xf0]  ;;  %v10627_v29 = vld [vmem:[#allocation8 + $0x528] sm:$0xf0] }
 0x1c8   :  { %v3330_v14 = vadd.f32 %v3316_v30, %v3301_v38  ;;  %v3337_v21 = vadd.f32 %v3316_v30, %v3308_v55  ;;  %v2893_v63 = vpop.f32.mrf.mxu1  ;;  %5627 = vmatpush.bf16.msrb.mxu2 %v9431_v61  ;;  %v9795_v30 = vor.u32 %v10787_v54, %v9794_v35  ;;  %v9519_v55 = vor.u32 %v10714_v51, %v9516_v19  ;;  %v9404_v35 = vld [vmem:[#allocation8 + $0x71c] sm:$0xf0]  ;;  %v9682_v54 = vld [vmem:[#allocation8 + $0x930] sm:$0xf] }
 0x1c9   :  { %v3103_v28 = vmul.f32 %v11357_v32, %v3074_v46  ;;  %v9099_v46 = vor.u32 %v10609_v6, %v9096_v0 }
 0x1ca   :  { %5670 = vmatpush.bf16.msrb.mxu3 %v8511_v11  ;;  %v3344_v9 = vmax.f32 %v3330_v14, 0.0  ;;  %v3351_v52 = vmax.f32 %v3337_v21, 0.0  ;;  %v9823_v11 = vor.u32 %v10794_v8, %v9822_v40  ;;  %v9766_v21 = vld [vmem:[#allocation8 + $0x9d8] sm:$0xf]  ;;  %v9463_v40 = vor.u32 %v10700_v57, %v9460_v20  ;;  %v10693_v8 = vld [vmem:[#allocation8 + $0x73c] sm:$0xf] }
 0x1cb   :  { %v11574_v37 = vsub.f32 %v2838_v15, %v3103_v28  ;;  %v11576_v42 = vsub.f32 %v2840_v44, %v3103_v28  ;;  %v10689_v15 = vld [vmem:[#allocation8 + $0x718] sm:$0xf0]  ;;  %v10623_v44 = vld [vmem:[#allocation8 + $0x50c] sm:$0xf]  ;;  %v2907_v49 = vpop.f32.mrf.mxu0  ;;  %v9767_v48 = vor.u32 %v10780_v41, %v9766_v21  ;;  %v9738_v28 = vld [vmem:[#allocation8 + $0x9a0] sm:$0xf] }
 0x1cc   :  { %v11570_v43 = vpack.c.bf16 %v3351_v52, %v3344_v9  ;;  %v2879_v3 = vpop.f32.mrf.mxu3  ;;  %v9403_v13 = vor.u32 %v10689_v15, %v9402_v7  ;;  %5635 = vmatpush.bf16.msra.mxu0 %v9823_v11  ;;  %v9155_v22 = vor.u32 %v10623_v44, %v9152_v16  ;;  %v9491_v52 = vor.u32 %v10707_v39, %v9488_v25  ;;  %v9432_v11 = vld [vmem:[#allocation8 + $0x754] sm:$0xf0]  ;;  %v9710_v7 = vld [vmem:[#allocation8 + $0x968] sm:$0xf]  ;;  %v10766_v15 = vld [vmem:[#allocation8 + $0x980] sm:$0xf0] }
 0x1cd   :  { %v3124_v50 = vmul.f32 %v11574_v37, %v11574_v37  ;;  %v3131_v10 = vmul.f32 %v11576_v42, %v11576_v42  ;;  %v2880_v14 = vadd.f32 %v2879_v3, %v2866_v5  ;;  %v9739_v61 = vor.u32 %v10773_v26, %v9738_v28  ;;  %v10686_v5 = vld [vmem:[#allocation8 + $0x704] sm:$0xf]  ;;  %v10588_v39 = vld [vmem:[#allocation8 + $0x3f4] sm:$0xf]  ;;  %v9654_v21 = vld [vmem:[#allocation8 + $0x8f8] sm:$0xf] }
 0x1ce   :  { %5615 = vmatmul.bf16.vlgmr.msra.gmra.mxu3 %v11570_v43  ;;  %5628 = vmatpush.bf16.msrb.mxu2 %v9403_v13  ;;  %v9711_v16 = vor.u32 %v10766_v15, %v9710_v7  ;;  %v10752_v41 = vld [vmem:[#allocation8 + $0x910] sm:$0xf0]  ;;  %v9102_v28 = vld [vmem:[#allocation8 + $0x4a0] sm:$0xf]  ;;  %v9074_v15 = vld [vmem:[#allocation8 + $0x468] sm:$0xf] }
 0x1cf   :  { %5719 = vmatpush.bf16.msra.mxu3 %v9603_v58  ;;  %v3162_v17 = vadd.f32 %v3131_v10, %v3124_v50  ;;  %v2894_v58 = vadd.f32 %v2893_v63, %v2880_v14  ;;  %v9407_v14 = vor.u32 %v10686_v5, %v9404_v35  ;;  %v9626_v26 = vld [vmem:[#allocation8 + $0x8c0] sm:$0xf] }
 0x1d0   :  { %5636 = vmatpush.bf16.msra.mxu0 %v9795_v30  ;;  %v2895_v47 = vpop.f32.mrf.mxu1  ;;  %v9158_v30 = vld [vmem:[#allocation8 + $0x510] sm:$0xf] }
 0x1d1   :  { %v3163_v24 = vrot.slane %v3162_v17, 4  ;;  %v2908_v63 = vadd.f32 %v2907_v49, %v2894_v58  ;;  %v9159_v25 = vor.u32 %v10627_v29, %v9158_v30  ;;  %v10599_v30 = vld [vmem:[#allocation8 + $0x448] sm:$0xf0]  ;;  %v10665_v29 = vld [vmem:[#allocation8 + $0x65c] sm:$0xf] }
 0x1d2   :  { %5691 = vmatpush.bf16.msra.mxu2 %v9155_v22  ;;  %v9435_v22 = vor.u32 %v10693_v8, %v9432_v11  ;;  %v10574_v8 = vld [vmem:[#allocation8 + $0x384] sm:$0xf] }
 0x1d3   :  { %5720 = vmatpush.bf16.msra.mxu3 %v9575_v1  ;;  %v3164_v2 = vadd.f32 %v3163_v24, %v3162_v17  ;;  %v2921_v38 = vpop.f32.mrf.mxu2  ;;  %v2909_v59 = vpop.f32.mrf.mxu0  ;;  %v10602_v1 = vld [vmem:[#allocation8 + $0x464] sm:$0xf]  ;;  %v10595_v17 = vld [vmem:[#allocation8 + $0x42c] sm:$0xf] }
 0x1d4   :  { %v2881_v27 = vpop.f32.mrf.mxu3  ;;  %5637 = vmatpush.bf16.msra.mxu0 %v9767_v48  ;;  %v9071_v50 = vor.u32 %v10602_v1, %v9068_v4  ;;  %v2922_v19 = vadd.f32 %v2921_v38, %v2908_v63  ;;  %v10759_v24 = vld [vmem:[#allocation8 + $0x948] sm:$0xf0]  ;;  %v9655_v48 = vor.u32 %v10752_v41, %v9654_v21  ;;  %v9376_v1 = vld [vmem:[#allocation8 + $0x6e4] sm:$0xf0]  ;;  %v9018_v41 = vld [vmem:[#allocation8 + $0x3f8] sm:$0xf] }
 0x1d5   :  { %v2882_v56 = vadd.f32 %v2881_v27, %v2868_v18  ;;  %v3165_v45 = vrot.slane %v3164_v2, 2  ;;  %v9683_v31 = vor.u32 %v10759_v24, %v9682_v54 }
 0x1d6   :  { %5692 = vmatpush.bf16.msra.mxu2 %v9127_v12  ;;  %v9012_v12 = vld [vmem:[#allocation8 + $0x40c] sm:$0xf0] }
 0x1d7   :  { %5721 = vmatpush.bf16.msra.mxu3 %v9547_v36  ;;  %v3166_v9 = vadd.f32 %v3165_v45, %v3164_v2  ;;  %v2896_v34 = vadd.f32 %v2895_v47, %v2882_v56  ;;  %v9040_v36 = vld [vmem:[#allocation8 + $0x444] sm:$0xf0]  ;;  %v9015_v38 = vor.u32 %v10588_v39, %v9012_v12  ;;  %v9130_v45 = vld [vmem:[#allocation8 + $0x4d8] sm:$0xf]  ;;  %v10620_v47 = vld [vmem:[#allocation8 + $0x4f0] sm:$0xf0] }
 0x1d8   :  { %5638 = vmatpush.bf16.msra.mxu0 %v9739_v61  ;;  %v9043_v18 = vor.u32 %v10595_v17, %v9040_v36  ;;  %v9131_v20 = vor.u32 %v10620_v47, %v9130_v45  ;;  %v10679_v61 = vld [vmem:[#allocation8 + $0x6cc] sm:$0xf]  ;;  %v10592_v45 = vld [vmem:[#allocation8 + $0x410] sm:$0xf0] }
 0x1d9   :  { %v3167_v3 = vrot.slane %v3166_v9, 1  ;;  %v2910_v10 = vadd.f32 %v2909_v59, %v2896_v34  ;;  %v10613_v59 = vld [vmem:[#allocation8 + $0x4b8] sm:$0xf0] }
 0x1da   :  { %5693 = vmatpush.bf16.msra.mxu2 %v9099_v46  ;;  %v9103_v7 = vor.u32 %v10613_v59, %v9102_v28  ;;  %v8990_v59 = vld [vmem:[#allocation8 + $0x3c0] sm:$0xf] }
 0x1db   :  { %5722 = vmatpush.bf16.msra.mxu3 %v9519_v55  ;;  %v3168_v33 = vadd.f32 %v3167_v3, %v3166_v9  ;;  %v2923_v44 = vpop.f32.mrf.mxu2  ;;  %v10581_v9 = vld [vmem:[#allocation8 + $0x3bc] sm:$0xf] }
 0x1dc   :  { %v2935_v60 = vpop.f32.mrf.mxu3  ;;  %5639 = vmatpush.bf16.msra.mxu0 %v9711_v16  ;;  %v2924_v49 = vadd.f32 %v2923_v44, %v2910_v10  ;;  %v10745_v3 = vld [vmem:[#allocation8 + $0x8d8] sm:$0xf0]  ;;  %v10672_v44 = vld [vmem:[#allocation8 + $0x694] sm:$0xf]  ;;  %v9348_v16 = vld [vmem:[#allocation8 + $0x6ac] sm:$0xf0] }
 0x1dd   :  { %v3189_v13 = vmul.f32 %v3168_v33, %v11357_v32  ;;  %v11588_v2 = vadd.f32 %v2935_v60, %v2922_v19  ;;  %v9627_v60 = vor.u32 %v10745_v3, %v9626_v26  ;;  %v11601_v19 = vld [vmem:[#allocation5] sm:$0x7f]  ;;  %v9019_v3 = vor.u32 %v10592_v45, %v9018_v41 }
 0x1de   :  { %5671 = vmatmul.bf16.vlgmr.msrb.gmra.mxu3 %v11536_v23  ;;  %5694 = vmatpush.bf16.msra.mxu2 %v9071_v50  ;;  %v8956_v50 = vld [vmem:[#allocation8 + $0x39c] sm:$0xf0] }
 0x1df   :  { %5723 = vmatpush.bf16.msra.mxu3 %v9491_v52  ;;  %v11585_v51 = vadd.f32 1e-05, %v3189_v13  ;;  %v8984_v52 = vld [vmem:[#allocation8 + $0x3d4] sm:$0xf0]  ;;  %v8959_v63 = vor.u32 %v10574_v8, %v8956_v50  ;;  %v10606_v13 = vld [vmem:[#allocation8 + $0x480] sm:$0xf0] }
 0x1e0   :  { %5640 = vmatpush.bf16.msra.mxu0 %v9683_v31  ;;  %v8987_v46 = vor.u32 %v10581_v9, %v8984_v52  ;;  %v9075_v24 = vor.u32 %v10606_v13, %v9074_v15  ;;  %v9320_v31 = vld [vmem:[#allocation8 + $0x674] sm:$0xf0]  ;;  %v10658_v9 = vld [vmem:[#allocation8 + $0x624] sm:$0xf]  ;;  %v9292_v52 = vld [vmem:[#allocation8 + $0x63c] sm:$0xf0] }
 0x1e1   :  { %10889 = vrsqrt.f32 %v11585_v51  ;;  %vm3245_vm15 = vweird.f32 %v11585_v51  ;;  %v10644_v15 = vld [vmem:[#allocation8 + $0x5b4] sm:$0xf]  ;;  %v9236_v13 = vld [vmem:[#allocation8 + $0x5cc] sm:$0xf0] }
 0x1e2   :  { %5695 = vmatpush.bf16.msra.mxu2 %v9043_v18  ;;  %v9351_v18 = vor.u32 %v10672_v44, %v9348_v16 }
 0x1e3   :  { %5724 = vmatpush.bf16.msra.mxu3 %v9463_v40  ;;  %v9379_v40 = vor.u32 %v10679_v61, %v9376_v1  ;;  %v10585_v1 = vld [vmem:[#allocation8 + $0x3d8] sm:$0xf0] }
 0x1e4   :  { %v2937_v27 = vpop.f32.mrf.mxu3  ;;  %5641 = vmatpush.bf16.msra.mxu0 %v9655_v48  ;;  %v11613_v48 = vld [vmem:[#allocation7] sm:$0x7f] }
 0x1e5   :  { %v11590_v55 = vadd.f32 %v2937_v27, %v2924_v49  ;;  %v3274_v49 = vperm.slane %v11601_v19, 4  ;;  %v9046_v27 = vld [vmem:[#allocation8 + $0x430] sm:$0xf] }
 0x1e6   :  { %5696 = vmatpush.bf16.msra.mxu2 %v9015_v38  ;;  %v9047_v21 = vor.u32 %v10599_v30, %v9046_v27  ;;  %v9208_v27 = vld [vmem:[#allocation8 + $0x594] sm:$0xf0] }
 0x1e7   :  { %5725 = vmatpush.bf16.msra.mxu3 %v9435_v22  ;;  %v3075_v56 = vadd.f32 %v11590_v55, %v11588_v2  ;;  %v10890_v57 = vpop.eup %10889 }
 0x1e8   :  { %v3240_v58 = vmul.f32 %v10890_v57, %v11585_v51  ;;  %5642 = vmatpush.bf16.msra.mxu0 %v9627_v60  ;;  %vm3246_vm14 = vweird.f32 %v10890_v57  ;;  %v11597_v22 = vpop.f32.mrf.mxu1 }
 0x1e9   :  { %v3076_v6 = vrot.slane %v3075_v56, 4  ;;  %vm3247_vm0 = vmor %vm3245_vm15, %vm3246_vm14 }
 0x1ea   :  { %5697 = vmatpush.bf16.msra.mxu2 %v8987_v46  ;;  %v3241_v4 = vmul.f32 %v10890_v57, %v3240_v58  ;;  %v9295_v46 = vor.u32 %v10658_v9, %v9292_v52 }
 0x1eb   :  { %v11594_v0 = vpop.f32.mrf.mxu0  ;;  %5726 = vmatpush.bf16.msra.mxu3 %v9407_v14  ;;  %v3077_v34 = vadd.f32 %v3076_v6, %v3075_v56  ;;  %v9323_v14 = vor.u32 %v10665_v29, %v9320_v31  ;;  %v3317_v6 = vperm.slane %v11613_v48, 4 }
 0x1ec   :  { %v3242_v10 = vmul.f32 0.5, %v3241_v4  ;;  %5705 = vmatpush.bf16.msrb.mxu0 %v9379_v40  ;;  %v10651_v4 = vld [vmem:[#allocation8 + $0x5ec] sm:$0xf] }
 0x1ed   :  { %v3078_v33 = vrot.slane %v3077_v34, 2 }
 0x1ee   :  { %5698 = vmatpush.bf16.msra.mxu2 %v8959_v63  ;;  %v3243_v17 = vsub.f32 1.5, %v3242_v10 }
 0x1ef   :  { %5789 = vmatpush.bf16.msrb.mxu3 %v9159_v25  ;;  %v3079_v11 = vadd.f32 %v3078_v33, %v3077_v34  ;;  %v9264_v33 = vld [vmem:[#allocation8 + $0x604] sm:$0xf0] }
 0x1f0   :  { %v3244_v35 = vmul.f32 %v10890_v57, %v3243_v17  ;;  %5706 = vmatpush.bf16.msrb.mxu0 %v9351_v18  ;;  %v2963_v25 = vpop.f32.mrf.mxu3  ;;  %v2951_v26 = vpop.f32.mrf.mxu1  ;;  %v9267_v8 = vor.u32 %v10651_v4, %v9264_v33  ;;  %v9239_v17 = vor.u32 %v10644_v15, %v9236_v13  ;;  %v9878_v33 = vld [vmem:[#allocation8 + $0xab8] sm:$0xf]  ;;  %v10809_v15 = vld [vmem:[#allocation8 + $0xad8] sm:$0xf0]  ;;  %v3275_v13 = vperm.slane %v11601_v19, 5 }
 0x1f1   :  { %v3080_v36 = vrot.slane %v3079_v11, 1 }
 0x1f2   :  { %v3248_v39 = vsel %vm3247_vm0, %v10890_v57, %v3244_v35 }
 0x1f3   :  { %5790 = vmatpush.bf16.msrb.mxu3 %v9131_v20  ;;  %v11599_v5 = vpop.f32.mrf.mxu0  ;;  %v3081_v54 = vadd.f32 %v3080_v36, %v3079_v11  ;;  %v3288_v38 = vmul.f32 %v3274_v49, %v3248_v39  ;;  %v2991_v28 = vpop.f32.mrf.mxu2  ;;  %v2964_v36 = vadd.f32 %v2963_v25, %v11597_v22  ;;  %v10630_v22 = vld [vmem:[#allocation8 + $0x544] sm:$0xf] }
 0x1f4   :  { %5707 = vmatpush.bf16.msrb.mxu0 %v9323_v14 }
 0x1f5   :  { %v3104_v12 = vmul.f32 %v11357_v32, %v3081_v54  ;;  %v3295_v47 = vperm.slane %v3288_v38, 0  ;;  %v2978_v39 = vadd.f32 %v11594_v0, %v2964_v36  ;;  %v9180_v38 = vld [vmem:[#allocation8 + $0x55c] sm:$0xf0] }
 0x1f6   :  { %v9183_v41 = vor.u32 %v10630_v22, %v9180_v38  ;;  %v9850_v36 = vld [vmem:[#allocation8 + $0xa80] sm:$0xf] }
 0x1f7   :  { %5791 = vmatpush.bf16.msrb.mxu3 %v9103_v7  ;;  %v11608_v56 = vsub.f32 %v11588_v2, %v3104_v12  ;;  %v11611_v51 = vsub.f32 %v11590_v55, %v3104_v12  ;;  %v3302_v58 = vmul.f32 %v3295_v47, %v11574_v37  ;;  %v3309_v34 = vmul.f32 %v3295_v47, %v11576_v42  ;;  %v8962_v42 = vld [vmem:[#allocation8 + $0x388] sm:$0xf]  ;;  %v10578_v7 = vld [vmem:[#allocation8 + $0x3a0] sm:$0xf0] }
 0x1f8   :  { %5708 = vmatpush.bf16.msrb.mxu0 %v9295_v46  ;;  %v8991_v37 = vor.u32 %v10585_v1, %v8990_v59  ;;  %v2965_v16 = vpop.f32.mrf.mxu3  ;;  %v8963_v54 = vor.u32 %v10578_v7, %v8962_v42  ;;  %v2992_v45 = vadd.f32 %v2991_v28, %v2978_v39  ;;  %v9886_v7 = vld [vmem:[#allocation8 + $0xac0] sm:$0xf]  ;;  %v10802_v39 = vld [vmem:[#allocation8 + $0xaa0] sm:$0xf0] }
 0x1f9   :  { %v3125_v2 = vmul.f32 %v11608_v56, %v11608_v56  ;;  %v3132_v55 = vmul.f32 %v11611_v51, %v11611_v51  ;;  %v3331_v60 = vadd.f32 %v3317_v6, %v3302_v58  ;;  %v3338_v61 = vadd.f32 %v3317_v6, %v3309_v34 }
 0x1fa   :  { %v2966_v12 = vadd.f32 %v2965_v16, %v2951_v26  ;;  %v9887_v16 = vor.u32 %v10809_v15, %v9886_v7  ;;  %v8878_v7 = vld [vmem:[#allocation8 + $0x2e0] sm:$0xf]  ;;  %v10557_v15 = vld [vmem:[#allocation8 + $0x2f8] sm:$0xf0] }
 0x1fb   :  { %5792 = vmatpush.bf16.msrb.mxu3 %v9075_v24  ;;  %v11620_v57 = vpop.f32.mrf.mxu0  ;;  %v3169_v20 = vadd.f32 %v3132_v55, %v3125_v2  ;;  %v3345_v50 = vmax.f32 %v3331_v60, 0.0  ;;  %v3352_v63 = vmax.f32 %v3338_v61, 0.0  ;;  %v10637_v24 = vld [vmem:[#allocation8 + $0x57c] sm:$0xf]  ;;  %v2993_v29 = vpop.f32.mrf.mxu2 }
 0x1fc   :  { %5709 = vmatpush.bf16.msrb.mxu0 %v9267_v8  ;;  %v9211_v31 = vor.u32 %v10637_v24, %v9208_v27  ;;  %v2980_v47 = vadd.f32 %v11599_v5, %v2966_v12  ;;  %v9852_v27 = vld [vmem:[#allocation8 + $0xa9c] sm:$0xf0]  ;;  %v10567_v12 = vld [vmem:[#allocation8 + $0x34c] sm:$0xf] }
 0x1fd   :  { %v3170_v40 = vrot.slane %v3169_v20, 4  ;;  %v11624_v11 = vpack.c.bf16 %v3352_v63, %v3345_v50  ;;  %v10805_v63 = vld [vmem:[#allocation8 + $0xabc] sm:$0xf] }
 0x1fe   :  { %v2994_v55 = vadd.f32 %v2993_v29, %v2980_v47  ;;  %v10568_v47 = vld [vmem:[#allocation8 + $0x354] sm:$0xf] }
 0x1ff   :  { %5793 = vmatpush.bf16.msrb.mxu3 %v9047_v21  ;;  %v3171_v10 = vadd.f32 %v3170_v40, %v3169_v20  ;;  %5629 = vmatmul.bf16.vlgmr.msrb.gmra.mxu2 %v11624_v11  ;;  %v10808_v40 = vld [vmem:[#allocation8 + $0xad0] sm:$0xf0] }
 0x200   :  { %5727 = vmatmul.bf16.vlgmr.msra.gmra.mxu3 %v11624_v11  ;;  %5710 = vmatpush.bf16.msrb.mxu0 %v9239_v17  ;;  %v9879_v50 = vor.u32 %v10808_v40, %v9878_v33 }
 0x201   :  { %v3172_v44 = vrot.slane %v3171_v10, 2 }
 0x202   :  { %5655 = vmatpush.bf16.msrb.mxu1 %v9879_v50 }
 0x203   :  { %5794 = vmatpush.bf16.msrb.mxu3 %v9019_v3  ;;  %v3035_v18 = vpop.f32.mrf.mxu0  ;;  %v3173_v49 = vadd.f32 %v3172_v44, %v3171_v10  ;;  %v9880_v10 = vld [vmem:[#allocation8 + $0xad4] sm:$0xf0] }
 0x204   :  { %5711 = vmatpush.bf16.msrb.mxu0 %v9211_v31  ;;  %v9883_v42 = vor.u32 %v10805_v63, %v9880_v10  ;;  %v10515_v10 = vld [vmem:[#allocation8 + $0x1a8] sm:$0xf0] }
 0x205   :  { %v3174_v30 = vrot.slane %v3173_v49, 1 }
 0x206   :  { %5753 = vmatpush.bf16.msrb.mxu2 %v9883_v42 }
 0x207   :  { %5795 = vmatpush.bf16.msrb.mxu3 %v8991_v37  ;;  %v3175_v14 = vadd.f32 %v3174_v30, %v3173_v49  ;;  %v10798_v49 = vld [vmem:[#allocation8 + $0xa84] sm:$0xf]  ;;  %v9858_v30 = vld [vmem:[#allocation8 + $0xa88] sm:$0xf] }
 0x208   :  { %v3005_v35 = vpop.f32.mrf.mxu1  ;;  %5712 = vmatpush.bf16.msrb.mxu0 %v9183_v41  ;;  %v9855_v31 = vor.u32 %v10798_v49, %v9852_v27  ;;  %v8934_v41 = vld [vmem:[#allocation8 + $0x350] sm:$0xf] }
 0x209   :  { %v3190_v25 = vmul.f32 %v3175_v14, %v11357_v32  ;;  %v3006_v9 = vadd.f32 %v3005_v35, %v2992_v45  ;;  %v3318_v35 = vperm.slane %v11613_v48, 5  ;;  %v8928_v14 = vld [vmem:[#allocation8 + $0x364] sm:$0xf0]  ;;  %v10571_v45 = vld [vmem:[#allocation8 + $0x368] sm:$0xf0] }
 0x20a   :  { %5754 = vmatpush.bf16.msrb.mxu2 %v9855_v31  ;;  %v8850_v31 = vld [vmem:[#allocation8 + $0x2a8] sm:$0xf] }
 0x20b   :  { %5796 = vmatpush.bf16.msrb.mxu3 %v8963_v54  ;;  %v3197_v6 = vadd.f32 1e-05, %v3190_v25  ;;  %v9859_v25 = vor.u32 %v10802_v39, %v9858_v30 }
 0x20d   :  { %10891 = vrsqrt.f32 %v3197_v6  ;;  %vm3255_vm3 = vweird.f32 %v3197_v6 }
 0x20f   :  { %v5588_v52 = vpop.f32.mrf.mxu0  ;;  %5699 = vmatmul.bf16.vlgmr.msra.gmra.mxu2 %v11560_v53  ;;  %5851 = vmatpush.bf16.msra.mxu3 %v9887_v16 }
 0x210   :  { %v3019_v21 = vpop.f32.mrf.mxu3  ;;  %v3007_v2 = vpop.f32.mrf.mxu1  ;;  %5797 = vmatmul.bf16.vlgmr.msrb.gmra.mxu3 %v11560_v53 }
 0x211   :  { %v3020_v46 = vadd.f32 %v3019_v21, %v3006_v9  ;;  %v3008_v34 = vadd.f32 %v3007_v2, %v2994_v55  ;;  %v8931_v21 = vor.u32 %v10567_v12, %v8928_v14  ;;  %v8935_v2 = vor.u32 %v10571_v45, %v8934_v41  ;;  %v10560_v55 = vld [vmem:[#allocation8 + $0x314] sm:$0xf]  ;;  %v10550_v12 = vld [vmem:[#allocation8 + $0x2c0] sm:$0xf0]  ;;  %v10547_v14 = vld [vmem:[#allocation8 + $0x2ac] sm:$0xf] }
 0x213   :  { %v5574_v0 = vpop.f32.mrf.mxu2  ;;  %v11635_v26 = vadd.f32 %v11620_v57, %v3020_v46  ;;  %v10892_v5 = vpop.eup %10891  ;;  %5852 = vmatpush.bf16.msra.mxu3 %v9859_v25  ;;  %v8900_v46 = vld [vmem:[#allocation8 + $0x32c] sm:$0xf0]  ;;  %5775 = vmatpush.bf16.msra.mxu2 %v8935_v2  ;;  %v8816_v2 = vld [vmem:[#allocation8 + $0x284] sm:$0xf0] }
 0x214   :  { %v11632_v58 = vadd.f32 %v5588_v52, %v5574_v0  ;;  %v3250_v28 = vmul.f32 %v10892_v5, %v3197_v6  ;;  %vm3256_vm2 = vweird.f32 %v10892_v5  ;;  %v8936_v6 = vld [vmem:[#allocation8 + $0x36c] sm:$0xf0] }
 0x215   :  { %v3083_v61 = vsel %vm3082_vm1, %v11635_v26, 0.0  ;;  %vm3257_vm4 = vmor %vm3255_vm3, %vm3256_vm2  ;;  %v8939_v0 = vor.u32 %v10568_v47, %v8936_v6  ;;  %v8654_v47 = vld [vmem:[#allocation8 + $0x120] sm:$0xf]  ;;  %v10501_v6 = vld [vmem:[#allocation8 + $0x138] sm:$0xf0] }
 0x216   :  { %v3251_v60 = vmul.f32 %v10892_v5, %v3250_v28 }
 0x217   :  { %5873 = vmatpush.bf16.msrb.mxu3 %v8939_v0  ;;  %v8822_v0 = vld [vmem:[#allocation8 + $0x270] sm:$0xf] }
 0x218   :  { %v3021_v20 = vpop.f32.mrf.mxu3  ;;  %v3252_v57 = vmul.f32 0.5, %v3251_v60  ;;  %v10564_v60 = vld [vmem:[#allocation8 + $0x330] sm:$0xf0] }
 0x219   :  { %v3022_v3 = vadd.f32 %v3021_v20, %v3008_v34  ;;  %v8903_v34 = vor.u32 %v10560_v55, %v8900_v46  ;;  %v8906_v20 = vld [vmem:[#allocation8 + $0x318] sm:$0xf] }
 0x21a   :  { %v3253_v37 = vsub.f32 1.5, %v3252_v57  ;;  %v8907_v57 = vor.u32 %v10564_v60, %v8906_v20  ;;  %v10540_v20 = vld [vmem:[#allocation8 + $0x274] sm:$0xf]  ;;  %v8655_v60 = vor.u32 %v10501_v6, %v8654_v47  ;;  %v8740_v47 = vld [vmem:[#allocation8 + $0x1e4] sm:$0xf0] }
 0x21b   :  { %v11639_v59 = vadd.f32 %v3035_v18, %v3022_v3  ;;  %v10801_v18 = vld [vmem:[#allocation8 + $0xa98] sm:$0xf0] }
 0x21c   :  { %v3254_v17 = vmul.f32 %v10892_v5, %v3253_v37  ;;  %v9851_v24 = vor.u32 %v10801_v18, %v9850_v36  ;;  %v10553_v37 = vld [vmem:[#allocation8 + $0x2dc] sm:$0xf]  ;;  %5776 = vmatpush.bf16.msra.mxu2 %v8907_v57  ;;  %v10554_v36 = vld [vmem:[#allocation8 + $0x2e4] sm:$0xf]  ;;  %v8880_v18 = vld [vmem:[#allocation8 + $0x2fc] sm:$0xf0] }
 0x21d   :  { %v3084_v1 = vsel %vm3082_vm1, %v11639_v59, 0.0  ;;  %v10532_v57 = vld [vmem:[#allocation8 + $0x234] sm:$0xf] }
 0x21e   :  { %v3085_v4 = vadd.f32 %v3084_v1, %v3083_v61  ;;  %v3258_v29 = vsel %vm3257_vm4, %v10892_v5, %v3254_v17  ;;  %5656 = vmatpush.bf16.msrb.mxu1 %v9851_v24  ;;  %v10561_v61 = vld [vmem:[#allocation8 + $0x31c] sm:$0xf]  ;;  %v8908_v1 = vld [vmem:[#allocation8 + $0x334] sm:$0xf0]  ;;  %v8883_v24 = vor.u32 %v10554_v36, %v8880_v18 }
 0x21f   :  { %v3289_v22 = vmul.f32 %v3275_v13, %v3258_v29  ;;  %v8911_v33 = vor.u32 %v10561_v61, %v8908_v1  ;;  %v8844_v29 = vld [vmem:[#allocation8 + $0x2bc] sm:$0xf0]  ;;  %v8626_v61 = vld [vmem:[#allocation8 + $0xe8] sm:$0xf]  ;;  %v10494_v1 = vld [vmem:[#allocation8 + $0x100] sm:$0xf0] }
 0x220   :  { %v3086_v8 = vrot.slane %v3085_v4, 4  ;;  %v10525_v36 = vld [vmem:[#allocation8 + $0x1fc] sm:$0xf]  ;;  %v8760_v18 = vld [vmem:[#allocation8 + $0x214] sm:$0xf0] }
 0x221   :  { %v3296_v9 = vperm.slane %v3289_v22, 0  ;;  %5874 = vmatpush.bf16.msrb.mxu3 %v8911_v33  ;;  %v8852_v22 = vld [vmem:[#allocation8 + $0x2c4] sm:$0xf0]  ;;  %v8788_v33 = vld [vmem:[#allocation8 + $0x24c] sm:$0xf0] }
 0x222   :  { %v3087_v44 = vadd.f32 %v3086_v8, %v3085_v4  ;;  %5677 = vmatpush.bf16.msra.mxu1 %v8931_v21  ;;  %v8710_v4 = vld [vmem:[#allocation8 + $0x190] sm:$0xf]  ;;  %v8851_v21 = vor.u32 %v10550_v12, %v8850_v31  ;;  %v8570_v31 = vld [vmem:[#allocation8 + $0x78] sm:$0xf] }
 0x223   :  { %v3303_v3 = vmul.f32 %v3296_v9, %v11608_v56  ;;  %v3310_v5 = vmul.f32 %v3296_v9, %v11611_v51  ;;  %v8872_v56 = vld [vmem:[#allocation8 + $0x2f4] sm:$0xf0]  ;;  %v8711_v49 = vor.u32 %v10515_v10, %v8710_v4  ;;  %v8855_v9 = vor.u32 %v10547_v14, %v8852_v22  ;;  %v10533_v10 = vld [vmem:[#allocation8 + $0x23c] sm:$0xf]  ;;  %v10518_v14 = vld [vmem:[#allocation8 + $0x1c4] sm:$0xf] }
 0x224   :  { %v3088_v54 = vrot.slane %v3087_v44, 2  ;;  %v8875_v42 = vor.u32 %v10553_v37, %v8872_v56  ;;  %v8796_v56 = vld [vmem:[#allocation8 + $0x254] sm:$0xf0]  ;;  %v8732_v22 = vld [vmem:[#allocation8 + $0x1dc] sm:$0xf0] }
 0x225   :  { %v3332_v40 = vadd.f32 %v3318_v35, %v3303_v3  ;;  %v3339_v8 = vadd.f32 %v3318_v35, %v3310_v5  ;;  %v8682_v35 = vld [vmem:[#allocation8 + $0x158] sm:$0xf]  ;;  %5875 = vmatpush.bf16.msrb.mxu3 %v8883_v24  ;;  %v8824_v5 = vld [vmem:[#allocation8 + $0x28c] sm:$0xf0]  ;;  %v10526_v24 = vld [vmem:[#allocation8 + $0x204] sm:$0xf] }
 0x226   :  { %v3089_v38 = vadd.f32 %v3088_v54, %v3087_v44  ;;  %5678 = vmatpush.bf16.msra.mxu1 %v8903_v34  ;;  %v10508_v54 = vld [vmem:[#allocation8 + $0x170] sm:$0xf0]  ;;  %v10543_v34 = vld [vmem:[#allocation8 + $0x288] sm:$0xf0]  ;;  %v8827_v4 = vor.u32 %v10540_v20, %v8824_v5  ;;  %v10466_v20 = vld [vmem:[#allocation8 + $0x20] sm:$0xf0] }
 0x227   :  { %v3346_v13 = vmax.f32 %v3332_v40, 0.0  ;;  %v3353_v44 = vmax.f32 %v3339_v8, 0.0  ;;  %v8683_v45 = vor.u32 %v10508_v54, %v8682_v35  ;;  %v8823_v3 = vor.u32 %v10543_v34, %v8822_v0  ;;  %v8794_v40 = vld [vmem:[#allocation8 + $0x238] sm:$0xf]  ;;  %v8542_v0 = vld [vmem:[#allocation8 + $0x40] sm:$0xf] }
 0x228   :  { %v3090_v52 = vrot.slane %v3089_v38, 1  ;;  %v5602_v63 = vpop.f32.mrf.mxu1  ;;  %v8763_v54 = vor.u32 %v10525_v36, %v8760_v18  ;;  %v8514_v34 = vld [vmem:[#allocation8 + $0x8] sm:$0xf]  ;;  %v10739_v5 = vld [vmem:[#allocation8 + $0x8a8] sm:$0xf0] }
 0x229   :  { %v11651_v51 = vadd.f32 %v5602_v63, %v11632_v58  ;;  %v8879_v58 = vor.u32 %v10557_v15, %v8878_v7  ;;  %v11659_v27 = vpack.c.bf16 %v3353_v44, %v3346_v13  ;;  %5876 = vmatpush.bf16.msrb.mxu3 %v8855_v9  ;;  %v10536_v63 = vld [vmem:[#allocation8 + $0x250] sm:$0xf0]  ;;  %v8627_v7 = vor.u32 %v10494_v1, %v8626_v61  ;;  %v8598_v15 = vld [vmem:[#allocation8 + $0xb0] sm:$0xf]  ;;  %v10487_v13 = vld [vmem:[#allocation8 + $0xc8] sm:$0xf0] }
 0x22a   :  { %v3091_v28 = vadd.f32 %v3090_v52, %v3089_v38  ;;  %5679 = vmatpush.bf16.msra.mxu1 %v8875_v42  ;;  %v10539_v52 = vld [vmem:[#allocation8 + $0x26c] sm:$0xf]  ;;  %v8795_v37 = vor.u32 %v10536_v63, %v8794_v40  ;;  %v8799_v44 = vor.u32 %v10533_v10, %v8796_v56  ;;  %v10725_v63 = vld [vmem:[#allocation8 + $0x838] sm:$0xf0] }
 0x22b   :  { %5643 = vmatmul.bf16.vlgmr.msra.gmra.mxu0 %v11659_v27  ;;  %5777 = vmatpush.bf16.msra.mxu2 %v8879_v58  ;;  %v8819_v46 = vor.u32 %v10539_v52, %v8816_v2  ;;  %v10529_v58 = vld [vmem:[#allocation8 + $0x218] sm:$0xf0] }
 0x22c   :  { %v3105_v50 = vmul.f32 %v11357_v32, %v3091_v28  ;;  %5761 = vmatpush.bf16.msra.mxu0 %v8711_v49  ;;  %v8766_v49 = vld [vmem:[#allocation8 + $0x200] sm:$0xf] }
 0x22d   :  { %5877 = vmatpush.bf16.msrb.mxu3 %v8827_v4  ;;  %v9578_v4 = vld [vmem:[#allocation8 + $0x858] sm:$0xf] }
 0x22e   :  { %v11654_v16 = vsub.f32 %v11635_v26, %v3105_v50  ;;  %v11657_v17 = vsub.f32 %v11639_v59, %v3105_v50  ;;  %v10546_v59 = vld [vmem:[#allocation8 + $0x2a4] sm:$0xf]  ;;  %v8791_v50 = vor.u32 %v10532_v57, %v8788_v33  ;;  %v10732_v57 = vld [vmem:[#allocation8 + $0x870] sm:$0xf0] }
 0x22f   :  { %v8847_v39 = vor.u32 %v10546_v59, %v8844_v29  ;;  %5778 = vmatpush.bf16.msra.mxu2 %v8851_v21  ;;  %v8599_v29 = vor.u32 %v10487_v13, %v8598_v15  ;;  %v8735_v21 = vor.u32 %v10518_v14, %v8732_v22  ;;  %v10718_v15 = vld [vmem:[#allocation8 + $0x800] sm:$0xf0]  ;;  %v10704_v14 = vld [vmem:[#allocation8 + $0x790] sm:$0xf0]  ;;  %v10795_v22 = vld [vmem:[#allocation8 + $0xa68] sm:$0xf0] }
 0x230   :  { %v3126_v30 = vmul.f32 %v11654_v16, %v11654_v16  ;;  %v3133_v26 = vmul.f32 %v11657_v17, %v11657_v17  ;;  %5762 = vmatpush.bf16.msra.mxu0 %v8683_v45  ;;  %v10519_v45 = vld [vmem:[#allocation8 + $0x1cc] sm:$0xf] }
 0x231   :  { %5680 = vmatpush.bf16.msra.mxu1 %v8847_v39  ;;  %v10480_v39 = vld [vmem:[#allocation8 + $0x90] sm:$0xf0]  ;;  %5878 = vmatpush.bf16.msrb.mxu3 %v8799_v44  ;;  %v8743_v2 = vor.u32 %v10519_v45, %v8740_v47 }
 0x232   :  { %v3176_v38 = vsel %vm3082_vm1, %v3126_v30, 0.0  ;;  %v3177_v25 = vsel %vm3082_vm1, %v3133_v26, 0.0  ;;  %v8767_v30 = vor.u32 %v10529_v58, %v8766_v49  ;;  %v8768_v26 = vld [vmem:[#allocation8 + $0x21c] sm:$0xf0]  ;;  %v8571_v52 = vor.u32 %v10480_v39, %v8570_v31  ;;  %v9494_v58 = vld [vmem:[#allocation8 + $0x7b0] sm:$0xf] }
 0x233   :  { %v3178_v41 = vadd.f32 %v3177_v25, %v3176_v38  ;;  %5779 = vmatpush.bf16.msra.mxu2 %v8823_v3  ;;  %v8771_v12 = vor.u32 %v10526_v24, %v8768_v26  ;;  %v8738_v38 = vld [vmem:[#allocation8 + $0x1c8] sm:$0xf]  ;;  %v9606_v3 = vld [vmem:[#allocation8 + $0x890] sm:$0xf] }
 0x234   :  { %5763 = vmatpush.bf16.msra.mxu0 %v8655_v60  ;;  %v8515_v60 = vor.u32 %v10466_v20, %v8514_v34  ;;  %v9607_v1 = vor.u32 %v10739_v5, %v9606_v3  ;;  %v9824_v39 = vld [vmem:[#allocation8 + $0xa64] sm:$0xf0]  ;;  %v9804_v34 = vld [vmem:[#allocation8 + $0xa34] sm:$0xf0]  ;;  %v10777_v5 = vld [vmem:[#allocation8 + $0x9dc] sm:$0xf] }
 0x235   :  { %v3179_v55 = vrot.slane %v3178_v41, 4  ;;  %5681 = vmatpush.bf16.msra.mxu1 %v8819_v46  ;;  %5879 = vmatpush.bf16.msrb.mxu3 %v8771_v12  ;;  %v9466_v12 = vld [vmem:[#allocation8 + $0x778] sm:$0xf] }
 0x236   :  { %v9467_v45 = vor.u32 %v10704_v14, %v9466_v12  ;;  %v10764_v12 = vld [vmem:[#allocation8 + $0x974] sm:$0xf]  ;;  %v9720_v14 = vld [vmem:[#allocation8 + $0x98c] sm:$0xf0] }
 0x237   :  { %v3180_v28 = vadd.f32 %v3179_v55, %v3178_v41  ;;  %5780 = vmatpush.bf16.msra.mxu2 %v8795_v37  ;;  %v10522_v41 = vld [vmem:[#allocation8 + $0x1e0] sm:$0xf0]  ;;  %v10473_v55 = vld [vmem:[#allocation8 + $0x58] sm:$0xf0]  ;;  %v3276_v37 = vperm.slane %v11601_v19, 6 }
 0x238   :  { %5764 = vmatpush.bf16.msra.mxu0 %v8627_v7  ;;  %v8739_v6 = vor.u32 %v10522_v41, %v8738_v38  ;;  %v8543_v46 = vor.u32 %v10473_v55, %v8542_v0  ;;  %v9522_v7 = vld [vmem:[#allocation8 + $0x7e8] sm:$0xf]  ;;  %v10711_v19 = vld [vmem:[#allocation8 + $0x7c8] sm:$0xf0]  ;;  %v9802_v0 = vld [vmem:[#allocation8 + $0xa18] sm:$0xf] }
 0x239   :  { %v3181_v8 = vrot.slane %v3180_v28, 2  ;;  %5682 = vmatpush.bf16.msra.mxu1 %v8791_v50  ;;  %5880 = vmatpush.bf16.msrb.mxu3 %v8743_v2  ;;  %v9550_v50 = vld [vmem:[#allocation8 + $0x820] sm:$0xf]  ;;  %v9523_v49 = vor.u32 %v10718_v15, %v9522_v7  ;;  %v9495_v26 = vor.u32 %v10711_v19, %v9494_v58  ;;  %v10788_v55 = vld [vmem:[#allocation8 + $0xa30] sm:$0xf0] }
 0x23a   :  { %v10770_v7 = vld [vmem:[#allocation8 + $0x9a4] sm:$0xf]  ;;  %v9740_v15 = vld [vmem:[#allocation8 + $0x9bc] sm:$0xf0]  ;;  %v9748_v58 = vld [vmem:[#allocation8 + $0x9c4] sm:$0xf0] }
 0x23b   :  { %v3182_v42 = vadd.f32 %v3181_v8, %v3180_v28  ;;  %5713 = vmatmul.bf16.vlgmr.msrb.gmra.mxu0 %v11570_v43  ;;  %5781 = vmatpush.bf16.msra.mxu2 %v8767_v30  ;;  %v9579_v8 = vor.u32 %v10732_v57, %v9578_v4  ;;  %v9774_v4 = vld [vmem:[#allocation8 + $0x9e0] sm:$0xf]  ;;  %v9743_v19 = vor.u32 %v10770_v7, %v9740_v15  ;;  %v9382_v7 = vld [vmem:[#allocation8 + $0x6d0] sm:$0xf]  ;;  %v10683_v15 = vld [vmem:[#allocation8 + $0x6e8] sm:$0xf0] }
 0x23c   :  { %5765 = vmatpush.bf16.msra.mxu0 %v8599_v29 }
 0x23d   :  { %v3183_v35 = vrot.slane %v3182_v42, 1  ;;  %5683 = vmatpush.bf16.msra.mxu1 %v8763_v54  ;;  %v3319_v54 = vperm.slane %v11613_v48, 6  ;;  %v9832_v48 = vld [vmem:[#allocation8 + $0xa6c] sm:$0xf0] }
 0x23f   :  { %v3184_v59 = vadd.f32 %v3183_v35, %v3182_v42  ;;  %5782 = vmatpush.bf16.msra.mxu2 %v8739_v6  ;;  %v9551_v42 = vor.u32 %v10725_v63, %v9550_v50  ;;  %v9796_v6 = vld [vmem:[#allocation8 + $0xa2c] sm:$0xf0]  ;;  %v10778_v50 = vld [vmem:[#allocation8 + $0x9e4] sm:$0xf]  ;;  %v9776_v63 = vld [vmem:[#allocation8 + $0x9fc] sm:$0xf0] }
 0x240   :  { %5766 = vmatpush.bf16.msra.mxu0 %v8571_v52  ;;  %v10697_v52 = vld [vmem:[#allocation8 + $0x758] sm:$0xf0] }
 0x241   :  { %v3191_v25 = vmul.f32 %v3184_v59, %v11357_v32  ;;  %5684 = vmatpush.bf16.msra.mxu1 %v8735_v21  ;;  %v10791_v59 = vld [vmem:[#allocation8 + $0xa4c] sm:$0xf]  ;;  %v10792_v21 = vld [vmem:[#allocation8 + $0xa54] sm:$0xf] }
 0x242   :  { %v9827_v41 = vor.u32 %v10791_v59, %v9824_v39  ;;  %v9835_v2 = vor.u32 %v10792_v21, %v9832_v48  ;;  %v9712_v59 = vld [vmem:[#allocation8 + $0x984] sm:$0xf0]  ;;  %v10767_v39 = vld [vmem:[#allocation8 + $0x988] sm:$0xf0]  ;;  %v10756_v21 = vld [vmem:[#allocation8 + $0x934] sm:$0xf] }
 0x243   :  { %v3198_v9 = vadd.f32 1e-05, %v3191_v25  ;;  %v9684_v48 = vld [vmem:[#allocation8 + $0x94c] sm:$0xf0] }
 0x244   :  { %5767 = vmatpush.bf16.msra.mxu0 %v8543_v46  ;;  %v10785_v46 = vld [vmem:[#allocation8 + $0xa1c] sm:$0xf] }
 0x245   :  { %10893 = vrsqrt.f32 %v3198_v9  ;;  %vm3265_vm6 = vweird.f32 %v3198_v9  ;;  %v9807_v57 = vor.u32 %v10785_v46, %v9804_v34  ;;  %v10749_v46 = vld [vmem:[#allocation8 + $0x8fc] sm:$0xf]  ;;  %v9656_v34 = vld [vmem:[#allocation8 + $0x914] sm:$0xf0] }
 0x248   :  { %5768 = vmatpush.bf16.msra.mxu0 %v8515_v60  ;;  %v9803_v60 = vor.u32 %v10788_v55, %v9802_v0  ;;  %v9687_v0 = vor.u32 %v10756_v21, %v9684_v48 }
 0x24b   :  { %v10894_v28 = vpop.eup %10893  ;;  %5769 = vmatmul.bf16.vlgmr.msra.gmra.mxu0 %v11536_v23 }
 0x24c   :  { %v3260_v61 = vmul.f32 %v10894_v28, %v3198_v9  ;;  %5817 = vmatpush.bf16.msrb.mxu0 %v9607_v1  ;;  %vm3266_vm5 = vweird.f32 %v10894_v28  ;;  %v9438_v9 = vld [vmem:[#allocation8 + $0x740] sm:$0xf]  ;;  %v10690_v1 = vld [vmem:[#allocation8 + $0x720] sm:$0xf0] }
 0x24d   :  { %vm3267_vm7 = vmor %vm3265_vm6, %vm3266_vm5  ;;  %v9439_v3 = vor.u32 %v10697_v52, %v9438_v9  ;;  %v9692_v9 = vld [vmem:[#allocation8 + $0x954] sm:$0xf0]  ;;  %v10603_v52 = vld [vmem:[#allocation8 + $0x46c] sm:$0xf] }
 0x24e   :  { %v3261_v33 = vmul.f32 %v10894_v28, %v3260_v61  ;;  %v9410_v61 = vld [vmem:[#allocation8 + $0x708] sm:$0xf] }
 0x250   :  { %v3262_v40 = vmul.f32 0.5, %v3261_v33  ;;  %5818 = vmatpush.bf16.msrb.mxu0 %v9579_v8  ;;  %v10781_v33 = vld [vmem:[#allocation8 + $0x9f8] sm:$0xf0]  ;;  %v9160_v8 = vld [vmem:[#allocation8 + $0x52c] sm:$0xf0] }
 0x251   :  { %v5616_v36 = vpop.f32.mrf.mxu3 }
 0x252   :  { %v3263_v10 = vsub.f32 1.5, %v3262_v40  ;;  %v11673_v18 = vadd.f32 %v5616_v36, %v11651_v51  ;;  %v9830_v51 = vld [vmem:[#allocation8 + $0xa50] sm:$0xf]  ;;  %v10624_v40 = vld [vmem:[#allocation8 + $0x514] sm:$0xf] }
 0x253   :  { %v10774_v36 = vld [vmem:[#allocation8 + $0x9c0] sm:$0xf0] }
 0x254   :  { %v3264_v56 = vmul.f32 %v10894_v28, %v3263_v10  ;;  %5819 = vmatpush.bf16.msrb.mxu0 %v9551_v42  ;;  %v9163_v42 = vor.u32 %v10624_v40, %v9160_v8  ;;  %v9628_v40 = vld [vmem:[#allocation8 + $0x8dc] sm:$0xf0] }
 0x256   :  { %v3268_v13 = vsel %vm3267_vm7, %v10894_v28, %v3264_v56  ;;  %v9768_v28 = vld [vmem:[#allocation8 + $0x9f4] sm:$0xf0]  ;;  %v9775_v56 = vor.u32 %v10781_v33, %v9774_v4  ;;  %v9048_v4 = vld [vmem:[#allocation8 + $0x44c] sm:$0xf0]  ;;  %v10742_v33 = vld [vmem:[#allocation8 + $0x8c4] sm:$0xf] }
 0x257   :  { %v3290_v44 = vmul.f32 %v3276_v37, %v3268_v13  ;;  %v9771_v10 = vor.u32 %v10777_v5, %v9768_v28  ;;  %v9411_v37 = vor.u32 %v10690_v1, %v9410_v61  ;;  %v9746_v13 = vld [vmem:[#allocation8 + $0x9a8] sm:$0xf]  ;;  %v9662_v5 = vld [vmem:[#allocation8 + $0x900] sm:$0xf]  ;;  %v10753_v28 = vld [vmem:[#allocation8 + $0x918] sm:$0xf0] }
 0x258   :  { %5820 = vmatpush.bf16.msrb.mxu0 %v9523_v49  ;;  %v10617_v49 = vld [vmem:[#allocation8 + $0x4dc] sm:$0xf]  ;;  %v9664_v61 = vld [vmem:[#allocation8 + $0x91c] sm:$0xf0]  ;;  %v10596_v1 = vld [vmem:[#allocation8 + $0x434] sm:$0xf]  ;;  %v9663_v8 = vor.u32 %v10753_v28, %v9662_v5 }
 0x259   :  { %v3297_v35 = vperm.slane %v3290_v44, 0  ;;  %v9779_v44 = vor.u32 %v10778_v50, %v9776_v63  ;;  %v9634_v50 = vld [vmem:[#allocation8 + $0x8c8] sm:$0xf]  ;;  %v10746_v63 = vld [vmem:[#allocation8 + $0x8e0] sm:$0xf0] }
 0x25a   :  { %v9298_v28 = vld [vmem:[#allocation8 + $0x628] sm:$0xf] }
 0x25b   :  { %v3304_v24 = vmul.f32 %v3297_v35, %v11654_v16  ;;  %v3311_v30 = vmul.f32 %v3297_v35, %v11657_v17  ;;  %v10784_v16 = vld [vmem:[#allocation8 + $0xa14] sm:$0xf]  ;;  %v9831_v17 = vor.u32 %v10795_v22, %v9830_v51  ;;  %v9132_v35 = vld [vmem:[#allocation8 + $0x4f4] sm:$0xf0]  ;;  %v10610_v51 = vld [vmem:[#allocation8 + $0x4a4] sm:$0xf] }
 0x25c   :  { %5821 = vmatpush.bf16.msrb.mxu0 %v9495_v26  ;;  %v9799_v20 = vor.u32 %v10784_v16, %v9796_v6  ;;  %v10763_v26 = vld [vmem:[#allocation8 + $0x96c] sm:$0xf]  ;;  %v9104_v22 = vld [vmem:[#allocation8 + $0x4bc] sm:$0xf0]  ;;  %v9690_v16 = vld [vmem:[#allocation8 + $0x938] sm:$0xf] }
 0x25d   :  { %v3333_v29 = vadd.f32 %v3319_v54, %v3304_v24  ;;  %v3340_v31 = vadd.f32 %v3319_v54, %v3311_v30  ;;  %v10771_v54 = vld [vmem:[#allocation8 + $0x9ac] sm:$0xf]  ;;  %v9747_v24 = vor.u32 %v10774_v36, %v9746_v13  ;;  %v9135_v30 = vor.u32 %v10617_v49, %v9132_v35  ;;  %v10757_v6 = vld [vmem:[#allocation8 + $0x93c] sm:$0xf]  ;;  %v10680_v36 = vld [vmem:[#allocation8 + $0x6d4] sm:$0xf] }
 0x25e   :  { %v10589_v13 = vld [vmem:[#allocation8 + $0x3fc] sm:$0xf]  ;;  %v9631_v49 = vor.u32 %v10742_v33, %v9628_v40  ;;  %v9384_v35 = vld [vmem:[#allocation8 + $0x6ec] sm:$0xf0]  ;;  %v9300_v33 = vld [vmem:[#allocation8 + $0x644] sm:$0xf0] }
 0x25f   :  { %v3347_v38 = vmax.f32 %v3333_v29, 0.0  ;;  %v3354_v25 = vmax.f32 %v3340_v31, 0.0  ;;  %v9751_v29 = vor.u32 %v10771_v54, %v9748_v58  ;;  %v9718_v31 = vld [vmem:[#allocation8 + $0x970] sm:$0xf]  ;;  %v9390_v54 = vld [vmem:[#allocation8 + $0x6d8] sm:$0xf] }
 0x260   :  { %5822 = vmatpush.bf16.msrb.mxu0 %v9467_v45  ;;  %v9107_v45 = vor.u32 %v10610_v51, %v9104_v22  ;;  %v10684_v58 = vld [vmem:[#allocation8 + $0x6f0] sm:$0xf0]  ;;  %v10673_v51 = vld [vmem:[#allocation8 + $0x69c] sm:$0xf]  ;;  %v9356_v22 = vld [vmem:[#allocation8 + $0x6b4] sm:$0xf0] }
 0x261   :  { %v11678_v47 = vpack.c.bf16 %v3354_v25, %v3347_v38  ;;  %v9715_v38 = vor.u32 %v10763_v26, %v9712_v59  ;;  %v9719_v25 = vor.u32 %v10767_v39, %v9718_v31  ;;  %v9354_v59 = vld [vmem:[#allocation8 + $0x698] sm:$0xf]  ;;  %v9387_v31 = vor.u32 %v10680_v36, %v9384_v35  ;;  %v9306_v40 = vld [vmem:[#allocation8 + $0x630] sm:$0xf] }
 0x262   :  { %v9391_v39 = vor.u32 %v10684_v58, %v9390_v54  ;;  %v9272_v35 = vld [vmem:[#allocation8 + $0x60c] sm:$0xf0]  ;;  %v9278_v54 = vld [vmem:[#allocation8 + $0x5f8] sm:$0xf]  ;;  %v10656_v58 = vld [vmem:[#allocation8 + $0x610] sm:$0xf0] }
 0x263   :  { %9904 = vmatmul.msk.bf16.vlgmr.msrb.gmra.mxu1 %vm3082_vm1, %v11678_v47  ;;  %9905 = vmatmul.msk.bf16.vlgmr.msrb.gmra.mxu2 %vm3082_vm1, %v11678_v47 }
 0x264   :  { %5733 = vmatpush.bf16.msrb.mxu1 %v9827_v41  ;;  %5831 = vmatpush.bf16.msrb.mxu2 %v9831_v17  ;;  %v9723_v41 = vor.u32 %v10764_v12, %v9720_v14  ;;  %v10760_v17 = vld [vmem:[#allocation8 + $0x950] sm:$0xf0]  ;;  %v10582_v12 = vld [vmem:[#allocation8 + $0x3c4] sm:$0xf]  ;;  %v8992_v14 = vld [vmem:[#allocation8 + $0x3dc] sm:$0xf0] }
 0x265   :  { %9906 = vmatmul.msk.bf16.vlgmr.msra.gmra.mxu3 %vm3082_vm1, %v11678_v47  ;;  %5823 = vmatpush.bf16.msrb.mxu0 %v9439_v3  ;;  %v9691_v55 = vor.u32 %v10760_v17, %v9690_v16  ;;  %v8995_v48 = vor.u32 %v10582_v12, %v8992_v14  ;;  %v9359_v16 = vor.u32 %v10673_v51, %v9356_v22  ;;  %v10645_v14 = vld [vmem:[#allocation8 + $0x5bc] sm:$0xf]  ;;  %v9244_v51 = vld [vmem:[#allocation8 + $0x5d4] sm:$0xf0]  ;;  %v9250_v22 = vld [vmem:[#allocation8 + $0x5c0] sm:$0xf] }
 0x266   :  { %5929 = vmatpush.bf16.msra.mxu3 %v9835_v2  ;;  %v9076_v2 = vld [vmem:[#allocation8 + $0x484] sm:$0xf0]  ;;  %v9279_v12 = vor.u32 %v10656_v58, %v9278_v54  ;;  %v8684_v54 = vld [vmem:[#allocation8 + $0x174] sm:$0xf0]  ;;  %v8690_v58 = vld [vmem:[#allocation8 + $0x160] sm:$0xf] }
 0x267   :  { %v9079_v3 = vor.u32 %v10603_v52, %v9076_v2  ;;  %v10666_v52 = vld [vmem:[#allocation8 + $0x664] sm:$0xf]  ;;  %v11690_v2 = vpop.f32.mrf.mxu2 }
 0x268   :  { %5734 = vmatpush.bf16.msrb.mxu1 %v9799_v20  ;;  %5832 = vmatpush.bf16.msrb.mxu2 %v9803_v60  ;;  %v9695_v20 = vor.u32 %v10757_v6, %v9692_v9  ;;  %v10750_v60 = vld [vmem:[#allocation8 + $0x904] sm:$0xf]  ;;  %v10575_v6 = vld [vmem:[#allocation8 + $0x38c] sm:$0xf]  ;;  %v8964_v9 = vld [vmem:[#allocation8 + $0x3a4] sm:$0xf0] }
 0x269   :  { %5824 = vmatpush.bf16.msrb.mxu0 %v9411_v37  ;;  %v9667_v37 = vor.u32 %v10750_v60, %v9664_v61  ;;  %v8967_v5 = vor.u32 %v10575_v6, %v8964_v9  ;;  %v10662_v60 = vld [vmem:[#allocation8 + $0x640] sm:$0xf0]  ;;  %v9216_v9 = vld [vmem:[#allocation8 + $0x59c] sm:$0xf0] }
 0x26a   :  { %5930 = vmatpush.bf16.msra.mxu3 %v9807_v57  ;;  %v9659_v57 = vor.u32 %v10749_v46, %v9656_v34  ;;  %v10670_v46 = vld [vmem:[#allocation8 + $0x680] sm:$0xf0] }
 0x26b   :  { %v10638_v6 = vld [vmem:[#allocation8 + $0x584] sm:$0xf] }
 0x26c   :  { %5735 = vmatpush.bf16.msrb.mxu1 %v9771_v10  ;;  %5833 = vmatpush.bf16.msrb.mxu2 %v9775_v56  ;;  %v10743_v10 = vld [vmem:[#allocation8 + $0x8cc] sm:$0xf]  ;;  %v9051_v56 = vor.u32 %v10596_v1, %v9048_v4 }
 0x26d   :  { %5887 = vmatpush.bf16.msra.mxu0 %v9163_v42  ;;  %v9636_v42 = vld [vmem:[#allocation8 + $0x8e4] sm:$0xf0]  ;;  %v10659_v4 = vld [vmem:[#allocation8 + $0x62c] sm:$0xf] }
 0x26e   :  { %5931 = vmatpush.bf16.msra.mxu3 %v9779_v44  ;;  %5825 = vmatmul.bf16.vlgmr.msrb.gmra.mxu0 %v11624_v11  ;;  %v9020_v44 = vld [vmem:[#allocation8 + $0x414] sm:$0xf0] }
 0x26f   :  { %v9023_v26 = vor.u32 %v10589_v13, %v9020_v44  ;;  %v10652_v44 = vld [vmem:[#allocation8 + $0x5f4] sm:$0xf] }
 0x270   :  { %5736 = vmatpush.bf16.msrb.mxu1 %v9743_v19  ;;  %5834 = vmatpush.bf16.msrb.mxu2 %v9747_v24  ;;  %v9635_v19 = vor.u32 %v10746_v63, %v9634_v50  ;;  %v9383_v24 = vor.u32 %v10683_v15, %v9382_v7  ;;  %v9299_v50 = vor.u32 %v10662_v60, %v9298_v28  ;;  %v10799_v63 = vld [vmem:[#allocation8 + $0xa8c] sm:$0xf] }
 0x271   :  { %5888 = vmatpush.bf16.msra.mxu0 %v9135_v30  ;;  %v9639_v30 = vor.u32 %v10743_v10, %v9636_v42  ;;  %v9860_v10 = vld [vmem:[#allocation8 + $0xaa4] sm:$0xf0]  ;;  %v9270_v42 = vld [vmem:[#allocation8 + $0x5f0] sm:$0xf]  ;;  %v10655_v7 = vld [vmem:[#allocation8 + $0x608] sm:$0xf0]  ;;  %v9303_v15 = vor.u32 %v10659_v4, %v9300_v33  ;;  %v9219_v60 = vor.u32 %v10638_v6, %v9216_v9 }
 0x272   :  { %5932 = vmatpush.bf16.msra.mxu3 %v9751_v29  ;;  %v10676_v29 = vld [vmem:[#allocation8 + $0x6b0] sm:$0xf0]  ;;  %v10631_v28 = vld [vmem:[#allocation8 + $0x54c] sm:$0xf]  ;;  %v9194_v33 = vld [vmem:[#allocation8 + $0x550] sm:$0xf] }
 0x273   :  { %5685 = vmatmul.bf16.vlgmr.msra.gmra.mxu1 %v11540_v62  ;;  %5783 = vmatmul.bf16.vlgmr.msra.gmra.mxu2 %v11540_v62  ;;  %v9355_v21 = vor.u32 %v10676_v29, %v9354_v59  ;;  %v10565_v59 = vld [vmem:[#allocation8 + $0x338] sm:$0xf0]  ;;  %v9242_v29 = vld [vmem:[#allocation8 + $0x5b8] sm:$0xf]  ;;  %v10512_v4 = vld [vmem:[#allocation8 + $0x194] sm:$0xf] }
 0x274   :  { %5737 = vmatpush.bf16.msrb.mxu1 %v9715_v38  ;;  %5835 = vmatpush.bf16.msrb.mxu2 %v9719_v25  ;;  %v9362_v38 = vld [vmem:[#allocation8 + $0x6a0] sm:$0xf]  ;;  %v10677_v25 = vld [vmem:[#allocation8 + $0x6b8] sm:$0xf0]  ;;  %v10491_v9 = vld [vmem:[#allocation8 + $0xec] sm:$0xf] }
 0x275   :  { %5881 = vmatmul.bf16.vlgmr.msrb.gmra.mxu3 %v11540_v62  ;;  %5889 = vmatpush.bf16.msra.mxu0 %v9107_v45  ;;  %v10669_v45 = vld [vmem:[#allocation8 + $0x678] sm:$0xf0]  ;;  %v9363_v17 = vor.u32 %v10677_v25, %v9362_v38 }
 0x276   :  { %5933 = vmatpush.bf16.msra.mxu3 %v9723_v41  ;;  %v9326_v41 = vld [vmem:[#allocation8 + $0x660] sm:$0xf]  ;;  %v10649_v38 = vld [vmem:[#allocation8 + $0x5d8] sm:$0xf0] }
 0x277   :  { %v9327_v34 = vor.u32 %v10669_v45, %v9326_v41  ;;  %v9214_v41 = vld [vmem:[#allocation8 + $0x580] sm:$0xf]  ;;  %v10641_v45 = vld [vmem:[#allocation8 + $0x598] sm:$0xf0] }
 0x278   :  { %5738 = vmatpush.bf16.msrb.mxu1 %v9687_v0  ;;  %5836 = vmatpush.bf16.msrb.mxu2 %v9691_v55  ;;  %v9328_v0 = vld [vmem:[#allocation8 + $0x67c] sm:$0xf0]  ;;  %v9334_v55 = vld [vmem:[#allocation8 + $0x668] sm:$0xf] }
 0x279   :  { %5890 = vmatpush.bf16.msra.mxu0 %v9079_v3  ;;  %v9888_v3 = vld [vmem:[#allocation8 + $0xadc] sm:$0xf0]  ;;  %v9331_v61 = vor.u32 %v10666_v52, %v9328_v0  ;;  %v9335_v1 = vor.u32 %v10670_v46, %v9334_v55  ;;  %v9222_v52 = vld [vmem:[#allocation8 + $0x588] sm:$0xf]  ;;  %v10642_v0 = vld [vmem:[#allocation8 + $0x5a0] sm:$0xf0]  ;;  %v9215_v46 = vor.u32 %v10641_v45, %v9214_v41 }
 0x27a   :  { %5934 = vmatpush.bf16.msra.mxu3 %v9695_v20  ;;  %v10806_v20 = vld [vmem:[#allocation8 + $0xac4] sm:$0xf]  ;;  %v8774_v41 = vld [vmem:[#allocation8 + $0x208] sm:$0xf] }
 0x27b   :  { %v10530_v45 = vld [vmem:[#allocation8 + $0x220] sm:$0xf0] }
 0x27c   :  { %5739 = vmatpush.bf16.msrb.mxu1 %v9659_v57  ;;  %5837 = vmatpush.bf16.msrb.mxu2 %v9663_v8  ;;  %v9891_v57 = vor.u32 %v10806_v20, %v9888_v3  ;;  %v10663_v8 = vld [vmem:[#allocation8 + $0x648] sm:$0xf0]  ;;  %v9186_v3 = vld [vmem:[#allocation8 + $0x548] sm:$0xf] }
 0x27d   :  { %5891 = vmatpush.bf16.msra.mxu0 %v9051_v56  ;;  %v10572_v56 = vld [vmem:[#allocation8 + $0x370] sm:$0xf0]  ;;  %v9307_v13 = vor.u32 %v10663_v8, %v9306_v40  ;;  %v10551_v20 = vld [vmem:[#allocation8 + $0x2c8] sm:$0xf0]  ;;  %v8718_v8 = vld [vmem:[#allocation8 + $0x198] sm:$0xf] }
 0x27e   :  { %5935 = vmatpush.bf16.msra.mxu3 %v9667_v37  ;;  %v8942_v37 = vld [vmem:[#allocation8 + $0x358] sm:$0xf]  ;;  %v10635_v40 = vld [vmem:[#allocation8 + $0x568] sm:$0xf0] }
 0x280   :  { %5740 = vmatpush.bf16.msrb.mxu1 %v9631_v49  ;;  %5838 = vmatpush.bf16.msrb.mxu2 %v9635_v19  ;;  %v9863_v49 = vor.u32 %v10799_v63, %v9860_v10  ;;  %v10516_v10 = vld [vmem:[#allocation8 + $0x1b0] sm:$0xf0] }
 0x281   :  { %5892 = vmatpush.bf16.msra.mxu0 %v9023_v26  ;;  %v8914_v26 = vld [vmem:[#allocation8 + $0x320] sm:$0xf] }
 0x282   :  { %5936 = vmatpush.bf16.msra.mxu3 %v9639_v30  ;;  %v5630_v36 = vpop.f32.mrf.mxu2  ;;  %v9271_v30 = vor.u32 %v10655_v7, %v9270_v42  ;;  %v8830_v7 = vld [vmem:[#allocation8 + $0x278] sm:$0xf] }
 0x283   :  { %5741 = vmatmul.bf16.vlgmr.msrb.gmra.mxu1 %v11659_v27  ;;  %5839 = vmatmul.bf16.vlgmr.msrb.gmra.mxu2 %v11659_v27  ;;  %v11697_v19 = vadd.f32 %v5630_v36, %v11673_v18  ;;  %v8915_v18 = vor.u32 %v10565_v59, %v8914_v26  ;;  %v8719_v36 = vor.u32 %v10516_v10, %v8718_v8  ;;  %v10506_v26 = vld [vmem:[#allocation8 + $0x164] sm:$0xf]  ;;  %v8692_v59 = vld [vmem:[#allocation8 + $0x17c] sm:$0xf0]  ;;  %v8606_v8 = vld [vmem:[#allocation8 + $0xb8] sm:$0xf] }
 0x284   :  { %5803 = vmatpush.bf16.msra.mxu1 %v9383_v24  ;;  %5901 = vmatpush.bf16.msra.mxu2 %v9387_v31  ;;  %v8943_v24 = vor.u32 %v10572_v56, %v8942_v37  ;;  %v10648_v31 = vld [vmem:[#allocation8 + $0x5d0] sm:$0xf0]  ;;  %v10513_v37 = vld [vmem:[#allocation8 + $0x19c] sm:$0xf]  ;;  %v8720_v56 = vld [vmem:[#allocation8 + $0x1b4] sm:$0xf0] }
 0x285   :  { %5937 = vmatmul.bf16.vlgmr.msra.gmra.mxu3 %v11659_v27  ;;  %5893 = vmatpush.bf16.msra.mxu0 %v8995_v48  ;;  %v9243_v25 = vor.u32 %v10648_v31, %v9242_v29  ;;  %v10558_v48 = vld [vmem:[#allocation8 + $0x300] sm:$0xf0]  ;;  %v8802_v29 = vld [vmem:[#allocation8 + $0x240] sm:$0xf]  ;;  %v10537_v31 = vld [vmem:[#allocation8 + $0x258] sm:$0xf0] }
 0x286   :  { %5999 = vmatpush.bf16.msrb.mxu3 %v9391_v39  ;;  %v9275_v39 = vor.u32 %v10652_v44, %v9272_v35  ;;  %v9195_v44 = vor.u32 %v10635_v40, %v9194_v33  ;;  %v10505_v35 = vld [vmem:[#allocation8 + $0x15c] sm:$0xf]  ;;  %v8600_v33 = vld [vmem:[#allocation8 + $0xcc] sm:$0xf0] }
 0x287   :  { %v10485_v10 = vld [vmem:[#allocation8 + $0xbc] sm:$0xf] }
 0x288   :  { %5804 = vmatpush.bf16.msra.mxu1 %v9355_v21  ;;  %5902 = vmatpush.bf16.msra.mxu2 %v9359_v16  ;;  %v8886_v21 = vld [vmem:[#allocation8 + $0x2e8] sm:$0xf]  ;;  %v9247_v16 = vor.u32 %v10645_v14, %v9244_v51  ;;  %v8695_v14 = vor.u32 %v10506_v26, %v8692_v59  ;;  %v10498_v51 = vld [vmem:[#allocation8 + $0x124] sm:$0xf] }
 0x289   :  { %5894 = vmatpush.bf16.msra.mxu0 %v8967_v5  ;;  %v8887_v55 = vor.u32 %v10558_v48, %v8886_v21  ;;  %v10634_v5 = vld [vmem:[#allocation8 + $0x560] sm:$0xf0]  ;;  %v10499_v21 = vld [vmem:[#allocation8 + $0x12c] sm:$0xf]  ;;  %v8664_v48 = vld [vmem:[#allocation8 + $0x144] sm:$0xf0] }
 0x28a   :  { %6000 = vmatpush.bf16.msrb.mxu3 %v9363_v17  ;;  %v9251_v17 = vor.u32 %v10649_v38, %v9250_v22  ;;  %v9187_v63 = vor.u32 %v10634_v5, %v9186_v3  ;;  %v8656_v22 = vld [vmem:[#allocation8 + $0x13c] sm:$0xf0]  ;;  %v8662_v38 = vld [vmem:[#allocation8 + $0x128] sm:$0xf]  ;;  %v8667_v6 = vor.u32 %v10499_v21, %v8664_v48  ;;  %v8746_v3 = vld [vmem:[#allocation8 + $0x1d0] sm:$0xf] }
 0x28b   :  { %v10523_v5 = vld [vmem:[#allocation8 + $0x1e8] sm:$0xf0]  ;;  %v9782_v26 = vld [vmem:[#allocation8 + $0x9e8] sm:$0xf]  ;;  %v10782_v59 = vld [vmem:[#allocation8 + $0xa00] sm:$0xf0] }
 0x28c   :  { %5805 = vmatpush.bf16.msra.mxu1 %v9327_v34  ;;  %5903 = vmatpush.bf16.msra.mxu2 %v9331_v61  ;;  %v8858_v34 = vld [vmem:[#allocation8 + $0x2b0] sm:$0xf]  ;;  %v9223_v61 = vor.u32 %v10642_v0, %v9222_v52  ;;  %v8628_v52 = vld [vmem:[#allocation8 + $0x104] sm:$0xf0]  ;;  %v8747_v40 = vor.u32 %v10523_v5, %v8746_v3  ;;  %v10775_v48 = vld [vmem:[#allocation8 + $0x9c8] sm:$0xf0] }
 0x28d   :  { %5949 = vmatpush.bf16.msrb.mxu0 %v9891_v57  ;;  %v8712_v57 = vld [vmem:[#allocation8 + $0x1ac] sm:$0xf0]  ;;  %v10740_v3 = vld [vmem:[#allocation8 + $0x8b0] sm:$0xf0]  ;;  %v10737_v5 = vld [vmem:[#allocation8 + $0x89c] sm:$0xf] }
 0x28e   :  { %6001 = vmatpush.bf16.msrb.mxu3 %v9335_v1  ;;  %5895 = vmatmul.bf16.vlgmr.msra.gmra.mxu0 %v11560_v53  ;;  %v9188_v1 = vld [vmem:[#allocation8 + $0x564] sm:$0xf0]  ;;  %v8715_v42 = vor.u32 %v10512_v4, %v8712_v57  ;;  %v8634_v0 = vld [vmem:[#allocation8 + $0xf0] sm:$0xf]  ;;  %v10484_v57 = vld [vmem:[#allocation8 + $0xb4] sm:$0xf] }
 0x290   :  { %5806 = vmatpush.bf16.msra.mxu1 %v9299_v50  ;;  %5904 = vmatpush.bf16.msra.mxu2 %v9303_v15  ;;  %v8859_v50 = vor.u32 %v10551_v20, %v8858_v34  ;;  %v10544_v15 = vld [vmem:[#allocation8 + $0x290] sm:$0xf0]  ;;  %v8636_v20 = vld [vmem:[#allocation8 + $0x10c] sm:$0xf0] }
 0x291   :  { %5950 = vmatpush.bf16.msrb.mxu0 %v9863_v49  ;;  %v8723_v49 = vor.u32 %v10513_v37, %v8720_v56  ;;  %v10492_v34 = vld [vmem:[#allocation8 + $0xf4] sm:$0xf]  ;;  %v8608_v37 = vld [vmem:[#allocation8 + $0xd4] sm:$0xf0]  ;;  %v8603_v56 = vor.u32 %v10484_v57, %v8600_v33 }
 0x292   :  { %6002 = vmatpush.bf16.msrb.mxu3 %v9307_v13  ;;  %v9191_v13 = vor.u32 %v10631_v28, %v9188_v1  ;;  %v8631_v28 = vor.u32 %v10491_v9, %v8628_v52  ;;  %v8639_v4 = vor.u32 %v10492_v34, %v8636_v20  ;;  %v10464_v9 = vld [vmem:[#allocation8 + $0x14] sm:$0xf]  ;;  %v9614_v20 = vld [vmem:[#allocation8 + $0x898] sm:$0xf] }
 0x294   :  { %5807 = vmatpush.bf16.msra.mxu1 %v9271_v30  ;;  %5905 = vmatpush.bf16.msra.mxu2 %v9275_v39  ;;  %v10509_v30 = vld [vmem:[#allocation8 + $0x178] sm:$0xf0]  ;;  %v8687_v39 = vor.u32 %v10505_v35, %v8684_v54 }
 0x295   :  { %5971 = vmatpush.bf16.msra.mxu0 %v8943_v24  ;;  %v8831_v24 = vor.u32 %v10544_v15, %v8830_v7  ;;  %v10789_v7 = vld [vmem:[#allocation8 + $0xa38] sm:$0xf0] }
 0x296   :  { %6003 = vmatpush.bf16.msrb.mxu3 %v9279_v12  ;;  %v8691_v12 = vor.u32 %v10509_v30, %v8690_v58  ;;  %v10481_v35 = vld [vmem:[#allocation8 + $0x98] sm:$0xf0]  ;;  %v10478_v58 = vld [vmem:[#allocation8 + $0x84] sm:$0xf] }
 0x298   :  { %5808 = vmatpush.bf16.msra.mxu1 %v9243_v25  ;;  %5906 = vmatpush.bf16.msra.mxu2 %v9247_v16  ;;  %v10502_v25 = vld [vmem:[#allocation8 + $0x140] sm:$0xf0]  ;;  %v8659_v16 = vor.u32 %v10498_v51, %v8656_v22  ;;  %v9783_v22 = vor.u32 %v10782_v59, %v9782_v26  ;;  %v10723_v26 = vld [vmem:[#allocation8 + $0x82c] sm:$0xf]  ;;  %v9560_v59 = vld [vmem:[#allocation8 + $0x844] sm:$0xf0] }
 0x299   :  { %5972 = vmatpush.bf16.msra.mxu0 %v8915_v18  ;;  %v8803_v18 = vor.u32 %v10537_v31, %v8802_v29  ;;  %v10470_v31 = vld [vmem:[#allocation8 + $0x44] sm:$0xf] }
 0x29a   :  { %6004 = vmatpush.bf16.msrb.mxu3 %v9251_v17  ;;  %v8663_v17 = vor.u32 %v10502_v25, %v8662_v38  ;;  %v10474_v51 = vld [vmem:[#allocation8 + $0x60] sm:$0xf0]  ;;  %v10471_v38 = vld [vmem:[#allocation8 + $0x4c] sm:$0xf]  ;;  %v9754_v25 = vld [vmem:[#allocation8 + $0x9b0] sm:$0xf] }
 0x29b   :  { %v9755_v34 = vor.u32 %v10775_v48, %v9754_v25  ;;  %v10719_v25 = vld [vmem:[#allocation8 + $0x808] sm:$0xf0]  ;;  %v9532_v48 = vld [vmem:[#allocation8 + $0x80c] sm:$0xf0] }
 0x29c   :  { %5809 = vmatpush.bf16.msra.mxu1 %v9215_v46  ;;  %5907 = vmatpush.bf16.msra.mxu2 %v9219_v60  ;;  %v10495_v46 = vld [vmem:[#allocation8 + $0x108] sm:$0xf0]  ;;  %v9838_v60 = vld [vmem:[#allocation8 + $0xa58] sm:$0xf] }
 0x29d   :  { %5973 = vmatpush.bf16.msra.mxu0 %v8887_v55  ;;  %v8775_v55 = vor.u32 %v10530_v45, %v8774_v41  ;;  %v8635_v1 = vor.u32 %v10495_v46, %v8634_v0  ;;  %v10463_v41 = vld [vmem:[#allocation8 + $0xc] sm:$0xf]  ;;  %v8516_v45 = vld [vmem:[#allocation8 + $0x24] sm:$0xf0]  ;;  %v8524_v0 = vld [vmem:[#allocation8 + $0x2c] sm:$0xf0] }
 0x29e   :  { %6005 = vmatpush.bf16.msrb.mxu3 %v9223_v61  ;;  %9907 = vmatmul.msk.bf16.vlgmr.msrb.gmra.mxu0 %vm3082_vm1, %v11678_v47  ;;  %v10796_v61 = vld [vmem:[#allocation8 + $0xa70] sm:$0xf0]  ;;  %v9608_v46 = vld [vmem:[#allocation8 + $0x8ac] sm:$0xf0]  ;;  %v8527_v33 = vor.u32 %v10464_v9, %v8524_v0 }
 0x29f   :  { %v9496_v0 = vld [vmem:[#allocation8 + $0x7cc] sm:$0xf0] }
 0x2a0   :  { %5810 = vmatpush.bf16.msra.mxu1 %v9187_v63  ;;  %5908 = vmatpush.bf16.msra.mxu2 %v9191_v13  ;;  %v9839_v63 = vor.u32 %v10796_v61, %v9838_v60  ;;  %v10477_v13 = vld [vmem:[#allocation8 + $0x7c] sm:$0xf]  ;;  %v9616_v60 = vld [vmem:[#allocation8 + $0x8b4] sm:$0xf0] }
 0x2a1   :  { %5974 = vmatpush.bf16.msra.mxu0 %v8859_v50  ;;  %v10488_v50 = vld [vmem:[#allocation8 + $0xd0] sm:$0xf0]  ;;  %v9726_v61 = vld [vmem:[#allocation8 + $0x978] sm:$0xf] }
 0x2a2   :  { %6006 = vmatpush.bf16.msrb.mxu3 %v9195_v44  ;;  %v8607_v15 = vor.u32 %v10488_v50, %v8606_v8  ;;  %v8572_v44 = vld [vmem:[#allocation8 + $0x94] sm:$0xf0]  ;;  %v10729_v8 = vld [vmem:[#allocation8 + $0x85c] sm:$0xf] }
 0x2a3   :  { %5811 = vmatmul.bf16.vlgmr.msra.gmra.mxu1 %v11570_v43  ;;  %5909 = vmatmul.bf16.vlgmr.msra.gmra.mxu2 %v11570_v43  ;;  %v8575_v30 = vor.u32 %v10477_v13, %v8572_v44  ;;  %v9580_v50 = vld [vmem:[#allocation8 + $0x874] sm:$0xf0]  ;;  %v10761_v13 = vld [vmem:[#allocation8 + $0x958] sm:$0xf0] }
 0x2a4   :  { %5859 = vmatpush.bf16.msrb.mxu1 %v8715_v42  ;;  %5957 = vmatpush.bf16.msrb.mxu2 %v8719_v36  ;;  %v9810_v42 = vld [vmem:[#allocation8 + $0xa20] sm:$0xf]  ;;  %v8611_v36 = vor.u32 %v10485_v10, %v8608_v37  ;;  %v9583_v44 = vor.u32 %v10729_v8, %v9580_v50  ;;  %v10705_v50 = vld [vmem:[#allocation8 + $0x798] sm:$0xf0] }
 0x2a5   :  { %5975 = vmatpush.bf16.msra.mxu0 %v8831_v24  ;;  %6007 = vmatmul.bf16.vlgmr.msrb.gmra.mxu3 %v11570_v43  ;;  %v9811_v54 = vor.u32 %v10789_v7, %v9810_v42  ;;  %v8580_v24 = vld [vmem:[#allocation8 + $0x9c] sm:$0xf0]  ;;  %v10730_v42 = vld [vmem:[#allocation8 + $0x864] sm:$0xf] }
 0x2a6   :  { %6055 = vmatpush.bf16.msra.mxu3 %v8723_v49  ;;  %v8578_v49 = vld [vmem:[#allocation8 + $0x80] sm:$0xf] }
 0x2a7   :  { %v8579_v29 = vor.u32 %v10481_v35, %v8578_v49  ;;  %v9586_v37 = vld [vmem:[#allocation8 + $0x860] sm:$0xf]  ;;  %v10722_v49 = vld [vmem:[#allocation8 + $0x824] sm:$0xf] }
 0x2a8   :  { %5860 = vmatpush.bf16.msrb.mxu1 %v8687_v39  ;;  %5958 = vmatpush.bf16.msrb.mxu2 %v8691_v12  ;;  %v8544_v39 = vld [vmem:[#allocation8 + $0x5c] sm:$0xf0]  ;;  %v8583_v12 = vor.u32 %v10478_v58, %v8580_v24  ;;  %v9558_v24 = vld [vmem:[#allocation8 + $0x828] sm:$0xf] }
 0x2a9   :  { %5976 = vmatpush.bf16.msra.mxu0 %v8803_v18  ;;  %v8552_v18 = vld [vmem:[#allocation8 + $0x64] sm:$0xf0]  ;;  %v8547_v21 = vor.u32 %v10470_v31, %v8544_v39  ;;  %v9588_v7 = vld [vmem:[#allocation8 + $0x87c] sm:$0xf0]  ;;  %v10754_v31 = vld [vmem:[#allocation8 + $0x920] sm:$0xf0] }
 0x2aa   :  { %6056 = vmatpush.bf16.msra.mxu3 %v8695_v14  ;;  %v8550_v14 = vld [vmem:[#allocation8 + $0x48] sm:$0xf]  ;;  %v8555_v52 = vor.u32 %v10471_v38, %v8552_v18  ;;  %v9552_v35 = vld [vmem:[#allocation8 + $0x83c] sm:$0xf0]  ;;  %v9530_v18 = vld [vmem:[#allocation8 + $0x7f0] sm:$0xf] }
 0x2ab   :  { %v9555_v39 = vor.u32 %v10722_v49, %v9552_v35  ;;  %v9531_v9 = vor.u32 %v10719_v25, %v9530_v18  ;;  %v9474_v8 = vld [vmem:[#allocation8 + $0x780] sm:$0xf]  ;;  %v9446_v49 = vld [vmem:[#allocation8 + $0x748] sm:$0xf]  ;;  %v10698_v35 = vld [vmem:[#allocation8 + $0x760] sm:$0xf0] }
 0x2ac   :  { %5861 = vmatpush.bf16.msrb.mxu1 %v8659_v16  ;;  %5959 = vmatpush.bf16.msrb.mxu2 %v8663_v17  ;;  %v8551_v16 = vor.u32 %v10474_v51, %v8550_v14  ;;  %v8522_v17 = vld [vmem:[#allocation8 + $0x10] sm:$0xf]  ;;  %v10715_v14 = vld [vmem:[#allocation8 + $0x7ec] sm:$0xf]  ;;  %v9524_v51 = vld [vmem:[#allocation8 + $0x804] sm:$0xf0] }
 0x2ad   :  { %5977 = vmatpush.bf16.msra.mxu0 %v8775_v55  ;;  %v10736_v55 = vld [vmem:[#allocation8 + $0x894] sm:$0xf]  ;;  %v9166_v18 = vld [vmem:[#allocation8 + $0x518] sm:$0xf] }
 0x2ae   :  { %6057 = vmatpush.bf16.msra.mxu3 %v8667_v6  ;;  %v10467_v6 = vld [vmem:[#allocation8 + $0x28] sm:$0xf0]  ;;  %v9611_v57 = vor.u32 %v10736_v55, %v9608_v46  ;;  %v10628_v25 = vld [vmem:[#allocation8 + $0x530] sm:$0xf0] }
 0x2b0   :  { %5862 = vmatpush.bf16.msrb.mxu1 %v8631_v28  ;;  %5960 = vmatpush.bf16.msrb.mxu2 %v8635_v1  ;;  %v8519_v28 = vor.u32 %v10463_v41, %v8516_v45  ;;  %v10768_v1 = vld [vmem:[#allocation8 + $0x990] sm:$0xf0]  ;;  %v9642_v41 = vld [vmem:[#allocation8 + $0x8d0] sm:$0xf]  ;;  %v10747_v45 = vld [vmem:[#allocation8 + $0x8e8] sm:$0xf0] }
 0x2b1   :  { %5978 = vmatpush.bf16.msra.mxu0 %v8747_v40  ;;  %v9615_v40 = vor.u32 %v10740_v3, %v9614_v20  ;;  %v9727_v10 = vor.u32 %v10768_v1, %v9726_v61  ;;  %v9643_v46 = vor.u32 %v10747_v45, %v9642_v41  ;;  %v10712_v20 = vld [vmem:[#allocation8 + $0x7d0] sm:$0xf0]  ;;  %v10674_v61 = vld [vmem:[#allocation8 + $0x6a4] sm:$0xf]  ;;  %v9364_v1 = vld [vmem:[#allocation8 + $0x6bc] sm:$0xf0] }
 0x2b2   :  { %6058 = vmatpush.bf16.msra.mxu3 %v8639_v4  ;;  %v8523_v4 = vor.u32 %v10467_v6, %v8522_v17  ;;  %v10681_v17 = vld [vmem:[#allocation8 + $0x6dc] sm:$0xf]  ;;  %v9392_v6 = vld [vmem:[#allocation8 + $0x6f4] sm:$0xf0]  ;;  %v9174_v45 = vld [vmem:[#allocation8 + $0x520] sm:$0xf] }
 0x2b3   :  { %v9395_v3 = vor.u32 %v10681_v17, %v9392_v6  ;;  %v9168_v41 = vld [vmem:[#allocation8 + $0x534] sm:$0xf0]  ;;  %v10629_v6 = vld [vmem:[#allocation8 + $0x538] sm:$0xf0] }
 0x2b4   :  { %5863 = vmatpush.bf16.msrb.mxu1 %v8603_v56  ;;  %5961 = vmatpush.bf16.msrb.mxu2 %v8607_v15  ;;  %v10733_v56 = vld [vmem:[#allocation8 + $0x878] sm:$0xf0]  ;;  %v9698_v15 = vld [vmem:[#allocation8 + $0x940] sm:$0xf] }
 0x2b5   :  { %6027 = vmatpush.bf16.msrb.mxu0 %v9839_v63  ;;  %v9619_v63 = vor.u32 %v10737_v5, %v9616_v60  ;;  %v9699_v58 = vor.u32 %v10761_v13, %v9698_v15  ;;  %v10709_v5 = vld [vmem:[#allocation8 + $0x7bc] sm:$0xf]  ;;  %v9475_v15 = vor.u32 %v10705_v50, %v9474_v8  ;;  %v10694_v13 = vld [vmem:[#allocation8 + $0x744] sm:$0xf] }
 0x2b6   :  { %5979 = vmatmul.bf16.vlgmr.msra.gmra.mxu0 %v11540_v62  ;;  %6059 = vmatpush.bf16.msra.mxu3 %v8611_v36  ;;  %v9587_v36 = vor.u32 %v10733_v56, %v9586_v37  ;;  %v9476_v37 = vld [vmem:[#allocation8 + $0x79c] sm:$0xf0] }
 0x2b8   :  { %5864 = vmatpush.bf16.msrb.mxu1 %v8575_v30  ;;  %5962 = vmatpush.bf16.msrb.mxu2 %v8579_v29  ;;  %v10726_v30 = vld [vmem:[#allocation8 + $0x840] sm:$0xf0]  ;;  %v9670_v29 = vld [vmem:[#allocation8 + $0x908] sm:$0xf] }
 0x2b9   :  { %6028 = vmatpush.bf16.msrb.mxu0 %v9811_v54  ;;  %v9591_v54 = vor.u32 %v10730_v42, %v9588_v7  ;;  %v9671_v38 = vor.u32 %v10754_v31, %v9670_v29  ;;  %v10667_v42 = vld [vmem:[#allocation8 + $0x66c] sm:$0xf]  ;;  %v9336_v7 = vld [vmem:[#allocation8 + $0x684] sm:$0xf0] }
 0x2ba   :  { %6060 = vmatpush.bf16.msra.mxu3 %v8583_v12  ;;  %v9559_v12 = vor.u32 %v10726_v30, %v9558_v24  ;;  %v9448_v24 = vld [vmem:[#allocation8 + $0x764] sm:$0xf0]  ;;  %v10660_v30 = vld [vmem:[#allocation8 + $0x634] sm:$0xf]  ;;  %v10687_v29 = vld [vmem:[#allocation8 + $0x70c] sm:$0xf] }
 0x2bb   :  { %v9412_v31 = vld [vmem:[#allocation8 + $0x724] sm:$0xf0] }
 0x2bc   :  { %5865 = vmatpush.bf16.msrb.mxu1 %v8547_v21  ;;  %5963 = vmatpush.bf16.msrb.mxu2 %v8551_v16  ;;  %v10716_v21 = vld [vmem:[#allocation8 + $0x7f4] sm:$0xf]  ;;  %v9527_v16 = vor.u32 %v10715_v14, %v9524_v51  ;;  %v10691_v14 = vld [vmem:[#allocation8 + $0x728] sm:$0xf0]  ;;  %v9415_v17 = vor.u32 %v10687_v29, %v9412_v31 }
 0x2bd   :  { %6029 = vmatpush.bf16.msrb.mxu0 %v9783_v22  ;;  %v9563_v22 = vor.u32 %v10723_v26, %v9560_v59  ;;  %v9535_v55 = vor.u32 %v10716_v21, %v9532_v48  ;;  %v9308_v59 = vld [vmem:[#allocation8 + $0x64c] sm:$0xf0]  ;;  %v10688_v51 = vld [vmem:[#allocation8 + $0x714] sm:$0xf]  ;;  %v10625_v48 = vld [vmem:[#allocation8 + $0x51c] sm:$0xf] }
 0x2be   :  { %6061 = vmatpush.bf16.msra.mxu3 %v8555_v52  ;;  %v10708_v52 = vld [vmem:[#allocation8 + $0x7b4] sm:$0xf]  ;;  %v9311_v21 = vor.u32 %v10660_v30, %v9308_v59  ;;  %v10607_v30 = vld [vmem:[#allocation8 + $0x488] sm:$0xf0] }
 0x2bf   :  { %v9499_v60 = vor.u32 %v10708_v52, %v9496_v0  ;;  %v9280_v52 = vld [vmem:[#allocation8 + $0x614] sm:$0xf0]  ;;  %v10604_v31 = vld [vmem:[#allocation8 + $0x474] sm:$0xf] }
 0x2c0   :  { %5866 = vmatpush.bf16.msrb.mxu1 %v8519_v28  ;;  %5964 = vmatpush.bf16.msrb.mxu2 %v8523_v4  ;;  %v9504_v28 = vld [vmem:[#allocation8 + $0x7d4] sm:$0xf0] }
 0x2c1   :  { %6030 = vmatpush.bf16.msrb.mxu0 %v9755_v34  ;;  %v9502_v34 = vld [vmem:[#allocation8 + $0x7b8] sm:$0xf] }
 0x2c2   :  { %6062 = vmatpush.bf16.msra.mxu3 %v8527_v33  ;;  %v9503_v4 = vor.u32 %v10712_v20, %v9502_v34  ;;  %v9468_v33 = vld [vmem:[#allocation8 + $0x794] sm:$0xf0]  ;;  %v9171_v34 = vor.u32 %v10625_v48, %v9168_v41  ;;  %v9138_v20 = vld [vmem:[#allocation8 + $0x4e0] sm:$0xf]  ;;  %v10517_v41 = vld [vmem:[#allocation8 + $0x1b8] sm:$0xf0] }
 0x2c3   :  { %5867 = vmatmul.bf16.vlgmr.msrb.gmra.mxu1 %v11536_v23  ;;  %5965 = vmatmul.bf16.vlgmr.msrb.gmra.mxu2 %v11536_v23 }
 0x2c4   :  { %5915 = vmatpush.bf16.msra.mxu1 %v9611_v57  ;;  %6013 = vmatpush.bf16.msra.mxu2 %v9615_v40  ;;  %v10701_v57 = vld [vmem:[#allocation8 + $0x77c] sm:$0xf]  ;;  %v9507_v40 = vor.u32 %v10709_v5, %v9504_v28  ;;  %v9175_v5 = vor.u32 %v10629_v6, %v9174_v45  ;;  %v10600_v6 = vld [vmem:[#allocation8 + $0x450] sm:$0xf0] }
 0x2c5   :  { %6031 = vmatpush.bf16.msrb.mxu0 %v9727_v10  ;;  %6063 = vmatmul.bf16.vlgmr.msra.gmra.mxu3 %v11536_v23  ;;  %v10702_v10 = vld [vmem:[#allocation8 + $0x784] sm:$0xf]  ;;  %v9471_v56 = vor.u32 %v10701_v57, %v9468_v33 }
 0x2c6   :  { %6111 = vmatpush.bf16.msrb.mxu3 %v9619_v63  ;;  %v9367_v63 = vor.u32 %v10674_v61, %v9364_v1  ;;  %v9140_v61 = vld [vmem:[#allocation8 + $0x4fc] sm:$0xf0]  ;;  %v9146_v1 = vld [vmem:[#allocation8 + $0x4e8] sm:$0xf]  ;;  %v10622_v57 = vld [vmem:[#allocation8 + $0x500] sm:$0xf0] }
 0x2c7   :  { %v10646_v33 = vld [vmem:[#allocation8 + $0x5c4] sm:$0xf] }
 0x2c8   :  { %5916 = vmatpush.bf16.msra.mxu1 %v9583_v44  ;;  %6014 = vmatpush.bf16.msra.mxu2 %v9587_v36  ;;  %v9440_v44 = vld [vmem:[#allocation8 + $0x75c] sm:$0xf0]  ;;  %v9479_v36 = vor.u32 %v10702_v10, %v9476_v37  ;;  %v10614_v10 = vld [vmem:[#allocation8 + $0x4c0] sm:$0xf0]  ;;  %v9147_v37 = vor.u32 %v10622_v57, %v9146_v1  ;;  %v10593_v57 = vld [vmem:[#allocation8 + $0x418] sm:$0xf0] }
 0x2c9   :  { %6032 = vmatpush.bf16.msrb.mxu0 %v9699_v58  ;;  %v10695_v58 = vld [vmem:[#allocation8 + $0x74c] sm:$0xf]  ;;  %v9443_v26 = vor.u32 %v10694_v13, %v9440_v44  ;;  %v5632_v13 = vpop.f32.mrf.mxu2 }
 0x2ca   :  { %6112 = vmatpush.bf16.msrb.mxu3 %v9591_v54  ;;  %v9339_v54 = vor.u32 %v10667_v42, %v9336_v7  ;;  %v10611_v42 = vld [vmem:[#allocation8 + $0x4ac] sm:$0xf]  ;;  %v9112_v7 = vld [vmem:[#allocation8 + $0x4c4] sm:$0xf0] }
 0x2cc   :  { %5917 = vmatpush.bf16.msra.mxu1 %v9555_v39  ;;  %6015 = vmatpush.bf16.msra.mxu2 %v9559_v12  ;;  %v9447_v39 = vor.u32 %v10698_v35, %v9446_v49  ;;  %v9418_v12 = vld [vmem:[#allocation8 + $0x710] sm:$0xf]  ;;  %v10639_v49 = vld [vmem:[#allocation8 + $0x58c] sm:$0xf]  ;;  %v9224_v35 = vld [vmem:[#allocation8 + $0x5a4] sm:$0xf0] }
 0x2cd   :  { %6033 = vmatpush.bf16.msrb.mxu0 %v9671_v38  ;;  %v9420_v38 = vld [vmem:[#allocation8 + $0x72c] sm:$0xf0]  ;;  %v9419_v0 = vor.u32 %v10691_v14, %v9418_v12  ;;  %v9227_v29 = vor.u32 %v10639_v49, %v9224_v35  ;;  %v9090_v12 = vld [vmem:[#allocation8 + $0x478] sm:$0xf]  ;;  %v5618_v14 = vpop.f32.mrf.mxu3  ;;  %v8998_v49 = vld [vmem:[#allocation8 + $0x3c8] sm:$0xf] }
 0x2ce   :  { %6113 = vmatpush.bf16.msrb.mxu3 %v9563_v22  ;;  %v9451_v22 = vor.u32 %v10695_v58, %v9448_v24  ;;  %v9115_v58 = vor.u32 %v10611_v42, %v9112_v7  ;;  %v9082_v24 = vld [vmem:[#allocation8 + $0x470] sm:$0xf]  ;;  %v10586_v35 = vld [vmem:[#allocation8 + $0x3e0] sm:$0xf0] }
 0x2cf   :  { %v9083_v48 = vor.u32 %v10607_v30, %v9082_v24  ;;  %v10583_v24 = vld [vmem:[#allocation8 + $0x3cc] sm:$0xf]  ;;  %v9000_v30 = vld [vmem:[#allocation8 + $0x3e4] sm:$0xf0] }
 0x2d0   :  { %5918 = vmatpush.bf16.msra.mxu1 %v9527_v16  ;;  %6016 = vmatpush.bf16.msra.mxu2 %v9531_v9  ;;  %v11709_v16 = vpop.f32.mrf.mxu0  ;;  %v10653_v9 = vld [vmem:[#allocation8 + $0x5fc] sm:$0xf] }
 0x2d1   :  { %6034 = vmatpush.bf16.msrb.mxu0 %v9643_v46  ;;  %v9423_v46 = vor.u32 %v10688_v51, %v9420_v38  ;;  %v9283_v28 = vor.u32 %v10653_v9, %v9280_v52  ;;  %v10632_v38 = vld [vmem:[#allocation8 + $0x554] sm:$0xf] }
 0x2d2   :  { %6114 = vmatpush.bf16.msrb.mxu3 %v9535_v55  ;;  %v9167_v55 = vor.u32 %v10628_v25, %v9166_v18  ;;  %v9196_v18 = vld [vmem:[#allocation8 + $0x56c] sm:$0xf0]  ;;  %v5591_v25 = vadd.f32 %v11709_v16, %v11690_v2  ;;  %v10601_v2 = vld [vmem:[#allocation8 + $0x458] sm:$0xf0] }
 0x2d4   :  { %5919 = vmatpush.bf16.msra.mxu1 %v9499_v60  ;;  %6017 = vmatpush.bf16.msra.mxu2 %v9503_v4  ;;  %v10618_v60 = vld [vmem:[#allocation8 + $0x4e4] sm:$0xf]  ;;  %v5604_v4 = vpop.f32.mrf.mxu1 }
 0x2d5   :  { %6097 = vmatpush.bf16.msra.mxu0 %v9395_v3  ;;  %v10621_v3 = vld [vmem:[#allocation8 + $0x4f8] sm:$0xf0]  ;;  %v9143_v50 = vor.u32 %v10618_v60, %v9140_v61  ;;  %v5605_v9 = vadd.f32 %v5604_v4, %v5591_v25  ;;  %v11719_v60 = vpop.f32.mrf.mxu2  ;;  %v9026_v4 = vld [vmem:[#allocation8 + $0x400] sm:$0xf] }
 0x2d6   :  { %6035 = vmatmul.bf16.vlgmr.msrb.gmra.mxu0 %v11659_v27  ;;  %6115 = vmatpush.bf16.msrb.mxu3 %v9507_v40  ;;  %v9252_v40 = vld [vmem:[#allocation8 + $0x5dc] sm:$0xf0]  ;;  %v9139_v8 = vor.u32 %v10621_v3, %v9138_v20  ;;  %v9027_v7 = vor.u32 %v10593_v57, %v9026_v4 }
 0x2d7   :  { %v9062_v20 = vld [vmem:[#allocation8 + $0x440] sm:$0xf]  ;;  %v5619_v16 = vadd.f32 %v5618_v14, %v5605_v9  ;;  %v8970_v14 = vld [vmem:[#allocation8 + $0x390] sm:$0xf] }
 0x2d8   :  { %5920 = vmatpush.bf16.msra.mxu1 %v9471_v56  ;;  %6018 = vmatpush.bf16.msra.mxu2 %v9475_v15  ;;  %v9255_v56 = vor.u32 %v10646_v33, %v9252_v40  ;;  %v9118_v15 = vld [vmem:[#allocation8 + $0x4b0] sm:$0xf]  ;;  %v5644_v44 = vpop.f32.mrf.mxu0  ;;  %v9063_v40 = vor.u32 %v10601_v2, %v9062_v20  ;;  %v10489_v20 = vld [vmem:[#allocation8 + $0xd8] sm:$0xf0] }
 0x2d9   :  { %6098 = vmatpush.bf16.msra.mxu0 %v9367_v63  ;;  %v9110_v63 = vld [vmem:[#allocation8 + $0x4a8] sm:$0xf]  ;;  %v5633_v33 = vadd.f32 %v5632_v13, %v5619_v16  ;;  %v9866_v2 = vld [vmem:[#allocation8 + $0xa90] sm:$0xf] }
 0x2da   :  { %6116 = vmatpush.bf16.msrb.mxu3 %v9479_v36  ;;  %v10615_v36 = vld [vmem:[#allocation8 + $0x4c8] sm:$0xf0] }
 0x2db   :  { %v9119_v59 = vor.u32 %v10615_v36, %v9118_v15  ;;  %v8670_v15 = vld [vmem:[#allocation8 + $0x130] sm:$0xf]  ;;  %v11721_v36 = vpop.f32.mrf.mxu3 }
 0x2dc   :  { %5921 = vmatpush.bf16.msra.mxu1 %v9443_v26  ;;  %6019 = vmatpush.bf16.msra.mxu2 %v9447_v39  ;;  %v5645_v26 = vadd.f32 %v5644_v44, %v11697_v19  ;;  %v9084_v39 = vld [vmem:[#allocation8 + $0x48c] sm:$0xf0]  ;;  %v8726_v19 = vld [vmem:[#allocation8 + $0x1a0] sm:$0xf]  ;;  %v10503_v44 = vld [vmem:[#allocation8 + $0x148] sm:$0xf0] }
 0x2dd   :  { %6099 = vmatpush.bf16.msra.mxu0 %v9339_v54  ;;  %v9111_v54 = vor.u32 %v10614_v10, %v9110_v63  ;;  %v9087_v45 = vor.u32 %v10604_v31, %v9084_v39  ;;  %v8999_v31 = vor.u32 %v10586_v35, %v8998_v49  ;;  %v8642_v39 = vld [vmem:[#allocation8 + $0xf8] sm:$0xf]  ;;  %v10804_v49 = vld [vmem:[#allocation8 + $0xab0] sm:$0xf0] }
 0x2de   :  { %6117 = vmatpush.bf16.msrb.mxu3 %v9451_v22  ;;  %v10608_v22 = vld [vmem:[#allocation8 + $0x490] sm:$0xf0] }
 0x2df   :  { %v9091_v52 = vor.u32 %v10608_v22, %v9090_v12  ;;  %v10496_v12 = vld [vmem:[#allocation8 + $0x110] sm:$0xf0]  ;;  %v10579_v22 = vld [vmem:[#allocation8 + $0x3a8] sm:$0xf0] }
 0x2e0   :  { %5922 = vmatpush.bf16.msra.mxu1 %v9415_v17  ;;  %6020 = vmatpush.bf16.msra.mxu2 %v9419_v0  ;;  %v5658_v51 = vpop.f32.mrf.mxu1  ;;  %v9054_v17 = vld [vmem:[#allocation8 + $0x438] sm:$0xf]  ;;  %v9199_v0 = vor.u32 %v10632_v38, %v9196_v18  ;;  %v5646_v61 = vpop.f32.mrf.mxu0  ;;  %v10576_v38 = vld [vmem:[#allocation8 + $0x394] sm:$0xf]  ;;  %v8972_v18 = vld [vmem:[#allocation8 + $0x3ac] sm:$0xf0]  ;;  %v8643_v9 = vor.u32 %v10496_v12, %v8642_v39 }
 0x2e1   :  { %6100 = vmatpush.bf16.msra.mxu0 %v9311_v21  ;;  %v11717_v21 = vadd.f32 %v5658_v51, %v5645_v26  ;;  %v9055_v3 = vor.u32 %v10600_v6, %v9054_v17  ;;  %v5647_v42 = vadd.f32 %v5646_v61, %v5633_v33  ;;  %v8671_v26 = vor.u32 %v10503_v44, %v8670_v15  ;;  %v11728_v17 = vpop.f32.mrf.mxu2  ;;  %v10811_v61 = vld [vmem:[#allocation8 + $0xae8] sm:$0xf0]  ;;  %v10800_v33 = vld [vmem:[#allocation8 + $0xa94] sm:$0xf]  ;;  %v10562_v39 = vld [vmem:[#allocation8 + $0x324] sm:$0xf] }
 0x2e2   :  { %6118 = vmatpush.bf16.msrb.mxu3 %v9423_v46  ;;  %v9056_v46 = vld [vmem:[#allocation8 + $0x454] sm:$0xf0]  ;;  %v9003_v51 = vor.u32 %v10583_v24, %v9000_v30  ;;  %v8975_v16 = vor.u32 %v10576_v38, %v8972_v18  ;;  %v8916_v12 = vld [vmem:[#allocation8 + $0x33c] sm:$0xf0]  ;;  %v10566_v38 = vld [vmem:[#allocation8 + $0x340] sm:$0xf0] }
 0x2e3   :  { %5923 = vmatmul.bf16.vlgmr.msra.gmra.mxu1 %v11624_v11  ;;  %6021 = vmatmul.bf16.vlgmr.msra.gmra.mxu2 %v11624_v11 }
 0x2e4   :  { %5985 = vmatpush.bf16.msrb.mxu1 %v9167_v55  ;;  %6083 = vmatpush.bf16.msrb.mxu2 %v9171_v34  ;;  %v10597_v55 = vld [vmem:[#allocation8 + $0x43c] sm:$0xf]  ;;  %v8727_v34 = vor.u32 %v10517_v41, %v8726_v19  ;;  %v8978_v19 = vld [vmem:[#allocation8 + $0x398] sm:$0xf]  ;;  %v9894_v41 = vld [vmem:[#allocation8 + $0xac8] sm:$0xf] }
 0x2e5   :  { %6101 = vmatpush.bf16.msra.mxu0 %v9283_v28  ;;  %6119 = vmatmul.bf16.vlgmr.msrb.gmra.mxu3 %v11624_v11  ;;  %v10510_v28 = vld [vmem:[#allocation8 + $0x180] sm:$0xf0]  ;;  %v9059_v1 = vor.u32 %v10597_v55, %v9056_v46  ;;  %v9896_v55 = vld [vmem:[#allocation8 + $0xae4] sm:$0xf0]  ;;  %v8971_v46 = vor.u32 %v10579_v22, %v8970_v14  ;;  %v8558_v14 = vld [vmem:[#allocation8 + $0x50] sm:$0xf] }
 0x2e6   :  { %6181 = vmatpush.bf16.msra.mxu3 %v9175_v5  ;;  %v8698_v5 = vld [vmem:[#allocation8 + $0x168] sm:$0xf] }
 0x2e7   :  { %v8699_v10 = vor.u32 %v10510_v28, %v8698_v5  ;;  %v10803_v5 = vld [vmem:[#allocation8 + $0xaa8] sm:$0xf0]  ;;  %v9902_v28 = vld [vmem:[#allocation8 + $0xad0] sm:$0xf]  ;;  %v8922_v22 = vld [vmem:[#allocation8 + $0x328] sm:$0xf] }
 0x2e8   :  { %5986 = vmatpush.bf16.msrb.mxu1 %v9139_v8  ;;  %6084 = vmatpush.bf16.msrb.mxu2 %v9143_v50  ;;  %v10590_v8 = vld [vmem:[#allocation8 + $0x404] sm:$0xf]  ;;  %v9028_v50 = vld [vmem:[#allocation8 + $0x41c] sm:$0xf0]  ;;  %v5660_v63 = vpop.f32.mrf.mxu1  ;;  %v9903_v15 = vor.u32 %v10811_v61, %v9902_v28  ;;  %v9867_v44 = vor.u32 %v10803_v5, %v9866_v2  ;;  %v5714_v35 = vpop.f32.mrf.mxu0  ;;  %v10559_v2 = vld [vmem:[#allocation8 + $0x308] sm:$0xf0] }
 0x2e9   :  { %6102 = vmatpush.bf16.msra.mxu0 %v9255_v56  ;;  %v10594_v56 = vld [vmem:[#allocation8 + $0x420] sm:$0xf0]  ;;  %v9031_v13 = vor.u32 %v10590_v8, %v9028_v50  ;;  %v5674_v8 = vpop.f32.mrf.mxu3 }
 0x2ea   :  { %6182 = vmatpush.bf16.msra.mxu3 %v9147_v37  ;;  %v9034_v37 = vld [vmem:[#allocation8 + $0x408] sm:$0xf] }
 0x2ec   :  { %5987 = vmatpush.bf16.msrb.mxu1 %v9111_v54  ;;  %6085 = vmatpush.bf16.msrb.mxu2 %v9115_v58  ;;  %v11724_v54 = vadd.f32 %v5660_v63, %v5647_v42  ;;  %v9035_v58 = vor.u32 %v10594_v56, %v9034_v37  ;;  %v10569_v63 = vld [vmem:[#allocation8 + $0x35c] sm:$0xf]  ;;  %v8586_v37 = vld [vmem:[#allocation8 + $0x88] sm:$0xf]  ;;  %v10482_v56 = vld [vmem:[#allocation8 + $0xa0] sm:$0xf0] }
 0x2ed   :  { %6103 = vmatpush.bf16.msra.mxu0 %v9227_v29  ;;  %v10587_v29 = vld [vmem:[#allocation8 + $0x3e8] sm:$0xf0]  ;;  %v8950_v42 = vld [vmem:[#allocation8 + $0x360] sm:$0xf] }
 0x2ee   :  { %6183 = vmatpush.bf16.msra.mxu3 %v9119_v59  ;;  %v9006_v59 = vld [vmem:[#allocation8 + $0x3d0] sm:$0xf]  ;;  %v6253_v25 = vadd.f32 %v11724_v54, %v11717_v21 }
 0x2f0   :  { %5988 = vmatpush.bf16.msrb.mxu1 %v9083_v48  ;;  %6086 = vmatpush.bf16.msrb.mxu2 %v9087_v45  ;;  %v9007_v48 = vor.u32 %v10587_v29, %v9006_v59  ;;  %v10810_v45 = vld [vmem:[#allocation8 + $0xae0] sm:$0xf0]  ;;  %v5686_v6 = vpop.f32.mrf.mxu1  ;;  %v8587_v29 = vor.u32 %v10482_v56, %v8586_v37 }
 0x2f1   :  { %6104 = vmatpush.bf16.msra.mxu0 %v9199_v0  ;;  %v10807_v0 = vld [vmem:[#allocation8 + $0xacc] sm:$0xf]  ;;  %v10734_v37 = vld [vmem:[#allocation8 + $0x880] sm:$0xf0] }
 0x2f2   :  { %6184 = vmatpush.bf16.msra.mxu3 %v9091_v52  ;;  %v10580_v52 = vld [vmem:[#allocation8 + $0x3b0] sm:$0xf0]  ;;  %v9899_v57 = vor.u32 %v10807_v0, %v9896_v55  ;;  %v10555_v0 = vld [vmem:[#allocation8 + $0x2ec] sm:$0xf]  ;;  %v8888_v55 = vld [vmem:[#allocation8 + $0x304] sm:$0xf0] }
 0x2f3   :  { %v8979_v4 = vor.u32 %v10580_v52, %v8978_v19  ;;  %v8919_v19 = vor.u32 %v10562_v39, %v8916_v12  ;;  %v8923_v52 = vor.u32 %v10566_v38, %v8922_v22  ;;  %v8804_v22 = vld [vmem:[#allocation8 + $0x25c] sm:$0xf0] }
 0x2f4   :  { %5989 = vmatpush.bf16.msrb.mxu1 %v9055_v3  ;;  %6087 = vmatpush.bf16.msrb.mxu2 %v9059_v1  ;;  %v9895_v3 = vor.u32 %v10810_v45, %v9894_v41  ;;  %v6254_v1 = vrot.slane %v6253_v25, 4  ;;  %v5728_v41 = vpop.f32.mrf.mxu3 }
 0x2f5   :  { %6153 = vmatpush.bf16.msrb.mxu0 %v8727_v34  ;;  %v8614_v34 = vld [vmem:[#allocation8 + $0xc0] sm:$0xf] }
 0x2f6   :  { %6105 = vmatmul.bf16.vlgmr.msra.gmra.mxu0 %v11570_v43  ;;  %6185 = vmatpush.bf16.msra.mxu3 %v9063_v40  ;;  %v9868_v40 = vld [vmem:[#allocation8 + $0xaac] sm:$0xf0]  ;;  %v8615_v50 = vor.u32 %v10489_v20, %v8614_v34  ;;  %v10468_v34 = vld [vmem:[#allocation8 + $0x30] sm:$0xf0] }
 0x2f7   :  { %v9871_v24 = vor.u32 %v10800_v33, %v9868_v40  ;;  %v8894_v20 = vld [vmem:[#allocation8 + $0x2f0] sm:$0xf]  ;;  %v8866_v40 = vld [vmem:[#allocation8 + $0x2b8] sm:$0xf] }
 0x2f8   :  { %5990 = vmatpush.bf16.msrb.mxu1 %v9027_v7  ;;  %6088 = vmatpush.bf16.msrb.mxu2 %v9031_v13  ;;  %v10573_v7 = vld [vmem:[#allocation8 + $0x378] sm:$0xf0]  ;;  %v9874_v13 = vld [vmem:[#allocation8 + $0xa98] sm:$0xf]  ;;  %v5688_v59 = vpop.f32.mrf.mxu1  ;;  %v8895_v61 = vor.u32 %v10559_v2, %v8894_v20  ;;  %v10527_v20 = vld [vmem:[#allocation8 + $0x20c] sm:$0xf] }
 0x2f9   :  { %6154 = vmatpush.bf16.msrb.mxu0 %v8699_v10  ;;  %v8944_v10 = vld [vmem:[#allocation8 + $0x374] sm:$0xf0]  ;;  %v9875_v18 = vor.u32 %v10804_v49, %v9874_v13  ;;  %v5689_v45 = vadd.f32 %v5688_v59, %v5674_v8  ;;  %v10552_v8 = vld [vmem:[#allocation8 + $0x2d0] sm:$0xf0]  ;;  %v8838_v49 = vld [vmem:[#allocation8 + $0x280] sm:$0xf] }
 0x2fa   :  { %6186 = vmatpush.bf16.msra.mxu3 %v9035_v58  ;;  %v6255_v58 = vadd.f32 %v6254_v1, %v6253_v25  ;;  %v8947_v30 = vor.u32 %v10569_v63, %v8944_v10  ;;  %v5687_v25 = vadd.f32 %v5686_v6, %v11721_v36  ;;  %v9622_v36 = vld [vmem:[#allocation8 + $0x8a0] sm:$0xf]  ;;  %v10741_v6 = vld [vmem:[#allocation8 + $0x8b8] sm:$0xf0]  ;;  %v10548_v1 = vld [vmem:[#allocation8 + $0x2b4] sm:$0xf] }
 0x2fb   :  { %v5703_v5 = vadd.f32 %v11728_v17, %v5689_v45  ;;  %v9623_v33 = vor.u32 %v10741_v6, %v9622_v36  ;;  %v9594_v10 = vld [vmem:[#allocation8 + $0x868] sm:$0xf]  ;;  %v8867_v17 = vor.u32 %v10552_v8, %v8866_v40  ;;  %v9566_v59 = vld [vmem:[#allocation8 + $0x830] sm:$0xf]  ;;  %v10531_v36 = vld [vmem:[#allocation8 + $0x228] sm:$0xf0] }
 0x2fc   :  { %5991 = vmatpush.bf16.msrb.mxu1 %v8999_v31  ;;  %6089 = vmatpush.bf16.msrb.mxu2 %v9003_v51  ;;  %v8951_v31 = vor.u32 %v10573_v7, %v8950_v42  ;;  %v10475_v51 = vld [vmem:[#allocation8 + $0x68] sm:$0xf0]  ;;  %v9595_v13 = vor.u32 %v10734_v37, %v9594_v10  ;;  %v8754_v40 = vld [vmem:[#allocation8 + $0x1d8] sm:$0xf]  ;;  %v10524_v8 = vld [vmem:[#allocation8 + $0x1f0] sm:$0xf0] }
 0x2fd   :  { %6155 = vmatpush.bf16.msrb.mxu0 %v8671_v26  ;;  %v11730_v26 = vpop.f32.mrf.mxu2  ;;  %v10706_v37 = vld [vmem:[#allocation8 + $0x7a0] sm:$0xf0] }
 0x2fe   :  { %6187 = vmatpush.bf16.msra.mxu3 %v9007_v48  ;;  %v6256_v48 = vrot.slane %v6255_v58, 2 }
 0x300   :  { %5992 = vmatpush.bf16.msrb.mxu1 %v8971_v46  ;;  %6090 = vmatpush.bf16.msrb.mxu2 %v8975_v16  ;;  %v8530_v46 = vld [vmem:[#allocation8 + $0x18] sm:$0xf]  ;;  %v6257_v16 = vadd.f32 %v6256_v48, %v6255_v58  ;;  %v10545_v58 = vld [vmem:[#allocation8 + $0x298] sm:$0xf0]  ;;  %v10538_v48 = vld [vmem:[#allocation8 + $0x260] sm:$0xf0] }
 0x301   :  { %6156 = vmatpush.bf16.msrb.mxu0 %v8643_v9  ;;  %v8559_v9 = vor.u32 %v10475_v51, %v8558_v14  ;;  %v8531_v28 = vor.u32 %v10468_v34, %v8530_v46  ;;  %v8839_v14 = vor.u32 %v10545_v58, %v8838_v49  ;;  %v10534_v51 = vld [vmem:[#allocation8 + $0x244] sm:$0xf]  ;;  %v10827_v49 = vld [vmem:[#allocation13 + $0x78] sm:$0xff] }
 0x302   :  { %6188 = vmatpush.bf16.msra.mxu3 %v8979_v4  ;;  %v8860_v4 = vld [vmem:[#allocation8 + $0x2cc] sm:$0xf0]  ;;  %v6258_v56 = vrot.slane %v6257_v16, 1 }
 0x303   :  { %5993 = vmatmul.bf16.vlgmr.msrb.gmra.mxu1 %v11560_v53  ;;  %6091 = vmatmul.bf16.vlgmr.msrb.gmra.mxu2 %v11560_v53  ;;  %v8863_v42 = vor.u32 %v10548_v1, %v8860_v4  ;;  %v8748_v1 = vld [vmem:[#allocation8 + $0x1ec] sm:$0xf0] }
 0x304   :  { %6047 = vmatpush.bf16.msra.mxu1 %v9895_v3  ;;  %6145 = vmatpush.bf16.msra.mxu2 %v9899_v57  ;;  %v8891_v3 = vor.u32 %v10555_v0, %v8888_v55  ;;  %v5742_v57 = vpop.f32.mrf.mxu1 }
 0x305   :  { %6157 = vmatpush.bf16.msrb.mxu0 %v8615_v50  ;;  %6189 = vmatmul.bf16.vlgmr.msra.gmra.mxu3 %v11560_v53  ;;  %v5701_v53 = vadd.f32 %v11719_v60, %v5687_v25  ;;  %v5716_v50 = vpop.f32.mrf.mxu0  ;;  %v5758_v63 = vpop.f32.mrf.mxu2  ;;  %v8810_v25 = vld [vmem:[#allocation8 + $0x248] sm:$0xf] }
 0x306   :  { %6243 = vmatpush.bf16.msrb.mxu3 %v9903_v15  ;;  %v5717_v7 = vadd.f32 %v5716_v50, %v5703_v5  ;;  %v10541_v15 = vld [vmem:[#allocation8 + $0x27c] sm:$0xf]  ;;  %v8811_v34 = vor.u32 %v10538_v48, %v8810_v25  ;;  %v10826_v25 = vld [vmem:[#allocation13 + $0x70] sm:$0xff] }
 0x307   :  { %v5715_v60 = vadd.f32 %v5714_v35, %v5701_v53  ;;  %v6259_v35 = vadd.f32 %v6258_v56, %v6257_v16  ;;  %v8782_v53 = vld [vmem:[#allocation8 + $0x210] sm:$0xf]  ;;  %v9510_v16 = vld [vmem:[#allocation8 + $0x7c0] sm:$0xf]  ;;  %v10797_v56 = vld [vmem:[#allocation8 + $0xa78] sm:$0xf0] }
 0x308   :  { %6048 = vmatpush.bf16.msra.mxu1 %v9867_v44  ;;  %6146 = vmatpush.bf16.msra.mxu2 %v9871_v24  ;;  %v8832_v44 = vld [vmem:[#allocation8 + $0x294] sm:$0xf0]  ;;  %v5730_v24 = vpop.f32.mrf.mxu3 }
 0x309   :  { %6158 = vmatpush.bf16.msrb.mxu0 %v8587_v29  ;;  %v10727_v29 = vld [vmem:[#allocation8 + $0x848] sm:$0xf0]  ;;  %v5731_v12 = vadd.f32 %v5730_v24, %v5717_v7  ;;  %v6304_v45 = vmul.f32 %v6259_v35, %v11357_v32 }
 0x30a   :  { %6244 = vmatpush.bf16.msrb.mxu3 %v9875_v18  ;;  %v9567_v18 = vor.u32 %v10727_v29, %v9566_v59  ;;  %v9812_v59 = vld [vmem:[#allocation8 + $0xa3c] sm:$0xf0]  ;;  %v9454_v29 = vld [vmem:[#allocation8 + $0x750] sm:$0xf] }
 0x30b   :  { %v11758_v5 = vsub.f32 %v11717_v21, %v6304_v45  ;;  %v9482_v21 = vld [vmem:[#allocation8 + $0x788] sm:$0xf] }
 0x30c   :  { %6069 = vmatpush.bf16.msrb.mxu1 %v8947_v30  ;;  %6167 = vmatpush.bf16.msrb.mxu2 %v8951_v31  ;;  %v5729_v30 = vadd.f32 %v5728_v41, %v5715_v60  ;;  %v8835_v31 = vor.u32 %v10541_v15, %v8832_v44  ;;  %v5744_v38 = vpop.f32.mrf.mxu1  ;;  %v10720_v41 = vld [vmem:[#allocation8 + $0x810] sm:$0xf0]  ;;  %v9840_v60 = vld [vmem:[#allocation8 + $0xa74] sm:$0xf0]  ;;  %v8755_v44 = vor.u32 %v10524_v8, %v8754_v40 }
 0x30d   :  { %6159 = vmatpush.bf16.msrb.mxu0 %v8559_v9  ;;  %v8807_v9 = vor.u32 %v10534_v51, %v8804_v22  ;;  %v11748_v0 = vpop.f32.mrf.mxu2  ;;  %v9483_v58 = vor.u32 %v10706_v37, %v9482_v21  ;;  %v10790_v51 = vld [vmem:[#allocation8 + $0xa40] sm:$0xf0] }
 0x30e   :  { %v5743_v39 = vadd.f32 %v5742_v57, %v5729_v30  ;;  %v10786_v30 = vld [vmem:[#allocation8 + $0xa24] sm:$0xf]  ;;  %6988 = vmatpush.bf16.msra.mxu3 %v10827_v49 }
 0x30f   :  { %v10824_v37 = vld [vmem:[#allocation13 + $0x60] sm:$0xff] }
 0x310   :  { %6070 = vmatpush.bf16.msrb.mxu1 %v8919_v19  ;;  %6168 = vmatpush.bf16.msrb.mxu2 %v8923_v52  ;;  %v9538_v19 = vld [vmem:[#allocation8 + $0x7f8] sm:$0xf]  ;;  %v11746_v52 = vpop.f32.mrf.mxu0  ;;  %v11751_v55 = vadd.f32 %v11730_v26, %v5743_v39  ;;  %v11761_v26 = vsub.f32 %v11724_v54, %v6304_v45  ;;  %v11763_v4 = vpop.f32.mrf.mxu3  ;;  %v9846_v54 = vld [vmem:[#allocation8 + $0xa60] sm:$0xf] }
 0x311   :  { %6160 = vmatpush.bf16.msrb.mxu0 %v8531_v28  ;;  %v9539_v2 = vor.u32 %v10720_v41, %v9538_v19  ;;  %v9847_v24 = vor.u32 %v10797_v56, %v9846_v54  ;;  %v10779_v19 = vld [vmem:[#allocation8 + $0x9ec] sm:$0xf]  ;;  %v9784_v41 = vld [vmem:[#allocation8 + $0xa04] sm:$0xf0]  ;;  %v9426_v45 = vld [vmem:[#allocation8 + $0x718] sm:$0xf] }
 0x312   :  { %6989 = vmatpush.bf16.msra.mxu3 %v10826_v25 }
 0x313   :  { %9908 = vmatmul.msk.bf16.vlgmr.msra.gmra.mxu1 %vm3082_vm1, %v11678_v47  ;;  %9909 = vmatmul.msk.bf16.vlgmr.msra.gmra.mxu2 %vm3082_vm1, %v11678_v47 }
 0x314   :  { %6071 = vmatpush.bf16.msrb.mxu1 %v8891_v3  ;;  %6169 = vmatpush.bf16.msrb.mxu2 %v8895_v61  ;;  %v10713_v3 = vld [vmem:[#allocation8 + $0x7d8] sm:$0xf0]  ;;  %v10520_v61 = vld [vmem:[#allocation8 + $0x1d4] sm:$0xf] }
 0x315   :  { %6209 = vmatpush.bf16.msra.mxu0 %v9623_v33  ;;  %9910 = vmatmul.msk.bf16.vlgmr.msrb.gmra.mxu3 %vm3082_vm1, %v11678_v47  ;;  %v8776_v47 = vld [vmem:[#allocation8 + $0x224] sm:$0xf0]  ;;  %v8783_v33 = vor.u32 %v10531_v36, %v8782_v53  ;;  %v9511_v50 = vor.u32 %v10713_v3, %v9510_v16  ;;  %v8751_v7 = vor.u32 %v10520_v61, %v8748_v1  ;;  %v10772_v1 = vld [vmem:[#allocation8 + $0x9b4] sm:$0xf] }
 0x316   :  { %6161 = vmatmul.bf16.vlgmr.msrb.gmra.mxu0 %v11536_v23  ;;  %v5745_v23 = vadd.f32 %v5744_v38, %v5731_v12  ;;  %v8779_v28 = vor.u32 %v10527_v20, %v8776_v47  ;;  %v10699_v12 = vld [vmem:[#allocation8 + $0x768] sm:$0xf0]  ;;  %v10692_v20 = vld [vmem:[#allocation8 + $0x730] sm:$0xf0]  ;;  %v9790_v47 = vld [vmem:[#allocation8 + $0x9f0] sm:$0xf]  ;;  %v5785_v36 = vadd.f32 %v11748_v0, %v11746_v52  ;;  %v9787_v16 = vor.u32 %v10779_v19, %v9784_v41 }
 0x317   :  { %v9455_v48 = vor.u32 %v10699_v12, %v9454_v29  ;;  %v10825_v3 = vld [vmem:[#allocation13 + $0x68] sm:$0xff]  ;;  %v10776_v0 = vld [vmem:[#allocation8 + $0x9d0] sm:$0xf0] }
 0x318   :  { %6072 = vmatpush.bf16.msrb.mxu1 %v8863_v42  ;;  %6170 = vmatpush.bf16.msrb.mxu2 %v8867_v17  ;;  %v11753_v46 = vadd.f32 %v5758_v63, %v5745_v23  ;;  %v10793_v63 = vld [vmem:[#allocation8 + $0xa5c] sm:$0xf]  ;;  %v6325_v42 = vmul.f32 %v11758_v5, %v11758_v5  ;;  %v6332_v17 = vmul.f32 %v11761_v26, %v11761_v26  ;;  %v5772_v35 = vpop.f32.mrf.mxu0 }
 0x319   :  { %6210 = vmatpush.bf16.msra.mxu0 %v9595_v13  ;;  %v9843_v13 = vor.u32 %v10793_v63, %v9840_v60  ;;  %6990 = vmatpush.bf16.msra.mxu3 %v10825_v3  ;;  %v5799_v63 = vadd.f32 %v11763_v4, %v5785_v36  ;;  %v9734_v4 = vld [vmem:[#allocation8 + $0x980] sm:$0xf] }
 0x31a   :  { %v6260_v6 = vadd.f32 %v11753_v46, %v11751_v55  ;;  %v6339_v22 = vadd.f32 %v6332_v17, %v6325_v42  ;;  %v10765_v42 = vld [vmem:[#allocation8 + $0x97c] sm:$0xf]  ;;  %v9728_v17 = vld [vmem:[#allocation8 + $0x994] sm:$0xf0] }
 0x31c   :  { %6073 = vmatpush.bf16.msrb.mxu1 %v8835_v31  ;;  %6171 = vmatpush.bf16.msrb.mxu2 %v8839_v14  ;;  %v6261_v57 = vrot.slane %v6260_v6, 4  ;;  %v5786_v31 = vpop.f32.mrf.mxu2  ;;  %v9818_v14 = vld [vmem:[#allocation8 + $0xa28] sm:$0xf]  ;;  %v6340_v53 = vrot.slane %v6339_v22, 4 }
 0x31d   :  { %6211 = vmatpush.bf16.msra.mxu0 %v9567_v18  ;;  %v9815_v18 = vor.u32 %v10786_v30, %v9812_v59  ;;  %v9819_v23 = vor.u32 %v10790_v51, %v9818_v14  ;;  %v5787_v54 = vadd.f32 %v5786_v31, %v5772_v35  ;;  %6991 = vmatpush.bf16.msra.mxu3 %v10824_v37  ;;  %v10758_v35 = vld [vmem:[#allocation8 + $0x944] sm:$0xf]  ;;  %v9700_v31 = vld [vmem:[#allocation8 + $0x95c] sm:$0xf0]  ;;  %v9706_v14 = vld [vmem:[#allocation8 + $0x948] sm:$0xf] }
 0x31e   :  { %v6262_v10 = vadd.f32 %v6261_v57, %v6260_v6  ;;  %v9756_v57 = vld [vmem:[#allocation8 + $0x9cc] sm:$0xf0]  ;;  %v10762_v51 = vld [vmem:[#allocation8 + $0x960] sm:$0xf0] }
 0x31f   :  { %v9707_v41 = vor.u32 %v10762_v51, %v9706_v14  ;;  %v9314_v14 = vld [vmem:[#allocation8 + $0x638] sm:$0xf]  ;;  %v10664_v51 = vld [vmem:[#allocation8 + $0x650] sm:$0xf0] }
 0x320   :  { %6074 = vmatpush.bf16.msrb.mxu1 %v8807_v9  ;;  %6172 = vmatpush.bf16.msrb.mxu2 %v8811_v34  ;;  %v6263_v15 = vrot.slane %v6262_v10, 2  ;;  %v5800_v9 = vpop.f32.mrf.mxu3  ;;  %v5812_v52 = vpop.f32.mrf.mxu1 }
 0x321   :  { %6212 = vmatpush.bf16.msra.mxu0 %v9539_v2  ;;  %v10783_v2 = vld [vmem:[#allocation8 + $0xa08] sm:$0xf0]  ;;  %v5801_v59 = vadd.f32 %v5800_v9, %v5787_v54  ;;  %v9672_v9 = vld [vmem:[#allocation8 + $0x924] sm:$0xf0]  ;;  %v10820_v54 = vld [vmem:[#allocation13 + $0x40] sm:$0xff] }
 0x322   :  { %v6264_v39 = vadd.f32 %v6263_v15, %v6262_v10  ;;  %v9791_v61 = vor.u32 %v10783_v2, %v9790_v47  ;;  %v9678_v47 = vld [vmem:[#allocation8 + $0x910] sm:$0xf]  ;;  %v10755_v2 = vld [vmem:[#allocation8 + $0x928] sm:$0xf0] }
 0x324   :  { %6075 = vmatpush.bf16.msrb.mxu1 %v8779_v28  ;;  %6173 = vmatpush.bf16.msrb.mxu2 %v8783_v33  ;;  %v6265_v38 = vrot.slane %v6264_v39, 1  ;;  %v9427_v28 = vor.u32 %v10692_v20, %v9426_v45  ;;  %v5826_v33 = vpop.f32.mrf.mxu0  ;;  %v5840_v60 = vpop.f32.mrf.mxu2  ;;  %v10751_v45 = vld [vmem:[#allocation8 + $0x90c] sm:$0xf] }
 0x325   :  { %6213 = vmatpush.bf16.msra.mxu0 %v9511_v50  ;;  %v6341_v50 = vadd.f32 %v6340_v53, %v6339_v22  ;;  %v9675_v3 = vor.u32 %v10751_v45, %v9672_v9 }
 0x326   :  { %v6266_v34 = vadd.f32 %v6265_v38, %v6264_v39 }
 0x328   :  { %6076 = vmatpush.bf16.msrb.mxu1 %v8751_v7  ;;  %6174 = vmatpush.bf16.msrb.mxu2 %v8755_v44  ;;  %v6305_v6 = vmul.f32 %v6266_v34, %v11357_v32  ;;  %v5854_v7 = vpop.f32.mrf.mxu3  ;;  %v10769_v44 = vld [vmem:[#allocation8 + $0x998] sm:$0xf0]  ;;  %v5814_v12 = vpop.f32.mrf.mxu1 }
 0x329   :  { %6214 = vmatpush.bf16.msra.mxu0 %v9483_v58  ;;  %v9731_v58 = vor.u32 %v10765_v42, %v9728_v17  ;;  %v9735_v29 = vor.u32 %v10769_v44, %v9734_v4  ;;  %v5815_v38 = vadd.f32 %v5814_v12, %v5801_v59 }
 0x32a   :  { %v11775_v40 = vsub.f32 %v11751_v55, %v6305_v6  ;;  %v11778_v8 = vsub.f32 %v11753_v46, %v6305_v6  ;;  %v9759_v55 = vor.u32 %v10772_v1, %v9756_v57  ;;  %v5813_v46 = vadd.f32 %v5812_v52, %v5799_v63  ;;  %v9644_v52 = vld [vmem:[#allocation8 + $0x8ec] sm:$0xf0]  ;;  %v9398_v63 = vld [vmem:[#allocation8 + $0x6e0] sm:$0xf] }
 0x32b   :  { %6077 = vmatmul.bf16.vlgmr.msrb.gmra.mxu1 %v11540_v62  ;;  %6175 = vmatmul.bf16.vlgmr.msrb.gmra.mxu2 %v11540_v62  ;;  %v9762_v62 = vld [vmem:[#allocation8 + $0x9b8] sm:$0xf]  ;;  %v9679_v57 = vor.u32 %v10755_v2, %v9678_v47  ;;  %v11800_v47 = vld [vmem:[#allocation10] sm:$0x7f] }
 0x32c   :  { %6125 = vmatpush.bf16.msra.mxu1 %v9843_v13  ;;  %6223 = vmatpush.bf16.msra.mxu2 %v9847_v24  ;;  %v6326_v21 = vmul.f32 %v11775_v40, %v11775_v40  ;;  %v6333_v10 = vmul.f32 %v11778_v8, %v11778_v8  ;;  %v9763_v56 = vor.u32 %v10776_v0, %v9762_v62  ;;  %v6342_v13 = vrot.slane %v6341_v50, 2  ;;  %v10823_v24 = vld [vmem:[#allocation13 + $0x58] sm:$0xff]  ;;  %v5842_v20 = vpop.f32.mrf.mxu2 }
 0x32d   :  { %6215 = vmatpush.bf16.msra.mxu0 %v9455_v48  ;;  %v5827_v30 = vadd.f32 %v5826_v33, %v5813_v46  ;;  %6992 = vmatpush.bf16.msra.mxu3 %v10823_v24  ;;  %v10822_v48 = vld [vmem:[#allocation13 + $0x50] sm:$0xff]  ;;  %v9650_v62 = vld [vmem:[#allocation8 + $0x8d8] sm:$0xf] }
 0x32e   :  { %v6346_v15 = vadd.f32 %v6333_v10, %v6326_v21  ;;  %v6343_v22 = vadd.f32 %v6342_v13, %v6341_v50  ;;  %v10744_v33 = vld [vmem:[#allocation8 + $0x8d4] sm:$0xf]  ;;  %v10835_v13 = vld [vmem:[#allocation13 + $0xb8] sm:$0xff]  ;;  %v9342_v24 = vld [vmem:[#allocation8 + $0x670] sm:$0xf] }
 0x32f   :  { %v10748_v50 = vld [vmem:[#allocation8 + $0x8f0] sm:$0xf0]  ;;  %v9647_v37 = vor.u32 %v10744_v33, %v9644_v52 }
 0x330   :  { %6126 = vmatpush.bf16.msra.mxu1 %v9815_v18  ;;  %6224 = vmatpush.bf16.msra.mxu2 %v9819_v23  ;;  %v6347_v49 = vrot.slane %v6346_v15, 4  ;;  %v5828_v18 = vpop.f32.mrf.mxu0  ;;  %v5841_v23 = vadd.f32 %v5840_v60, %v5827_v30  ;;  %v6344_v53 = vrot.slane %v6343_v22, 1  ;;  %v5856_v6 = vpop.f32.mrf.mxu3  ;;  %v10685_v60 = vld [vmem:[#allocation8 + $0x6f8] sm:$0xf0]  ;;  %v10671_v30 = vld [vmem:[#allocation8 + $0x688] sm:$0xf0] }
 0x331   :  { %6216 = vmatpush.bf16.msra.mxu0 %v9427_v28  ;;  %v5829_v19 = vadd.f32 %v5828_v18, %v5815_v38  ;;  %6993 = vmatpush.bf16.msra.mxu3 %v10822_v48  ;;  %v10821_v28 = vld [vmem:[#allocation13 + $0x48] sm:$0xff]  ;;  %v9399_v42 = vor.u32 %v10685_v60, %v9398_v63  ;;  %v9315_v48 = vor.u32 %v10664_v51, %v9314_v14  ;;  %v9230_v63 = vld [vmem:[#allocation8 + $0x590] sm:$0xf]  ;;  %v10819_v14 = vld [vmem:[#allocation13 + $0x38] sm:$0xff] }
 0x332   :  { %v6348_v39 = vadd.f32 %v6347_v49, %v6346_v15  ;;  %v6345_v21 = vadd.f32 %v6344_v53, %v6343_v22  ;;  %v10678_v15 = vld [vmem:[#allocation8 + $0x6c0] sm:$0xf0]  ;;  %v10833_v18 = vld [vmem:[#allocation13 + $0xa8] sm:$0xff] }
 0x333   :  { %v5843_v36 = vadd.f32 %v5842_v20, %v5829_v19  ;;  %v10643_v60 = vld [vmem:[#allocation8 + $0x5a8] sm:$0xf0] }
 0x334   :  { %6127 = vmatpush.bf16.msra.mxu1 %v9787_v16  ;;  %6225 = vmatpush.bf16.msra.mxu2 %v9791_v61  ;;  %v6349_v25 = vrot.slane %v6348_v39, 2  ;;  %v5855_v61 = vadd.f32 %v5854_v7, %v5841_v23  ;;  %v9370_v7 = vld [vmem:[#allocation8 + $0x6a8] sm:$0xf]  ;;  %v6390_v4 = vmul.f32 %v6345_v21, %v11357_v32  ;;  %v9286_v23 = vld [vmem:[#allocation8 + $0x600] sm:$0xf] }
 0x335   :  { %6217 = vmatmul.bf16.vlgmr.msra.gmra.mxu0 %v11624_v11  ;;  %v9703_v11 = vor.u32 %v10758_v35, %v9700_v31  ;;  %v5857_v1 = vadd.f32 %v5856_v6, %v5843_v36  ;;  %6994 = vmatpush.bf16.msra.mxu3 %v10821_v28  ;;  %v10834_v35 = vld [vmem:[#allocation13 + $0xb0] sm:$0xff]  ;;  %v6476_v6 = vperm.slane %v11800_v47, 1  ;;  %v11809_v21 = vld [vmem:[#allocation11] sm:$0x7f] }
 0x336   :  { %v6350_v34 = vadd.f32 %v6349_v25, %v6348_v39  ;;  %7002 = vmatpush.bf16.msrb.mxu0 %v10835_v13  ;;  %v11788_v59 = vadd.f32 1e-05, %v6390_v4  ;;  %v9343_v39 = vor.u32 %v10671_v30, %v9342_v24  ;;  %v10636_v13 = vld [vmem:[#allocation8 + $0x570] sm:$0xf0] }
 0x337   :  { %v6267_v10 = vadd.f32 %v5857_v1, %v5855_v61 }
 0x338   :  { %6128 = vmatpush.bf16.msra.mxu1 %v9759_v55  ;;  %6226 = vmatpush.bf16.msra.mxu2 %v9763_v56  ;;  %v6351_v16 = vrot.slane %v6350_v34, 1  ;;  %v9651_v56 = vor.u32 %v10748_v50, %v9650_v62  ;;  %v5882_v33 = vpop.f32.mrf.mxu3  ;;  %vm6410_vm12 = vweird.f32 %v11788_v59 }
 0x339   :  { %v6268_v46 = vrot.slane %v6267_v10, 4  ;;  %6995 = vmatpush.bf16.msra.mxu3 %v10820_v54 }
 0x33a   :  { %v6352_v0 = vadd.f32 %v6351_v16, %v6350_v34  ;;  %7003 = vmatpush.bf16.msrb.mxu0 %v10834_v35  ;;  %v10832_v34 = vld [vmem:[#allocation13 + $0xa0] sm:$0xff]  ;;  %v9258_v16 = vld [vmem:[#allocation8 + $0x5c8] sm:$0xf] }
 0x33b   :  { %v6269_v44 = vadd.f32 %v6268_v46, %v6267_v10  ;;  %v5896_v10 = vpop.f32.mrf.mxu0 }
 0x33c   :  { %6129 = vmatpush.bf16.msra.mxu1 %v9731_v58  ;;  %6227 = vmatpush.bf16.msra.mxu2 %v9735_v29  ;;  %v6391_v55 = vmul.f32 %v6352_v0, %v11357_v32  ;;  %v9371_v58 = vor.u32 %v10678_v15, %v9370_v7  ;;  %v9231_v7 = vor.u32 %v10643_v60, %v9230_v63 }
 0x33d   :  { %v6270_v49 = vrot.slane %v6269_v44, 2 }
 0x33e   :  { %v6398_v17 = vadd.f32 1e-05, %v6391_v55  ;;  %7004 = vmatpush.bf16.msrb.mxu0 %v10833_v18 }
 0x33f   :  { %v6271_v29 = vadd.f32 %v6270_v49, %v6269_v44  ;;  %v9202_v44 = vld [vmem:[#allocation8 + $0x558] sm:$0xf] }
 0x340   :  { %6130 = vmatpush.bf16.msra.mxu1 %v9703_v11  ;;  %6228 = vmatpush.bf16.msra.mxu2 %v9707_v41  ;;  %10895 = vrsqrt.f32 %v6398_v17  ;;  %vm6420_vm9 = vweird.f32 %v6398_v17  ;;  %v5884_v51 = vpop.f32.mrf.mxu3 }
 0x341   :  { %v6272_v31 = vrot.slane %v6271_v29, 1  ;;  %10897 = vrsqrt.f32 %v11788_v59 }
 0x342   :  { %7005 = vmatpush.bf16.msrb.mxu0 %v10832_v34  ;;  %v10817_v34 = vld [vmem:[#allocation13 + $0x28] sm:$0xff] }
 0x343   :  { %v6273_v38 = vadd.f32 %v6272_v31, %v6271_v29  ;;  %v10829_v29 = vld [vmem:[#allocation13 + $0x88] sm:$0xff]  ;;  %v9203_v31 = vor.u32 %v10636_v13, %v9202_v44  ;;  %v5898_v18 = vpop.f32.mrf.mxu0 }
 0x344   :  { %6131 = vmatpush.bf16.msra.mxu1 %v9675_v3  ;;  %6229 = vmatpush.bf16.msra.mxu2 %v9679_v57  ;;  %v10650_v3 = vld [vmem:[#allocation8 + $0x5e0] sm:$0xf0]  ;;  %v10831_v57 = vld [vmem:[#allocation13 + $0x98] sm:$0xff] }
 0x345   :  { %v6306_v11 = vmul.f32 %v6273_v38, %v11357_v32  ;;  %v9259_v0 = vor.u32 %v10650_v3, %v9258_v16 }
 0x346   :  { %v10896_v12 = vpop.eup %10895  ;;  %7006 = vmatpush.bf16.msrb.mxu0 %v10831_v57 }
 0x347   :  { %v6415_v22 = vmul.f32 %v10896_v12, %v6398_v17  ;;  %v11794_v41 = vsub.f32 %v5855_v61, %v6306_v11  ;;  %v11796_v45 = vsub.f32 %v5857_v1, %v6306_v11  ;;  %v11798_v20 = vpop.eup %10897  ;;  %vm6421_vm8 = vweird.f32 %v10896_v12 }
 0x348   :  { %6132 = vmatpush.bf16.msra.mxu1 %v9647_v37  ;;  %6230 = vmatpush.bf16.msra.mxu2 %v9651_v56  ;;  %v6405_v1 = vmul.f32 %v11798_v20, %v11788_v59  ;;  %vm6422_vm10 = vmor %vm6420_vm9, %vm6421_vm8  ;;  %v5868_v37 = vpop.f32.mrf.mxu1  ;;  %v6519_v56 = vperm.slane %v11809_v21, 1  ;;  %vm6411_vm11 = vweird.f32 %v11798_v20  ;;  %v5938_v16 = vpop.f32.mrf.mxu3 }
 0x349   :  { %v6416_v25 = vmul.f32 %v10896_v12, %v6415_v22  ;;  %v6327_v53 = vmul.f32 %v11794_v41, %v11794_v41  ;;  %v6334_v36 = vmul.f32 %v11796_v45, %v11796_v45  ;;  %vm6412_vm13 = vmor %vm6410_vm12, %vm6411_vm11 }
 0x34a   :  { %v6406_v54 = vmul.f32 %v11798_v20, %v6405_v1 }
 0x34b   :  { %6133 = vmatmul.bf16.vlgmr.msra.gmra.mxu1 %v11659_v27  ;;  %6231 = vmatmul.bf16.vlgmr.msra.gmra.mxu2 %v11659_v27  ;;  %v10657_v27 = vld [vmem:[#allocation8 + $0x618] sm:$0xf0]  ;;  %v6417_v19 = vmul.f32 0.5, %v6416_v25  ;;  %v6353_v61 = vadd.f32 %v6334_v36, %v6327_v53 }
 0x34c   :  { %6195 = vmatpush.bf16.msrb.mxu1 %v9399_v42  ;;  %v9287_v9 = vor.u32 %v10657_v27, %v9286_v23  ;;  %v10830_v42 = vld [vmem:[#allocation13 + $0x90] sm:$0xff] }
 0x34d   :  { %v6418_v2 = vsub.f32 1.5, %v6417_v19  ;;  %v6354_v62 = vrot.slane %v6353_v61, 4  ;;  %7007 = vmatpush.bf16.msrb.mxu0 %v10830_v42  ;;  %v5883_v19 = vadd.f32 %v5882_v33, %v5868_v37 }
 0x34f   :  { %v6419_v28 = vmul.f32 %v10896_v12, %v6418_v2  ;;  %v6355_v55 = vadd.f32 %v6354_v62, %v6353_v61  ;;  %v6475_v2 = vperm.slane %v11800_v47, 0  ;;  %v5897_v36 = vadd.f32 %v5896_v10, %v5883_v19 }
 0x350   :  { %6196 = vmatpush.bf16.msrb.mxu1 %v9371_v58  ;;  %v6407_v58 = vmul.f32 0.5, %v6406_v54  ;;  %v5870_v11 = vpop.f32.mrf.mxu1 }
 0x351   :  { %v6423_v52 = vsel %vm6422_vm10, %v10896_v12, %v6419_v28  ;;  %v6356_v17 = vrot.slane %v6355_v55, 2  ;;  %7008 = vmatpush.bf16.msrb.mxu0 %v10829_v29  ;;  %v10816_v28 = vld [vmem:[#allocation13 + $0x20] sm:$0xff] }
 0x352   :  { %v6490_v50 = vmul.f32 %v6476_v6, %v6423_v52  ;;  %v5885_v6 = vadd.f32 %v5884_v51, %v5870_v11 }
 0x353   :  { %v6357_v49 = vadd.f32 %v6356_v17, %v6355_v55  ;;  %v6518_v17 = vperm.slane %v11809_v21, 0 }
 0x354   :  { %6197 = vmatpush.bf16.msrb.mxu1 %v9343_v39  ;;  %v6497_v46 = vperm.slane %v6490_v50, 0  ;;  %v5899_v33 = vadd.f32 %v5898_v18, %v5885_v6 }
 0x355   :  { %v6358_v35 = vrot.slane %v6357_v49, 1 }
 0x356   :  { %v6504_v15 = vmul.f32 %v6497_v46, %v11775_v40  ;;  %v6511_v4 = vmul.f32 %v6497_v46, %v11778_v8  ;;  %v6408_v40 = vsub.f32 1.5, %v6407_v58  ;;  %v10828_v8 = vld [vmem:[#allocation13 + $0x80] sm:$0xff]  ;;  %v10814_v46 = vld [vmem:[#allocation13 + $0x10] sm:$0xff] }
 0x357   :  { %v6359_v22 = vadd.f32 %v6358_v35, %v6357_v49  ;;  %7009 = vmatpush.bf16.msrb.mxu0 %v10828_v8 }
 0x358   :  { %6198 = vmatpush.bf16.msrb.mxu1 %v9315_v48  ;;  %v6533_v24 = vadd.f32 %v6519_v56, %v6504_v15  ;;  %v6540_v30 = vadd.f32 %v6519_v56, %v6511_v4  ;;  %v10818_v48 = vld [vmem:[#allocation13 + $0x30] sm:$0xff]  ;;  %v6409_v27 = vmul.f32 %v11798_v20, %v6408_v40  ;;  %v6477_v15 = vperm.slane %v11800_v47, 2 }
 0x359   :  { %v6392_v25 = vmul.f32 %v6359_v22, %v11357_v32 }
 0x35a   :  { %v6547_v39 = vmax.f32 %v6533_v24, 0.0  ;;  %v6554_v12 = vmax.f32 %v6540_v30, 0.0  ;;  %v6413_v53 = vsel %vm6412_vm13, %v11798_v20, %v6409_v27  ;;  %v10813_v30 = vld [vmem:[#allocation13 + $0x8] sm:$0xff] }
 0x35b   :  { %v6399_v23 = vadd.f32 1e-05, %v6392_v25  ;;  %v6489_v1 = vmul.f32 %v6475_v2, %v6413_v53  ;;  %v10843_v25 = vld [vmem:[#allocation13 + $0xf8] sm:$0xff]  ;;  %v10842_v53 = vld [vmem:[#allocation13 + $0xf0] sm:$0xff] }
 0x35c   :  { %6199 = vmatpush.bf16.msrb.mxu1 %v9287_v9  ;;  %v6561_v38 = vpack.c.bf16 %v6554_v12, %v6547_v39  ;;  %v5910_v9 = vpop.f32.mrf.mxu2  ;;  %v6520_v39 = vperm.slane %v11809_v21, 2  ;;  %7016 = vmatpush.bf16.msrb.mxu2 %v10843_v25 }
 0x35d   :  { %10899 = vrsqrt.f32 %v6399_v23  ;;  %v5911_v52 = vadd.f32 %v5910_v9, %v5897_v36  ;;  %v6496_v50 = vperm.slane %v6489_v1, 0  ;;  %vm6430_vm15 = vweird.f32 %v6399_v23 }
 0x35e   :  { %6996 = vmatmul.bf16.vlgmr.msra.gmra.mxu3 %v6561_v38 }
 0x35f   :  { %v6503_v56 = vmul.f32 %v6496_v50, %v11758_v5  ;;  %v6510_v42 = vmul.f32 %v6496_v50, %v11761_v26 }
 0x360   :  { %6200 = vmatpush.bf16.msrb.mxu1 %v9259_v0  ;;  %v5924_v3 = vpop.f32.mrf.mxu1  ;;  %v10815_v0 = vld [vmem:[#allocation13 + $0x18] sm:$0xff]  ;;  %7017 = vmatpush.bf16.msrb.mxu2 %v10842_v53 }
 0x361   :  { %v5925_v62 = vadd.f32 %v5924_v3, %v5911_v52  ;;  %v6532_v29 = vadd.f32 %v6518_v17, %v6503_v56  ;;  %v6539_v35 = vadd.f32 %v6518_v17, %v6510_v42 }
 0x363   :  { %v10900_v61 = vpop.eup %10899  ;;  %v5939_v37 = vadd.f32 %v5938_v16, %v5925_v62  ;;  %v6546_v51 = vmax.f32 %v6532_v29, 0.0  ;;  %v6553_v22 = vmax.f32 %v6539_v35, 0.0  ;;  %v10836_v35 = vld [vmem:[#allocation13 + $0xc0] sm:$0xff] }
 0x364   :  { %6201 = vmatpush.bf16.msrb.mxu1 %v9231_v7  ;;  %v6425_v57 = vmul.f32 %v10900_v61, %v6399_v23  ;;  %v5912_v63 = vpop.f32.mrf.mxu2  ;;  %vm6431_vm14 = vweird.f32 %v10900_v61  ;;  %v5940_v7 = vpop.f32.mrf.mxu3 }
 0x365   :  { %v5913_v20 = vadd.f32 %v5912_v63, %v5899_v33  ;;  %vm6432_vm0 = vmor %vm6430_vm15, %vm6431_vm14  ;;  %v6560_v27 = vpack.c.bf16 %v6553_v22, %v6546_v51 }
 0x366   :  { %v6426_v59 = vmul.f32 %v10900_v61, %v6425_v57 }
 0x368   :  { %6202 = vmatpush.bf16.msrb.mxu1 %v9203_v31  ;;  %v6427_v60 = vmul.f32 0.5, %v6426_v59  ;;  %v5926_v10 = vpop.f32.mrf.mxu1 }
 0x369   :  { %v5927_v54 = vadd.f32 %v5926_v10, %v5913_v20 }
 0x36a   :  { %v6428_v55 = vsub.f32 1.5, %v6427_v60 }
 0x36b   :  { %6203 = vmatmul.bf16.vlgmr.msrb.gmra.mxu1 %v11570_v43  ;;  %v5952_v43 = vpop.f32.mrf.mxu0  ;;  %v5941_v44 = vadd.f32 %v5940_v7, %v5927_v54 }
 0x36c   :  { %6974 = vmatpush.bf16.msra.mxu1 %v10819_v14  ;;  %v6429_v4 = vmul.f32 %v10900_v61, %v6428_v55  ;;  %v5953_v58 = vadd.f32 %v5952_v43, %v5939_v37  ;;  %v10812_v14 = vld [vmem:[#allocation13] sm:$0xff]  ;;  %v5966_v8 = vpop.f32.mrf.mxu2  ;;  %v6008_v57 = vpop.f32.mrf.mxu3 }
 0x36d   :  { %v10840_v43 = vld [vmem:[#allocation13 + $0xe0] sm:$0xff] }
 0x36e   :  { %v6433_v49 = vsel %vm6432_vm0, %v10900_v61, %v6429_v4 }
 0x36f   :  { %v6491_v5 = vmul.f32 %v6477_v15, %v6433_v49 }
 0x370   :  { %6975 = vmatpush.bf16.msra.mxu1 %v10818_v48 }
 0x371   :  { %v6498_v26 = vperm.slane %v6491_v5, 0 }
 0x373   :  { %v5954_v13 = vpop.f32.mrf.mxu0  ;;  %v6505_v40 = vmul.f32 %v6498_v26, %v11794_v41  ;;  %v6512_v38 = vmul.f32 %v6498_v26, %v11796_v45  ;;  %v10841_v45 = vld [vmem:[#allocation13 + $0xe8] sm:$0xff] }
 0x374   :  { %6976 = vmatpush.bf16.msra.mxu1 %v10817_v34  ;;  %v5955_v24 = vadd.f32 %v5954_v13, %v5941_v44  ;;  %v5968_v16 = vpop.f32.mrf.mxu2  ;;  %7018 = vmatpush.bf16.msrb.mxu2 %v10841_v45  ;;  %v6010_v17 = vpop.f32.mrf.mxu3  ;;  %v10837_v44 = vld [vmem:[#allocation13 + $0xc8] sm:$0xff] }
 0x375   :  { %v6541_v11 = vadd.f32 %v6520_v39, %v6512_v38  ;;  %v6534_v48 = vadd.f32 %v6520_v39, %v6505_v40 }
 0x376   :  { %v6274_v31 = vadd.f32 %v5955_v24, %v5953_v58 }
 0x377   :  { %v6555_v19 = vmax.f32 %v6541_v11, 0.0  ;;  %v6548_v34 = vmax.f32 %v6534_v48, 0.0  ;;  %v10851_v11 = vld [vmem:[#allocation13 + $0x138] sm:$0xff] }
 0x378   :  { %6977 = vmatpush.bf16.msra.mxu1 %v10816_v28  ;;  %v6275_v12 = vrot.slane %v6274_v31, 4  ;;  %7019 = vmatpush.bf16.msrb.mxu2 %v10840_v43 }
 0x379   :  { %v6562_v36 = vpack.c.bf16 %v6555_v19, %v6548_v34 }
 0x37a   :  { %v6276_v18 = vadd.f32 %v6275_v12, %v6274_v31 }
 0x37b   :  { %v5980_v9 = vpop.f32.mrf.mxu0  ;;  %7010 = vmatmul.bf16.vlgmr.msrb.gmra.mxu0 %v6562_v36  ;;  %v6478_v36 = vperm.slane %v11800_v47, 3 }
 0x37c   :  { %6978 = vmatpush.bf16.msra.mxu1 %v10815_v0  ;;  %v6277_v23 = vrot.slane %v6276_v18, 2  ;;  %v10839_v0 = vld [vmem:[#allocation13 + $0xd8] sm:$0xff]  ;;  %v6022_v50 = vpop.f32.mrf.mxu2  ;;  %v5981_v60 = vadd.f32 %v5980_v9, %v5966_v8  ;;  %v10850_v9 = vld [vmem:[#allocation13 + $0x130] sm:$0xff] }
 0x37d   :  { %7020 = vmatpush.bf16.msrb.mxu2 %v10839_v0 }
 0x37e   :  { %v6278_v2 = vadd.f32 %v6277_v23, %v6276_v18 }
 0x380   :  { %6979 = vmatpush.bf16.msra.mxu1 %v10814_v46  ;;  %v6279_v6 = vrot.slane %v6278_v2, 1  ;;  %v5994_v3 = vpop.f32.mrf.mxu1  ;;  %v10838_v46 = vld [vmem:[#allocation13 + $0xd0] sm:$0xff] }
 0x381   :  { %v5995_v37 = vadd.f32 %v5994_v3, %v5981_v60  ;;  %7021 = vmatpush.bf16.msrb.mxu2 %v10838_v46 }
 0x382   :  { %v6280_v41 = vadd.f32 %v6279_v6, %v6278_v2 }
 0x383   :  { %v5982_v33 = vpop.f32.mrf.mxu0  ;;  %v6009_v15 = vadd.f32 %v6008_v57, %v5995_v37  ;;  %v10847_v37 = vld [vmem:[#allocation13 + $0x118] sm:$0xff] }
 0x384   :  { %6980 = vmatpush.bf16.msra.mxu1 %v10813_v30  ;;  %v6307_v28 = vmul.f32 %v6280_v41, %v11357_v32  ;;  %v5983_v20 = vadd.f32 %v5982_v33, %v5968_v16  ;;  %v6064_v41 = vpop.f32.mrf.mxu3  ;;  %v10849_v16 = vld [vmem:[#allocation13 + $0x128] sm:$0xff] }
 0x385   :  { %7022 = vmatpush.bf16.msrb.mxu2 %v10837_v44  ;;  %v6023_v30 = vadd.f32 %v6022_v50, %v6009_v15 }
 0x386   :  { %v11830_v61 = vsub.f32 %v5953_v58, %v6307_v28  ;;  %v11832_v1 = vsub.f32 %v5955_v24, %v6307_v28  ;;  %v6024_v58 = vpop.f32.mrf.mxu2 }
 0x388   :  { %6981 = vmatpush.bf16.msra.mxu1 %v10812_v14  ;;  %v6328_v52 = vmul.f32 %v11830_v61, %v11830_v61  ;;  %v6335_v59 = vmul.f32 %v11832_v1, %v11832_v1  ;;  %v5996_v63 = vpop.f32.mrf.mxu1 }
 0x389   :  { %v5997_v54 = vadd.f32 %v5996_v63, %v5983_v20  ;;  %7023 = vmatpush.bf16.msrb.mxu2 %v10836_v35 }
 0x38a   :  { %v6360_v62 = vadd.f32 %v6335_v59, %v6328_v52  ;;  %v10848_v52 = vld [vmem:[#allocation13 + $0x120] sm:$0xff] }
 0x38b   :  { %6982 = vmatmul.bf16.vlgmr.msra.gmra.mxu1 %v6560_v27  ;;  %v6036_v56 = vpop.f32.mrf.mxu0  ;;  %v6011_v4 = vadd.f32 %v6010_v17, %v5997_v54 }
 0x38c   :  { %v6361_v10 = vrot.slane %v6360_v62, 4  ;;  %v6037_v39 = vadd.f32 %v6036_v56, %v6023_v30  ;;  %7030 = vmatpush.bf16.msrb.mxu1 %v10851_v11 }
 0x38d   :  { %v6025_v29 = vadd.f32 %v6024_v58, %v6011_v4  ;;  %v10846_v4 = vld [vmem:[#allocation13 + $0x110] sm:$0xff] }
 0x38e   :  { %v6362_v55 = vadd.f32 %v6361_v10, %v6360_v62  ;;  %v6092_v53 = vpop.f32.mrf.mxu2  ;;  %v6521_v62 = vperm.slane %v11809_v21, 3 }
 0x390   :  { %v6363_v42 = vrot.slane %v6362_v55, 2  ;;  %v6050_v13 = vpop.f32.mrf.mxu1  ;;  %7031 = vmatpush.bf16.msrb.mxu1 %v10850_v9 }
 0x391   :  { %v6051_v51 = vadd.f32 %v6050_v13, %v6037_v39  ;;  %v10844_v39 = vld [vmem:[#allocation13 + $0x100] sm:$0xff] }
 0x392   :  { %v6364_v7 = vadd.f32 %v6363_v42, %v6362_v55  ;;  %v6066_v42 = vpop.f32.mrf.mxu3 }
 0x393   :  { %v6038_v31 = vpop.f32.mrf.mxu0 }
 0x394   :  { %v6365_v49 = vrot.slane %v6364_v7, 1  ;;  %v6039_v12 = vadd.f32 %v6038_v31, %v6025_v29  ;;  %7032 = vmatpush.bf16.msrb.mxu1 %v10849_v16 }
 0x396   :  { %v6366_v24 = vadd.f32 %v6365_v49, %v6364_v7  ;;  %v6094_v55 = vpop.f32.mrf.mxu2 }
 0x398   :  { %v6393_v5 = vmul.f32 %v6366_v24, %v11357_v32  ;;  %v6052_v14 = vpop.f32.mrf.mxu1  ;;  %7033 = vmatpush.bf16.msrb.mxu1 %v10848_v52  ;;  %v10845_v24 = vld [vmem:[#allocation13 + $0x108] sm:$0xff]  ;;  %v6479_v52 = vperm.slane %v11800_v47, 4 }
 0x399   :  { %v6053_v22 = vadd.f32 %v6052_v14, %v6039_v12 }
 0x39a   :  { %v6400_v26 = vadd.f32 1e-05, %v6393_v5  ;;  %v6120_v29 = vpop.f32.mrf.mxu3 }
 0x39b   :  { %v6281_v40 = vadd.f32 %v6053_v22, %v6051_v51  ;;  %v6106_v49 = vpop.f32.mrf.mxu0 }
 0x39c   :  { %10901 = vrsqrt.f32 %v6400_v26  ;;  %vm6440_vm3 = vweird.f32 %v6400_v26  ;;  %7034 = vmatpush.bf16.msrb.mxu1 %v10847_v37  ;;  %v6522_v37 = vperm.slane %v11809_v21, 4 }
 0x39d   :  { %v6282_v38 = vrot.slane %v6281_v40, 4 }
 0x39e   :  { %v6148_v35 = vpop.f32.mrf.mxu2 }
 0x39f   :  { %v6283_v18 = vadd.f32 %v6282_v38, %v6281_v40 }
 0x3a0   :  { %7035 = vmatpush.bf16.msrb.mxu1 %v10846_v4 }
 0x3a1   :  { %v6284_v48 = vrot.slane %v6283_v18, 2 }
 0x3a2   :  { %v10902_v8 = vpop.eup %10901 }
 0x3a3   :  { %v6435_v25 = vmul.f32 %v10902_v8, %v6400_v26  ;;  %v6285_v27 = vadd.f32 %v6284_v48, %v6283_v18  ;;  %vm6441_vm2 = vweird.f32 %v10902_v8  ;;  %v6108_v38 = vpop.f32.mrf.mxu0  ;;  %v6122_v18 = vpop.f32.mrf.mxu3 }
 0x3a4   :  { %vm6442_vm4 = vmor %vm6440_vm3, %vm6441_vm2  ;;  %7036 = vmatpush.bf16.msrb.mxu1 %v10845_v24 }
 0x3a5   :  { %v6436_v23 = vmul.f32 %v10902_v8, %v6435_v25  ;;  %v6286_v34 = vrot.slane %v6285_v27, 1 }
 0x3a6   :  { %v6150_v25 = vpop.f32.mrf.mxu2 }
 0x3a7   :  { %v6437_v19 = vmul.f32 0.5, %v6436_v23  ;;  %v6287_v6 = vadd.f32 %v6286_v34, %v6285_v27 }
 0x3a8   :  { %v6078_v63 = vpop.f32.mrf.mxu1  ;;  %7037 = vmatpush.bf16.msrb.mxu1 %v10844_v39 }
 0x3a9   :  { %v6438_v2 = vsub.f32 1.5, %v6437_v19  ;;  %v6308_v3 = vmul.f32 %v6287_v6, %v11357_v32 }
 0x3ab   :  { %v6439_v45 = vmul.f32 %v10902_v8, %v6438_v2  ;;  %v11841_v57 = vsub.f32 %v6051_v51, %v6308_v3  ;;  %v11843_v33 = vsub.f32 %v6053_v22, %v6308_v3  ;;  %v6162_v2 = vpop.f32.mrf.mxu0 }
 0x3ad   :  { %v6443_v28 = vsel %vm6442_vm4, %v10902_v8, %v6439_v45  ;;  %v6329_v0 = vmul.f32 %v11841_v57, %v11841_v57  ;;  %v6336_v50 = vmul.f32 %v11843_v33, %v11843_v33 }
 0x3ae   :  { %v6492_v43 = vmul.f32 %v6478_v36, %v6443_v28  ;;  %v6176_v16 = vpop.f32.mrf.mxu2 }
 0x3af   :  { %v6367_v10 = vadd.f32 %v6336_v50, %v6329_v0  ;;  %v10859_v0 = vld [vmem:[#allocation13 + $0x178] sm:$0xff] }
 0x3b0   :  { %v6499_v59 = vperm.slane %v6492_v43, 0  ;;  %7044 = vmatpush.bf16.msrb.mxu3 %v10859_v0 }
 0x3b1   :  { %v6368_v46 = vrot.slane %v6367_v10, 4 }
 0x3b2   :  { %v6506_v60 = vmul.f32 %v6499_v59, %v11830_v61  ;;  %v6513_v20 = vmul.f32 %v6499_v59, %v11832_v1  ;;  %v6080_v61 = vpop.f32.mrf.mxu1  ;;  %v6079_v1 = vadd.f32 %v6078_v63, %v6064_v41  ;;  %v6190_v41 = vpop.f32.mrf.mxu3 }
 0x3b3   :  { %v6369_v7 = vadd.f32 %v6368_v46, %v6367_v10  ;;  %v6081_v5 = vadd.f32 %v6080_v61, %v6066_v42 }
 0x3b4   :  { %v6542_v54 = vadd.f32 %v6521_v62, %v6513_v20  ;;  %v6535_v56 = vadd.f32 %v6521_v62, %v6506_v60  ;;  %v6093_v26 = vadd.f32 %v6092_v53, %v6079_v1  ;;  %v6164_v20 = vpop.f32.mrf.mxu0 }
 0x3b5   :  { %v6370_v44 = vrot.slane %v6369_v7, 2  ;;  %v6095_v14 = vadd.f32 %v6094_v55, %v6081_v5 }
 0x3b6   :  { %v6556_v17 = vmax.f32 %v6542_v54, 0.0  ;;  %v6549_v15 = vmax.f32 %v6535_v56, 0.0  ;;  %v6107_v40 = vadd.f32 %v6106_v49, %v6093_v26  ;;  %v10858_v54 = vld [vmem:[#allocation13 + $0x170] sm:$0xff]  ;;  %v6178_v56 = vpop.f32.mrf.mxu2  ;;  %v10857_v49 = vld [vmem:[#allocation13 + $0x168] sm:$0xff] }
 0x3b7   :  { %v6371_v58 = vadd.f32 %v6370_v44, %v6369_v7  ;;  %v6109_v8 = vadd.f32 %v6108_v38, %v6095_v14  ;;  %7045 = vmatpush.bf16.msrb.mxu3 %v10858_v54  ;;  %v6179_v14 = vadd.f32 %v6178_v56, %v6164_v20  ;;  %v10855_v38 = vld [vmem:[#allocation13 + $0x158] sm:$0xff] }
 0x3b8   :  { %v6563_v13 = vpack.c.bf16 %v6556_v17, %v6549_v15  ;;  %v6121_v11 = vadd.f32 %v6120_v29, %v6107_v40  ;;  %v6177_v15 = vadd.f32 %v6176_v16, %v6162_v2 }
 0x3b9   :  { %v6372_v30 = vrot.slane %v6371_v58, 1  ;;  %v6123_v23 = vadd.f32 %v6122_v18, %v6109_v8 }
 0x3ba   :  { %7024 = vmatmul.bf16.vlgmr.msrb.gmra.mxu2 %v6563_v13  ;;  %v6192_v46 = vpop.f32.mrf.mxu3  ;;  %v6191_v24 = vadd.f32 %v6190_v41, %v6177_v15  ;;  %v10853_v41 = vld [vmem:[#allocation13 + $0x148] sm:$0xff] }
 0x3bb   :  { %v6373_v31 = vadd.f32 %v6372_v30, %v6371_v58  ;;  %7046 = vmatpush.bf16.msrb.mxu3 %v10857_v49  ;;  %v6193_v18 = vadd.f32 %v6192_v46, %v6179_v14 }
 0x3bc   :  { %v6218_v30 = vpop.f32.mrf.mxu0 }
 0x3bd   :  { %v6394_v12 = vmul.f32 %v6373_v31, %v11357_v32  ;;  %v10856_v31 = vld [vmem:[#allocation13 + $0x160] sm:$0xff] }
 0x3bf   :  { %v6401_v51 = vadd.f32 1e-05, %v6394_v12  ;;  %7047 = vmatpush.bf16.msrb.mxu3 %v10856_v31  ;;  %v6523_v31 = vperm.slane %v11809_v21, 5 }
 0x3c1   :  { %10903 = vrsqrt.f32 %v6401_v51  ;;  %vm6450_vm6 = vweird.f32 %v6401_v51 }
 0x3c3   :  { %7048 = vmatpush.bf16.msrb.mxu3 %v10855_v38 }
 0x3c7   :  { %v10904_v27 = vpop.eup %10903 }
 0x3c8   :  { %v6134_v22 = vpop.f32.mrf.mxu1  ;;  %v6445_v9 = vmul.f32 %v10904_v27, %v6401_v51  ;;  %vm6451_vm5 = vweird.f32 %v10904_v27  ;;  %v6246_v51 = vpop.f32.mrf.mxu3 }
 0x3c9   :  { %v6135_v48 = vadd.f32 %v6134_v22, %v6121_v11  ;;  %vm6452_vm7 = vmor %vm6450_vm6, %vm6451_vm5 }
 0x3ca   :  { %v6446_v53 = vmul.f32 %v10904_v27, %v6445_v9 }
 0x3cb   :  { %v6149_v36 = vadd.f32 %v6148_v35, %v6135_v48 }
 0x3cc   :  { %v6447_v45 = vmul.f32 0.5, %v6446_v53 }
 0x3ce   :  { %v6448_v28 = vsub.f32 1.5, %v6447_v45  ;;  %v6232_v26 = vpop.f32.mrf.mxu2 }
 0x3d0   :  { %v6136_v19 = vpop.f32.mrf.mxu1  ;;  %v6449_v59 = vmul.f32 %v10904_v27, %v6448_v28  ;;  %v6248_v45 = vpop.f32.mrf.mxu3 }
 0x3d1   :  { %v6137_v34 = vadd.f32 %v6136_v19, %v6123_v23  ;;  %v6220_v19 = vpop.f32.mrf.mxu0 }
 0x3d2   :  { %v6453_v50 = vsel %vm6452_vm7, %v10904_v27, %v6449_v59  ;;  %v10854_v27 = vld [vmem:[#allocation13 + $0x150] sm:$0xff]  ;;  %v10852_v59 = vld [vmem:[#allocation13 + $0x140] sm:$0xff] }
 0x3d3   :  { %v6151_v6 = vadd.f32 %v6150_v25, %v6137_v34  ;;  %v6493_v60 = vmul.f32 %v6479_v52, %v6453_v50  ;;  %7049 = vmatpush.bf16.msrb.mxu3 %v10854_v27 }
 0x3d5   :  { %v6288_v3 = vadd.f32 %v6151_v6, %v6149_v36  ;;  %v6500_v55 = vperm.slane %v6493_v60, 0 }
 0x3d6   :  { %v6234_v53 = vpop.f32.mrf.mxu2 }
 0x3d7   :  { %v6289_v43 = vrot.slane %v6288_v3, 4  ;;  %v6507_v17 = vmul.f32 %v6500_v55, %v11841_v57  ;;  %v6514_v7 = vmul.f32 %v6500_v55, %v11843_v33  ;;  %7050 = vmatpush.bf16.msrb.mxu3 %v10853_v41 }
 0x3d9   :  { %v6290_v62 = vadd.f32 %v6289_v43, %v6288_v3  ;;  %v6536_v44 = vadd.f32 %v6522_v37, %v6507_v17  ;;  %v6543_v13 = vadd.f32 %v6522_v37, %v6514_v7 }
 0x3db   :  { %v6291_v63 = vrot.slane %v6290_v62, 2  ;;  %v6550_v61 = vmax.f32 %v6536_v44, 0.0  ;;  %v6557_v1 = vmax.f32 %v6543_v13, 0.0  ;;  %7051 = vmatpush.bf16.msrb.mxu3 %v10852_v59  ;;  %v6480_v44 = vperm.slane %v11800_v47, 5 }
 0x3dd   :  { %v6292_v10 = vadd.f32 %v6291_v63, %v6290_v62  ;;  %v6564_v5 = vpack.c.bf16 %v6557_v1, %v6550_v61 }
 0x3df   :  { %v6293_v42 = vrot.slane %v6292_v10, 1  ;;  %7038 = vmatmul.bf16.vlgmr.msrb.gmra.mxu1 %v6564_v5 }
 0x3e1   :  { %v6294_v4 = vadd.f32 %v6293_v42, %v6292_v10 }
 0x3e3   :  { %v6309_v58 = vmul.f32 %v6294_v4, %v11357_v32 }
 0x3e5   :  { %v11858_v29 = vsub.f32 %v6149_v36, %v6309_v58  ;;  %v11860_v35 = vsub.f32 %v6151_v6, %v6309_v58 }
 0x3e7   :  { %v6330_v39 = vmul.f32 %v11858_v29, %v11858_v29  ;;  %v6337_v12 = vmul.f32 %v11860_v35, %v11860_v35 }
 0x3e8   :  { %v6204_v57 = vpop.f32.mrf.mxu1 }
 0x3e9   :  { %v6205_v33 = vadd.f32 %v6204_v57, %v6191_v24  ;;  %v6374_v22 = vadd.f32 %v6337_v12, %v6330_v39 }
 0x3eb   :  { %v6219_v40 = vadd.f32 %v6218_v30, %v6205_v33  ;;  %v6375_v8 = vrot.slane %v6374_v22, 4 }
 0x3ed   :  { %v6376_v25 = vadd.f32 %v6375_v8, %v6374_v22  ;;  %v6233_v48 = vadd.f32 %v6232_v26, %v6219_v40 }
 0x3ef   :  { %v6377_v9 = vrot.slane %v6376_v25, 2  ;;  %v6247_v36 = vadd.f32 %v6246_v51, %v6233_v48 }
 0x3f0   :  { %v6206_v11 = vpop.f32.mrf.mxu1 }
 0x3f1   :  { %v6207_v23 = vadd.f32 %v6206_v11, %v6193_v18  ;;  %v6378_v2 = vadd.f32 %v6377_v9, %v6376_v25  ;;  %v6295_v43 = vsel %vm3082_vm1, %v6247_v36, 0.0  ;;  %v10861_v18 = vld [vmem:[#allocation13 + $0x188] sm:$0xff] }
 0x3f2   :  { %7064 = vmatpush.bf16.msra.mxu0 %v10861_v18 }
 0x3f3   :  { %v6221_v34 = vadd.f32 %v6220_v19, %v6207_v23  ;;  %v6379_v16 = vrot.slane %v6378_v2, 1  ;;  %v10860_v23 = vld [vmem:[#allocation13 + $0x180] sm:$0xff] }
 0x3f5   :  { %v6235_v6 = vadd.f32 %v6234_v53, %v6221_v34  ;;  %v6380_v28 = vadd.f32 %v6379_v16, %v6378_v2  ;;  %v6481_v53 = vperm.slane %v11800_v47, 6  ;;  %v6524_v16 = vperm.slane %v11809_v21, 6  ;;  %v10878_v47 = vld [vmem:[#allocation14] ss:$0 sm:$0xff] }
 0x3f6   :  { %7065 = vmatpush.bf16.msra.mxu0 %v10860_v23 }
 0x3f7   :  { %v6249_v3 = vadd.f32 %v6248_v45, %v6235_v6  ;;  %v6395_v62 = vmul.f32 %v6380_v28, %v11357_v32 }
 0x3f9   :  { %v6296_v52 = vsel %vm3082_vm1, %v6249_v3, 0.0  ;;  %v6402_v50 = vadd.f32 1e-05, %v6395_v62 }
 0x3fa   :  { %v6297_v0 = vadd.f32 %v6296_v52, %v6295_v43 }
 0x3fb   :  { %10905 = vrsqrt.f32 %v6402_v50  ;;  %vm6460_vm9 = vweird.f32 %v6402_v50 }
 0x3fc   :  { %v6298_v63 = vrot.slane %v6297_v0, 4 }
 0x3fe   :  { %v6299_v60 = vadd.f32 %v6298_v63, %v6297_v0  ;;  %v7011_v63 = vpop.f32.mrf.mxu0 }
 0x400   :  { %v6300_v20 = vrot.slane %v6299_v60, 2 }
 0x401   :  { %v10906_v55 = vpop.eup %10905 }
 0x402   :  { %v6301_v10 = vadd.f32 %v6300_v20, %v6299_v60  ;;  %v6455_v54 = vmul.f32 %v10906_v55, %v6402_v50  ;;  %vm6461_vm8 = vweird.f32 %v10906_v55  ;;  %v6997_v50 = vpop.f32.mrf.mxu3 }
 0x403   :  { %vm6462_vm10 = vmor %vm6460_vm9, %vm6461_vm8 }
 0x404   :  { %v6302_v37 = vrot.slane %v6301_v10, 1  ;;  %v6456_v56 = vmul.f32 %v10906_v55, %v6455_v54 }
 0x406   :  { %v6303_v46 = vadd.f32 %v6302_v37, %v6301_v10  ;;  %v6457_v17 = vmul.f32 0.5, %v6456_v56  ;;  %v7013_v54 = vpop.f32.mrf.mxu0 }
 0x408   :  { %v6310_v42 = vmul.f32 %v6303_v46, %v11357_v32  ;;  %v6458_v4 = vsub.f32 1.5, %v6457_v17  ;;  %v6983_v0 = vpop.f32.mrf.mxu1 }
 0x409   :  { %v6984_v20 = vadd.f32 %v10878_v47, %v6983_v0 }
 0x40a   :  { %v6317_v7 = vsub.f32 %v6247_v36, %v6310_v42  ;;  %v6324_v15 = vsub.f32 %v6249_v3, %v6310_v42  ;;  %v6459_v58 = vmul.f32 %v10906_v55, %v6458_v4  ;;  %v6999_v10 = vpop.f32.mrf.mxu3 }
 0x40c   :  { %v6331_v13 = vmul.f32 %v6317_v7, %v6317_v7  ;;  %v6338_v49 = vmul.f32 %v6324_v15, %v6324_v15  ;;  %v6463_v24 = vsel %vm6462_vm10, %v10906_v55, %v6459_v58  ;;  %v6998_v55 = vadd.f32 %v6997_v50, %v6984_v20 }
 0x40d   :  { %v6494_v57 = vmul.f32 %v6480_v44, %v6463_v24 }
 0x40e   :  { %v6381_v61 = vsel %vm3082_vm1, %v6331_v13, 0.0  ;;  %v6382_v1 = vsel %vm3082_vm1, %v6338_v49, 0.0  ;;  %v7012_v46 = vadd.f32 %v7011_v63, %v6998_v55 }
 0x40f   :  { %v6383_v30 = vadd.f32 %v6382_v1, %v6381_v61  ;;  %v6501_v33 = vperm.slane %v6494_v57, 0 }
 0x410   :  { %v6985_v60 = vpop.f32.mrf.mxu1 }
 0x411   :  { %v6384_v5 = vrot.slane %v6383_v30, 4  ;;  %v6508_v39 = vmul.f32 %v6501_v33, %v11858_v29  ;;  %v6515_v12 = vmul.f32 %v6501_v33, %v11860_v35  ;;  %v6986_v56 = vadd.f32 %v10878_v47, %v6985_v60 }
 0x413   :  { %v6385_v26 = vadd.f32 %v6384_v5, %v6383_v30  ;;  %v6537_v51 = vadd.f32 %v6523_v31, %v6508_v39  ;;  %v6544_v22 = vadd.f32 %v6523_v31, %v6515_v12 }
 0x415   :  { %v6386_v14 = vrot.slane %v6385_v26, 2  ;;  %v6551_v38 = vmax.f32 %v6537_v51, 0.0  ;;  %v6558_v8 = vmax.f32 %v6544_v22, 0.0 }
 0x417   :  { %v6387_v40 = vadd.f32 %v6386_v14, %v6385_v26  ;;  %v6565_v11 = vpack.c.bf16 %v6558_v8, %v6551_v38 }
 0x419   :  { %v6388_v25 = vrot.slane %v6387_v40, 1  ;;  %7052 = vmatmul.bf16.vlgmr.msrb.gmra.mxu3 %v6565_v11 }
 0x41b   :  { %v6389_v48 = vadd.f32 %v6388_v25, %v6387_v40 }
 0x41d   :  { %v6396_v27 = vmul.f32 %v6389_v48, %v11357_v32 }
 0x41f   :  { %v6403_v19 = vadd.f32 1e-05, %v6396_v27 }
 0x421   :  { %10907 = vrsqrt.f32 %v6403_v19  ;;  %vm6470_vm12 = vweird.f32 %v6403_v19 }
 0x427   :  { %v10908_v29 = vpop.eup %10907 }
 0x428   :  { %v6465_v35 = vmul.f32 %v10908_v29, %v6403_v19  ;;  %vm6471_vm11 = vweird.f32 %v10908_v29 }
 0x429   :  { %vm6472_vm13 = vmor %vm6470_vm12, %vm6471_vm11 }
 0x42a   :  { %v6466_v9 = vmul.f32 %v10908_v29, %v6465_v35 }
 0x42c   :  { %v6467_v34 = vmul.f32 0.5, %v6466_v9 }
 0x42e   :  { %v6468_v2 = vsub.f32 1.5, %v6467_v34 }
 0x430   :  { %v6469_v36 = vmul.f32 %v10908_v29, %v6468_v2 }
 0x432   :  { %v6473_v6 = vsel %vm6472_vm13, %v10908_v29, %v6469_v36 }
 0x433   :  { %v6495_v41 = vmul.f32 %v6481_v53, %v6473_v6 }
 0x435   :  { %v6502_v45 = vperm.slane %v6495_v41, 0 }
 0x437   :  { %v6509_v32 = vmul.f32 %v6502_v45, %v6317_v7  ;;  %v6516_v3 = vmul.f32 %v6502_v45, %v6324_v15  ;;  %v7000_v7 = vadd.f32 %v6999_v10, %v6986_v56 }
 0x439   :  { %v6538_v28 = vadd.f32 %v6524_v16, %v6509_v32  ;;  %v6545_v43 = vadd.f32 %v6524_v16, %v6516_v3  ;;  %v7014_v49 = vadd.f32 %v7013_v54, %v7000_v7 }
 0x43b   :  { %v6552_v52 = vmax.f32 %v6538_v28, 0.0  ;;  %v6559_v59 = vmax.f32 %v6545_v43, 0.0 }
 0x43d   :  { %v6566_v62 = vpack.c.bf16 %v6559_v59, %v6552_v52  ;;  %v7025_v37 = vpop.f32.mrf.mxu2 }
 0x43e   :  { %v7026_v17 = vadd.f32 %v7025_v37, %v7012_v46 }
 0x43f   :  { %10111 = vmatmul.msk.bf16.vlgmr.msra.gmra.mxu0 %vm3082_vm1, %v6566_v62 }
 0x445   :  { %v7027_v44 = vpop.f32.mrf.mxu2 }
 0x446   :  { %v7028_v1 = vadd.f32 %v7027_v44, %v7014_v49 }
 0x45c   :  { %v7039_v21 = vpop.f32.mrf.mxu1 }
 0x45d   :  { %v7040_v15 = vadd.f32 %v7039_v21, %v7026_v17 }
 0x464   :  { %v7041_v61 = vpop.f32.mrf.mxu1 }
 0x465   :  { %v7042_v30 = vadd.f32 %v7041_v61, %v7028_v1 }
 0x49c   :  { %v7053_v42 = vpop.f32.mrf.mxu3 }
 0x49d   :  { %v7054_v4 = vadd.f32 %v7053_v42, %v7040_v15 }
 0x4a4   :  { %v7055_v24 = vpop.f32.mrf.mxu3 }
 0x4a5   :  { %v7056_v57 = vadd.f32 %v7055_v24, %v7042_v30 }
 0x4bc   :  { %v7067_v13 = vpop.f32.mrf.mxu0 }
 0x4bd   :  { %v7068_v58 = vadd.f32 %v7067_v13, %v7054_v4 }
 0x4bf   :  { %7072 = vst [vmem:[#allocation16] sm:$0xff] %v7068_v58 }
 0x4c4   :  { %v7069_v5 = vpop.f32.mrf.mxu0 }
 0x4c5   :  { %v7070_v33 = vadd.f32 %v7069_v5, %v7056_v57 }
 0x4c7   :  { %7073 = vst [vmem:[#allocation16 + $0x8] sm:$0xff] %v7070_v33 }
 0x4c8   :  { %7086 = dma.vmem_to_hbm [thread:$0]  %s7079_s24, 256, %s7081_s25, [#allocation4], %s11153_s26, %s11153_s26, %s11154_s27  }
 0x4c9   :  { %11137 = dma.done.wait [#allocation4], 256  }
 0x4ca   :  { %11138 = vsyncadd [#allocation4], 4294967040 }
 0x4cb   :  { %7091 = vsyncpa [#allocation3], 1 }
 0x4cc   :  { %7092 = vsyncpa [#allocation6], 1 }
 0x4cd   :  { %7093 = vsyncpa [#allocation9], 1 }
 0x4ce   :  { %7094 = vsyncpa [#allocation12], 1 }
 0x4cf   :  { %7095 = vsyncpa [#allocation15], 1 }
 0x4d0   :  { %7096 = vsyncpa [#allocation4], 1 }

</bundles_post_ra>
